<compile_context>
chip_gen: v7x
topology: tpu7x:2x2x1
jax: 0.10.0
libtpu: 0.0.40
codegen_flags: <defaults>
</compile_context>

<pallas_src>
import functools

import jax
import jax.numpy as jnp
from jax import lax
from jax.experimental import pallas as pl
from jax.experimental.pallas import tpu as pltpu


def _res_block_kernel(xpad_ref, w1_ref, w2_ref, s1_ref, b1_ref, s2_ref, b2_ref,
                      o_ref, hpad_ref, *, H, W, Wpad, Cin, Cout):
    # xpad_ref : (H+2, Wpad, Cin)   zero-padded input (one batch element)
    # w*_ref   : (3, cin, 3*Cout)   per-dy weights; dx taps packed on output axis
    # s*/b*    : (1, 1, Cout)       folded BN scale / bias (f32)
    # o_ref    : (H, W, Cout)       output (f32)
    # hpad_ref : (H+2, Wpad, Cout)  VMEM scratch: padded conv1 intermediate
    f32 = jnp.float32
    cdt = hpad_ref.dtype  # compute dtype of conv operands (f32 or bf16)

    def conv3x3(src_ref, w_ref, cin):
        # 3 big matmuls: M = H*Wpad, N = 3*Cout, K = cin.
        acc = jnp.zeros((H, W, Cout), f32)
        for dy in range(3):
            lhs = src_ref[dy:dy + H, :, :].reshape(H * Wpad, cin)
            p = jnp.dot(lhs, w_ref[dy], preferred_element_type=f32)
            p = p.reshape(H, Wpad, 3 * Cout)
            for dx in range(3):
                acc = acc + p[:, dx:dx + W, dx * Cout:(dx + 1) * Cout]
        return acc

    # ---- conv1 + BN1 (LeakyReLU(1.0) == identity) ----
    h1 = conv3x3(xpad_ref, w1_ref, Cin) * s1_ref[...] + b1_ref[...]

    # ---- re-pad intermediate in VMEM: zero only the 1-px border, then interior ----
    zrow = jnp.zeros((1, Wpad, Cout), cdt)
    hpad_ref[0:1, :, :] = zrow
    hpad_ref[H + 1:H + 2, :, :] = zrow
    hpad_ref[1:H + 1, 0:1, :] = jnp.zeros((H, 1, Cout), cdt)
    hpad_ref[1:H + 1, W + 1:Wpad, :] = jnp.zeros((H, Wpad - W - 1, Cout), cdt)
    hpad_ref[1:H + 1, 1:W + 1, :] = h1.astype(cdt)

    # ---- conv2 + BN2, residual add (sliced from the padded input), LeakyReLU(0.2) ----
    h2 = conv3x3(hpad_ref, w2_ref, Cout) * s2_ref[...] + b2_ref[...]
    res = xpad_ref[1:H + 1, 1:W + 1, :].astype(f32)
    y = h2 + res
    o_ref[...] = jnp.where(y >= 0, y, 0.2 * y).astype(o_ref.dtype)


def leaky_res_block(x_nchw, w1_oihw, w2_oihw, bn1, bn2, eps=1e-5,
                    compute_dtype=jnp.float32, pad_channels_to=None):
    """x_nchw: (N, C, H, W) f32.  Returns (N, C, H, W) f32 (eval-mode BN)."""
    N, Cin, H, W = x_nchw.shape
    Cout = w1_oihw.shape[0]
    assert w1_oihw.shape == (Cout, Cin, 3, 3)
    assert w2_oihw.shape == (Cout, Cout, 3, 3)

    # Optional channel padding (lane density + MXU K fill at tiny channel counts).
    Cpi = Cin if pad_channels_to is None else max(Cin, pad_channels_to)
    Cpo = Cout if pad_channels_to is None else max(Cout, pad_channels_to)

    # Fold BatchNorm (inference semantics) into per-channel scale/bias (f32).
    def fold_bn(bn):
        gamma, beta, mean, var = bn
        scale = gamma / jnp.sqrt(var + eps)
        bias = beta - mean * scale
        scale = jnp.pad(scale, (0, Cpo - scale.shape[0]))
        bias = jnp.pad(bias, (0, Cpo - bias.shape[0]))
        return (scale.reshape(1, 1, Cpo).astype(jnp.float32),
                bias.reshape(1, 1, Cpo).astype(jnp.float32))

    s1, b1 = fold_bn(bn1)
    s2, b2 = fold_bn(bn2)

    # Weights OIHW -> (dy, Cin, 3*Cout): the three dx taps packed on the output axis,
    # so each conv needs only one weight slab read per dy.
    def pack_w(w_oihw, cin_p, cout_p):
        o, i = w_oihw.shape[0], w_oihw.shape[1]
        w = jnp.transpose(w_oihw, (2, 3, 1, 0))                         # (3,3,in,out)
        w = jnp.pad(w, ((0, 0), (0, 0), (0, cin_p - i), (0, cout_p - o)))
        w = jnp.transpose(w, (0, 2, 1, 3)).reshape(3, cin_p, 3 * cout_p)
        return w.astype(compute_dtype)

    w1 = pack_w(w1_oihw, Cpi, Cpo)
    w2 = pack_w(w2_oihw, Cpo, Cpo)

    # NCHW -> NHWC, pad channels, spatial zero pad: 1 row top/bottom, 1 col left,
    # right-pad so the padded width is a multiple of the sublane tile (layout-
    # preserving in-kernel reshape).
    sub = 8 if jnp.dtype(compute_dtype).itemsize == 4 else 16
    Wpad = ((W + 2 + sub - 1) // sub) * sub
    x = jnp.transpose(x_nchw, (0, 2, 3, 1)).astype(jnp.float32)
    x = jnp.pad(x, ((0, 0), (0, 0), (0, 0), (0, Cpi - Cin)))
    xpad = jnp.pad(x, ((0, 0), (1, 1), (1, Wpad - W - 1), (0, 0))).astype(compute_dtype)

    dsz = jnp.dtype(compute_dtype).itemsize
    est = (2 * (H + 2) * Wpad * Cpi * dsz            # double-buffered input block
           + 2 * H * W * Cpo * 4                     # double-buffered output block
           + 4 * 3 * max(Cpi, Cpo) * 3 * Cpo * dsz   # weight slabs
           + (H + 2) * Wpad * Cpo * dsz)             # padded-intermediate scratch
    vmem_limit = int(min(max(4 * est, 32 * 2**20), 64 * 2**20))

    kernel = functools.partial(_res_block_kernel, H=H, W=W, Wpad=Wpad,
                               Cin=Cpi, Cout=Cpo)

    out_nhwc = pl.pallas_call(
        kernel,
        out_shape=jax.ShapeDtypeStruct((N, H, W, Cpo), jnp.float32),
        grid_spec=pltpu.PrefetchScalarGridSpec(
            num_scalar_prefetch=0,
            grid=(N,),
            in_specs=[
                pl.BlockSpec((None, H + 2, Wpad, Cpi), lambda n: (n, 0, 0, 0)),
                pl.BlockSpec((3, Cpi, 3 * Cpo), lambda n: (0, 0, 0)),
                pl.BlockSpec((3, Cpo, 3 * Cpo), lambda n: (0, 0, 0)),
                pl.BlockSpec((1, 1, Cpo), lambda n: (0, 0, 0)),
                pl.BlockSpec((1, 1, Cpo), lambda n: (0, 0, 0)),
                pl.BlockSpec((1, 1, Cpo), lambda n: (0, 0, 0)),
                pl.BlockSpec((1, 1, Cpo), lambda n: (0, 0, 0)),
            ],
            out_specs=pl.BlockSpec((None, H, W, Cpo), lambda n: (n, 0, 0, 0)),
            scratch_shapes=[pltpu.VMEM((H + 2, Wpad, Cpo), compute_dtype)],
        ),
        compiler_params=pltpu.CompilerParams(
            dimension_semantics=("parallel",),
            vmem_limit_bytes=vmem_limit),
    )(xpad, w1, w2, s1, b1, s2, b2)

    out_nhwc = out_nhwc[..., :Cout]
    return jnp.transpose(out_nhwc, (0, 3, 1, 2))  # back to NCHW


def _reference(x_nchw, w1_oihw, w2_oihw, bn1, bn2, eps=1e-5):
    """Pure-JAX reference matching the PyTorch module (eval-mode BN)."""
    dn = ("NCHW", "OIHW", "NCHW")

    def bn_apply(y, bn):
        g, b, m, v = bn
        g = g[None, :, None, None]
        b = b[None, :, None, None]
        m = m[None, :, None, None]
        v = v[None, :, None, None]
        return (y - m) / jnp.sqrt(v + eps) * g + b

    y = lax.conv_general_dilated(x_nchw, w1_oihw, (1, 1), "SAME",
                                 dimension_numbers=dn)
    y = bn_apply(y, bn1)
    # LeakyReLU(1.0) == identity
    y = lax.conv_general_dilated(y, w2_oihw, (1, 1), "SAME",
                                 dimension_numbers=dn)
    y = bn_apply(y, bn2)
    out = y + x_nchw
    return jnp.where(out >= 0, out, 0.2 * out)


if __name__ == "__main__":
    key = jax.random.PRNGKey(0)
    N, C, H, W = 2, 4, 16, 16

    k = jax.random.split(key, 8)
    x = jax.random.normal(k[0], (N, C, H, W), jnp.float32)
    w1 = jax.random.normal(k[1], (C, C, 3, 3), jnp.float32) * 0.1
    w2 = jax.random.normal(k[2], (C, C, 3, 3), jnp.float32) * 0.1

    # Deterministic BatchNorm parameters / running stats (inference semantics).
    bn1 = (1.0 + 0.1 * jnp.arange(C, dtype=jnp.float32),             # gamma
           0.05 * jnp.arange(C, dtype=jnp.float32),                  # beta
           0.1 * jax.random.normal(k[3], (C,), jnp.float32),         # running_mean
           1.0 + 0.1 * jnp.abs(jax.random.normal(k[4], (C,), jnp.float32)))
    bn2 = (1.0 - 0.05 * jnp.arange(C, dtype=jnp.float32),
           -0.02 * jnp.arange(C, dtype=jnp.float32),
           0.1 * jax.random.normal(k[5], (C,), jnp.float32),
           1.0 + 0.1 * jnp.abs(jax.random.normal(k[6], (C,), jnp.float32)))

    ref = jax.block_until_ready(_reference(x, w1, w2, bn1, bn2))

    # (A) f32 operands, native channel count (tight check).
    out = jax.block_until_ready(leaky_res_block(x, w1, w2, bn1, bn2))
    assert out.shape == (N, C, H, W), out.shape
    assert jnp.allclose(out, ref, atol=2e-4, rtol=2e-4), \
        float(jnp.max(jnp.abs(out - ref)))

    # (B) bf16 conv operands (f32 accumulation) + lane-dense channel padding to 128.
    out_b = jax.block_until_ready(
        leaky_res_block(x, w1, w2, bn1, bn2,
                        compute_dtype=jnp.bfloat16, pad_channels_to=128))
    cast = lambda a: a.astype(jnp.bfloat16).astype(jnp.float32)
    ref_b = jax.block_until_ready(_reference(cast(x), cast(w1), cast(w2), bn1, bn2))
    assert out_b.shape == (N, C, H, W), out_b.shape
    assert jnp.allclose(out_b, ref_b, atol=1e-1, rtol=1e-1), \
        float(jnp.max(jnp.abs(out_b - ref_b)))

    print("KERNEL_OK")
</pallas_src>

<mosaic_0001>
module attributes {stable_mosaic.version = 11 : i64} {
  func.func @_res_block_kernel(%arg0: i32, %arg1: memref<1x18x24x4xf32, #tpu.memory_space<vmem>>, %arg2: memref<3x4x12xf32, #tpu.memory_space<vmem>>, %arg3: memref<3x4x12xf32, #tpu.memory_space<vmem>>, %arg4: memref<1x1x4xf32, #tpu.memory_space<vmem>>, %arg5: memref<1x1x4xf32, #tpu.memory_space<vmem>>, %arg6: memref<1x1x4xf32, #tpu.memory_space<vmem>>, %arg7: memref<1x1x4xf32, #tpu.memory_space<vmem>>, %arg8: memref<1x16x16x4xf32, #tpu.memory_space<vmem>>, %arg9: memref<18x24x4xf32, #tpu.memory_space<vmem>>) attributes {dimension_semantics = [#tpu.dimension_semantics<parallel>], iteration_bounds = array<i64: 2>, scalar_prefetch = 0 : i64, scratch_operands = 1 : i64, tpu.core_type = #tpu.core_type<tc>, window_params = [{transform_indices = @transform_0, window_bounds = array<i64: 1, 18, 24, 4>}, {pipeline_mode = #tpu.pipeline_mode<synchronous>, transform_indices = @transform_1, window_bounds = array<i64: 3, 4, 12>}, {pipeline_mode = #tpu.pipeline_mode<synchronous>, transform_indices = @transform_2, window_bounds = array<i64: 3, 4, 12>}, {pipeline_mode = #tpu.pipeline_mode<synchronous>, transform_indices = @transform_3, window_bounds = array<i64: 1, 1, 4>}, {pipeline_mode = #tpu.pipeline_mode<synchronous>, transform_indices = @transform_4, window_bounds = array<i64: 1, 1, 4>}, {pipeline_mode = #tpu.pipeline_mode<synchronous>, transform_indices = @transform_5, window_bounds = array<i64: 1, 1, 4>}, {pipeline_mode = #tpu.pipeline_mode<synchronous>, transform_indices = @transform_6, window_bounds = array<i64: 1, 1, 4>}, {transform_indices = @transform_7, window_bounds = array<i64: 1, 16, 16, 4>}]} {
    %cst = arith.constant 0.000000e+00 : f32
    %0 = vector.broadcast %cst : f32 to vector<16x16x4xf32>
    %c0 = arith.constant 0 : index
    %c0_0 = arith.constant 0 : index
    %c0_1 = arith.constant 0 : index
    %c0_2 = arith.constant 0 : index
    %1 = vector.load %arg1[%c0, %c0_0, %c0_1, %c0_2] : memref<1x18x24x4xf32, #tpu.memory_space<vmem>>, vector<1x16x24x4xf32>
    %2 = vector.shape_cast %1 : vector<1x16x24x4xf32> to vector<16x24x4xf32>
    %3 = vector.shape_cast %2 : vector<16x24x4xf32> to vector<384x4xf32>
    %c0_3 = arith.constant 0 : index
    %c0_4 = arith.constant 0 : index
    %c0_5 = arith.constant 0 : index
    %4 = vector.load %arg2[%c0_3, %c0_4, %c0_5] : memref<3x4x12xf32, #tpu.memory_space<vmem>>, vector<1x4x12xf32>
    %5 = vector.shape_cast %4 : vector<1x4x12xf32> to vector<4x12xf32>
    %cst_6 = arith.constant dense<0.000000e+00> : vector<384x12xf32>
    %6 = tpu.matmul %3, %5, %cst_6 {dimension_numbers = #tpu.dot_dimension_numbers<[1], [0], [0], [1], [0, 0, 1, 1], [], []>} : vector<384x4xf32>, vector<4x12xf32>, vector<384x12xf32> -> vector<384x12xf32>
    %7 = vector.shape_cast %6 : vector<384x12xf32> to vector<16x24x12xf32>
    %8 = vector.extract_strided_slice %7 {offsets = [0, 0, 0], sizes = [16, 16, 4], strides = [1, 1, 1]} : vector<16x24x12xf32> to vector<16x16x4xf32>
    %9 = arith.addf %0, %8 : vector<16x16x4xf32>
    %10 = vector.extract_strided_slice %7 {offsets = [0, 1, 4], sizes = [16, 16, 4], strides = [1, 1, 1]} : vector<16x24x12xf32> to vector<16x16x4xf32>
    %11 = arith.addf %9, %10 : vector<16x16x4xf32>
    %12 = vector.extract_strided_slice %7 {offsets = [0, 2, 8], sizes = [16, 16, 4], strides = [1, 1, 1]} : vector<16x24x12xf32> to vector<16x16x4xf32>
    %13 = arith.addf %11, %12 : vector<16x16x4xf32>
    %c0_7 = arith.constant 0 : index
    %c1 = arith.constant 1 : index
    %c0_8 = arith.constant 0 : index
    %c0_9 = arith.constant 0 : index
    %14 = vector.load %arg1[%c0_7, %c1, %c0_8, %c0_9] : memref<1x18x24x4xf32, #tpu.memory_space<vmem>>, vector<1x16x24x4xf32>
    %15 = vector.shape_cast %14 : vector<1x16x24x4xf32> to vector<16x24x4xf32>
    %16 = vector.shape_cast %15 : vector<16x24x4xf32> to vector<384x4xf32>
    %c1_10 = arith.constant 1 : index
    %c0_11 = arith.constant 0 : index
    %c0_12 = arith.constant 0 : index
    %17 = vector.load %arg2[%c1_10, %c0_11, %c0_12] : memref<3x4x12xf32, #tpu.memory_space<vmem>>, vector<1x4x12xf32>
    %18 = vector.shape_cast %17 : vector<1x4x12xf32> to vector<4x12xf32>
    %cst_13 = arith.constant dense<0.000000e+00> : vector<384x12xf32>
    %19 = tpu.matmul %16, %18, %cst_13 {dimension_numbers = #tpu.dot_dimension_numbers<[1], [0], [0], [1], [0, 0, 1, 1], [], []>} : vector<384x4xf32>, vector<4x12xf32>, vector<384x12xf32> -> vector<384x12xf32>
    %20 = vector.shape_cast %19 : vector<384x12xf32> to vector<16x24x12xf32>
    %21 = vector.extract_strided_slice %20 {offsets = [0, 0, 0], sizes = [16, 16, 4], strides = [1, 1, 1]} : vector<16x24x12xf32> to vector<16x16x4xf32>
    %22 = arith.addf %13, %21 : vector<16x16x4xf32>
    %23 = vector.extract_strided_slice %20 {offsets = [0, 1, 4], sizes = [16, 16, 4], strides = [1, 1, 1]} : vector<16x24x12xf32> to vector<16x16x4xf32>
    %24 = arith.addf %22, %23 : vector<16x16x4xf32>
    %25 = vector.extract_strided_slice %20 {offsets = [0, 2, 8], sizes = [16, 16, 4], strides = [1, 1, 1]} : vector<16x24x12xf32> to vector<16x16x4xf32>
    %26 = arith.addf %24, %25 : vector<16x16x4xf32>
    %c0_14 = arith.constant 0 : index
    %c2 = arith.constant 2 : index
    %c0_15 = arith.constant 0 : index
    %c0_16 = arith.constant 0 : index
    %27 = vector.load %arg1[%c0_14, %c2, %c0_15, %c0_16] : memref<1x18x24x4xf32, #tpu.memory_space<vmem>>, vector<1x16x24x4xf32>
    %28 = vector.shape_cast %27 : vector<1x16x24x4xf32> to vector<16x24x4xf32>
    %29 = vector.shape_cast %28 : vector<16x24x4xf32> to vector<384x4xf32>
    %c2_17 = arith.constant 2 : index
    %c0_18 = arith.constant 0 : index
    %c0_19 = arith.constant 0 : index
    %30 = vector.load %arg2[%c2_17, %c0_18, %c0_19] : memref<3x4x12xf32, #tpu.memory_space<vmem>>, vector<1x4x12xf32>
    %31 = vector.shape_cast %30 : vector<1x4x12xf32> to vector<4x12xf32>
    %cst_20 = arith.constant dense<0.000000e+00> : vector<384x12xf32>
    %32 = tpu.matmul %29, %31, %cst_20 {dimension_numbers = #tpu.dot_dimension_numbers<[1], [0], [0], [1], [0, 0, 1, 1], [], []>} : vector<384x4xf32>, vector<4x12xf32>, vector<384x12xf32> -> vector<384x12xf32>
    %33 = vector.shape_cast %32 : vector<384x12xf32> to vector<16x24x12xf32>
    %34 = vector.extract_strided_slice %33 {offsets = [0, 0, 0], sizes = [16, 16, 4], strides = [1, 1, 1]} : vector<16x24x12xf32> to vector<16x16x4xf32>
    %35 = arith.addf %26, %34 : vector<16x16x4xf32>
    %36 = vector.extract_strided_slice %33 {offsets = [0, 1, 4], sizes = [16, 16, 4], strides = [1, 1, 1]} : vector<16x24x12xf32> to vector<16x16x4xf32>
    %37 = arith.addf %35, %36 : vector<16x16x4xf32>
    %38 = vector.extract_strided_slice %33 {offsets = [0, 2, 8], sizes = [16, 16, 4], strides = [1, 1, 1]} : vector<16x24x12xf32> to vector<16x16x4xf32>
    %39 = arith.addf %37, %38 : vector<16x16x4xf32>
    %c0_21 = arith.constant 0 : index
    %c0_22 = arith.constant 0 : index
    %c0_23 = arith.constant 0 : index
    %40 = vector.load %arg4[%c0_21, %c0_22, %c0_23] : memref<1x1x4xf32, #tpu.memory_space<vmem>>, vector<1x1x4xf32>
    %41 = vector.broadcast %40 : vector<1x1x4xf32> to vector<16x16x4xf32>
    %42 = arith.mulf %39, %41 : vector<16x16x4xf32>
    %c0_24 = arith.constant 0 : index
    %c0_25 = arith.constant 0 : index
    %c0_26 = arith.constant 0 : index
    %43 = vector.load %arg5[%c0_24, %c0_25, %c0_26] : memref<1x1x4xf32, #tpu.memory_space<vmem>>, vector<1x1x4xf32>
    %44 = vector.broadcast %43 : vector<1x1x4xf32> to vector<16x16x4xf32>
    %45 = arith.addf %42, %44 : vector<16x16x4xf32>
    %cst_27 = arith.constant 0.000000e+00 : f32
    %46 = vector.broadcast %cst_27 : f32 to vector<1x24x4xf32>
    %c0_28 = arith.constant 0 : index
    %c0_29 = arith.constant 0 : index
    %c0_30 = arith.constant 0 : index
    %47 = vector.load %arg9[%c0_28, %c0_29, %c0_30] : memref<18x24x4xf32, #tpu.memory_space<vmem>>, vector<1x24x4xf32>
    tpu.vector_store %arg9[%c0_28, %c0_29, %c0_30], %46 {strides = array<i32>} : memref<18x24x4xf32, #tpu.memory_space<vmem>>, vector<1x24x4xf32>,
    %c17 = arith.constant 17 : index
    %c0_31 = arith.constant 0 : index
    %c0_32 = arith.constant 0 : index
    %48 = vector.load %arg9[%c17, %c0_31, %c0_32] : memref<18x24x4xf32, #tpu.memory_space<vmem>>, vector<1x24x4xf32>
    tpu.vector_store %arg9[%c17, %c0_31, %c0_32], %46 {strides = array<i32>} : memref<18x24x4xf32, #tpu.memory_space<vmem>>, vector<1x24x4xf32>,
    %cst_33 = arith.constant 0.000000e+00 : f32
    %49 = vector.broadcast %cst_33 : f32 to vector<16x1x4xf32>
    %c1_34 = arith.constant 1 : index
    %c0_35 = arith.constant 0 : index
    %c0_36 = arith.constant 0 : index
    %50 = vector.load %arg9[%c1_34, %c0_35, %c0_36] : memref<18x24x4xf32, #tpu.memory_space<vmem>>, vector<16x1x4xf32>
    tpu.vector_store %arg9[%c1_34, %c0_35, %c0_36], %49 {strides = array<i32>} : memref<18x24x4xf32, #tpu.memory_space<vmem>>, vector<16x1x4xf32>,
    %cst_37 = arith.constant 0.000000e+00 : f32
    %51 = vector.broadcast %cst_37 : f32 to vector<16x7x4xf32>
    %c1_38 = arith.constant 1 : index
    %c17_39 = arith.constant 17 : index
    %c0_40 = arith.constant 0 : index
    %52 = vector.load %arg9[%c1_38, %c17_39, %c0_40] : memref<18x24x4xf32, #tpu.memory_space<vmem>>, vector<16x7x4xf32>
    tpu.vector_store %arg9[%c1_38, %c17_39, %c0_40], %51 {strides = array<i32>} : memref<18x24x4xf32, #tpu.memory_space<vmem>>, vector<16x7x4xf32>,
    %c1_41 = arith.constant 1 : index
    %c1_42 = arith.constant 1 : index
    %c0_43 = arith.constant 0 : index
    %53 = vector.load %arg9[%c1_41, %c1_42, %c0_43] : memref<18x24x4xf32, #tpu.memory_space<vmem>>, vector<16x16x4xf32>
    tpu.vector_store %arg9[%c1_41, %c1_42, %c0_43], %45 {strides = array<i32>} : memref<18x24x4xf32, #tpu.memory_space<vmem>>, vector<16x16x4xf32>,
    %cst_44 = arith.constant 0.000000e+00 : f32
    %54 = vector.broadcast %cst_44 : f32 to vector<16x16x4xf32>
    %c0_45 = arith.constant 0 : index
    %c0_46 = arith.constant 0 : index
    %c0_47 = arith.constant 0 : index
    %55 = vector.load %arg9[%c0_45, %c0_46, %c0_47] : memref<18x24x4xf32, #tpu.memory_space<vmem>>, vector<16x24x4xf32>
    %56 = vector.shape_cast %55 : vector<16x24x4xf32> to vector<384x4xf32>
    %c0_48 = arith.constant 0 : index
    %c0_49 = arith.constant 0 : index
    %c0_50 = arith.constant 0 : index
    %57 = vector.load %arg3[%c0_48, %c0_49, %c0_50] : memref<3x4x12xf32, #tpu.memory_space<vmem>>, vector<1x4x12xf32>
    %58 = vector.shape_cast %57 : vector<1x4x12xf32> to vector<4x12xf32>
    %cst_51 = arith.constant dense<0.000000e+00> : vector<384x12xf32>
    %59 = tpu.matmul %56, %58, %cst_51 {dimension_numbers = #tpu.dot_dimension_numbers<[1], [0], [0], [1], [0, 0, 1, 1], [], []>} : vector<384x4xf32>, vector<4x12xf32>, vector<384x12xf32> -> vector<384x12xf32>
    %60 = vector.shape_cast %59 : vector<384x12xf32> to vector<16x24x12xf32>
    %61 = vector.extract_strided_slice %60 {offsets = [0, 0, 0], sizes = [16, 16, 4], strides = [1, 1, 1]} : vector<16x24x12xf32> to vector<16x16x4xf32>
    %62 = arith.addf %54, %61 : vector<16x16x4xf32>
    %63 = vector.extract_strided_slice %60 {offsets = [0, 1, 4], sizes = [16, 16, 4], strides = [1, 1, 1]} : vector<16x24x12xf32> to vector<16x16x4xf32>
    %64 = arith.addf %62, %63 : vector<16x16x4xf32>
    %65 = vector.extract_strided_slice %60 {offsets = [0, 2, 8], sizes = [16, 16, 4], strides = [1, 1, 1]} : vector<16x24x12xf32> to vector<16x16x4xf32>
    %66 = arith.addf %64, %65 : vector<16x16x4xf32>
    %c1_52 = arith.constant 1 : index
    %c0_53 = arith.constant 0 : index
    %c0_54 = arith.constant 0 : index
    %67 = vector.load %arg9[%c1_52, %c0_53, %c0_54] : memref<18x24x4xf32, #tpu.memory_space<vmem>>, vector<16x24x4xf32>
    %68 = vector.shape_cast %67 : vector<16x24x4xf32> to vector<384x4xf32>
    %c1_55 = arith.constant 1 : index
    %c0_56 = arith.constant 0 : index
    %c0_57 = arith.constant 0 : index
    %69 = vector.load %arg3[%c1_55, %c0_56, %c0_57] : memref<3x4x12xf32, #tpu.memory_space<vmem>>, vector<1x4x12xf32>
    %70 = vector.shape_cast %69 : vector<1x4x12xf32> to vector<4x12xf32>
    %cst_58 = arith.constant dense<0.000000e+00> : vector<384x12xf32>
    %71 = tpu.matmul %68, %70, %cst_58 {dimension_numbers = #tpu.dot_dimension_numbers<[1], [0], [0], [1], [0, 0, 1, 1], [], []>} : vector<384x4xf32>, vector<4x12xf32>, vector<384x12xf32> -> vector<384x12xf32>
    %72 = vector.shape_cast %71 : vector<384x12xf32> to vector<16x24x12xf32>
    %73 = vector.extract_strided_slice %72 {offsets = [0, 0, 0], sizes = [16, 16, 4], strides = [1, 1, 1]} : vector<16x24x12xf32> to vector<16x16x4xf32>
    %74 = arith.addf %66, %73 : vector<16x16x4xf32>
    %75 = vector.extract_strided_slice %72 {offsets = [0, 1, 4], sizes = [16, 16, 4], strides = [1, 1, 1]} : vector<16x24x12xf32> to vector<16x16x4xf32>
    %76 = arith.addf %74, %75 : vector<16x16x4xf32>
    %77 = vector.extract_strided_slice %72 {offsets = [0, 2, 8], sizes = [16, 16, 4], strides = [1, 1, 1]} : vector<16x24x12xf32> to vector<16x16x4xf32>
    %78 = arith.addf %76, %77 : vector<16x16x4xf32>
    %c2_59 = arith.constant 2 : index
    %c0_60 = arith.constant 0 : index
    %c0_61 = arith.constant 0 : index
    %79 = vector.load %arg9[%c2_59, %c0_60, %c0_61] : memref<18x24x4xf32, #tpu.memory_space<vmem>>, vector<16x24x4xf32>
    %80 = vector.shape_cast %79 : vector<16x24x4xf32> to vector<384x4xf32>
    %c2_62 = arith.constant 2 : index
    %c0_63 = arith.constant 0 : index
    %c0_64 = arith.constant 0 : index
    %81 = vector.load %arg3[%c2_62, %c0_63, %c0_64] : memref<3x4x12xf32, #tpu.memory_space<vmem>>, vector<1x4x12xf32>
    %82 = vector.shape_cast %81 : vector<1x4x12xf32> to vector<4x12xf32>
    %cst_65 = arith.constant dense<0.000000e+00> : vector<384x12xf32>
    %83 = tpu.matmul %80, %82, %cst_65 {dimension_numbers = #tpu.dot_dimension_numbers<[1], [0], [0], [1], [0, 0, 1, 1], [], []>} : vector<384x4xf32>, vector<4x12xf32>, vector<384x12xf32> -> vector<384x12xf32>
    %84 = vector.shape_cast %83 : vector<384x12xf32> to vector<16x24x12xf32>
    %85 = vector.extract_strided_slice %84 {offsets = [0, 0, 0], sizes = [16, 16, 4], strides = [1, 1, 1]} : vector<16x24x12xf32> to vector<16x16x4xf32>
    %86 = arith.addf %78, %85 : vector<16x16x4xf32>
    %87 = vector.extract_strided_slice %84 {offsets = [0, 1, 4], sizes = [16, 16, 4], strides = [1, 1, 1]} : vector<16x24x12xf32> to vector<16x16x4xf32>
    %88 = arith.addf %86, %87 : vector<16x16x4xf32>
    %89 = vector.extract_strided_slice %84 {offsets = [0, 2, 8], sizes = [16, 16, 4], strides = [1, 1, 1]} : vector<16x24x12xf32> to vector<16x16x4xf32>
    %90 = arith.addf %88, %89 : vector<16x16x4xf32>
    %c0_66 = arith.constant 0 : index
    %c0_67 = arith.constant 0 : index
    %c0_68 = arith.constant 0 : index
    %91 = vector.load %arg6[%c0_66, %c0_67, %c0_68] : memref<1x1x4xf32, #tpu.memory_space<vmem>>, vector<1x1x4xf32>
    %92 = vector.broadcast %91 : vector<1x1x4xf32> to vector<16x16x4xf32>
    %93 = arith.mulf %90, %92 : vector<16x16x4xf32>
    %c0_69 = arith.constant 0 : index
    %c0_70 = arith.constant 0 : index
    %c0_71 = arith.constant 0 : index
    %94 = vector.load %arg7[%c0_69, %c0_70, %c0_71] : memref<1x1x4xf32, #tpu.memory_space<vmem>>, vector<1x1x4xf32>
    %95 = vector.broadcast %94 : vector<1x1x4xf32> to vector<16x16x4xf32>
    %96 = arith.addf %93, %95 : vector<16x16x4xf32>
    %c0_72 = arith.constant 0 : index
    %c1_73 = arith.constant 1 : index
    %c1_74 = arith.constant 1 : index
    %c0_75 = arith.constant 0 : index
    %97 = vector.load %arg1[%c0_72, %c1_73, %c1_74, %c0_75] : memref<1x18x24x4xf32, #tpu.memory_space<vmem>>, vector<1x16x16x4xf32>
    %98 = vector.shape_cast %97 : vector<1x16x16x4xf32> to vector<16x16x4xf32>
    %99 = arith.addf %96, %98 : vector<16x16x4xf32>
    %cst_76 = arith.constant 0.000000e+00 : f32
    %100 = vector.broadcast %cst_76 : f32 to vector<16x16x4xf32>
    %101 = arith.cmpf oge, %99, %100 : vector<16x16x4xf32>
    %cst_77 = arith.constant 2.000000e-01 : f32
    %102 = vector.broadcast %cst_77 : f32 to vector<16x16x4xf32>
    %103 = arith.mulf %102, %99 : vector<16x16x4xf32>
    %104 = arith.select %101, %99, %103 : vector<16x16x4xi1>, vector<16x16x4xf32>
    %c0_78 = arith.constant 0 : index
    %c0_79 = arith.constant 0 : index
    %c0_80 = arith.constant 0 : index
    %c0_81 = arith.constant 0 : index
    %105 = vector.load %arg8[%c0_78, %c0_79, %c0_80, %c0_81] : memref<1x16x16x4xf32, #tpu.memory_space<vmem>>, vector<1x16x16x4xf32>
    %106 = vector.shape_cast %105 : vector<1x16x16x4xf32> to vector<16x16x4xf32>
    %107 = vector.shape_cast %104 : vector<16x16x4xf32> to vector<1x16x16x4xf32>
    tpu.vector_store %arg8[%c0_78, %c0_79, %c0_80, %c0_81], %107 {strides = array<i32>} : memref<1x16x16x4xf32, #tpu.memory_space<vmem>>, vector<1x16x16x4xf32>,
    return
  }
  func.func @transform_0(%arg0: i32) -> (i32, i32, i32, i32) {
    %c0_i32 = arith.constant 0 : i32
    %c0_i32_0 = arith.constant 0 : i32
    %c0_i32_1 = arith.constant 0 : i32
    %c0_i32_2 = arith.constant 0 : i32
    return %arg0, %c0_i32, %c0_i32_0, %c0_i32_1 : i32, i32, i32, i32
  }
  func.func @transform_1(%arg0: i32) -> (i32, i32, i32) {
    %c0_i32 = arith.constant 0 : i32
    %c0_i32_0 = arith.constant 0 : i32
    %c0_i32_1 = arith.constant 0 : i32
    %c0_i32_2 = arith.constant 0 : i32
    return %c0_i32, %c0_i32_0, %c0_i32_1 : i32, i32, i32
  }
  func.func @transform_2(%arg0: i32) -> (i32, i32, i32) {
    %c0_i32 = arith.constant 0 : i32
    %c0_i32_0 = arith.constant 0 : i32
    %c0_i32_1 = arith.constant 0 : i32
    %c0_i32_2 = arith.constant 0 : i32
    return %c0_i32, %c0_i32_0, %c0_i32_1 : i32, i32, i32
  }
  func.func @transform_3(%arg0: i32) -> (i32, i32, i32) {
    %c0_i32 = arith.constant 0 : i32
    %c0_i32_0 = arith.constant 0 : i32
    %c0_i32_1 = arith.constant 0 : i32
    %c0_i32_2 = arith.constant 0 : i32
    return %c0_i32, %c0_i32_0, %c0_i32_1 : i32, i32, i32
  }
  func.func @transform_4(%arg0: i32) -> (i32, i32, i32) {
    %c0_i32 = arith.constant 0 : i32
    %c0_i32_0 = arith.constant 0 : i32
    %c0_i32_1 = arith.constant 0 : i32
    %c0_i32_2 = arith.constant 0 : i32
    return %c0_i32, %c0_i32_0, %c0_i32_1 : i32, i32, i32
  }
  func.func @transform_5(%arg0: i32) -> (i32, i32, i32) {
    %c0_i32 = arith.constant 0 : i32
    %c0_i32_0 = arith.constant 0 : i32
    %c0_i32_1 = arith.constant 0 : i32
    %c0_i32_2 = arith.constant 0 : i32
    return %c0_i32, %c0_i32_0, %c0_i32_1 : i32, i32, i32
  }
  func.func @transform_6(%arg0: i32) -> (i32, i32, i32) {
    %c0_i32 = arith.constant 0 : i32
    %c0_i32_0 = arith.constant 0 : i32
    %c0_i32_1 = arith.constant 0 : i32
    %c0_i32_2 = arith.constant 0 : i32
    return %c0_i32, %c0_i32_0, %c0_i32_1 : i32, i32, i32
  }
  func.func @transform_7(%arg0: i32) -> (i32, i32, i32, i32) {
    %c0_i32 = arith.constant 0 : i32
    %c0_i32_0 = arith.constant 0 : i32
    %c0_i32_1 = arith.constant 0 : i32
    %c0_i32_2 = arith.constant 0 : i32
    return %arg0, %c0_i32, %c0_i32_0, %c0_i32_1 : i32, i32, i32, i32
  }
}

</mosaic_0001>

<bundles_post_ra>
// kernel: tpu_custom_call.1
= control target key start
LH: loop header
LB: loop body
LE: loop exit
PB: predicated region body
PF: predicated region fallthrough
CT: control target
= control target key end

     0   :  { %s7991_s24 = smov 0   ;;  %s12223_s0 = inlined_call_operand.vmem [shape: f32[2,18,24,4], index: 0, kind: input, shape index: {}]   ;;  %s12224_s1 = inlined_call_operand.vmem [shape: f32[3,4,12], index: 1, kind: input, shape index: {}]   ;;  %s12225_s2 = inlined_call_operand.vmem [shape: f32[3,4,12], index: 2, kind: input, shape index: {}]   ;;  %s12226_s3 = inlined_call_operand.vmem [shape: f32[1,1,4], index: 3, kind: input, shape index: {}]   ;;  %s12227_s4 = inlined_call_operand.vmem [shape: f32[1,1,4], index: 4, kind: input, shape index: {}]   ;;  %s12228_s5 = inlined_call_operand.vmem [shape: f32[1,1,4], index: 5, kind: input, shape index: {}]   ;;  %s12229_s6 = inlined_call_operand.vmem [shape: f32[1,1,4], index: 6, kind: input, shape index: {}]   ;;  %s12230_s7 = inlined_call_operand.vmem [shape: f32[2,16,16,4], index: 7, kind: output, shape index: {}]  }
   0x1 LB: > { %s6749_s25 = sadd.s32 4294967295, %s7946_s24   ;;  %p6753_p0 = scmp.ge.s32.totalorder %s7946_s24, 1  ;;  %s7946_s24 = sphi %s7991_s24, %s17_s24  }
   0x2   : > { %p237_p1 = scmp.lt.s32.totalorder %s7946_s24, 3 }
   0x4   : > { %p238_p2 = pnand %p6753_p0, %p237_p1 }
   0x6   : > { %241 = sbr.rel (%p238_p2) target bundleno = 1354 (0x54a), region = 48 }
   0xd   : > { %v327_v0 = vld [vmem:[%s12224_s1] sm:$0xf]  ;;  %vm473_vm0 = vcmask 1043456   ;;  %v6854_v1 = vld [vmem:[%s12224_s1 + $0x4] sm:$0xf]  ;;  %p269_p3 = scmp.lt.s32.totalorder %s6749_s25, 1 }
   0xe   : > { %7484 = vmatprep.subr.msk.mxu0 %vm473_vm0, %v327_v0  ;;  %7558 = vmatprep.subr.msk.mxu1 %vm473_vm0, %v6854_v1  ;;  %v6952_v2 = vld [vmem:[%s12224_s1 + $0x8] sm:$0xf]  ;;  %vm328_vm1 = vcmask 31744   ;;  %vm862_vm2 = vcmask 1046528   ;;  %vm1071_vm3 = vcmask 1045504   ;;  %s7948_s13 = smov 124  }
   0xf   : > { %7485 = vmatpush3.msk.msra.mxu0 %vm473_vm0, %v327_v0  ;;  %s12948_s25 = smov (!%p269_p3, %s6749_s25), 1  ;;  %7559 = vmatpush3.msk.msra.mxu1 %vm473_vm0, %v6854_v1  ;;  %s7949_s14 = smov 120   ;;  %vm3364_vm4 = vcmask 24576   ;;  %vm3381_vm5 = vcmask 30720  }
  0x10   : > { %7632 = vmatprep.subr.msk.mxu0 %vm473_vm0, %v6952_v2  ;;  %s7928_s9 = smul.u32 432, %s12948_s25  ;;  %s7189_s8 = sshll.u32 %s12948_s25, 8 }
  0x11   : > { %s12017_s11 = scalar_lea.vmem %s12230_s7, %s7189_s8 }
  0x12   : > { %s8019_s12 = scalar_lea.vmem %s12223_s0, %s7928_s9 }
  0x13   : > { %v279_v3 = vld [vmem:[%s8019_s12] sm:$0xff]  ;;  %v6806_v4 = vld [vmem:[%s8019_s12 + $0x18] sm:$0xff]  ;;  %v280_v5 = vld [vmem:[%s8019_s12 + $0x8] sm:$0xff] }
  0x14   : > { %7486 = vmatprep.mubr.msk.f32.mxu0 %vm328_vm1, %v279_v3  ;;  %7560 = vmatprep.mubr.msk.f32.mxu1 %vm328_vm1, %v6806_v4  ;;  %v6807_v6 = vld [vmem:[%s8019_s12 + $0x20] sm:$0xff]  ;;  %v281_v7 = vld [vmem:[%s8019_s12 + $0x10] sm:$0xff]  ;;  %v6808_v8 = vld [vmem:[%s8019_s12 + $0x28] sm:$0xff] }
  0x15   : > { %7487 = vmatmul.mubr.msk.f32.vlgmr.msra.gmra.mrb[0].mxu0 %vm328_vm1, %v280_v5  ;;  %7561 = vmatmul.mubr.msk.f32.vlgmr.msra.gmra.mrb[0].mxu1 %vm328_vm1, %v6807_v6  ;;  %v8034_v9 = vld [vmem:[%s8019_s12 + $0x30] sm:$0xff]  ;;  %v8037_v10 = vld [vmem:[%s8019_s12 + $0x38] sm:$0xff]  ;;  %v8047_v11 = vld [vmem:[%s8019_s12 + $0x40] sm:$0xff] }
  0x16   : > { %7489 = vmatprep.mubr.msk.f32.mxu0 %vm328_vm1, %v281_v7  ;;  %7563 = vmatprep.mubr.msk.f32.mxu1 %vm328_vm1, %v6808_v8  ;;  %v8053_v12 = vld [vmem:[%s8019_s12 + $0x48] sm:$0xff]  ;;  %v8058_v13 = vld [vmem:[%s8019_s12 + $0x50] sm:$0xff]  ;;  %v8065_v14 = vld [vmem:[%s8019_s12 + $0x58] sm:$0xff] }
  0x17   : > { %7633 = vmatpush3.msk.msra.mxu0 %vm473_vm0, %v6952_v2  ;;  %v8074_v15 = vld [vmem:[%s8019_s12 + $0x60] sm:$0xff]  ;;  %v8077_v16 = vld [vmem:[%s8019_s12 + $0x68] sm:$0xff]  ;;  %v8088_v17 = vld [vmem:[%s8019_s12 + $0x70] sm:$0xff] }
  0x18   : > { %v8095_v18 = vld [vmem:[%s8019_s12 + $0x78] sm:$0xff]  ;;  %v8100_v19 = vld [vmem:[%s8019_s12 + $0x80] sm:$0xff]  ;;  %v8107_v20 = vld [vmem:[%s8019_s12 + $0x88] sm:$0xff] }
  0x19   : > { %7490 = vmatmul.mubr.msk.f32.gmra.mrb[2].mxu0 %vm328_vm1, %v6806_v4  ;;  %7564 = vmatmul.mubr.msk.f32.gmra.mrb[2].mxu1 %vm328_vm1, %v8034_v9  ;;  %v8116_v21 = vld [vmem:[%s8019_s12 + $0x90] sm:$0xff]  ;;  %v8123_v22 = vld [vmem:[%s8019_s12 + $0x98] sm:$0xff]  ;;  %v8130_v23 = vld [vmem:[%s8019_s12 + $0xa0] sm:$0xff] }
  0x1a   : > { %7492 = vmatprep.mubr.msk.f32.mxu0 %vm328_vm1, %v6807_v6  ;;  %7566 = vmatprep.mubr.msk.f32.mxu1 %vm328_vm1, %v8037_v10  ;;  %v8137_v24 = vld [vmem:[%s8019_s12 + $0xa8] sm:$0xff]  ;;  %v8144_v25 = vld [vmem:[%s8019_s12 + $0xb0] sm:$0xff]  ;;  %v8149_v26 = vld [vmem:[%s8019_s12 + $0xb8] sm:$0xff] }
  0x1b   : > { %v8158_v27 = vld [vmem:[%s8019_s12 + $0xc0] sm:$0xff]  ;;  %v8163_v28 = vld [vmem:[%s8019_s12 + $0xc8] sm:$0xff]  ;;  %v8172_v29 = vld [vmem:[%s8019_s12 + $0xd0] sm:$0xff] }
  0x1c   : > { %v8177_v30 = vld [vmem:[%s8019_s12 + $0xd8] sm:$0xff]  ;;  %v8186_v31 = vld [vmem:[%s8019_s12 + $0xe0] sm:$0xff]  ;;  %v8191_v32 = vld [vmem:[%s8019_s12 + $0xe8] sm:$0xff] }
  0x1d   : > { %7493 = vmatmul.mubr.msk.f32.gmra.mrb[4].mxu0 %vm328_vm1, %v6808_v8  ;;  %7567 = vmatmul.mubr.msk.f32.gmra.mrb[4].mxu1 %vm328_vm1, %v8047_v11  ;;  %v8200_v33 = vld [vmem:[%s8019_s12 + $0xf0] sm:$0xff]  ;;  %v8205_v34 = vld [vmem:[%s8019_s12 + $0xf8] sm:$0xff]  ;;  %v8214_v35 = vld [vmem:[%s8019_s12 + $0x100] sm:$0xff] }
  0x1e   : > { %7495 = vmatprep.mubr.msk.f32.mxu0 %vm328_vm1, %v8034_v9  ;;  %7569 = vmatprep.mubr.msk.f32.mxu1 %vm328_vm1, %v8053_v12  ;;  %v8219_v36 = vld [vmem:[%s8019_s12 + $0x108] sm:$0xff]  ;;  %v8228_v37 = vld [vmem:[%s8019_s12 + $0x110] sm:$0xff]  ;;  %v8233_v38 = vld [vmem:[%s8019_s12 + $0x118] sm:$0xff] }
  0x1f   : > { %v8242_v39 = vld [vmem:[%s8019_s12 + $0x120] sm:$0xff]  ;;  %v8247_v40 = vld [vmem:[%s8019_s12 + $0x128] sm:$0xff]  ;;  %v8256_v41 = vld [vmem:[%s8019_s12 + $0x130] sm:$0xff] }
  0x20   : > { %v8261_v42 = vld [vmem:[%s8019_s12 + $0x138] sm:$0xff]  ;;  %v8270_v43 = vld [vmem:[%s8019_s12 + $0x140] sm:$0xff]  ;;  %v8275_v44 = vld [vmem:[%s8019_s12 + $0x148] sm:$0xff] }
  0x21   : > { %7496 = vmatmul.mubr.msk.f32.gmra.mrb[6].mxu0 %vm328_vm1, %v8037_v10  ;;  %7570 = vmatmul.mubr.msk.f32.gmra.mrb[6].mxu1 %vm328_vm1, %v8058_v13  ;;  %v8284_v45 = vld [vmem:[%s8019_s12 + $0x150] sm:$0xff]  ;;  %v322_v46 = vld [vmem:[%s8019_s12 + $0x158] sm:$0xff]  ;;  %v323_v47 = vld [vmem:[%s8019_s12 + $0x160] sm:$0xff] }
  0x22   : > { %7498 = vmatprep.mubr.msk.f32.mxu0 %vm328_vm1, %v8047_v11  ;;  %7572 = vmatprep.mubr.msk.f32.mxu1 %vm328_vm1, %v8065_v14  ;;  %v324_v48 = vld [vmem:[%s8019_s12 + $0x168] sm:$0xff]  ;;  %v325_v49 = vld [vmem:[%s8019_s12 + $0x170] sm:$0xff]  ;;  %v8305_v50 = vld [vmem:[%s8019_s12 + $0x178] sm:$0xff] }
  0x23   : > { %v8320_v51 = vld [vmem:[%s8019_s12 + $0x180] sm:$0xff]  ;;  %v8337_v52 = vld [vmem:[%s8019_s12 + $0x188] sm:$0xff]  ;;  %v8340_v53 = vld [vmem:[%s8019_s12 + $0x190] sm:$0xff] }
  0x25   : > { %7499 = vmatmul.mubr.msk.f32.gmra.mrb[8].mxu0 %vm328_vm1, %v8053_v12  ;;  %7573 = vmatmul.mubr.msk.f32.gmra.mrb[8].mxu1 %vm328_vm1, %v8074_v15 }
  0x26   : > { %7501 = vmatprep.mubr.msk.f32.mxu0 %vm328_vm1, %v8058_v13  ;;  %7575 = vmatprep.mubr.msk.f32.mxu1 %vm328_vm1, %v8077_v16 }
  0x29   : > { %7502 = vmatmul.mubr.msk.f32.gmra.mrb[10].mxu0 %vm328_vm1, %v8065_v14  ;;  %7576 = vmatmul.mubr.msk.f32.gmra.mrb[10].mxu1 %vm328_vm1, %v8088_v17 }
  0x2a   : > { %7504 = vmatprep.mubr.msk.f32.mxu0 %vm328_vm1, %v8074_v15  ;;  %7578 = vmatprep.mubr.msk.f32.mxu1 %vm328_vm1, %v8095_v18 }
  0x2d   : > { %7505 = vmatmul.mubr.msk.f32.gmra.mrb[12].mxu0 %vm328_vm1, %v8077_v16  ;;  %7579 = vmatmul.mubr.msk.f32.gmra.mrb[12].mxu1 %vm328_vm1, %v8100_v19 }
  0x2e   : > { %7507 = vmatprep.mubr.msk.f32.mxu0 %vm328_vm1, %v8088_v17  ;;  %7581 = vmatprep.mubr.msk.f32.mxu1 %vm328_vm1, %v8107_v20 }
  0x31   : > { %7508 = vmatmul.mubr.msk.f32.gmra.mrb[14].mxu0 %vm328_vm1, %v8095_v18  ;;  %7582 = vmatmul.mubr.msk.f32.gmra.mrb[14].mxu1 %vm328_vm1, %v8116_v21 }
  0x32   : > { %7510 = vmatprep.mubr.msk.f32.mxu0 %vm328_vm1, %v8100_v19  ;;  %7584 = vmatprep.mubr.msk.f32.mxu1 %vm328_vm1, %v8123_v22 }
  0x35   : > { %7511 = vmatmul.mubr.msk.f32.gmra.mrb[16].mxu0 %vm328_vm1, %v8107_v20  ;;  %7585 = vmatmul.mubr.msk.f32.gmra.mrb[16].mxu1 %vm328_vm1, %v8130_v23 }
  0x36   : > { %7513 = vmatprep.mubr.msk.f32.mxu0 %vm328_vm1, %v8116_v21  ;;  %7587 = vmatprep.mubr.msk.f32.mxu1 %vm328_vm1, %v8137_v24 }
  0x39   : > { %7514 = vmatmul.mubr.msk.f32.gmra.mrb[18].mxu0 %vm328_vm1, %v8123_v22  ;;  %7588 = vmatmul.mubr.msk.f32.gmra.mrb[18].mxu1 %vm328_vm1, %v8144_v25 }
  0x3a   : > { %7516 = vmatprep.mubr.msk.f32.mxu0 %vm328_vm1, %v8130_v23  ;;  %7590 = vmatprep.mubr.msk.f32.mxu1 %vm328_vm1, %v8149_v26 }
  0x3d   : > { %7517 = vmatmul.mubr.msk.f32.gmra.mrb[20].mxu0 %vm328_vm1, %v8137_v24  ;;  %7591 = vmatmul.mubr.msk.f32.gmra.mrb[20].mxu1 %vm328_vm1, %v8158_v27 }
  0x3e   : > { %7519 = vmatprep.mubr.msk.f32.mxu0 %vm328_vm1, %v8144_v25  ;;  %7593 = vmatprep.mubr.msk.f32.mxu1 %vm328_vm1, %v8163_v28 }
  0x41   : > { %7520 = vmatmul.mubr.msk.f32.gmra.mrb[22].mxu0 %vm328_vm1, %v8149_v26  ;;  %7594 = vmatmul.mubr.msk.f32.gmra.mrb[22].mxu1 %vm328_vm1, %v8172_v29 }
  0x42   : > { %7522 = vmatprep.mubr.msk.f32.mxu0 %vm328_vm1, %v8158_v27  ;;  %7596 = vmatprep.mubr.msk.f32.mxu1 %vm328_vm1, %v8177_v30 }
  0x45   : > { %7523 = vmatmul.mubr.msk.f32.gmra.mrb[24].mxu0 %vm328_vm1, %v8163_v28  ;;  %7597 = vmatmul.mubr.msk.f32.gmra.mrb[24].mxu1 %vm328_vm1, %v8186_v31 }
  0x46   : > { %7525 = vmatprep.mubr.msk.f32.mxu0 %vm328_vm1, %v8172_v29  ;;  %7599 = vmatprep.mubr.msk.f32.mxu1 %vm328_vm1, %v8191_v32 }
  0x49   : > { %7526 = vmatmul.mubr.msk.f32.gmra.mrb[26].mxu0 %vm328_vm1, %v8177_v30  ;;  %7600 = vmatmul.mubr.msk.f32.gmra.mrb[26].mxu1 %vm328_vm1, %v8200_v33 }
  0x4a   : > { %7528 = vmatprep.mubr.msk.f32.mxu0 %vm328_vm1, %v8186_v31  ;;  %7602 = vmatprep.mubr.msk.f32.mxu1 %vm328_vm1, %v8205_v34 }
  0x4d   : > { %7529 = vmatmul.mubr.msk.f32.gmra.mrb[28].mxu0 %vm328_vm1, %v8191_v32  ;;  %7603 = vmatmul.mubr.msk.f32.gmra.mrb[28].mxu1 %vm328_vm1, %v8214_v35 }
  0x4e   : > { %7531 = vmatprep.mubr.msk.f32.mxu0 %vm328_vm1, %v8200_v33  ;;  %7605 = vmatprep.mubr.msk.f32.mxu1 %vm328_vm1, %v8219_v36 }
  0x51   : > { %7532 = vmatmul.mubr.msk.f32.gmra.mrb[30].mxu0 %vm328_vm1, %v8205_v34  ;;  %7606 = vmatmul.mubr.msk.f32.gmra.mrb[30].mxu1 %vm328_vm1, %v8228_v37 }
  0x52   : > { %7534 = vmatprep.mubr.msk.f32.mxu0 %vm328_vm1, %v8214_v35  ;;  %7608 = vmatprep.mubr.msk.f32.mxu1 %vm328_vm1, %v8233_v38 }
  0x55   : > { %7535 = vmatmul.mubr.msk.f32.gmra.mrb[32].mxu0 %vm328_vm1, %v8219_v36  ;;  %7609 = vmatmul.mubr.msk.f32.gmra.mrb[32].mxu1 %vm328_vm1, %v8242_v39 }
  0x56   : > { %7537 = vmatprep.mubr.msk.f32.mxu0 %vm328_vm1, %v8228_v37  ;;  %7611 = vmatprep.mubr.msk.f32.mxu1 %vm328_vm1, %v8247_v40 }
  0x59   : > { %7538 = vmatmul.mubr.msk.f32.gmra.mrb[34].mxu0 %vm328_vm1, %v8233_v38  ;;  %7612 = vmatmul.mubr.msk.f32.gmra.mrb[34].mxu1 %vm328_vm1, %v8256_v41 }
  0x5a   : > { %7540 = vmatprep.mubr.msk.f32.mxu0 %vm328_vm1, %v8242_v39  ;;  %7614 = vmatprep.mubr.msk.f32.mxu1 %vm328_vm1, %v8261_v42 }
  0x5d   : > { %7541 = vmatmul.mubr.msk.f32.gmra.mrb[36].mxu0 %vm328_vm1, %v8247_v40  ;;  %7615 = vmatmul.mubr.msk.f32.gmra.mrb[36].mxu1 %vm328_vm1, %v8270_v43 }
  0x5e   : > { %7543 = vmatprep.mubr.msk.f32.mxu0 %vm328_vm1, %v8256_v41  ;;  %7617 = vmatprep.mubr.msk.f32.mxu1 %vm328_vm1, %v8275_v44 }
  0x61   : > { %7544 = vmatmul.mubr.msk.f32.gmra.mrb[38].mxu0 %vm328_vm1, %v8261_v42  ;;  %7618 = vmatmul.mubr.msk.f32.gmra.mrb[38].mxu1 %vm328_vm1, %v8284_v45 }
  0x62   : > { %7546 = vmatprep.mubr.msk.f32.mxu0 %vm328_vm1, %v8270_v43  ;;  %7620 = vmatprep.mubr.msk.f32.mxu1 %vm328_vm1, %v322_v46 }
  0x65   : > { %7547 = vmatmul.mubr.msk.f32.gmra.mrb[40].mxu0 %vm328_vm1, %v8275_v44  ;;  %7621 = vmatmul.mubr.msk.f32.gmra.mrb[40].mxu1 %vm328_vm1, %v323_v47 }
  0x66   : > { %7549 = vmatprep.mubr.msk.f32.mxu0 %vm328_vm1, %v8284_v45  ;;  %7623 = vmatprep.mubr.msk.f32.mxu1 %vm328_vm1, %v324_v48 }
  0x69   : > { %7550 = vmatmul.mubr.msk.f32.gmra.mrb[42].mxu0 %vm328_vm1, %v322_v46  ;;  %7624 = vmatmul.mubr.msk.f32.gmra.mrb[42].mxu1 %vm328_vm1, %v325_v49 }
  0x6a   : > { %7552 = vmatprep.mubr.msk.f32.mxu0 %vm328_vm1, %v323_v47  ;;  %7626 = vmatprep.mubr.msk.f32.mxu1 %vm328_vm1, %v8305_v50 }
  0x6d   : > { %7553 = vmatmul.mubr.msk.f32.gmra.mrb[44].mxu0 %vm328_vm1, %v324_v48  ;;  %7627 = vmatmul.mubr.msk.f32.gmra.mrb[44].mxu1 %vm328_vm1, %v8320_v51 }
  0x6e   : > { %7555 = vmatprep.mubr.msk.f32.mxu0 %vm328_vm1, %v325_v49  ;;  %7629 = vmatprep.mubr.msk.f32.mxu1 %vm328_vm1, %v8337_v52 }
  0x71   : > { %7556 = vmatmul.mubr.msk.f32.gmra.mrb[46].mxu0 %vm328_vm1, %v8305_v50  ;;  %7630 = vmatmul.mubr.msk.f32.gmra.mrb[46].mxu1 %vm328_vm1, %v8340_v53 }
  0x72   : > { %7634 = vmatprep.mubr.msk.f32.mxu0 %vm328_vm1, %v8034_v9 }
  0x75   : > { %7635 = vmatmul.mubr.msk.f32.vlgmr.msra.gmra.mrb[48].mxu0 %vm328_vm1, %v8037_v10 }
  0x76   : > { %7637 = vmatprep.mubr.msk.f32.mxu0 %vm328_vm1, %v8047_v11 }
  0x79   : > { %7638 = vmatmul.mubr.msk.f32.gmra.mrb[50].mxu0 %vm328_vm1, %v8053_v12 }
  0x7a   : > { %7640 = vmatprep.mubr.msk.f32.mxu0 %vm328_vm1, %v8058_v13 }
  0x7d   : > { %7641 = vmatmul.mubr.msk.f32.gmra.mrb[52].mxu0 %vm328_vm1, %v8065_v14  ;;  %v6944_v14 = vld [vmem:[%s8019_s12 + $0x170] sm:$0xff] }
  0x7e   : > { %7643 = vmatprep.mubr.msk.f32.mxu0 %vm328_vm1, %v8074_v15 }
  0x81   : > { %7644 = vmatmul.mubr.msk.f32.gmra.mrb[54].mxu0 %vm328_vm1, %v8077_v16 }
  0x82   : > { %7646 = vmatprep.mubr.msk.f32.mxu0 %vm328_vm1, %v8088_v17 }
  0x85   : > { %7647 = vmatmul.mubr.msk.f32.gmra.mrb[56].mxu0 %vm328_vm1, %v8095_v18 }
  0x86   : > { %7649 = vmatprep.mubr.msk.f32.mxu0 %vm328_vm1, %v8100_v19 }
  0x89   : > { %7650 = vmatmul.mubr.msk.f32.gmra.mrb[58].mxu0 %vm328_vm1, %v8107_v20 }
  0x8a   : > { %7652 = vmatprep.mubr.msk.f32.mxu0 %vm328_vm1, %v8116_v21 }
  0x8d   : > { %7653 = vmatmul.mubr.msk.f32.gmra.mrb[60].mxu0 %vm328_vm1, %v8123_v22 }
  0x8e   : > { %7655 = vmatprep.mubr.msk.f32.mxu0 %vm328_vm1, %v8130_v23 }
  0x91   : > { %7656 = vmatmul.mubr.msk.f32.gmra.mrb[62].mxu0 %vm328_vm1, %v8137_v24 }
  0x92   : > { %7658 = vmatprep.mubr.msk.f32.mxu0 %vm328_vm1, %v8144_v25 }
  0x95   : > { %7659 = vmatmul.mubr.msk.f32.gmra.mrb[64].mxu0 %vm328_vm1, %v8149_v26 }
  0x96   : > { %7661 = vmatprep.mubr.msk.f32.mxu0 %vm328_vm1, %v8158_v27 }
  0x99   : > { %7662 = vmatmul.mubr.msk.f32.gmra.mrb[66].mxu0 %vm328_vm1, %v8163_v28 }
  0x9a   : > { %7664 = vmatprep.mubr.msk.f32.mxu0 %vm328_vm1, %v8172_v29 }
  0x9d   : > { %7665 = vmatmul.mubr.msk.f32.gmra.mrb[68].mxu0 %vm328_vm1, %v8177_v30 }
  0x9e   : > { %7667 = vmatprep.mubr.msk.f32.mxu0 %vm328_vm1, %v8186_v31 }
  0xa1   : > { %7668 = vmatmul.mubr.msk.f32.gmra.mrb[70].mxu0 %vm328_vm1, %v8191_v32 }
  0xa2   : > { %7670 = vmatprep.mubr.msk.f32.mxu0 %vm328_vm1, %v8200_v33 }
  0xa5   : > { %7671 = vmatmul.mubr.msk.f32.gmra.mrb[72].mxu0 %vm328_vm1, %v8205_v34 }
  0xa6   : > { %7673 = vmatprep.mubr.msk.f32.mxu0 %vm328_vm1, %v8214_v35 }
  0xa9   : > { %7674 = vmatmul.mubr.msk.f32.gmra.mrb[74].mxu0 %vm328_vm1, %v8219_v36 }
  0xaa   : > { %7676 = vmatprep.mubr.msk.f32.mxu0 %vm328_vm1, %v8228_v37 }
  0xad   : > { %7677 = vmatmul.mubr.msk.f32.gmra.mrb[76].mxu0 %vm328_vm1, %v8233_v38 }
  0xae   : > { %7679 = vmatprep.mubr.msk.f32.mxu0 %vm328_vm1, %v8242_v39 }
  0xb1   : > { %7680 = vmatmul.mubr.msk.f32.gmra.mrb[78].mxu0 %vm328_vm1, %v8247_v40 }
  0xb2   : > { %7682 = vmatprep.mubr.msk.f32.mxu0 %vm328_vm1, %v8256_v41 }
  0xb5   : > { %7683 = vmatmul.mubr.msk.f32.gmra.mrb[80].mxu0 %vm328_vm1, %v8261_v42 }
  0xb6   : > { %7685 = vmatprep.mubr.msk.f32.mxu0 %vm328_vm1, %v8270_v43 }
  0xb9   : > { %7686 = vmatmul.mubr.msk.f32.gmra.mrb[82].mxu0 %vm328_vm1, %v8275_v44 }
  0xba   : > { %7688 = vmatprep.mubr.msk.f32.mxu0 %vm328_vm1, %v8284_v45 }
  0xbd   : > { %7689 = vmatmul.mubr.msk.f32.gmra.mrb[84].mxu0 %vm328_vm1, %v322_v46 }
  0xbe   : > { %7691 = vmatprep.mubr.msk.f32.mxu0 %vm328_vm1, %v323_v47 }
  0xc1   : > { %7692 = vmatmul.mubr.msk.f32.gmra.mrb[86].mxu0 %vm328_vm1, %v324_v48 }
  0xc2   : > { %7694 = vmatprep.mubr.msk.f32.mxu0 %vm328_vm1, %v6944_v14 }
  0xc5   : > { %7695 = vmatmul.mubr.msk.f32.gmra.mrb[88].mxu0 %vm328_vm1, %v8305_v50 }
  0xc6   : > { %7697 = vmatprep.mubr.msk.f32.mxu0 %vm328_vm1, %v8320_v51 }
  0xc9   : > { %7698 = vmatmul.mubr.msk.f32.gmra.mrb[90].mxu0 %vm328_vm1, %v8337_v52 }
  0xca   : > { %7700 = vmatprep.mubr.msk.f32.mxu0 %vm328_vm1, %v8340_v53 }
  0xe8   : > { %v8407_v54 = vpop.f32.mrb[0].mxu0  ;;  %v8409_v55 = vpop.f32.mrb[0].mxu1 }
  0xe9   : > { %12356 = vst [vmem:[#allocation3_spill] sm:$0xff] %v8407_v54  ;;  %12357 = vst [vmem:[#allocation4_spill] sm:$0xff] %v8409_v55  ;;  %v864_v56 = vrot.slane %v8407_v54, 1  ;;  %v1073_v57 = vrot.slane %v8407_v54, 2  ;;  %v8413_v58 = vpop.f32.mrb[1].mxu0  ;;  %v1864_v59 = vrot.slane %v8409_v55, 1 }
  0xea   : > { %v2072_v60 = vrot.slane %v8409_v55, 2  ;;  %v8417_v61 = vpop.f32.mrb[1].mxu1  ;;  %v863_v62 = vrot.slane %v8413_v58, 1  ;;  %v1072_v63 = vrot.slane %v8413_v58, 2 }
  0xeb   : > { %v1863_v0 = vrot.slane %v8417_v61, 1  ;;  %v2071_v1 = vrot.slane %v8417_v61, 2 }
  0xec   : > { %v8423_v2 = vpop.f32.mrb[2].mxu0  ;;  %v8425_v3 = vpop.f32.mrb[2].mxu1  ;;  %v865_v4 = vsel %vm862_vm2, %v863_v62, %v864_v56  ;;  %v1074_v5 = vsel %vm1071_vm3, %v1072_v63, %v1073_v57 }
  0xed   : > { %12358 = vst [vmem:[#allocation5_spill] sm:$0xff] %v8423_v2  ;;  %12359 = vst [vmem:[#allocation6_spill] sm:$0xff] %v8425_v3  ;;  %v1865_v6 = vsel %vm862_vm2, %v1863_v0, %v1864_v59  ;;  %v8431_v7 = vsel %vm1071_vm3, %v2071_v1, %v2072_v60  ;;  %v1554_v8 = vpop.f32.mrb[3].mxu1  ;;  %943 = vrot.lane.b32.xlu0 %v865_v4, %s7948_s13  ;;  %v553_v9 = vpop.f32.mrb[3].mxu0  ;;  %v868_v15 = vrot.slane %v8423_v2, 1  ;;  %v1077_v16 = vrot.slane %v8423_v2, 2 }
  0xee   : > { %v1866_v10 = vrot.slane %v1554_v8, 1  ;;  %v2074_v11 = vrot.slane %v1554_v8, 2  ;;  %v866_v12 = vrot.slane %v553_v9, 1  ;;  %v1075_v13 = vrot.slane %v553_v9, 2 }
  0xef   : > { %v1868_v17 = vrot.slane %v8425_v3, 1  ;;  %v2076_v24 = vrot.slane %v8425_v3, 2 }
  0xf0   : > { %v7494_v18 = vpop.f32.mrb[4].mxu0  ;;  %v7568_v19 = vpop.f32.mrb[4].mxu1  ;;  %v1076_v20 = vsel %vm1071_vm3, %v1073_v57, %v1075_v13  ;;  %v1867_v21 = vsel %vm862_vm2, %v1864_v59, %v1866_v10  ;;  %v2075_v22 = vsel %vm1071_vm3, %v2072_v60, %v2074_v11  ;;  %v8443_v23 = vsel %vm862_vm2, %v864_v56, %v866_v12 }
  0xf1   : > { %v871_v25 = vrot.slane %v7494_v18, 1  ;;  %v1080_v26 = vrot.slane %v7494_v18, 2  ;;  %v1871_v27 = vrot.slane %v7568_v19, 1  ;;  %v8448_v28 = vpop.f32.mrb[5].mxu1  ;;  %1152 = vrot.lane.b32.xlu0 %v1074_v5, %s7949_s14  ;;  %1154 = vrot.lane.b32.xlu1 %v1076_v20, %s7949_s14  ;;  %v8452_v29 = vpop.f32.mrb[5].mxu0  ;;  %v2079_v34 = vrot.slane %v7568_v19, 2 }
  0xf2   : > { %12360 = vst [vmem:[#allocation7_spill] sm:$0xff] %v8448_v28  ;;  %12361 = vst [vmem:[#allocation8_spill] sm:$0xff] %v8452_v29  ;;  %v1869_v30 = vrot.slane %v8448_v28, 1  ;;  %v2077_v31 = vrot.slane %v8448_v28, 2  ;;  %v869_v32 = vrot.slane %v8452_v29, 1  ;;  %v1078_v33 = vrot.slane %v8452_v29, 2 }
  0xf4   : > { %v870_v35 = vsel %vm862_vm2, %v868_v15, %v869_v32  ;;  %v8462_v36 = vsel %vm1071_vm3, %v1077_v16, %v1078_v33  ;;  %v8465_v37 = vsel %vm862_vm2, %v869_v32, %v871_v25  ;;  %v8468_v38 = vsel %vm862_vm2, %v1868_v17, %v1869_v30  ;;  %v8470_v39 = vpop.f32.mrb[6].mxu0  ;;  %v8472_v40 = vpop.f32.mrb[6].mxu1 }
  0xf5   : > { %12362 = vst [vmem:[#allocation9_spill] sm:$0xff] %v8470_v39  ;;  %12363 = vst [vmem:[#allocation10_spill] sm:$0xff] %v8472_v40  ;;  %1943 = vrot.lane.b32.xlu0 %v1865_v6, %s7948_s13  ;;  %1945 = vrot.lane.b32.xlu1 %v1867_v21, %s7948_s13  ;;  %v8479_v41 = vsel %vm1071_vm3, %v1078_v33, %v1080_v26  ;;  %v874_v42 = vrot.slane %v8470_v39, 1  ;;  %v1083_v43 = vrot.slane %v8470_v39, 2  ;;  %v8483_v44 = vpop.f32.mrb[7].mxu0  ;;  %v8488_v46 = vpop.f32.mrb[7].mxu1 }
  0xf6   : > { %12364 = vst [vmem:[#allocation11_spill] sm:$0xff] %v8483_v44  ;;  %v8486_v45 = vsel %vm1071_vm3, %v2076_v24, %v2077_v31  ;;  %12365 = vst [vmem:[#allocation12_spill] sm:$0xff] %v8488_v46  ;;  %v873_v47 = vrot.slane %v8483_v44, 1  ;;  %v1082_v48 = vrot.slane %v8483_v44, 2  ;;  %v8493_v49 = vsel %vm862_vm2, %v1869_v30, %v1871_v27 }
  0xf7   : > { %v1874_v50 = vrot.slane %v8472_v40, 1  ;;  %v2082_v51 = vrot.slane %v8472_v40, 2  ;;  %v8500_v52 = vsel %vm1071_vm3, %v2077_v31, %v2079_v34  ;;  %v1873_v56 = vrot.slane %v8488_v46, 1 }
  0xf8   : > { %v2081_v57 = vrot.slane %v8488_v46, 2  ;;  %v8504_v59 = vpop.f32.mrb[8].mxu0  ;;  %v8507_v60 = vsel %vm862_vm2, %v873_v47, %v874_v42  ;;  %v8509_v62 = vpop.f32.mrb[8].mxu1  ;;  %v8512_v63 = vsel %vm1071_vm3, %v1082_v48, %v1083_v43 }
  0xf9   : > { %12366 = vst [vmem:[#allocation13_spill] sm:$0xff] %v8504_v59  ;;  %12367 = vst [vmem:[#allocation14_spill] sm:$0xff] %v8509_v62  ;;  %2151 = vrot.lane.b32.xlu0 %v8431_v7, %s7949_s14  ;;  %2153 = vrot.lane.b32.xlu1 %v2075_v22, %s7949_s14  ;;  %v878_v53 = vrot.slane %v8504_v59, 1  ;;  %v583_v0 = vpop.f32.mrb[9].mxu0  ;;  %v1584_v1 = vpop.f32.mrb[9].mxu1  ;;  %v1087_v9 = vrot.slane %v8504_v59, 2  ;;  %v8521_v11 = vsel %vm862_vm2, %v1873_v56, %v1874_v50 }
  0xfa   : > { %v876_v4 = vrot.slane %v583_v0, 1  ;;  %v1085_v5 = vrot.slane %v583_v0, 2  ;;  %v1876_v6 = vrot.slane %v1584_v1, 1  ;;  %v2084_v8 = vrot.slane %v1584_v1, 2 }
  0xfb   : > { %v1878_v10 = vrot.slane %v8509_v62, 1  ;;  %v8524_v12 = vsel %vm1071_vm3, %v2081_v57, %v2082_v51  ;;  %v2086_v21 = vrot.slane %v8509_v62, 2 }
  0xfc   : > { %v7503_v7 = vpop.f32.mrb[10].mxu0  ;;  %v8527_v13 = vsel %vm862_vm2, %v874_v42, %v876_v4  ;;  %v7577_v14 = vpop.f32.mrb[10].mxu1  ;;  %v8530_v15 = vsel %vm1071_vm3, %v1083_v43, %v1085_v5  ;;  %v8533_v16 = vsel %vm862_vm2, %v1874_v50, %v1876_v6  ;;  %v8536_v17 = vsel %vm1071_vm3, %v2082_v51, %v2084_v8 }
  0xfd   : > { %945 = vrot.lane.b32.xlu0 %v8443_v23, %s7948_s13  ;;  %947 = vrot.lane.b32.xlu1 %v870_v35, %s7948_s13  ;;  %v881_v18 = vrot.slane %v7503_v7, 1  ;;  %v1090_v19 = vrot.slane %v7503_v7, 2  ;;  %v8541_v20 = vpop.f32.mrb[11].mxu0  ;;  %v1881_v22 = vrot.slane %v7577_v14, 1  ;;  %v8544_v24 = vpop.f32.mrb[11].mxu1  ;;  %v2089_v23 = vrot.slane %v7577_v14, 2 }
  0xfe   : > { %12368 = vst [vmem:[#allocation15_spill] sm:$0xff] %v8541_v20  ;;  %12369 = vst [vmem:[#allocation16_spill] sm:$0xff] %v8544_v24  ;;  %v879_v25 = vrot.slane %v8541_v20, 1  ;;  %v1088_v26 = vrot.slane %v8541_v20, 2  ;;  %v1879_v27 = vrot.slane %v8544_v24, 1  ;;  %v2087_v30 = vrot.slane %v8544_v24, 2 }
  0xff   : > { %v6951_v24 = vld [vmem:[%s8019_s12 + $0x1a8] sm:$0xff] }
 0x100   : > { %v8551_v31 = vsel %vm862_vm2, %v878_v53, %v879_v25  ;;  %v8554_v32 = vsel %vm862_vm2, %v879_v25, %v881_v18  ;;  %v8557_v33 = vsel %vm1071_vm3, %v1087_v9, %v1088_v26  ;;  %v8560_v34 = vsel %vm1071_vm3, %v1088_v26, %v1090_v19  ;;  %v8562_v35 = vpop.f32.mrb[12].mxu0  ;;  %v8564_v42 = vpop.f32.mrb[12].mxu1  ;;  %v6949_v25 = vld [vmem:[%s8019_s12 + $0x198] sm:$0xff] }
 0x101   : > { %12370 = vst [vmem:[#allocation17_spill] sm:$0xff] %v8562_v35  ;;  %12371 = vst [vmem:[#allocation18_spill] sm:$0xff] %v8564_v42  ;;  %1156 = vrot.lane.b32.xlu0 %v8462_v36, %s7949_s14  ;;  %949 = vrot.lane.b32.xlu1 %v8465_v37, %s7948_s13  ;;  %v8571_v43 = vsel %vm862_vm2, %v1878_v10, %v1879_v27  ;;  %v884_v47 = vrot.slane %v8562_v35, 1  ;;  %v1093_v48 = vrot.slane %v8562_v35, 2  ;;  %v8575_v50 = vpop.f32.mrb[13].mxu0  ;;  %v8580_v56 = vpop.f32.mrb[13].mxu1 }
 0x102   : > { %12372 = vst [vmem:[#allocation19_spill] sm:$0xff] %v8575_v50  ;;  %v8578_v51 = vsel %vm862_vm2, %v1879_v27, %v1881_v22  ;;  %12373 = vst [vmem:[#allocation20_spill] sm:$0xff] %v8580_v56  ;;  %v883_v57 = vrot.slane %v8575_v50, 1  ;;  %v1092_v36 = vrot.slane %v8575_v50, 2  ;;  %v8585_v37 = vsel %vm1071_vm3, %v2086_v21, %v2087_v30  ;;  %7701 = vmatmul.mubr.msk.f32.gmra.mrb[92].mxu0 %vm328_vm1, %v6949_v25 }
 0x103   : > { %v1884_v53 = vrot.slane %v8564_v42, 1  ;;  %v2092_v0 = vrot.slane %v8564_v42, 2  ;;  %v8590_v1 = vsel %vm1071_vm3, %v2087_v30, %v2089_v23  ;;  %v1883_v4 = vrot.slane %v8580_v56, 1 }
 0x104   : > { %v2091_v5 = vrot.slane %v8580_v56, 2  ;;  %v8594_v6 = vpop.f32.mrb[14].mxu0  ;;  %v8597_v8 = vsel %vm862_vm2, %v883_v57, %v884_v47  ;;  %v8599_v9 = vpop.f32.mrb[14].mxu1  ;;  %v8602_v10 = vsel %vm1071_vm3, %v1092_v36, %v1093_v48  ;;  %v12231_v19 = vmov 0.0  }
 0x105   : > { %12374 = vst [vmem:[#allocation21_spill] sm:$0xff] %v8594_v6  ;;  %12375 = vst [vmem:[#allocation22_spill] sm:$0xff] %v8599_v9  ;;  %1947 = vrot.lane.b32.xlu0 %v8468_v38, %s7948_s13  ;;  %1158 = vrot.lane.b32.xlu1 %v8479_v41, %s7949_s14  ;;  %v888_v7 = vrot.slane %v8594_v6, 1  ;;  %v613_v14 = vpop.f32.mrb[15].mxu0  ;;  %v1614_v18 = vpop.f32.mrb[15].mxu1  ;;  %v1097_v26 = vrot.slane %v8594_v6, 2  ;;  %v8625_v30 = vsel %vm862_vm2, %v1883_v4, %v1884_v53 }
 0x106   : > { %3356 = vst.msk [vmem:[#allocation2] sm:$0xff] %vm328_vm1, %v12231_v19  ;;  %3357 = vst.msk [vmem:[#allocation2 + $0x8] sm:$0xff] %vm328_vm1, %v12231_v19  ;;  %v886_v38 = vrot.slane %v613_v14, 1  ;;  %v1095_v41 = vrot.slane %v613_v14, 2  ;;  %v1886_v21 = vrot.slane %v1614_v18, 1  ;;  %v2094_v22 = vrot.slane %v1614_v18, 2 }
 0x107   : > { %3358 = vst.msk [vmem:[#allocation2 + $0x10] sm:$0xff] %vm328_vm1, %v12231_v19  ;;  %3360 = vst.msk [vmem:[#allocation2 + $0x198] sm:$0xff] %vm328_vm1, %v12231_v19  ;;  %v1888_v27 = vrot.slane %v8599_v9, 1  ;;  %v8628_v23 = vsel %vm1071_vm3, %v2091_v5, %v2092_v0 }
 0x108   : > { %3361 = vst.msk [vmem:[#allocation2 + $0x1a0] sm:$0xff] %vm328_vm1, %v12231_v19  ;;  %3362 = vst.msk [vmem:[#allocation2 + $0x1a8] sm:$0xff] %vm328_vm1, %v12231_v19  ;;  %v7512_v57 = vpop.f32.mrb[16].mxu0  ;;  %v8632_v36 = vsel %vm862_vm2, %v884_v47, %v886_v38  ;;  %v7586_v14 = vpop.f32.mrb[16].mxu1  ;;  %v8635_v18 = vsel %vm1071_vm3, %v1093_v48, %v1095_v41  ;;  %v8638_v19 = vsel %vm862_vm2, %v1884_v53, %v1886_v21  ;;  %v2096_v38 = vrot.slane %v8599_v9, 2 }
 0x109   : > { %v8641_v6 = vsel %vm1071_vm3, %v2092_v0, %v2094_v22  ;;  %2155 = vrot.lane.b32.xlu0 %v8486_v45, %s7949_s14  ;;  %1949 = vrot.lane.b32.xlu1 %v8493_v49, %s7948_s13  ;;  %v891_v4 = vrot.slane %v7512_v57, 1  ;;  %v1100_v5 = vrot.slane %v7512_v57, 2  ;;  %v8647_v47 = vpop.f32.mrb[17].mxu0  ;;  %v1891_v48 = vrot.slane %v7586_v14, 1  ;;  %v8650_v41 = vpop.f32.mrb[17].mxu1 }
 0x10a   : > { %12376 = vst [vmem:[#allocation23_spill] sm:$0xff] %v8647_v47  ;;  %12377 = vst [vmem:[#allocation24_spill] sm:$0xff] %v8650_v41  ;;  %v889_v53 = vrot.slane %v8647_v47, 1  ;;  %v1098_v0 = vrot.slane %v8647_v47, 2  ;;  %v1889_v21 = vrot.slane %v8650_v41, 1  ;;  %v2097_v45 = vrot.slane %v8650_v41, 2 }
 0x10b   : > { %v3478_v49 = vld [vmem:[%s12225_s2] sm:$0xf]  ;;  %v2099_v22 = vrot.slane %v7586_v14, 2 }
 0x10c   : > { %7706 = vmatprep.subr.msk.mxu1 %vm473_vm0, %v3478_v49  ;;  %v8661_v25 = vsel %vm862_vm2, %v888_v7, %v889_v53  ;;  %v8664_v57 = vsel %vm862_vm2, %v889_v53, %v891_v4  ;;  %v8667_v9 = vsel %vm1071_vm3, %v1097_v26, %v1098_v0  ;;  %v8670_v47 = vsel %vm1071_vm3, %v1098_v0, %v1100_v5  ;;  %v8672_v41 = vpop.f32.mrb[18].mxu0  ;;  %v8674_v42 = vpop.f32.mrb[18].mxu1 }
 0x10d   : > { %12378 = vst [vmem:[#allocation25_spill] sm:$0xff] %v8672_v41  ;;  %12379 = vst [vmem:[#allocation26_spill] sm:$0xff] %v8674_v42  ;;  %7707 = vmatpush3.msk.msra.mxu1 %vm473_vm0, %v3478_v49  ;;  %v3430_v14 = vld [vmem:[#allocation2] sm:$0xff]  ;;  %v3431_v56 = vld [vmem:[#allocation2 + $0x8] sm:$0xff]  ;;  %2157 = vrot.lane.b32.xlu1 %v8500_v52, %s7949_s14  ;;  %v8682_v7 = vsel %vm862_vm2, %v1888_v27, %v1889_v21  ;;  %v894_v26 = vrot.slane %v8672_v41, 1  ;;  %v1103_v4 = vrot.slane %v8672_v41, 2 }
 0x10e   : > { %951 = vrot.lane.b32.xlu0 %v8507_v60, %s7948_s13  ;;  %v8686_v5 = vpop.f32.mrb[19].mxu0  ;;  %v8689_v53 = vsel %vm862_vm2, %v1889_v21, %v1891_v48  ;;  %v8691_v0 = vpop.f32.mrb[19].mxu1  ;;  %v8696_v27 = vsel %vm1071_vm3, %v2096_v38, %v2097_v45  ;;  %v1894_v49 = vrot.slane %v8674_v42, 1  ;;  %7708 = vmatprep.mubr.msk.f32.mxu1 %vm328_vm1, %v3430_v14  ;;  %v2102_v41 = vrot.slane %v8674_v42, 2  ;;  %v6950_v42 = vld [vmem:[%s8019_s12 + $0x1a0] sm:$0xff] }
 0x10f   : > { %12380 = vst [vmem:[#allocation27_spill] sm:$0xff] %v8686_v5  ;;  %12381 = vst [vmem:[#allocation28_spill] sm:$0xff] %v8691_v0  ;;  %v893_v52 = vrot.slane %v8686_v5, 1  ;;  %v1102_v60 = vrot.slane %v8686_v5, 2  ;;  %v8702_v48 = vsel %vm1071_vm3, %v2097_v45, %v2099_v22  ;;  %v1893_v21 = vrot.slane %v8691_v0, 1  ;;  %7709 = vmatmul.mubr.msk.f32.vlgmr.msra.gmra.mrb[48].mxu1 %vm328_vm1, %v3431_v56  ;;  %7703 = vmatprep.mubr.msk.f32.mxu0 %vm328_vm1, %v6950_v42 }
 0x110   : > { %v2101_v35 = vrot.slane %v8691_v0, 2  ;;  %v8707_v50 = vpop.f32.mrb[20].mxu0  ;;  %v8712_v5 = vpop.f32.mrb[20].mxu1  ;;  %7704 = vmatmul.mubr.msk.f32.gmra.mrb[94].mxu0 %vm328_vm1, %v6951_v24 }
 0x111   : > { %12382 = vst [vmem:[#allocation29_spill] sm:$0xff] %v8707_v50  ;;  %v8710_v38 = vsel %vm862_vm2, %v893_v52, %v894_v26  ;;  %12383 = vst [vmem:[#allocation30_spill] sm:$0xff] %v8712_v5  ;;  %v8715_v14 = vsel %vm1071_vm3, %v1102_v60, %v1103_v4  ;;  %953 = vrot.lane.b32.xlu1 %v8527_v13, %s7948_s13  ;;  %v643_v45 = vpop.f32.mrb[21].mxu0  ;;  %v1644_v56 = vpop.f32.mrb[21].mxu1  ;;  %v898_v20 = vrot.slane %v8707_v50, 1  ;;  %v1107_v60 = vrot.slane %v8707_v50, 2 }
 0x112   : > { %1160 = vrot.lane.b32.xlu0 %v8512_v63, %s7949_s14  ;;  %v896_v22 = vrot.slane %v643_v45, 1  ;;  %v1105_v0 = vrot.slane %v643_v45, 2  ;;  %v1896_v62 = vrot.slane %v1644_v56, 1  ;;  %v2104_v52 = vrot.slane %v1644_v56, 2 }
 0x113   : > { %v8727_v59 = vsel %vm862_vm2, %v1893_v21, %v1894_v49  ;;  %v8730_v63 = vsel %vm1071_vm3, %v2101_v35, %v2102_v41  ;;  %v1898_v21 = vrot.slane %v8712_v5, 1 }
 0x114   : > { %v7521_v13 = vpop.f32.mrb[22].mxu0  ;;  %v8734_v40 = vsel %vm862_vm2, %v894_v26, %v896_v22  ;;  %v7595_v45 = vpop.f32.mrb[22].mxu1  ;;  %v8737_v56 = vsel %vm1071_vm3, %v1103_v4, %v1105_v0  ;;  %v8740_v42 = vsel %vm862_vm2, %v1894_v49, %v1896_v62  ;;  %v8743_v50 = vsel %vm1071_vm3, %v2102_v41, %v2104_v52 }
 0x115   : > { %1162 = vrot.lane.b32.xlu1 %v8530_v15, %s7949_s14  ;;  %v901_v24 = vrot.slane %v7521_v13, 1  ;;  %v1110_v35 = vrot.slane %v7521_v13, 2  ;;  %v8749_v26 = vpop.f32.mrb[23].mxu0  ;;  %v8752_v4 = vpop.f32.mrb[23].mxu1  ;;  %v1901_v41 = vrot.slane %v7595_v45, 1  ;;  %v2109_v22 = vrot.slane %v7595_v45, 2 }
 0x116   : > { %1951 = vrot.lane.b32.xlu0 %v8521_v11, %s7948_s13  ;;  %12384 = vst [vmem:[#allocation31_spill] sm:$0xff] %v8749_v26  ;;  %12385 = vst [vmem:[#allocation32_spill] sm:$0xff] %v8752_v4  ;;  %v899_v62 = vrot.slane %v8749_v26, 1  ;;  %v1108_v0 = vrot.slane %v8749_v26, 2  ;;  %v1899_v49 = vrot.slane %v8752_v4, 1  ;;  %v2106_v11 = vrot.slane %v8712_v5, 2 }
 0x117   : > { %v2107_v15 = vrot.slane %v8752_v4, 2 }
 0x118   : > { %v8759_v52 = vpop.f32.mrb[24].mxu0  ;;  %v8762_v13 = vsel %vm862_vm2, %v898_v20, %v899_v62  ;;  %v8765_v46 = vsel %vm862_vm2, %v899_v62, %v901_v24  ;;  %v8768_v39 = vsel %vm1071_vm3, %v1107_v60, %v1108_v0  ;;  %v8771_v26 = vsel %vm1071_vm3, %v1108_v0, %v1110_v35  ;;  %v8773_v44 = vpop.f32.mrb[24].mxu1 }
 0x119   : > { %12386 = vst [vmem:[#allocation33_spill] sm:$0xff] %v8759_v52  ;;  %12387 = vst [vmem:[#allocation34_spill] sm:$0xff] %v8773_v44  ;;  %1953 = vrot.lane.b32.xlu1 %v8533_v16, %s7948_s13  ;;  %v904_v20 = vrot.slane %v8759_v52, 1  ;;  %v1113_v45 = vrot.slane %v8759_v52, 2  ;;  %v8781_v24 = vpop.f32.mrb[25].mxu0  ;;  %v8784_v60 = vsel %vm862_vm2, %v1898_v21, %v1899_v49  ;;  %v1904_v35 = vrot.slane %v8773_v44, 1 }
 0x11a   : > { %2159 = vrot.lane.b32.xlu0 %v8524_v12, %s7949_s14  ;;  %12388 = vst [vmem:[#allocation35_spill] sm:$0xff] %v8781_v24  ;;  %v8787_v62 = vpop.f32.mrb[25].mxu1  ;;  %v903_v0 = vrot.slane %v8781_v24, 1  ;;  %v1112_v12 = vrot.slane %v8781_v24, 2  ;;  %v2112_v4 = vrot.slane %v8773_v44, 2  ;;  %v8793_v16 = vsel %vm862_vm2, %v1899_v49, %v1901_v41 }
 0x11b   : > { %12389 = vst [vmem:[#allocation36_spill] sm:$0xff] %v8787_v62  ;;  %v8796_v52 = vsel %vm1071_vm3, %v2106_v11, %v2107_v15  ;;  %v1903_v5 = vrot.slane %v8787_v62, 1  ;;  %v2111_v21 = vrot.slane %v8787_v62, 2  ;;  %v8801_v28 = vsel %vm1071_vm3, %v2107_v15, %v2109_v22 }
 0x11c   : > { %v8803_v3 = vpop.f32.mrb[26].mxu0  ;;  %v8805_v29 = vpop.f32.mrb[26].mxu1  ;;  %v8808_v24 = vsel %vm862_vm2, %v903_v0, %v904_v20  ;;  %v8811_v41 = vsel %vm1071_vm3, %v1112_v12, %v1113_v45 }
 0x11d   : > { %12390 = vst [vmem:[#allocation37_spill] sm:$0xff] %v8803_v3  ;;  %12391 = vst [vmem:[#allocation38_spill] sm:$0xff] %v8805_v29  ;;  %2161 = vrot.lane.b32.xlu1 %v8536_v17, %s7949_s14  ;;  %v908_v49 = vrot.slane %v8803_v3, 1  ;;  %v673_v11 = vpop.f32.mrb[27].mxu0  ;;  %v1674_v22 = vpop.f32.mrb[27].mxu1  ;;  %v1117_v0 = vrot.slane %v8803_v3, 2  ;;  %v8821_v12 = vsel %vm1071_vm3, %v2111_v21, %v2112_v4  ;;  %v8824_v17 = vsel %vm862_vm2, %v1903_v5, %v1904_v35 }
 0x11e   : > { %12392 = vst [vmem:[#allocation39_spill] sm:$0xff] %v8808_v24  ;;  %12393 = vst [vmem:[#allocation40_spill] sm:$0xff] %v8811_v41  ;;  %955 = vrot.lane.b32.xlu0 %v8551_v31, %s7948_s13  ;;  %v906_v15 = vrot.slane %v673_v11, 1  ;;  %v1115_v44 = vrot.slane %v673_v11, 2  ;;  %v1906_v62 = vrot.slane %v1674_v22, 1  ;;  %v2114_v55 = vrot.slane %v1674_v22, 2 }
 0x11f   : > { %v1908_v2 = vrot.slane %v8805_v29, 1 }
 0x120   : > { %v7530_v41 = vpop.f32.mrb[28].mxu0  ;;  %v8827_v31 = vsel %vm862_vm2, %v904_v20, %v906_v15  ;;  %v7604_v54 = vpop.f32.mrb[28].mxu1  ;;  %v8830_v24 = vsel %vm1071_vm3, %v1113_v45, %v1115_v44  ;;  %v8833_v11 = vsel %vm862_vm2, %v1904_v35, %v1906_v62  ;;  %v8836_v22 = vsel %vm1071_vm3, %v2112_v4, %v2114_v55 }
 0x121   : > { %12394 = vst [vmem:[#allocation41_spill] sm:$0xff] %v8833_v11  ;;  %12395 = vst [vmem:[#allocation42_spill] sm:$0xff] %v8836_v22  ;;  %957 = vrot.lane.b32.xlu1 %v8554_v32, %s7948_s13  ;;  %v911_v5 = vrot.slane %v7530_v41, 1  ;;  %v1120_v21 = vrot.slane %v7530_v41, 2  ;;  %v8842_v20 = vpop.f32.mrb[29].mxu0  ;;  %v2116_v15 = vrot.slane %v8805_v29, 2 }
 0x122   : > { %1164 = vrot.lane.b32.xlu0 %v8557_v33, %s7949_s14  ;;  %12396 = vst [vmem:[#allocation43_spill] sm:$0xff] %v8842_v20  ;;  %v8845_v44 = vpop.f32.mrb[29].mxu1  ;;  %v909_v45 = vrot.slane %v8842_v20, 1  ;;  %v1118_v35 = vrot.slane %v8842_v20, 2  ;;  %v1911_v32 = vrot.slane %v7604_v54, 1  ;;  %v2119_v62 = vrot.slane %v7604_v54, 2 }
 0x123   : > { %12397 = vst [vmem:[#allocation44_spill] sm:$0xff] %v8845_v44  ;;  %v1909_v55 = vrot.slane %v8845_v44, 1  ;;  %v2117_v4 = vrot.slane %v8845_v44, 2 }
 0x124   : > { %v8851_v3 = vpop.f32.mrb[30].mxu0  ;;  %v8854_v33 = vsel %vm862_vm2, %v908_v49, %v909_v45  ;;  %v8857_v41 = vsel %vm1071_vm3, %v1117_v0, %v1118_v35  ;;  %v8863_v22 = vsel %vm862_vm2, %v909_v45, %v911_v5  ;;  %v8865_v20 = vpop.f32.mrb[30].mxu1 }
 0x125   : > { %12398 = vst [vmem:[#allocation45_spill] sm:$0xff] %v8851_v3  ;;  %12399 = vst [vmem:[#allocation46_spill] sm:$0xff] %v8857_v41  ;;  %v8860_v29 = vsel %vm862_vm2, %v1908_v2, %v1909_v55  ;;  %1166 = vrot.lane.b32.xlu1 %v8560_v34, %s7949_s14  ;;  %v914_v54 = vrot.slane %v8851_v3, 1  ;;  %v1123_v49 = vrot.slane %v8851_v3, 2  ;;  %v8873_v0 = vpop.f32.mrb[31].mxu0  ;;  %v8876_v2 = vsel %vm1071_vm3, %v2116_v15, %v2117_v4  ;;  %v8879_v45 = vpop.f32.mrb[31].mxu1 }
 0x126   : > { %12400 = vst [vmem:[#allocation47_spill] sm:$0xff] %v8860_v29  ;;  %12401 = vst [vmem:[#allocation48_spill] sm:$0xff] %v8863_v22  ;;  %1955 = vrot.lane.b32.xlu0 %v8571_v43, %s7948_s13  ;;  %v1914_v5 = vrot.slane %v8865_v20, 1  ;;  %v913_v44 = vrot.slane %v8873_v0, 1  ;;  %v1122_v34 = vrot.slane %v8873_v0, 2  ;;  %v2122_v22 = vrot.slane %v8865_v20, 2 }
 0x127   : > { %12402 = vst [vmem:[#allocation49_spill] sm:$0xff] %v8865_v20  ;;  %12403 = vst [vmem:[#allocation50_spill] sm:$0xff] %v8873_v0  ;;  %v8885_v43 = vsel %vm1071_vm3, %v1118_v35, %v1120_v21  ;;  %v8888_v3 = vsel %vm1071_vm3, %v2117_v4, %v2119_v62  ;;  %v1913_v29 = vrot.slane %v8879_v45, 1  ;;  %v2121_v15 = vrot.slane %v8879_v45, 2 }
 0x128   : > { %12404 = vst [vmem:[#allocation51_spill] sm:$0xff] %v8876_v2  ;;  %12405 = vst [vmem:[#allocation52_spill] sm:$0xff] %v8879_v45  ;;  %v8893_v2 = vsel %vm862_vm2, %v1909_v55, %v1911_v32  ;;  %v8895_v41 = vpop.f32.mrb[32].mxu0  ;;  %v8897_v11 = vpop.f32.mrb[32].mxu1  ;;  %v8900_v0 = vsel %vm862_vm2, %v913_v44, %v914_v54  ;;  %v8903_v21 = vsel %vm1071_vm3, %v1122_v34, %v1123_v49 }
 0x129   : > { %12406 = vst [vmem:[#allocation53_spill] sm:$0xff] %v8888_v3  ;;  %12407 = vst [vmem:[#allocation54_spill] sm:$0xff] %v8893_v2  ;;  %1957 = vrot.lane.b32.xlu1 %v8578_v51, %s7948_s13  ;;  %v918_v35 = vrot.slane %v8895_v41, 1  ;;  %v703_v55 = vpop.f32.mrb[33].mxu0  ;;  %v1704_v4 = vpop.f32.mrb[33].mxu1  ;;  %v1127_v44 = vrot.slane %v8895_v41, 2  ;;  %v8913_v34 = vsel %vm1071_vm3, %v2121_v15, %v2122_v22  ;;  %v8916_v51 = vsel %vm862_vm2, %v1913_v29, %v1914_v5 }
 0x12a   : > { %12408 = vst [vmem:[#allocation55_spill] sm:$0xff] %v8895_v41  ;;  %12409 = vst [vmem:[#allocation56_spill] sm:$0xff] %v8897_v11  ;;  %2163 = vrot.lane.b32.xlu0 %v8585_v37, %s7949_s14  ;;  %v916_v32 = vrot.slane %v703_v55, 1  ;;  %v1125_v62 = vrot.slane %v703_v55, 2  ;;  %v1916_v20 = vrot.slane %v1704_v4, 1  ;;  %v2124_v45 = vrot.slane %v1704_v4, 2 }
 0x12b   : > { %12410 = vst [vmem:[#allocation57_spill] sm:$0xff] %v8900_v0  ;;  %12411 = vst [vmem:[#allocation58_spill] sm:$0xff] %v8903_v21  ;;  %v1918_v0 = vrot.slane %v8897_v11, 1 }
 0x12c   : > { %v7539_v21 = vpop.f32.mrb[34].mxu0  ;;  %v8919_v37 = vsel %vm862_vm2, %v914_v54, %v916_v32  ;;  %v7613_v2 = vpop.f32.mrb[34].mxu1  ;;  %v8922_v3 = vsel %vm1071_vm3, %v1123_v49, %v1125_v62  ;;  %v8925_v55 = vsel %vm862_vm2, %v1914_v5, %v1916_v20  ;;  %v8928_v4 = vsel %vm1071_vm3, %v2122_v22, %v2124_v45 }
 0x12d   : > { %12412 = vst [vmem:[#allocation59_spill] sm:$0xff] %v8925_v55  ;;  %12413 = vst [vmem:[#allocation60_spill] sm:$0xff] %v8928_v4  ;;  %2165 = vrot.lane.b32.xlu1 %v8590_v1, %s7949_s14  ;;  %v921_v29 = vrot.slane %v7539_v21, 1  ;;  %v1130_v15 = vrot.slane %v7539_v21, 2  ;;  %v8934_v54 = vpop.f32.mrb[35].mxu0  ;;  %v2126_v32 = vrot.slane %v8897_v11, 2 }
 0x12e   : > { %959 = vrot.lane.b32.xlu0 %v8597_v8, %s7948_s13  ;;  %12414 = vst [vmem:[#allocation61_spill] sm:$0xff] %v8934_v54  ;;  %v8937_v49 = vpop.f32.mrb[35].mxu1  ;;  %v919_v20 = vrot.slane %v8934_v54, 1  ;;  %v1128_v5 = vrot.slane %v8934_v54, 2  ;;  %v1921_v1 = vrot.slane %v7613_v2, 1  ;;  %v2129_v62 = vrot.slane %v7613_v2, 2 }
 0x12f   : > { %12415 = vst [vmem:[#allocation62_spill] sm:$0xff] %v8937_v49  ;;  %v1919_v22 = vrot.slane %v8937_v49, 1  ;;  %v2127_v45 = vrot.slane %v8937_v49, 2 }
 0x130   : > { %v8943_v41 = vpop.f32.mrb[36].mxu0  ;;  %v8946_v8 = vsel %vm862_vm2, %v918_v35, %v919_v20  ;;  %v8949_v21 = vsel %vm1071_vm3, %v1127_v44, %v1128_v5  ;;  %v8955_v4 = vsel %vm862_vm2, %v919_v20, %v921_v29  ;;  %v8957_v54 = vpop.f32.mrb[36].mxu1 }
 0x131   : > { %12416 = vst [vmem:[#allocation63_spill] sm:$0xff] %v8943_v41  ;;  %12417 = vst [vmem:[#allocation64_spill] sm:$0xff] %v8949_v21  ;;  %v8952_v11 = vsel %vm862_vm2, %v1918_v0, %v1919_v22  ;;  %961 = vrot.lane.b32.xlu1 %v8632_v36, %s7948_s13  ;;  %v924_v2 = vrot.slane %v8943_v41, 1  ;;  %v1133_v35 = vrot.slane %v8943_v41, 2  ;;  %v8965_v44 = vpop.f32.mrb[37].mxu0  ;;  %v8968_v0 = vsel %vm1071_vm3, %v2126_v32, %v2127_v45  ;;  %v8971_v20 = vpop.f32.mrb[37].mxu1 }
 0x132   : > { %12418 = vst [vmem:[#allocation65_spill] sm:$0xff] %v8952_v11  ;;  %12419 = vst [vmem:[#allocation66_spill] sm:$0xff] %v8955_v4  ;;  %1168 = vrot.lane.b32.xlu0 %v8602_v10, %s7949_s14  ;;  %v1924_v29 = vrot.slane %v8957_v54, 1  ;;  %v923_v49 = vrot.slane %v8965_v44, 1  ;;  %v1132_v10 = vrot.slane %v8965_v44, 2  ;;  %v2132_v4 = vrot.slane %v8957_v54, 2 }
 0x133   : > { %12420 = vst [vmem:[#allocation67_spill] sm:$0xff] %v8957_v54  ;;  %12421 = vst [vmem:[#allocation68_spill] sm:$0xff] %v8965_v44  ;;  %v8977_v36 = vsel %vm1071_vm3, %v1128_v5, %v1130_v15  ;;  %v8980_v41 = vsel %vm1071_vm3, %v2127_v45, %v2129_v62  ;;  %v1923_v11 = vrot.slane %v8971_v20, 1  ;;  %v2131_v32 = vrot.slane %v8971_v20, 2 }
 0x134   : > { %12422 = vst [vmem:[#allocation69_spill] sm:$0xff] %v8968_v0  ;;  %12423 = vst [vmem:[#allocation70_spill] sm:$0xff] %v8971_v20  ;;  %v8985_v0 = vsel %vm862_vm2, %v1919_v22, %v1921_v1  ;;  %v8987_v21 = vpop.f32.mrb[38].mxu0  ;;  %v8989_v55 = vpop.f32.mrb[38].mxu1  ;;  %v8992_v44 = vsel %vm862_vm2, %v923_v49, %v924_v2  ;;  %v8995_v15 = vsel %vm1071_vm3, %v1132_v10, %v1133_v35 }
 0x135   : > { %12424 = vst [vmem:[#allocation71_spill] sm:$0xff] %v8980_v41  ;;  %12425 = vst [vmem:[#allocation72_spill] sm:$0xff] %v8985_v0  ;;  %1170 = vrot.lane.b32.xlu1 %v8635_v18, %s7949_s14  ;;  %v928_v5 = vrot.slane %v8987_v21, 1  ;;  %v1137_v22 = vrot.slane %v8987_v21, 2  ;;  %v733_v45 = vpop.f32.mrb[39].mxu0  ;;  %v1734_v1 = vpop.f32.mrb[39].mxu1 }
 0x136   : > { %12426 = vst [vmem:[#allocation73_spill] sm:$0xff] %v8987_v21  ;;  %12427 = vst [vmem:[#allocation74_spill] sm:$0xff] %v8989_v55  ;;  %1959 = vrot.lane.b32.xlu0 %v8625_v30, %s7948_s13  ;;  %v926_v62 = vrot.slane %v733_v45, 1  ;;  %v1135_v54 = vrot.slane %v733_v45, 2  ;;  %v1926_v20 = vrot.slane %v1734_v1, 1  ;;  %v2134_v49 = vrot.slane %v1734_v1, 2 }
 0x137   : > { %12428 = vst [vmem:[#allocation75_spill] sm:$0xff] %v8992_v44  ;;  %12429 = vst [vmem:[#allocation76_spill] sm:$0xff] %v8995_v15  ;;  %v1928_v44 = vrot.slane %v8989_v55, 1  ;;  %v2136_v10 = vrot.slane %v8989_v55, 2  ;;  %v9006_v15 = vsel %vm1071_vm3, %v2131_v32, %v2132_v4  ;;  %v9009_v30 = vsel %vm862_vm2, %v1923_v11, %v1924_v29 }
 0x138   : > { %v7548_v18 = vpop.f32.mrb[40].mxu0  ;;  %v9012_v0 = vsel %vm862_vm2, %v924_v2, %v926_v62  ;;  %v7622_v21 = vpop.f32.mrb[40].mxu1  ;;  %v9015_v41 = vsel %vm1071_vm3, %v1133_v35, %v1135_v54  ;;  %v9018_v45 = vsel %vm862_vm2, %v1924_v29, %v1926_v20  ;;  %v9021_v1 = vsel %vm1071_vm3, %v2132_v4, %v2134_v49 }
 0x139   : > { %12430 = vst [vmem:[#allocation77_spill] sm:$0xff] %v9021_v1  ;;  %1961 = vrot.lane.b32.xlu1 %v8638_v19, %s7948_s13  ;;  %v9027_v11 = vpop.f32.mrb[41].mxu0  ;;  %v9029_v2 = vpop.f32.mrb[41].mxu1 }
 0x13a   : > { %2167 = vrot.lane.b32.xlu0 %v8628_v23, %s7949_s14  ;;  %12431 = vst [vmem:[#allocation78_spill] sm:$0xff] %v9027_v11  ;;  %12432 = vst [vmem:[#allocation79_spill] sm:$0xff] %v9029_v2  ;;  %v929_v32 = vrot.slane %v9027_v11, 1  ;;  %v1138_v54 = vrot.slane %v9027_v11, 2  ;;  %v1929_v35 = vrot.slane %v9029_v2, 1  ;;  %v2137_v29 = vrot.slane %v9029_v2, 2 }
 0x13b   : > { %v931_v2 = vrot.slane %v7548_v18, 1 }
 0x13c   : > { %v9035_v4 = vpop.f32.mrb[42].mxu0  ;;  %v9038_v20 = vsel %vm862_vm2, %v928_v5, %v929_v32  ;;  %v9041_v23 = vsel %vm1071_vm3, %v1137_v22, %v1138_v54  ;;  %v9044_v19 = vsel %vm862_vm2, %v1928_v44, %v1929_v35  ;;  %v9047_v62 = vsel %vm1071_vm3, %v2136_v10, %v2137_v29  ;;  %v9077_v55 = vpop.f32.mrb[42].mxu1 }
 0x13d   : > { %12433 = vst [vmem:[#allocation80_spill] sm:$0xff] %v9035_v4  ;;  %12434 = vst [vmem:[#allocation81_spill] sm:$0xff] %v9041_v23  ;;  %2169 = vrot.lane.b32.xlu1 %v8641_v6, %s7949_s14  ;;  %v9053_v49 = vpop.f32.mrb[43].mxu0  ;;  %v1140_v5 = vrot.slane %v7548_v18, 2  ;;  %v9062_v22 = vsel %vm862_vm2, %v929_v32, %v931_v2  ;;  %v1931_v18 = vrot.slane %v7622_v21, 1 }
 0x13e   : > { %12435 = vst [vmem:[#allocation82_spill] sm:$0xff] %v9044_v19  ;;  %12436 = vst [vmem:[#allocation83_spill] sm:$0xff] %v9047_v62  ;;  %963 = vrot.lane.b32.xlu0 %v8661_v25, %s7948_s13  ;;  %v933_v32 = vrot.slane %v9053_v49, 1  ;;  %v2142_v19 = vrot.slane %v9077_v55, 2 }
 0x13f   : > { %12437 = vst [vmem:[#allocation84_spill] sm:$0xff] %v9053_v49  ;;  %12439 = vst [vmem:[#allocation86_spill] sm:$0xff] %v9062_v22  ;;  %v9065_v6 = vsel %vm1071_vm3, %v1138_v54, %v1140_v5  ;;  %v1143_v5 = vrot.slane %v9035_v4, 2  ;;  %v1934_v22 = vrot.slane %v9077_v55, 1 }
 0x140   : > { %v9055_v11 = vpop.f32.mrb[44].mxu0  ;;  %12440 = vst [vmem:[#allocation87_spill] sm:$0xff] %v9065_v6  ;;  %12442 = vst [vmem:[#allocation89_spill] sm:$0xff] %v9077_v55 }
 0x141   : > { %12438 = vst [vmem:[#allocation85_spill] sm:$0xff] %v9055_v11  ;;  %965 = vrot.lane.b32.xlu1 %v8664_v57, %s7948_s13  ;;  %v763_v44 = vpop.f32.mrb[45].mxu0  ;;  %v2139_v57 = vrot.slane %v7622_v21, 2  ;;  %v938_v55 = vrot.slane %v9055_v11, 1 }
 0x142   : > { %1172 = vrot.lane.b32.xlu0 %v8667_v9, %s7949_s14  ;;  %v936_v6 = vrot.slane %v763_v44, 1 }
 0x143   : > { %v9090_v21 = vsel %vm1071_vm3, %v2137_v29, %v2139_v57 }
 0x144   : > { %v9067_v25 = vpop.f32.mrb[46].mxu0  ;;  %12444 = vst [vmem:[#allocation91_spill] sm:$0xff] %v9090_v21  ;;  %v1147_v21 = vrot.slane %v9055_v11, 2 }
 0x145   : > { %1174 = vrot.lane.b32.xlu1 %v8670_v47, %s7949_s14  ;;  %v9073_v10 = vpop.f32.mrb[47].mxu0  ;;  %v9085_v47 = vpop.f32.mrb[43].mxu1 }
 0x146   : > { %1963 = vrot.lane.b32.xlu0 %v8682_v7, %s7948_s13  ;;  %12441 = vst [vmem:[#allocation88_spill] sm:$0xff] %v9073_v10  ;;  %12443 = vst [vmem:[#allocation90_spill] sm:$0xff] %v9085_v47  ;;  %v934_v7 = vrot.slane %v9035_v4, 1  ;;  %v9092_v54 = vpop.f32.mrb[44].mxu1  ;;  %v1933_v1 = vrot.slane %v9085_v47, 1  ;;  %v2141_v29 = vrot.slane %v9085_v47, 2 }
 0x147   : > { %12445 = vst [vmem:[#allocation92_spill] sm:$0xff] %v9092_v54  ;;  %v1764_v57 = vpop.f32.mrb[45].mxu1  ;;  %v1145_v4 = vrot.slane %v763_v44, 2  ;;  %v939_v47 = vrot.slane %v9073_v10, 1  ;;  %v1148_v23 = vrot.slane %v9073_v10, 2 }
 0x148   : > { %v9075_v9 = vpop.f32.mrb[48].mxu0 }
 0x149   : > { %1965 = vrot.lane.b32.xlu1 %v8689_v53, %s7948_s13  ;;  %v9083_v2 = vpop.f32.mrb[49].mxu0  ;;  %v1142_v53 = vrot.slane %v9053_v49, 2  ;;  %v2144_v49 = vrot.slane %v1764_v57, 2 }
 0x14a   : > { %2171 = vrot.lane.b32.xlu0 %v8696_v27, %s7949_s14  ;;  %v9097_v27 = vsel %vm862_vm2, %v1929_v35, %v1931_v18  ;;  %v1936_v18 = vrot.slane %v1764_v57, 1  ;;  %v9127_v57 = vsel %vm862_vm2, %v1933_v1, %v1934_v22 }
 0x14b   : > { %12446 = vst [vmem:[#allocation93_spill] sm:$0xff] %v9097_v27  ;;  %v9112_v27 = vsel %vm862_vm2, %v933_v32, %v934_v7  ;;  %v9124_v44 = vsel %vm1071_vm3, %v1142_v53, %v1143_v5  ;;  %12447 = vst [vmem:[#allocation94_spill] sm:$0xff] %v9127_v57  ;;  %v9130_v32 = vsel %vm862_vm2, %v934_v7, %v936_v6 }
 0x14c   : > { %v9099_v62 = vpop.f32.mrb[50].mxu0  ;;  %12448 = vst [vmem:[#allocation95_spill] sm:$0xff] %v9130_v32  ;;  %v9142_v53 = vsel %vm862_vm2, %v1934_v22, %v1936_v18  ;;  %v9145_v1 = vsel %vm1071_vm3, %v2142_v19, %v2144_v49  ;;  %v9150_v6 = vsel %vm862_vm2, %v938_v55, %v939_v47  ;;  %v2146_v49 = vrot.slane %v9092_v54, 2 }
 0x14d   : > { %2173 = vrot.lane.b32.xlu1 %v8702_v48, %s7949_s14  ;;  %v9109_v35 = vpop.f32.mrb[51].mxu0  ;;  %12450 = vst [vmem:[#allocation97_spill] sm:$0xff] %v9142_v53  ;;  %12451 = vst [vmem:[#allocation98_spill] sm:$0xff] %v9145_v1 }
 0x14e   : > { %967 = vrot.lane.b32.xlu0 %v8710_v38, %s7948_s13  ;;  %v9121_v38 = vsel %vm1071_vm3, %v2141_v29, %v2142_v19  ;;  %v9139_v29 = vsel %vm1071_vm3, %v1143_v5, %v1145_v4  ;;  %12452 = vst [vmem:[#allocation99_spill] sm:$0xff] %v9150_v6  ;;  %v7631_v4 = vpop.f32.mrb[46].mxu1  ;;  %v1938_v19 = vrot.slane %v9092_v54, 1 }
 0x14f   : > { %12449 = vst [vmem:[#allocation96_spill] sm:$0xff] %v9139_v29  ;;  %v9165_v55 = vpop.f32.mrb[47].mxu1 }
 0x150   : > { %v9118_v48 = vpop.f32.mrb[52].mxu0  ;;  %12454 = vst [vmem:[#allocation101_spill] sm:$0xff] %v9165_v55  ;;  %v2147_v7 = vrot.slane %v9165_v55, 2 }
 0x151   : > { %969 = vrot.lane.b32.xlu1 %v8734_v40, %s7948_s13  ;;  %v9136_v10 = vpop.f32.mrb[53].mxu0 }
 0x152   : > { %1176 = vrot.lane.b32.xlu0 %v8715_v14, %s7949_s14  ;;  %v9153_v14 = vsel %vm1071_vm3, %v1147_v21, %v1148_v23  ;;  %v9181_v18 = vsel %vm1071_vm3, %v2146_v49, %v2147_v7 }
 0x153   : > { %12453 = vst [vmem:[#allocation100_spill] sm:$0xff] %v9153_v14  ;;  %12456 = vst [vmem:[#allocation103_spill] sm:$0xff] %v9181_v18 }
 0x154   : > { %v9147_v11 = vpop.f32.mrb[54].mxu0 }
 0x155   : > { %1178 = vrot.lane.b32.xlu1 %v8737_v56, %s7949_s14  ;;  %v9159_v40 = vpop.f32.mrb[55].mxu0  ;;  %v1939_v56 = vrot.slane %v9165_v55, 1  ;;  %v1150_v55 = vrot.slane %v9067_v25, 2 }
 0x156   : > { %1967 = vrot.lane.b32.xlu0 %v8727_v59, %s7948_s13 }
 0x157   : > { %v9178_v5 = vsel %vm862_vm2, %v1938_v19, %v1939_v56  ;;  %v9204_v49 = vsel %vm1071_vm3, %v1148_v23, %v1150_v55 }
 0x158   : > { %v9161_v22 = vpop.f32.mrb[56].mxu0  ;;  %12455 = vst [vmem:[#allocation102_spill] sm:$0xff] %v9178_v5  ;;  %12458 = vst [vmem:[#allocation105_spill] sm:$0xff] %v9204_v49 }
 0x159   : > { %1969 = vrot.lane.b32.xlu1 %v8740_v42, %s7948_s13  ;;  %v9171_v59 = vpop.f32.mrb[57].mxu0  ;;  %v941_v42 = vrot.slane %v9067_v25, 1 }
 0x15a   : > { %2175 = vrot.lane.b32.xlu0 %v8730_v63, %s7949_s14 }
 0x15c   : > { %v9175_v21 = vpop.f32.mrb[58].mxu0 }
 0x15d   : > { %2177 = vrot.lane.b32.xlu1 %v8743_v50, %s7949_s14  ;;  %v9187_v63 = vpop.f32.mrb[59].mxu0 }
 0x15e   : > { %971 = vrot.lane.b32.xlu0 %v8762_v13, %s7948_s13  ;;  %v9201_v13 = vsel %vm862_vm2, %v939_v47, %v941_v42  ;;  %v1941_v47 = vrot.slane %v7631_v4, 1 }
 0x15f   : > { %v944_v54 = vpop.permute.xlu0 %943  ;;  %12457 = vst [vmem:[#allocation104_spill] sm:$0xff] %v9201_v13 }
 0x160   : > { %v9191_v1 = vpop.f32.mrb[60].mxu0  ;;  %v1039_v50 = vadd.f32 %v944_v54, %v8413_v58  ;;  %v2862_v58 = vrot.slane %v9083_v2, 1  ;;  %v2149_v54 = vrot.slane %v7631_v4, 2  ;;  %v9230_v4 = vsel %vm862_vm2, %v1939_v56, %v1941_v47 }
 0x161   : > { %973 = vrot.lane.b32.xlu1 %v8765_v46, %s7948_s13  ;;  %v9197_v19 = vpop.f32.mrb[61].mxu0  ;;  %12460 = vst [vmem:[#allocation107_spill] sm:$0xff] %v9230_v4  ;;  %v3071_v47 = vrot.slane %v9075_v9, 2 }
 0x162   : > { %1180 = vrot.lane.b32.xlu0 %v8768_v39, %s7949_s14  ;;  %v2863_v39 = vrot.slane %v9075_v9, 1 }
 0x163   : > { %v1153_v25 = vpop.permute.xlu0 %1152  ;;  %v1155_v18 = vpop.permute.xlu1 %1154 }
 0x164   : > { %v1248_v5 = vadd.f32 %v1153_v25, %v1039_v50  ;;  %v9206_v14 = vpop.f32.mrb[62].mxu0  ;;  %v9227_v25 = vsel %vm862_vm2, %v2862_v58, %v2863_v39  ;;  %v2867_v58 = vrot.slane %v9099_v62, 1 }
 0x165   : > { %1182 = vrot.lane.b32.xlu1 %v8771_v26, %s7949_s14  ;;  %v9214_v46 = vpop.f32.mrb[63].mxu0  ;;  %v2865_v26 = vrot.slane %v9109_v35, 1  ;;  %12459 = vst [vmem:[#allocation106_spill] sm:$0xff] %v9227_v25 }
 0x166   : > { %1971 = vrot.lane.b32.xlu0 %v8784_v60, %s7948_s13  ;;  %v1783_v23 = vadd.f32 %v8417_v61, %v1248_v5  ;;  %v9233_v5 = vsel %vm1071_vm3, %v2147_v7, %v2149_v54  ;;  %v3070_v54 = vrot.slane %v9083_v2, 2 }
 0x167   : > { %v1944_v55 = vpop.permute.xlu0 %1943  ;;  %v1946_v42 = vpop.permute.xlu1 %1945  ;;  %12461 = vst [vmem:[#allocation108_spill] sm:$0xff] %v9233_v5  ;;  %v9246_v7 = vsel %vm862_vm2, %v2863_v39, %v2865_v26  ;;  %v12466_v39 = vld [vmem:[#allocation40_spill] sm:$0xff]  ;;  %v3075_v26 = vrot.slane %v9099_v62, 2 }
 0x168   : > { %v9217_v50 = vpop.f32.mrb[64].mxu0  ;;  %v2039_v61 = vadd.f32 %v1944_v55, %v1783_v23  ;;  %v2868_v23 = vrot.slane %v9136_v10, 1 }
 0x169   : > { %1973 = vrot.lane.b32.xlu1 %v8793_v16, %s7948_s13  ;;  %v9224_v60 = vpop.f32.mrb[65].mxu0 }
 0x16a   : > { %2179 = vrot.lane.b32.xlu0 %v8796_v52, %s7949_s14  ;;  %v12462_v52 = vld [vmem:[#allocation39_spill] sm:$0xff] }
 0x16b   : > { %v2152_v49 = vpop.permute.xlu0 %2151  ;;  %v2154_v13 = vpop.permute.xlu1 %2153  ;;  %12463 = vst [vmem:[#allocation39_spill] sm:$0xff] %v9246_v7  ;;  %v12467_v7 = vld [vmem:[#allocation5_spill] sm:$0xff] }
 0x16c   : > { %v2247_v16 = vadd.f32 %v2152_v49, %v2039_v61  ;;  %v9235_v53 = vpop.f32.mrb[66].mxu0  ;;  %v3073_v61 = vrot.slane %v9109_v35, 2 }
 0x16d   : > { %2181 = vrot.lane.b32.xlu1 %v8801_v28, %s7949_s14  ;;  %v9243_v56 = vpop.f32.mrb[67].mxu0 }
 0x16e   : > { %975 = vrot.lane.b32.xlu0 %v12462_v52, %s7948_s13  ;;  %v9250_v49 = vadd.f32 %v9083_v2, %v2247_v16  ;;  %v12465_v52 = vld [vmem:[#allocation3_spill] sm:$0xff]  ;;  %v3076_v16 = vrot.slane %v9136_v10, 2  ;;  %v9266_v2 = vsel %vm862_vm2, %v2867_v58, %v2868_v23  ;;  %v9273_v6 = vsel %vm1071_vm3, %v3071_v47, %v3073_v61 }
 0x16f   : > { %v946_v28 = vpop.permute.xlu0 %945  ;;  %v948_v55 = vpop.permute.xlu1 %947  ;;  %12468 = vst [vmem:[#allocation3_spill] sm:$0xff] %v9273_v6 }
 0x170   : > { %12464 = vst [vmem:[#allocation109_spill] sm:$0xff] %v9250_v49  ;;  %v1040_v5 = vadd.f32 %v12465_v52, %v946_v28  ;;  %v9255_v4 = vpop.f32.mrb[68].mxu0  ;;  %v1041_v28 = vadd.f32 %v12467_v7, %v948_v55  ;;  %v9270_v52 = vsel %vm1071_vm3, %v3070_v54, %v3071_v47  ;;  %v9287_v7 = vsel %vm1071_vm3, %v3075_v26, %v3076_v16  ;;  %v12471_v47 = vld [vmem:[#allocation8_spill] sm:$0xff] }
 0x171   : > { %2183 = vrot.lane.b32.xlu1 %v8821_v12, %s7949_s14  ;;  %v9263_v49 = vpop.f32.mrb[69].mxu0  ;;  %12470 = vst [vmem:[#allocation40_spill] sm:$0xff] %v9287_v7  ;;  %v2875_v26 = vrot.slane %v9171_v59, 1  ;;  %v12476_v7 = vld [vmem:[#allocation41_spill] sm:$0xff] }
 0x172   : > { %1184 = vrot.lane.b32.xlu0 %v12466_v39, %s7949_s14  ;;  %v1249_v35 = vadd.f32 %v1155_v18, %v1040_v5  ;;  %v12469_v39 = vld [vmem:[#allocation4_spill] sm:$0xff]  ;;  %v2873_v18 = vrot.slane %v9147_v11, 1  ;;  %v2872_v5 = vrot.slane %v9159_v40, 1 }
 0x173   : > { %v1157_v25 = vpop.permute.xlu0 %1156  ;;  %v950_v12 = vpop.permute.xlu1 %949 }
 0x174   : > { %v1784_v29 = vadd.f32 %v12469_v39, %v1249_v35  ;;  %v1250_v32 = vadd.f32 %v1157_v25, %v1041_v28  ;;  %v9276_v57 = vpop.f32.mrb[70].mxu0  ;;  %v1042_v54 = vadd.f32 %v950_v12, %v12471_v47  ;;  %v12472_v25 = vld [vmem:[#allocation6_spill] sm:$0xff]  ;;  %v2870_v39 = vrot.slane %v9118_v48, 1 }
 0x175   : > { %977 = vrot.lane.b32.xlu1 %v8827_v31, %s7948_s13  ;;  %v9284_v58 = vpop.f32.mrb[71].mxu0 }
 0x176   : > { %1975 = vrot.lane.b32.xlu0 %v8824_v17, %s7948_s13  ;;  %v1785_v55 = vadd.f32 %v12472_v25, %v1250_v32  ;;  %v2040_v61 = vadd.f32 %v1946_v42, %v1784_v29  ;;  %v9302_v32 = vsel %vm862_vm2, %v2872_v5, %v2873_v18  ;;  %v12473_v42 = vld [vmem:[#allocation7_spill] sm:$0xff]  ;;  %v12477_v5 = vld [vmem:[#allocation46_spill] sm:$0xff] }
 0x177   : > { %v1948_v35 = vpop.permute.xlu0 %1947  ;;  %v1159_v28 = vpop.permute.xlu1 %1158 }
 0x178   : > { %v1251_v17 = vadd.f32 %v1159_v28, %v1042_v54  ;;  %v9292_v31 = vpop.f32.mrb[72].mxu0  ;;  %v2248_v6 = vadd.f32 %v2154_v13, %v2040_v61  ;;  %v2041_v29 = vadd.f32 %v1948_v35, %v1785_v55  ;;  %v2877_v55 = vrot.slane %v9161_v22, 1 }
 0x179   : > { %1186 = vrot.lane.b32.xlu1 %v8830_v24, %s7949_s14  ;;  %v9299_v12 = vpop.f32.mrb[73].mxu0  ;;  %v3078_v24 = vrot.slane %v9118_v48, 2 }
 0x17a   : > { %979 = vrot.lane.b32.xlu0 %v8854_v33, %s7948_s13  ;;  %v1786_v47 = vadd.f32 %v12473_v42, %v1251_v17  ;;  %v9306_v54 = vadd.f32 %v9075_v9, %v2248_v6  ;;  %v9312_v33 = vsel %vm862_vm2, %v2868_v23, %v2870_v39  ;;  %v2878_v9 = vrot.slane %v9187_v63, 1 }
 0x17b   : > { %v2156_v13 = vpop.permute.xlu0 %2155  ;;  %v1950_v25 = vpop.permute.xlu1 %1949  ;;  %12475 = vst [vmem:[#allocation4_spill] sm:$0xff] %v9312_v33  ;;  %v9321_v6 = vsel %vm862_vm2, %v2873_v18, %v2875_v26  ;;  %v9329_v42 = vsel %vm1071_vm3, %v3076_v16, %v3078_v24  ;;  %v12482_v18 = vld [vmem:[#allocation47_spill] sm:$0xff]  ;;  %v3085_v26 = vrot.slane %v9161_v22, 2 }
 0x17c   : > { %12474 = vst [vmem:[#allocation5_spill] sm:$0xff] %v9306_v54  ;;  %v2249_v61 = vadd.f32 %v2156_v13, %v2041_v29  ;;  %v9309_v28 = vpop.f32.mrb[74].mxu0  ;;  %12478 = vst [vmem:[#allocation8_spill] sm:$0xff] %v9321_v6  ;;  %v2042_v35 = vadd.f32 %v1950_v25, %v1786_v47  ;;  %v3081_v29 = vrot.slane %v9147_v11, 2  ;;  %v12481_v13 = vld [vmem:[#allocation42_spill] sm:$0xff]  ;;  %v9338_v47 = vsel %vm862_vm2, %v2877_v55, %v2878_v9  ;;  %v12484_v25 = vld [vmem:[#allocation11_spill] sm:$0xff] }
 0x17d   : > { %1977 = vrot.lane.b32.xlu1 %v12476_v7, %s7948_s13  ;;  %v3080_v7 = vrot.slane %v9159_v40, 2  ;;  %12480 = vst [vmem:[#allocation7_spill] sm:$0xff] %v9329_v42  ;;  %12483 = vst [vmem:[#allocation41_spill] sm:$0xff] %v9338_v47  ;;  %v9344_v16 = vpop.f32.mrb[75].mxu0  ;;  %v12487_v54 = vld [vmem:[#allocation48_spill] sm:$0xff]  ;;  %v12488_v55 = vld [vmem:[#allocation51_spill] sm:$0xff] }
 0x17e   : > { %1188 = vrot.lane.b32.xlu0 %v12477_v5, %s7949_s14  ;;  %v9324_v48 = vadd.f32 %v9099_v62, %v2249_v61  ;;  %v3086_v62 = vrot.slane %v9187_v63, 2  ;;  %v2885_v42 = vrot.slane %v9214_v46, 1 }
 0x17f   : > { %v2158_v17 = vpop.permute.xlu1 %2157 }
 0x180   : > { %12479 = vst [vmem:[#allocation6_spill] sm:$0xff] %v9324_v48  ;;  %v952_v23 = vpop.permute.xlu0 %951  ;;  %v2250_v39 = vadd.f32 %v2158_v17, %v2042_v35 }
 0x181   : > { %2185 = vrot.lane.b32.xlu1 %v12481_v13, %s7949_s14  ;;  %v1043_v61 = vadd.f32 %v952_v23, %v12484_v25  ;;  %v9346_v13 = vpop.f32.mrb[76].mxu0  ;;  %v3083_v23 = vrot.slane %v9171_v59, 2  ;;  %v12492_v59 = vld [vmem:[#allocation53_spill] sm:$0xff] }
 0x182   : > { %1979 = vrot.lane.b32.xlu0 %v12482_v18, %s7948_s13  ;;  %v9342_v5 = vadd.f32 %v9136_v10, %v2250_v39  ;;  %v9349_v18 = vsel %vm1071_vm3, %v3080_v7, %v3081_v29  ;;  %v2883_v10 = vrot.slane %v9191_v1, 1  ;;  %v2882_v39 = vrot.slane %v9197_v19, 1  ;;  %v9358_v25 = vpop.f32.mrb[77].mxu0 }
 0x183   : > { %v954_v35 = vpop.permute.xlu1 %953  ;;  %12486 = vst [vmem:[#allocation42_spill] sm:$0xff] %v9349_v18 }
 0x184   : > { %12485 = vst [vmem:[#allocation46_spill] sm:$0xff] %v9342_v5  ;;  %v1161_v24 = vpop.permute.xlu0 %1160  ;;  %v12491_v5 = vld [vmem:[#allocation12_spill] sm:$0xff] }
 0x185   : > { %v1252_v17 = vadd.f32 %v1161_v24, %v1043_v61  ;;  %981 = vrot.lane.b32.xlu1 %v12487_v54, %s7948_s13  ;;  %v9361_v61 = vsel %vm1071_vm3, %v3085_v26, %v3086_v62  ;;  %v12490_v24 = vld [vmem:[#allocation9_spill] sm:$0xff]  ;;  %v9372_v26 = vsel %vm1071_vm3, %v3081_v29, %v3083_v23  ;;  %v12494_v29 = vld [vmem:[#allocation54_spill] sm:$0xff] }
 0x186   : > { %2187 = vrot.lane.b32.xlu0 %v12488_v55, %s7949_s14  ;;  %12489 = vst [vmem:[#allocation47_spill] sm:$0xff] %v9361_v61  ;;  %v1044_v7 = vadd.f32 %v12490_v24, %v954_v35  ;;  %v2880_v55 = vrot.slane %v9175_v21, 1  ;;  %v9375_v35 = vsel %vm862_vm2, %v2882_v39, %v2883_v10  ;;  %v12495_v23 = vld [vmem:[#allocation57_spill] sm:$0xff] }
 0x187   : > { %v1787_v48 = vadd.f32 %v12491_v5, %v1252_v17  ;;  %v1163_v54 = vpop.permute.xlu1 %1162  ;;  %v12493_v17 = vld [vmem:[#allocation10_spill] sm:$0xff] }
 0x188   : > { %v1952_v18 = vpop.permute.xlu0 %1951  ;;  %v1253_v47 = vadd.f32 %v1163_v54, %v1044_v7  ;;  %v9378_v7 = vpop.f32.mrb[78].mxu0 }
 0x189   : > { %1190 = vrot.lane.b32.xlu1 %v8885_v43, %s7949_s14  ;;  %v2043_v5 = vadd.f32 %v1952_v18, %v1787_v48  ;;  %v3088_v43 = vrot.slane %v9175_v21, 2  ;;  %v9381_v33 = vpop.f32.mrb[79].mxu0  ;;  %v2887_v48 = vrot.slane %v9206_v14, 1  ;;  %v9393_v18 = vsel %vm862_vm2, %v2883_v10, %v2885_v42  ;;  %v12497_v42 = vld [vmem:[#allocation58_spill] sm:$0xff] }
 0x18a   : > { %2189 = vrot.lane.b32.xlu0 %v12492_v59, %s7949_s14  ;;  %v1788_v24 = vadd.f32 %v12493_v17, %v1253_v47  ;;  %v9384_v59 = vsel %vm862_vm2, %v2878_v9, %v2880_v55  ;;  %v2888_v47 = vrot.slane %v9224_v60, 1  ;;  %v3091_v17 = vrot.slane %v9191_v1, 2 }
 0x18b   : > { %v1954_v61 = vpop.permute.xlu1 %1953  ;;  %v3095_v10 = vrot.slane %v9206_v14, 2 }
 0x18c   : > { %v2160_v54 = vpop.permute.xlu0 %2159  ;;  %v2044_v39 = vadd.f32 %v1954_v61, %v1788_v24  ;;  %v12498_v61 = vld [vmem:[#allocation13_spill] sm:$0xff] }
 0x18d   : > { %v2251_v6 = vadd.f32 %v2160_v54, %v2043_v5  ;;  %1981 = vrot.lane.b32.xlu1 %v12494_v29, %s7948_s13  ;;  %v3090_v54 = vrot.slane %v9197_v19, 2  ;;  %v9401_v29 = vsel %vm1071_vm3, %v3086_v62, %v3088_v43 }
 0x18e   : > { %983 = vrot.lane.b32.xlu0 %v12495_v23, %s7948_s13 }
 0x18f   : > { %v9396_v21 = vadd.f32 %v9159_v40, %v2251_v6  ;;  %v2162_v5 = vpop.permute.xlu1 %2161  ;;  %v3096_v40 = vrot.slane %v9224_v60, 2  ;;  %v9410_v6 = vsel %vm862_vm2, %v2887_v48, %v2888_v47  ;;  %v3093_v48 = vrot.slane %v9214_v46, 2 }
 0x190   : > { %v956_v9 = vpop.permute.xlu0 %955  ;;  %v2252_v55 = vadd.f32 %v2162_v5, %v2044_v39  ;;  %v2893_v5 = vrot.slane %v9235_v53, 1 }
 0x191   : > { %12496 = vst [vmem:[#allocation11_spill] sm:$0xff] %v9396_v21  ;;  %2191 = vrot.lane.b32.xlu1 %v8913_v34, %s7949_s14  ;;  %v1045_v24 = vadd.f32 %v12498_v61, %v956_v9  ;;  %v9417_v34 = vsel %vm1071_vm3, %v3090_v54, %v3091_v17  ;;  %v2892_v9 = vrot.slane %v9243_v56, 1  ;;  %v12502_v61 = vld [vmem:[#allocation14_spill] sm:$0xff]  ;;  %v9432_v21 = vpop.f32.mrb[80].mxu0  ;;  %v9440_v46 = vsel %vm1071_vm3, %v3091_v17, %v3093_v48  ;;  %v12505_v17 = vld [vmem:[#allocation64_spill] sm:$0xff] }
 0x192   : > { %1192 = vrot.lane.b32.xlu0 %v12497_v42, %s7949_s14  ;;  %v9414_v23 = vadd.f32 %v9147_v11, %v2252_v55  ;;  %v9427_v11 = vsel %vm1071_vm3, %v3095_v10, %v3096_v40  ;;  %v12501_v55 = vld [vmem:[#allocation15_spill] sm:$0xff]  ;;  %v3098_v48 = vrot.slane %v9217_v50, 2 }
 0x193   : > { %v958_v62 = vpop.permute.xlu1 %957  ;;  %12500 = vst [vmem:[#allocation51_spill] sm:$0xff] %v9427_v11  ;;  %v9443_v10 = vsel %vm862_vm2, %v2892_v9, %v2893_v5  ;;  %v12504_v11 = vld [vmem:[#allocation59_spill] sm:$0xff]  ;;  %v2898_v9 = vrot.slane %v9284_v58, 1 }
 0x194   : > { %12499 = vst [vmem:[#allocation48_spill] sm:$0xff] %v9414_v23  ;;  %v1165_v43 = vpop.permute.xlu0 %1164  ;;  %v1046_v42 = vadd.f32 %v958_v62, %v12501_v55 }
 0x195   : > { %v1254_v39 = vadd.f32 %v1165_v43, %v1045_v24  ;;  %985 = vrot.lane.b32.xlu1 %v8919_v37, %s7948_s13  ;;  %v2895_v37 = vrot.slane %v9263_v49, 1 }
 0x196   : > { %1983 = vrot.lane.b32.xlu0 %v8916_v51, %s7948_s13  ;;  %v2890_v51 = vrot.slane %v9217_v50, 1  ;;  %v3101_v50 = vrot.slane %v9235_v53, 2 }
 0x197   : > { %v1789_v54 = vadd.f32 %v12502_v61, %v1254_v39  ;;  %v1167_v24 = vpop.permute.xlu1 %1166  ;;  %v12503_v39 = vld [vmem:[#allocation16_spill] sm:$0xff] }
 0x198   : > { %v1956_v43 = vpop.permute.xlu0 %1955  ;;  %v1255_v23 = vadd.f32 %v1167_v24, %v1046_v42 }
 0x199   : > { %1194 = vrot.lane.b32.xlu1 %v8922_v3, %s7949_s14  ;;  %v2045_v62 = vadd.f32 %v1956_v43, %v1789_v54  ;;  %v7053_v3 = vld [vmem:[%s12225_s2 + $0x4] sm:$0xf]  ;;  %v9460_v54 = vsel %vm862_vm2, %v2893_v5, %v2895_v37  ;;  %v9475_v37 = vsel %vm1071_vm3, %v3096_v40, %v3098_v48  ;;  %v12515_v40 = vld [vmem:[#allocation66_spill] sm:$0xff] }
 0x19a   : > { %987 = vrot.lane.b32.xlu0 %v8946_v8, %s7948_s13  ;;  %v1790_v55 = vadd.f32 %v12503_v39, %v1255_v23  ;;  %v9450_v8 = vsel %vm862_vm2, %v2888_v47, %v2890_v51  ;;  %v2897_v23 = vrot.slane %v9255_v4, 1  ;;  %12506 = vst [vmem:[#allocation9_spill] sm:$0xff] %v9460_v54  ;;  %7780 = vmatprep.subr.msk.mxu0 %vm473_vm0, %v7053_v3  ;;  %v3100_v39 = vrot.slane %v9243_v56, 2  ;;  %v12509_v5 = vld [vmem:[#allocation65_spill] sm:$0xff] }
 0x19b   : > { %v1958_v42 = vpop.permute.xlu1 %1957  ;;  %7781 = vmatpush3.msk.msra.mxu0 %vm473_vm0, %v7053_v3  ;;  %12510 = vst [vmem:[#allocation53_spill] sm:$0xff] %v9475_v37  ;;  %v12516_v48 = vld [vmem:[#allocation69_spill] sm:$0xff]  ;;  %v3110_v37 = vrot.slane %v9299_v12, 2 }
 0x19c   : > { %v2164_v61 = vpop.permute.xlu0 %2163  ;;  %v2046_v43 = vadd.f32 %v1958_v42, %v1790_v55  ;;  %v9478_v55 = vsel %vm862_vm2, %v2897_v23, %v2898_v9  ;;  %v12512_v42 = vld [vmem:[#allocation19_spill] sm:$0xff]  ;;  %v3103_v23 = vrot.slane %v9263_v49, 2  ;;  %v2903_v49 = vrot.slane %v9292_v31, 1 }
 0x19d   : > { %v2253_v24 = vadd.f32 %v2164_v61, %v2045_v62  ;;  %1985 = vrot.lane.b32.xlu1 %v12504_v11, %s7948_s13  ;;  %v12508_v61 = vld [vmem:[#allocation60_spill] sm:$0xff]  ;;  %12511 = vst [vmem:[#allocation10_spill] sm:$0xff] %v9478_v55 }
 0x19e   : > { %1196 = vrot.lane.b32.xlu0 %v12505_v17, %s7949_s14  ;;  %v9484_v17 = vpop.f32.mrb[81].mxu0 }
 0x19f   : > { %v9463_v62 = vadd.f32 %v9161_v22, %v2253_v24  ;;  %v2166_v47 = vpop.permute.xlu1 %2165  ;;  %v2900_v22 = vrot.slane %v9276_v57, 1 }
 0x1a0   : > { %v960_v11 = vpop.permute.xlu0 %959  ;;  %v2254_v51 = vadd.f32 %v2166_v47, %v2046_v43 }
 0x1a1   : > { %12507 = vst [vmem:[#allocation12_spill] sm:$0xff] %v9463_v62  ;;  %2193 = vrot.lane.b32.xlu1 %v12508_v61, %s7949_s14  ;;  %v1047_v24 = vadd.f32 %v960_v11, %v12512_v42  ;;  %v9486_v62 = vpop.f32.mrb[82].mxu0  ;;  %v3106_v11 = vrot.slane %v9284_v58, 2  ;;  %v9501_v42 = vsel %vm862_vm2, %v2898_v9, %v2900_v22  ;;  %v2902_v9 = vrot.slane %v9299_v12, 1 }
 0x1a2   : > { %1987 = vrot.lane.b32.xlu0 %v12509_v5, %s7948_s13  ;;  %v9482_v3 = vadd.f32 %v9187_v63, %v2254_v51  ;;  %v9489_v5 = vsel %vm1071_vm3, %v3100_v39, %v3101_v50  ;;  %v3108_v63 = vrot.slane %v9276_v57, 2  ;;  %v9498_v51 = vpop.f32.mrb[83].mxu0  ;;  %12517 = vst [vmem:[#allocation58_spill] sm:$0xff] %v9501_v42  ;;  %v12520_v57 = vld [vmem:[#allocation71_spill] sm:$0xff]  ;;  %v9513_v22 = vsel %vm1071_vm3, %v3101_v50, %v3103_v23  ;;  %v12523_v23 = vld [vmem:[#allocation72_spill] sm:$0xff] }
 0x1a3   : > { %v962_v47 = vpop.permute.xlu1 %961  ;;  %12514 = vst [vmem:[#allocation57_spill] sm:$0xff] %v9489_v5 }
 0x1a4   : > { %12513 = vst [vmem:[#allocation54_spill] sm:$0xff] %v9482_v3  ;;  %v1169_v43 = vpop.permute.xlu0 %1168 }
 0x1a5   : > { %v1256_v61 = vadd.f32 %v1169_v43, %v1047_v24  ;;  %989 = vrot.lane.b32.xlu1 %v12515_v40, %s7948_s13  ;;  %v12518_v24 = vld [vmem:[#allocation17_spill] sm:$0xff]  ;;  %v12519_v43 = vld [vmem:[#allocation20_spill] sm:$0xff] }
 0x1a6   : > { %2195 = vrot.lane.b32.xlu0 %v12516_v48, %s7949_s14  ;;  %v1048_v39 = vadd.f32 %v12518_v24, %v962_v47  ;;  %v3105_v48 = vrot.slane %v9255_v4, 2  ;;  %v9516_v47 = vsel %vm1071_vm3, %v3106_v11, %v3108_v63  ;;  %v12521_v24 = vld [vmem:[#allocation18_spill] sm:$0xff]  ;;  %v9535_v63 = vsel %vm862_vm2, %v2902_v9, %v2903_v49 }
 0x1a7   : > { %v1791_v3 = vadd.f32 %v12519_v43, %v1256_v61  ;;  %v1171_v40 = vpop.permute.xlu1 %1170  ;;  %v9519_v43 = vpop.f32.mrb[84].mxu0  ;;  %v2910_v9 = vrot.slane %v9346_v13, 1 }
 0x1a8   : > { %v1960_v5 = vpop.permute.xlu0 %1959  ;;  %v1257_v55 = vadd.f32 %v1171_v40, %v1048_v39  ;;  %v9523_v54 = vpop.f32.mrb[85].mxu0  ;;  %v9526_v50 = vsel %vm1071_vm3, %v3105_v48, %v3106_v11 }
 0x1a9   : > { %1198 = vrot.lane.b32.xlu1 %v8977_v36, %s7949_s14  ;;  %v2047_v61 = vadd.f32 %v1960_v5, %v1791_v3  ;;  %12522 = vst [vmem:[#allocation13_spill] sm:$0xff] %v9526_v50  ;;  %v12524_v3 = vld [vmem:[#allocation75_spill] sm:$0xff]  ;;  %v2908_v5 = vrot.slane %v9358_v25, 1  ;;  %v2905_v50 = vrot.slane %v9344_v16, 1 }
 0x1aa   : > { %2197 = vrot.lane.b32.xlu0 %v12520_v57, %s7949_s14  ;;  %v1792_v39 = vadd.f32 %v12521_v24, %v1257_v55  ;;  %v3111_v57 = vrot.slane %v9292_v31, 2  ;;  %v2907_v55 = vrot.slane %v9309_v28, 1 }
 0x1ab   : > { %v1962_v36 = vpop.permute.xlu1 %1961 }
 0x1ac   : > { %v2168_v40 = vpop.permute.xlu0 %2167 }
 0x1ad   : > { %v2255_v42 = vadd.f32 %v2168_v40, %v2047_v61  ;;  %1989 = vrot.lane.b32.xlu1 %v12523_v23, %s7948_s13  ;;  %v2048_v61 = vadd.f32 %v1962_v36, %v1792_v39  ;;  %v9542_v23 = vsel %vm1071_vm3, %v3110_v37, %v3111_v57  ;;  %v9550_v39 = vsel %vm862_vm2, %v2907_v55, %v2908_v5 }
 0x1ae   : > { %991 = vrot.lane.b32.xlu0 %v12524_v3, %s7948_s13  ;;  %v12526_v3 = vld [vmem:[#allocation76_spill] sm:$0xff]  ;;  %v3118_v55 = vrot.slane %v9346_v13, 2 }
 0x1af   : > { %v9538_v24 = vadd.f32 %v9197_v19, %v2255_v42  ;;  %v2170_v40 = vpop.permute.xlu1 %2169  ;;  %v12527_v19 = vld [vmem:[#allocation21_spill] sm:$0xff] }
 0x1b0   : > { %v964_v11 = vpop.permute.xlu0 %963  ;;  %v2256_v48 = vadd.f32 %v2170_v40, %v2048_v61 }
 0x1b1   : > { %12525 = vst [vmem:[#allocation15_spill] sm:$0xff] %v9538_v24  ;;  %2199 = vrot.lane.b32.xlu1 %v9006_v15, %s7949_s14  ;;  %v1049_v42 = vadd.f32 %v12527_v19, %v964_v11  ;;  %v9557_v24 = vsel %vm862_vm2, %v2903_v49, %v2905_v50  ;;  %v3113_v15 = vrot.slane %v9344_v16, 2  ;;  %v3116_v11 = vrot.slane %v9358_v25, 2  ;;  %v12530_v19 = vld [vmem:[#allocation22_spill] sm:$0xff] }
 0x1b2   : > { %1200 = vrot.lane.b32.xlu0 %v12526_v3, %s7949_s14  ;;  %v9554_v36 = vadd.f32 %v9191_v1, %v2256_v48  ;;  %v9567_v1 = vsel %vm862_vm2, %v2908_v5, %v2910_v9  ;;  %v12529_v48 = vld [vmem:[#allocation23_spill] sm:$0xff]  ;;  %v2912_v16 = vrot.slane %v9381_v33, 1 }
 0x1b3   : > { %v966_v61 = vpop.permute.xlu1 %965  ;;  %v9581_v13 = vsel %vm1071_vm3, %v3111_v57, %v3113_v15  ;;  %v9584_v5 = vsel %vm1071_vm3, %v3116_v11, %v3118_v55  ;;  %v12534_v57 = vld [vmem:[#allocation81_spill] sm:$0xff]  ;;  %v3120_v15 = vrot.slane %v9381_v33, 2  ;;  %v2917_v55 = vrot.slane %v9432_v21, 1 }
 0x1b4   : > { %12528 = vst [vmem:[#allocation14_spill] sm:$0xff] %v9554_v36  ;;  %v1173_v40 = vpop.permute.xlu0 %1172  ;;  %v1050_v3 = vadd.f32 %v966_v61, %v12529_v48  ;;  %v9572_v36 = vpop.f32.mrb[86].mxu0  ;;  %12531 = vst [vmem:[#allocation16_spill] sm:$0xff] %v9584_v5  ;;  %v12532_v61 = vld [vmem:[#allocation24_spill] sm:$0xff] }
 0x1b5   : > { %v1258_v37 = vadd.f32 %v1173_v40, %v1049_v42  ;;  %993 = vrot.lane.b32.xlu1 %v9012_v0, %s7948_s13  ;;  %v2913_v0 = vrot.slane %v9378_v7, 1 }
 0x1b6   : > { %1991 = vrot.lane.b32.xlu0 %v9009_v30, %s7948_s13  ;;  %v3115_v30 = vrot.slane %v9309_v28, 2 }
 0x1b7   : > { %v1793_v49 = vadd.f32 %v12530_v19, %v1258_v37  ;;  %v1175_v50 = vpop.permute.xlu1 %1174 }
 0x1b8   : > { %v1964_v42 = vpop.permute.xlu0 %1963  ;;  %v1259_v40 = vadd.f32 %v1175_v50, %v1050_v3  ;;  %v9599_v50 = vsel %vm862_vm2, %v2912_v16, %v2913_v0 }
 0x1b9   : > { %1202 = vrot.lane.b32.xlu1 %v9015_v41, %s7949_s14  ;;  %v2049_v9 = vadd.f32 %v1964_v42, %v1793_v49  ;;  %v3121_v41 = vrot.slane %v9378_v7, 2  ;;  %v2918_v49 = vrot.slane %v9498_v51, 1  ;;  %12535 = vst [vmem:[#allocation64_spill] sm:$0xff] %v9599_v50 }
 0x1ba   : > { %995 = vrot.lane.b32.xlu0 %v9038_v20, %s7948_s13  ;;  %v1794_v37 = vadd.f32 %v12532_v61, %v1259_v40  ;;  %v9589_v20 = vsel %vm1071_vm3, %v3115_v30, %v3116_v11  ;;  %v12537_v61 = vld [vmem:[#allocation77_spill] sm:$0xff] }
 0x1bb   : > { %v1966_v48 = vpop.permute.xlu1 %1965  ;;  %12533 = vst [vmem:[#allocation59_spill] sm:$0xff] %v9589_v20  ;;  %v9611_v16 = vsel %vm1071_vm3, %v3120_v15, %v3121_v41  ;;  %v12544_v15 = vld [vmem:[#allocation86_spill] sm:$0xff]  ;;  %v3130_v20 = vrot.slane %v9523_v54, 2 }
 0x1bc   : > { %v2172_v3 = vpop.permute.xlu0 %2171  ;;  %v2050_v42 = vadd.f32 %v1966_v48, %v1794_v37  ;;  %12539 = vst [vmem:[#allocation65_spill] sm:$0xff] %v9611_v16  ;;  %v9614_v37 = vsel %vm862_vm2, %v2917_v55, %v2918_v49  ;;  %v12545_v55 = vld [vmem:[#allocation83_spill] sm:$0xff]  ;;  %v2923_v16 = vrot.slane %v9519_v43, 1 }
 0x1bd   : > { %v2257_v19 = vadd.f32 %v2172_v3, %v2049_v9  ;;  %1993 = vrot.lane.b32.xlu1 %v9018_v45, %s7948_s13  ;;  %v2915_v45 = vrot.slane %v9484_v17, 1  ;;  %v12538_v3 = vld [vmem:[#allocation82_spill] sm:$0xff]  ;;  %12540 = vst [vmem:[#allocation19_spill] sm:$0xff] %v9614_v37 }
 0x1be   : > { %1204 = vrot.lane.b32.xlu0 %v12534_v57, %s7949_s14  ;;  %v2920_v57 = vrot.slane %v9486_v62, 1 }
 0x1bf   : > { %v9602_v40 = vadd.f32 %v9206_v14, %v2257_v19  ;;  %v2174_v11 = vpop.permute.xlu1 %2173  ;;  %v12541_v14 = vld [vmem:[#allocation27_spill] sm:$0xff] }
 0x1c0   : > { %v968_v30 = vpop.permute.xlu0 %967  ;;  %v2258_v9 = vadd.f32 %v2174_v11, %v2050_v42  ;;  %v9620_v42 = vpop.f32.mrb[87].mxu0 }
 0x1c1   : > { %12536 = vst [vmem:[#allocation60_spill] sm:$0xff] %v9602_v40  ;;  %2201 = vrot.lane.b32.xlu1 %v12537_v61, %s7949_s14  ;;  %v1051_v48 = vadd.f32 %v968_v30, %v12541_v14  ;;  %v9622_v50 = vpop.f32.mrb[88].mxu0  ;;  %v3123_v30 = vrot.slane %v9484_v17, 2  ;;  %v12549_v17 = vld [vmem:[#allocation87_spill] sm:$0xff] }
 0x1c2   : > { %1995 = vrot.lane.b32.xlu0 %v12538_v3, %s7948_s13  ;;  %v9618_v19 = vadd.f32 %v9224_v60, %v2258_v9  ;;  %v9625_v3 = vsel %vm862_vm2, %v2913_v0, %v2915_v45  ;;  %v3128_v60 = vrot.slane %v9486_v62, 2  ;;  %v3126_v9 = vrot.slane %v9498_v51, 2  ;;  %v9634_v14 = vpop.f32.mrb[89].mxu0  ;;  %v12548_v45 = vld [vmem:[#allocation28_spill] sm:$0xff]  ;;  %v12550_v62 = vld [vmem:[#allocation91_spill] sm:$0xff] }
 0x1c3   : > { %v970_v61 = vpop.permute.xlu1 %969  ;;  %12543 = vst [vmem:[#allocation69_spill] sm:$0xff] %v9625_v3 }
 0x1c4   : > { %12542 = vst [vmem:[#allocation66_spill] sm:$0xff] %v9618_v19  ;;  %v1177_v11 = vpop.permute.xlu0 %1176 }
 0x1c5   : > { %v1260_v40 = vadd.f32 %v1177_v11, %v1051_v48  ;;  %997 = vrot.lane.b32.xlu1 %v12544_v15, %s7948_s13  ;;  %v9637_v48 = vsel %vm862_vm2, %v2918_v49, %v2920_v57  ;;  %v12547_v11 = vld [vmem:[#allocation25_spill] sm:$0xff]  ;;  %v2922_v49 = vrot.slane %v9523_v54, 1  ;;  %v9649_v57 = vsel %vm1071_vm3, %v3121_v41, %v3123_v30 }
 0x1c6   : > { %2203 = vrot.lane.b32.xlu0 %v12545_v55, %s7949_s14  ;;  %12546 = vst [vmem:[#allocation17_spill] sm:$0xff] %v9637_v48  ;;  %v1052_v0 = vadd.f32 %v12547_v11, %v970_v61  ;;  %v3125_v55 = vrot.slane %v9432_v21, 2  ;;  %v12551_v11 = vld [vmem:[#allocation26_spill] sm:$0xff]  ;;  %v12552_v30 = vld [vmem:[#allocation93_spill] sm:$0xff] }
 0x1c7   : > { %v1795_v19 = vadd.f32 %v12548_v45, %v1260_v40  ;;  %v1179_v15 = vpop.permute.xlu1 %1178  ;;  %v9652_v40 = vsel %vm1071_vm3, %v3126_v9, %v3128_v60  ;;  %v9655_v45 = vpop.f32.mrb[90].mxu0 }
 0x1c8   : > { %v1968_v3 = vpop.permute.xlu0 %1967  ;;  %v1261_v37 = vadd.f32 %v1179_v15, %v1052_v0  ;;  %v9659_v5 = vpop.f32.mrb[91].mxu0  ;;  %v9662_v41 = vsel %vm1071_vm3, %v3125_v55, %v3126_v9 }
 0x1c9   : > { %1206 = vrot.lane.b32.xlu1 %v12549_v17, %s7949_s14  ;;  %v2051_v61 = vadd.f32 %v1968_v3, %v1795_v19  ;;  %v2928_v19 = vrot.slane %v9634_v14, 1  ;;  %v9671_v3 = vsel %vm862_vm2, %v2922_v49, %v2923_v16 }
 0x1ca   : > { %2205 = vrot.lane.b32.xlu0 %v12550_v62, %s7949_s14  ;;  %v1796_v0 = vadd.f32 %v12551_v11, %v1261_v37  ;;  %v3131_v62 = vrot.slane %v9519_v43, 2  ;;  %v2927_v37 = vrot.slane %v9572_v36, 1 }
 0x1cb   : > { %v1970_v17 = vpop.permute.xlu1 %1969 }
 0x1cc   : > { %v2176_v15 = vpop.permute.xlu0 %2175  ;;  %v2052_v60 = vadd.f32 %v1970_v17, %v1796_v0  ;;  %v9686_v49 = vsel %vm862_vm2, %v2927_v37, %v2928_v19  ;;  %v3133_v37 = vrot.slane %v9620_v42, 2 }
 0x1cd   : > { %v2259_v48 = vadd.f32 %v2176_v15, %v2051_v61  ;;  %1997 = vrot.lane.b32.xlu1 %v12552_v30, %s7948_s13  ;;  %v2925_v15 = vrot.slane %v9620_v42, 1  ;;  %v9678_v30 = vsel %vm1071_vm3, %v3130_v20, %v3131_v62  ;;  %12555 = vst [vmem:[#allocation18_spill] sm:$0xff] %v9686_v49  ;;  %v12565_v42 = vld [vmem:[#allocation99_spill] sm:$0xff] }
 0x1ce   : > { %999 = vrot.lane.b32.xlu0 %v9112_v27, %s7948_s13  ;;  %12554 = vst [vmem:[#allocation71_spill] sm:$0xff] %v9678_v30  ;;  %v2930_v27 = vrot.slane %v9622_v50, 1 }
 0x1cf   : > { %v9674_v61 = vadd.f32 %v9243_v56, %v2259_v48  ;;  %v2178_v11 = vpop.permute.xlu1 %2177  ;;  %v12556_v56 = vld [vmem:[#allocation29_spill] sm:$0xff] }
 0x1d0   : > { %v972_v9 = vpop.permute.xlu0 %971  ;;  %v2260_v55 = vadd.f32 %v2178_v11, %v2052_v60  ;;  %v9693_v11 = vsel %vm862_vm2, %v2923_v16, %v2925_v15 }
 0x1d1   : > { %12553 = vst [vmem:[#allocation20_spill] sm:$0xff] %v9674_v61  ;;  %2207 = vrot.lane.b32.xlu1 %v9121_v38, %s7949_s14  ;;  %v1053_v48 = vadd.f32 %v12556_v56, %v972_v9  ;;  %12558 = vst [vmem:[#allocation75_spill] sm:$0xff] %v9693_v11  ;;  %v12559_v38 = vld [vmem:[#allocation94_spill] sm:$0xff]  ;;  %v3138_v61 = vrot.slane %v9622_v50, 2  ;;  %v3136_v9 = vrot.slane %v9634_v14, 2  ;;  %v2933_v50 = vrot.slane %v9655_v45, 1 }
 0x1d2   : > { %1208 = vrot.lane.b32.xlu0 %v9124_v44, %s7949_s14  ;;  %v9690_v0 = vadd.f32 %v9235_v53, %v2260_v55  ;;  %v12560_v44 = vld [vmem:[#allocation95_spill] sm:$0xff]  ;;  %v9703_v53 = vsel %vm862_vm2, %v2928_v19, %v2930_v27  ;;  %v2932_v19 = vrot.slane %v9659_v5, 1  ;;  %v9715_v27 = vsel %vm1071_vm3, %v3131_v62, %v3133_v37  ;;  %v12567_v62 = vld [vmem:[#allocation97_spill] sm:$0xff] }
 0x1d3   : > { %v974_v17 = vpop.permute.xlu1 %973  ;;  %12561 = vst [vmem:[#allocation76_spill] sm:$0xff] %v9703_v53  ;;  %v12562_v55 = vld [vmem:[#allocation31_spill] sm:$0xff]  ;;  %v3140_v11 = vrot.slane %v9659_v5, 2 }
 0x1d4   : > { %12557 = vst [vmem:[#allocation72_spill] sm:$0xff] %v9690_v0  ;;  %v1181_v60 = vpop.permute.xlu0 %1180  ;;  %v1054_v56 = vadd.f32 %v974_v17, %v12562_v55  ;;  %v9718_v17 = vsel %vm1071_vm3, %v3136_v9, %v3138_v61  ;;  %v12566_v55 = vld [vmem:[#allocation32_spill] sm:$0xff]  ;;  %v9733_v37 = vsel %vm862_vm2, %v2932_v19, %v2933_v50 }
 0x1d5   : > { %v1262_v20 = vadd.f32 %v1181_v60, %v1053_v48  ;;  %1001 = vrot.lane.b32.xlu1 %v12560_v44, %s7948_s13  ;;  %v12563_v48 = vld [vmem:[#allocation30_spill] sm:$0xff]  ;;  %v12564_v44 = vld [vmem:[#allocation96_spill] sm:$0xff] }
 0x1d6   : > { %1999 = vrot.lane.b32.xlu0 %v12559_v38, %s7948_s13  ;;  %v3135_v38 = vrot.slane %v9572_v36, 2  ;;  %v12568_v61 = vld [vmem:[#allocation100_spill] sm:$0xff] }
 0x1d7   : > { %v1797_v16 = vadd.f32 %v12563_v48, %v1262_v20  ;;  %v1183_v15 = vpop.permute.xlu1 %1182  ;;  %v9721_v48 = vpop.f32.mrb[92].mxu0 }
 0x1d8   : > { %v1972_v60 = vpop.permute.xlu0 %1971  ;;  %v1263_v0 = vadd.f32 %v1183_v15, %v1054_v56  ;;  %v2763_v49 = vpop.f32.mrb[93].mxu0  ;;  %v9726_v30 = vsel %vm1071_vm3, %v3135_v38, %v3136_v9  ;;  %v12571_v38 = vld [vmem:[#allocation98_spill] sm:$0xff] }
 0x1d9   : > { %1210 = vrot.lane.b32.xlu1 %v12564_v44, %s7949_s14  ;;  %v2053_v20 = vadd.f32 %v1972_v60, %v1797_v16 }
 0x1da   : > { %1003 = vrot.lane.b32.xlu0 %v12565_v42, %s7948_s13  ;;  %v1798_v56 = vadd.f32 %v12566_v55, %v1263_v0  ;;  %v3141_v42 = vrot.slane %v9655_v45, 2  ;;  %v2935_v0 = vrot.slane %v2763_v49, 1 }
 0x1db   : > { %v1974_v15 = vpop.permute.xlu1 %1973 }
 0x1dc   : > { %v2180_v44 = vpop.permute.xlu0 %2179  ;;  %v2054_v16 = vadd.f32 %v1974_v15, %v1798_v56  ;;  %v9739_v9 = vsel %vm1071_vm3, %v3140_v11, %v3141_v42  ;;  %v9746_v19 = vsel %vm862_vm2, %v2933_v50, %v2935_v0  ;;  %v12574_v56 = vld [vmem:[#allocation35_spill] sm:$0xff]  ;;  %v12580_v0 = vld [vmem:[#allocation36_spill] sm:$0xff] }
 0x1dd   : > { %v2261_v53 = vadd.f32 %v2180_v44, %v2053_v20  ;;  %2001 = vrot.lane.b32.xlu1 %v12567_v62, %s7948_s13  ;;  %12570 = vst [vmem:[#allocation23_spill] sm:$0xff] %v9739_v9  ;;  %v12572_v62 = vld [vmem:[#allocation102_spill] sm:$0xff]  ;;  %12573 = vst [vmem:[#allocation22_spill] sm:$0xff] %v9746_v19 }
 0x1de   : > { %1212 = vrot.lane.b32.xlu0 %v12568_v61, %s7949_s14  ;;  %v3143_v61 = vrot.slane %v2763_v49, 2  ;;  %v12578_v49 = vld [vmem:[#allocation103_spill] sm:$0xff] }
 0x1df   : > { %v9736_v60 = vadd.f32 %v9255_v4, %v2261_v53  ;;  %v2182_v20 = vpop.permute.xlu1 %2181 }
 0x1e0   : > { %v976_v55 = vpop.permute.xlu0 %975  ;;  %v2262_v44 = vadd.f32 %v2182_v20, %v2054_v16  ;;  %v9761_v50 = vsel %vm1071_vm3, %v3141_v42, %v3143_v61 }
 0x1e1   : > { %12569 = vst [vmem:[#allocation21_spill] sm:$0xff] %v9736_v60  ;;  %2209 = vrot.lane.b32.xlu1 %v12571_v38, %s7949_s14  ;;  %v1055_v15 = vadd.f32 %v976_v55, %v12574_v56  ;;  %v12577_v38 = vld [vmem:[#allocation104_spill] sm:$0xff]  ;;  %12579 = vst [vmem:[#allocation77_spill] sm:$0xff] %v9761_v50 }
 0x1e2   : > { %2003 = vrot.lane.b32.xlu0 %v12572_v62, %s7948_s13  ;;  %v9750_v4 = vadd.f32 %v9284_v58, %v2262_v44  ;;  %v9752_v53 = vpop.f32.mrb[48].mxu1 }
 0x1e3   : > { %v2184_v16 = vpop.permute.xlu1 %2183  ;;  %v9754_v60 = vpop.f32.mrb[49].mxu1 }
 0x1e4   : > { %12575 = vst [vmem:[#allocation24_spill] sm:$0xff] %v9750_v4  ;;  %v1185_v11 = vpop.permute.xlu0 %1184  ;;  %12576 = vst [vmem:[#allocation81_spill] sm:$0xff] %v9754_v60  ;;  %v7705_v58 = vpop.f32.mrb[94].mxu0 }
 0x1e5   : > { %v1264_v20 = vadd.f32 %v1185_v11, %v1055_v15  ;;  %1005 = vrot.lane.b32.xlu1 %v12577_v38, %s7948_s13  ;;  %v2940_v56 = vrot.slane %v7705_v58, 1  ;;  %v9764_v19 = vpop.f32.mrb[95].mxu0  ;;  %v12582_v15 = vld [vmem:[#allocation105_spill] sm:$0xff]  ;;  %v12583_v11 = vld [vmem:[#allocation106_spill] sm:$0xff]  ;;  %v2937_v38 = vrot.slane %v9721_v48, 1 }
 0x1e6   : > { %2211 = vrot.lane.b32.xlu0 %v12578_v49, %s7949_s14  ;;  %12581 = vst [vmem:[#allocation82_spill] sm:$0xff] %v9764_v19  ;;  %v3148_v49 = vrot.slane %v7705_v58, 2  ;;  %v2938_v42 = vrot.slane %v9764_v19, 1  ;;  %v3146_v61 = vrot.slane %v9764_v19, 2  ;;  %v12586_v58 = vld [vmem:[#allocation39_spill] sm:$0xff]  ;;  %v3145_v19 = vrot.slane %v9721_v48, 2 }
 0x1e7   : > { %v1799_v55 = vadd.f32 %v12580_v0, %v1264_v20  ;;  %v978_v62 = vpop.permute.xlu1 %977  ;;  %v12584_v0 = vld [vmem:[#allocation33_spill] sm:$0xff] }
 0x1e8   : > { %v1976_v44 = vpop.permute.xlu0 %1975  ;;  %v1056_v50 = vadd.f32 %v12584_v0, %v978_v62  ;;  %v12587_v62 = vld [vmem:[#allocation37_spill] sm:$0xff]  ;;  %v12589_v0 = vmov 0.0  }
 0x1e9   : > { %v2055_v4 = vadd.f32 %v1976_v44, %v1799_v55  ;;  %1214 = vrot.lane.b32.xlu1 %v12582_v15, %s7949_s14  ;;  %v9775_v44 = vsel %vm862_vm2, %v2938_v42, %v2940_v56  ;;  %3365 = vst.msk [vmem:[#allocation2 + $0x18] sm:$0x1] %vm3364_vm4, %v12589_v0  ;;  %3366 = vst.msk [vmem:[#allocation2 + $0x30] sm:$0x1] %vm3364_vm4, %v12589_v0 }
 0x1ea   : > { %2942 = vrot.lane.b32.xlu0 %v12583_v11, %s7948_s13  ;;  %v12585_v11 = vld [vmem:[#allocation107_spill] sm:$0xff]  ;;  %3367 = vst.msk [vmem:[#allocation2 + $0x48] sm:$0x1] %vm3364_vm4, %v12589_v0  ;;  %3368 = vst.msk [vmem:[#allocation2 + $0x60] sm:$0x1] %vm3364_vm4, %v12589_v0 }
 0x1eb   : > { %v2263_v20 = vadd.f32 %v2184_v16, %v2055_v4  ;;  %v1187_v9 = vpop.permute.xlu1 %1186  ;;  %v9786_v4 = vsel %vm1071_vm3, %v3146_v61, %v3148_v49  ;;  %v9789_v16 = vsel %vm862_vm2, %v2937_v38, %v2938_v42  ;;  %3369 = vst.msk [vmem:[#allocation2 + $0x78] sm:$0x1] %vm3364_vm4, %v12589_v0  ;;  %3370 = vst.msk [vmem:[#allocation2 + $0x90] sm:$0x1] %vm3364_vm4, %v12589_v0  ;;  %v12590_v38 = vld [vmem:[#allocation108_spill] sm:$0xff] }
 0x1ec   : > { %v980_v55 = vpop.permute.xlu0 %979  ;;  %v1265_v60 = vadd.f32 %v1187_v9, %v1056_v50  ;;  %v12588_v9 = vld [vmem:[#allocation34_spill] sm:$0xff]  ;;  %3371 = vst.msk [vmem:[#allocation2 + $0xa8] sm:$0x1] %vm3364_vm4, %v12589_v0  ;;  %3372 = vst.msk [vmem:[#allocation2 + $0xc0] sm:$0x1] %vm3364_vm4, %v12589_v0  ;;  %v9830_v49 = vsel %vm1071_vm3, %v3145_v19, %v3146_v61  ;;  %v12592_v19 = vld [vmem:[#allocation40_spill] sm:$0xff] }
 0x1ed   : > { %v9778_v15 = vadd.f32 %v9299_v12, %v2263_v20  ;;  %2005 = vrot.lane.b32.xlu1 %v12585_v11, %s7948_s13  ;;  %v1057_v56 = vadd.f32 %v12587_v62, %v980_v55  ;;  %3373 = vst.msk [vmem:[#allocation2 + $0xd8] sm:$0x1] %vm3364_vm4, %v12589_v0  ;;  %3374 = vst.msk [vmem:[#allocation2 + $0xf0] sm:$0x1] %vm3364_vm4, %v12589_v0  ;;  %v12591_v55 = vld [vmem:[#allocation38_spill] sm:$0xff]  ;;  %v3432_v61 = vld [vmem:[#allocation2 + $0x10] sm:$0xff] }
 0x1ee   : > { %2944 = vrot.lane.b32.xlu0 %v12586_v58, %s7948_s13  ;;  %v1800_v50 = vadd.f32 %v12588_v9, %v1265_v60  ;;  %3375 = vst.msk [vmem:[#allocation2 + $0x108] sm:$0x1] %vm3364_vm4, %v12589_v0  ;;  %3376 = vst.msk [vmem:[#allocation2 + $0x120] sm:$0x1] %vm3364_vm4, %v12589_v0  ;;  %7711 = vmatprep.mubr.msk.f32.mxu1 %vm328_vm1, %v3432_v61 }
 0x1ef   : > { %v1978_v12 = vpop.permute.xlu1 %1977  ;;  %3377 = vst.msk [vmem:[#allocation2 + $0x138] sm:$0x1] %vm3364_vm4, %v12589_v0  ;;  %3378 = vst.msk [vmem:[#allocation2 + $0x150] sm:$0x1] %vm3364_vm4, %v12589_v0 }
 0x1f0   : > { %v1189_v20 = vpop.permute.xlu0 %1188  ;;  %3379 = vst.msk [vmem:[#allocation2 + $0x168] sm:$0x1] %vm3364_vm4, %v12589_v0  ;;  %3380 = vst.msk [vmem:[#allocation2 + $0x180] sm:$0x1] %vm3364_vm4, %v12589_v0  ;;  %v2056_v42 = vadd.f32 %v1978_v12, %v1800_v50 }
 0x1f1   : > { %v1266_v60 = vadd.f32 %v1189_v20, %v1057_v56  ;;  %2213 = vrot.lane.b32.xlu1 %v12590_v38, %s7949_s14  ;;  %3382 = vst.msk [vmem:[#allocation2 + $0x29] sm:$0x7f] %vm3381_vm5, %v12589_v0  ;;  %3383 = vst.msk [vmem:[#allocation2 + $0x41] sm:$0x7f] %vm3381_vm5, %v12589_v0 }
 0x1f2   : > { %2946 = vrot.lane.b32.xlu0 %v9266_v2, %s7948_s13  ;;  %3384 = vst.msk [vmem:[#allocation2 + $0x59] sm:$0x7f] %vm3381_vm5, %v12589_v0  ;;  %3385 = vst.msk [vmem:[#allocation2 + $0x71] sm:$0x7f] %vm3381_vm5, %v12589_v0 }
 0x1f3   : > { %v1801_v11 = vadd.f32 %v12591_v55, %v1266_v60  ;;  %v2186_v58 = vpop.permute.xlu1 %2185  ;;  %3386 = vst.msk [vmem:[#allocation2 + $0x89] sm:$0x7f] %vm3381_vm5, %v12589_v0  ;;  %3387 = vst.msk [vmem:[#allocation2 + $0xa1] sm:$0x7f] %vm3381_vm5, %v12589_v0  ;;  %v12593_v60 = vld [vmem:[#allocation3_spill] sm:$0xff] }
 0x1f4   : > { %v1980_v62 = vpop.permute.xlu0 %1979  ;;  %3388 = vst.msk [vmem:[#allocation2 + $0xb9] sm:$0x7f] %vm3381_vm5, %v12589_v0  ;;  %3389 = vst.msk [vmem:[#allocation2 + $0xd1] sm:$0x7f] %vm3381_vm5, %v12589_v0  ;;  %v2264_v2 = vadd.f32 %v2186_v58, %v2056_v42  ;;  %v12596_v58 = vld [vmem:[#allocation8_spill] sm:$0xff] }
 0x1f5   : > { %3390 = vst.msk [vmem:[#allocation2 + $0xe9] sm:$0x7f] %vm3381_vm5, %v12589_v0  ;;  %3391 = vst.msk [vmem:[#allocation2 + $0x101] sm:$0x7f] %vm3381_vm5, %v12589_v0  ;;  %3150 = vrot.lane.b32.xlu1 %v9270_v52, %s7949_s14  ;;  %v2057_v56 = vadd.f32 %v1980_v62, %v1801_v11  ;;  %v12594_v52 = vld [vmem:[#allocation43_spill] sm:$0xff]  ;;  %v12597_v62 = vld [vmem:[#allocation44_spill] sm:$0xff] }
 0x1f6   : > { %3392 = vst.msk [vmem:[#allocation2 + $0x119] sm:$0x7f] %vm3381_vm5, %v12589_v0  ;;  %3393 = vst.msk [vmem:[#allocation2 + $0x131] sm:$0x7f] %vm3381_vm5, %v12589_v0  ;;  %3154 = vrot.lane.b32.xlu0 %v12592_v19, %s7949_s14  ;;  %v9871_v9 = vadd.f32 %v9292_v31, %v2264_v2  ;;  %v12595_v31 = vld [vmem:[#allocation4_spill] sm:$0xff] }
 0x1f7   : > { %3394 = vst.msk [vmem:[#allocation2 + $0x149] sm:$0x7f] %vm3381_vm5, %v12589_v0  ;;  %3395 = vst.msk [vmem:[#allocation2 + $0x161] sm:$0x7f] %vm3381_vm5, %v12589_v0  ;;  %v982_v50 = vpop.permute.xlu1 %981 }
 0x1f8   : > { %3396 = vst.msk [vmem:[#allocation2 + $0x179] sm:$0x7f] %vm3381_vm5, %v12589_v0  ;;  %3397 = vst.msk [vmem:[#allocation2 + $0x191] sm:$0x7f] %vm3381_vm5, %v12589_v0  ;;  %v2188_v12 = vpop.permute.xlu0 %2187  ;;  %v1058_v0 = vadd.f32 %v982_v50, %v12594_v52 }
 0x1f9   : > { %v2265_v20 = vadd.f32 %v2188_v12, %v2057_v56  ;;  %3152 = vrot.lane.b32.xlu1 %v12593_v60, %s7949_s14  ;;  %v12600_v12 = vld [vmem:[#allocation50_spill] sm:$0xff] }
 0x1fa   : > { %2950 = vrot.lane.b32.xlu0 %v9302_v32, %s7948_s13  ;;  %v12598_v32 = vld [vmem:[#allocation7_spill] sm:$0xff] }
 0x1fb   : > { %v9879_v38 = vadd.f32 %v9309_v28, %v2265_v20  ;;  %v1191_v42 = vpop.permute.xlu1 %1190  ;;  %v12599_v28 = vld [vmem:[#allocation41_spill] sm:$0xff] }
 0x1fc   : > { %v2190_v55 = vpop.permute.xlu0 %2189  ;;  %v1267_v11 = vadd.f32 %v1191_v42, %v1058_v0 }
 0x1fd   : > { %2948 = vrot.lane.b32.xlu1 %v12595_v31, %s7948_s13  ;;  %v12602_v31 = vld [vmem:[#allocation47_spill] sm:$0xff] }
 0x1fe   : > { %2952 = vrot.lane.b32.xlu0 %v12596_v58, %s7948_s13  ;;  %v1802_v2 = vadd.f32 %v12597_v62, %v1267_v11  ;;  %v12601_v11 = vld [vmem:[#allocation42_spill] sm:$0xff]  ;;  %v12603_v58 = vld [vmem:[#allocation52_spill] sm:$0xff] }
 0x1ff   : > { %v1982_v19 = vpop.permute.xlu1 %1981 }
 0x200   : > { %v984_v61 = vpop.permute.xlu0 %983  ;;  %v2058_v56 = vadd.f32 %v1982_v19, %v1802_v2 }
 0x201   : > { %3156 = vrot.lane.b32.xlu1 %v12598_v32, %s7949_s14  ;;  %v1059_v20 = vadd.f32 %v984_v61, %v12600_v12 }
 0x202   : > { %2954 = vrot.lane.b32.xlu0 %v12599_v28, %s7948_s13  ;;  %v2266_v50 = vadd.f32 %v2190_v55, %v2058_v56 }
 0x203   : > { %v2192_v60 = vpop.permute.xlu1 %2191 }
 0x204   : > { %v1193_v52 = vpop.permute.xlu0 %1192  ;;  %v9892_v42 = vadd.f32 %v9358_v25, %v2266_v50  ;;  %v12604_v25 = vld [vmem:[#allocation45_spill] sm:$0xff] }
 0x205   : > { %v1268_v0 = vadd.f32 %v1193_v52, %v1059_v20  ;;  %3158 = vrot.lane.b32.xlu1 %v12601_v11, %s7949_s14  ;;  %v12605_v20 = vld [vmem:[#allocation55_spill] sm:$0xff]  ;;  %v12606_v52 = vld [vmem:[#allocation49_spill] sm:$0xff] }
 0x206   : > { %3162 = vrot.lane.b32.xlu0 %v12602_v31, %s7949_s14  ;;  %v12607_v31 = vld [vmem:[#allocation56_spill] sm:$0xff] }
 0x207   : > { %v1803_v62 = vadd.f32 %v12603_v58, %v1268_v0  ;;  %v986_v19 = vpop.permute.xlu1 %985 }
 0x208   : > { %v1984_v2 = vpop.permute.xlu0 %1983  ;;  %v1060_v61 = vadd.f32 %v12604_v25, %v986_v19 }
 0x209   : > { %v2059_v32 = vadd.f32 %v1984_v2, %v1803_v62  ;;  %3160 = vrot.lane.b32.xlu1 %v9372_v26, %s7949_s14 }
 0x20a   : > { %2958 = vrot.lane.b32.xlu0 %v9375_v35, %s7948_s13 }
 0x20b   : > { %v2267_v55 = vadd.f32 %v2192_v60, %v2059_v32  ;;  %v1195_v56 = vpop.permute.xlu1 %1194 }
 0x20c   : > { %v988_v28 = vpop.permute.xlu0 %987  ;;  %v1269_v50 = vadd.f32 %v1195_v56, %v1060_v61 }
 0x20d   : > { %v9905_v12 = vadd.f32 %v9381_v33, %v2267_v55  ;;  %2956 = vrot.lane.b32.xlu1 %v9384_v59, %s7948_s13  ;;  %v1061_v26 = vadd.f32 %v12605_v20, %v988_v28  ;;  %v12611_v20 = vld [vmem:[#allocation62_spill] sm:$0xff] }
 0x20e   : > { %2960 = vrot.lane.b32.xlu0 %v9393_v18, %s7948_s13  ;;  %v1804_v0 = vadd.f32 %v12606_v52, %v1269_v50  ;;  %v12608_v18 = vld [vmem:[#allocation51_spill] sm:$0xff] }
 0x20f   : > { %v1986_v35 = vpop.permute.xlu1 %1985 }
 0x210   : > { %v1197_v60 = vpop.permute.xlu0 %1196  ;;  %v2060_v33 = vadd.f32 %v1986_v35, %v1804_v0 }
 0x211   : > { %v1270_v11 = vadd.f32 %v1197_v60, %v1061_v26  ;;  %3164 = vrot.lane.b32.xlu1 %v9401_v29, %s7949_s14  ;;  %v12614_v60 = vld [vmem:[#allocation68_spill] sm:$0xff] }
 0x212   : > { %2962 = vrot.lane.b32.xlu0 %v9410_v6, %s7948_s13  ;;  %v12609_v6 = vld [vmem:[#allocation61_spill] sm:$0xff] }
 0x213   : > { %v1805_v58 = vadd.f32 %v12607_v31, %v1270_v11  ;;  %v2194_v59 = vpop.permute.xlu1 %2193 }
 0x214   : > { %v1988_v62 = vpop.permute.xlu0 %1987  ;;  %v2268_v2 = vadd.f32 %v2194_v59, %v2060_v33  ;;  %v12615_v59 = vld [vmem:[#allocation57_spill] sm:$0xff] }
 0x215   : > { %3166 = vrot.lane.b32.xlu1 %v9417_v34, %s7949_s14  ;;  %v2061_v19 = vadd.f32 %v1988_v62, %v1805_v58  ;;  %v12616_v62 = vld [vmem:[#allocation58_spill] sm:$0xff] }
 0x216   : > { %3170 = vrot.lane.b32.xlu0 %v12608_v18, %s7949_s14  ;;  %v9923_v32 = vadd.f32 %v9378_v7, %v2268_v2  ;;  %v12610_v7 = vld [vmem:[#allocation9_spill] sm:$0xff]  ;;  %v12617_v2 = vld [vmem:[#allocation70_spill] sm:$0xff] }
 0x217   : > { %v990_v29 = vpop.permute.xlu1 %989 }
 0x218   : > { %v2196_v55 = vpop.permute.xlu0 %2195  ;;  %v1062_v61 = vadd.f32 %v990_v29, %v12609_v6 }
 0x219   : > { %v2269_v25 = vadd.f32 %v2196_v55, %v2061_v19  ;;  %3168 = vrot.lane.b32.xlu1 %v9440_v46, %s7949_s14 }
 0x21a   : > { %2966 = vrot.lane.b32.xlu0 %v9443_v10, %s7948_s13  ;;  %v12612_v10 = vld [vmem:[#allocation53_spill] sm:$0xff] }
 0x21b   : > { %v9931_v34 = vadd.f32 %v9432_v21, %v2269_v25  ;;  %v1199_v56 = vpop.permute.xlu1 %1198  ;;  %v12613_v21 = vld [vmem:[#allocation10_spill] sm:$0xff] }
 0x21c   : > { %v2198_v28 = vpop.permute.xlu0 %2197  ;;  %v1271_v50 = vadd.f32 %v1199_v56, %v1062_v61 }
 0x21d   : > { %2964 = vrot.lane.b32.xlu1 %v9450_v8, %s7948_s13 }
 0x21e   : > { %2968 = vrot.lane.b32.xlu0 %v12610_v7, %s7948_s13  ;;  %v1806_v26 = vadd.f32 %v12611_v20, %v1271_v50  ;;  %v12619_v7 = vld [vmem:[#allocation13_spill] sm:$0xff] }
 0x21f   : > { %v1990_v46 = vpop.permute.xlu1 %1989  ;;  %v12620_v20 = vld [vmem:[#allocation73_spill] sm:$0xff] }
 0x220   : > { %v992_v52 = vpop.permute.xlu0 %991  ;;  %v2062_v0 = vadd.f32 %v1990_v46, %v1806_v26  ;;  %v12621_v26 = vld [vmem:[#allocation67_spill] sm:$0xff] }
 0x221   : > { %3172 = vrot.lane.b32.xlu1 %v12612_v10, %s7949_s14  ;;  %v1063_v11 = vadd.f32 %v992_v52, %v12614_v60  ;;  %v12622_v10 = vld [vmem:[#allocation74_spill] sm:$0xff] }
 0x222   : > { %2970 = vrot.lane.b32.xlu0 %v12613_v21, %s7948_s13  ;;  %v2270_v35 = vadd.f32 %v2198_v28, %v2062_v0 }
 0x223   : > { %v2200_v33 = vpop.permute.xlu1 %2199 }
 0x224   : > { %v1201_v31 = vpop.permute.xlu0 %1200  ;;  %v9944_v58 = vadd.f32 %v9498_v51, %v2270_v35  ;;  %v12618_v51 = vld [vmem:[#allocation63_spill] sm:$0xff] }
 0x225   : > { %v1272_v8 = vadd.f32 %v1201_v31, %v1063_v11  ;;  %3174 = vrot.lane.b32.xlu1 %v12615_v59, %s7949_s14  ;;  %v12624_v59 = vld [vmem:[#allocation78_spill] sm:$0xff] }
 0x226   : > { %2972 = vrot.lane.b32.xlu0 %v12616_v62, %s7948_s13 }
 0x227   : > { %v1807_v18 = vadd.f32 %v12617_v2, %v1272_v8  ;;  %v994_v29 = vpop.permute.xlu1 %993 }
 0x228   : > { %v1992_v19 = vpop.permute.xlu0 %1991  ;;  %v1064_v6 = vadd.f32 %v12618_v51, %v994_v29  ;;  %v12627_v29 = vld [vmem:[#allocation79_spill] sm:$0xff] }
 0x229   : > { %v2063_v55 = vadd.f32 %v1992_v19, %v1807_v18  ;;  %3176 = vrot.lane.b32.xlu1 %v9513_v22, %s7949_s14  ;;  %v12626_v19 = vld [vmem:[#allocation64_spill] sm:$0xff] }
 0x22a   : > { %3180 = vrot.lane.b32.xlu0 %v9516_v47, %s7949_s14 }
 0x22b   : > { %v2271_v25 = vadd.f32 %v2200_v33, %v2063_v55  ;;  %v1203_v61 = vpop.permute.xlu1 %1202 }
 0x22c   : > { %v996_v56 = vpop.permute.xlu0 %995  ;;  %v1273_v28 = vadd.f32 %v1203_v61, %v1064_v6  ;;  %v12628_v6 = vld [vmem:[#allocation65_spill] sm:$0xff] }
 0x22d   : > { %v9957_v50 = vadd.f32 %v9523_v54, %v2271_v25  ;;  %3178 = vrot.lane.b32.xlu1 %v12619_v7, %s7949_s14  ;;  %v1065_v22 = vadd.f32 %v12620_v20, %v996_v56  ;;  %v12630_v56 = vld [vmem:[#allocation84_spill] sm:$0xff] }
 0x22e   : > { %2974 = vrot.lane.b32.xlu0 %v9535_v63, %s7948_s13  ;;  %v1808_v46 = vadd.f32 %v12621_v26, %v1273_v28 }
 0x22f   : > { %v1994_v47 = vpop.permute.xlu1 %1993 }
 0x230   : > { %v1205_v52 = vpop.permute.xlu0 %1204  ;;  %v2064_v54 = vadd.f32 %v1994_v47, %v1808_v46  ;;  %v12631_v46 = vld [vmem:[#allocation69_spill] sm:$0xff] }
 0x231   : > { %v1274_v0 = vadd.f32 %v1205_v52, %v1065_v22  ;;  %3182 = vrot.lane.b32.xlu1 %v9542_v23, %s7949_s14  ;;  %v12632_v47 = vld [vmem:[#allocation17_spill] sm:$0xff]  ;;  %v12633_v52 = vld [vmem:[#allocation90_spill] sm:$0xff] }
 0x232   : > { %2978 = vrot.lane.b32.xlu0 %v9550_v39, %s7948_s13  ;;  %v12623_v39 = vld [vmem:[#allocation16_spill] sm:$0xff] }
 0x233   : > { %v1809_v21 = vadd.f32 %v12622_v10, %v1274_v0  ;;  %v2202_v35 = vpop.permute.xlu1 %2201 }
 0x234   : > { %v1996_v60 = vpop.permute.xlu0 %1995  ;;  %v2272_v11 = vadd.f32 %v2202_v35, %v2064_v54 }
 0x235   : > { %2976 = vrot.lane.b32.xlu1 %v9557_v24, %s7948_s13  ;;  %v2065_v63 = vadd.f32 %v1996_v60, %v1809_v21 }
 0x236   : > { %2980 = vrot.lane.b32.xlu0 %v9567_v1, %s7948_s13  ;;  %v9975_v33 = vadd.f32 %v9519_v43, %v2272_v11  ;;  %v12625_v43 = vld [vmem:[#allocation59_spill] sm:$0xff] }
 0x237   : > { %v998_v23 = vpop.permute.xlu1 %997 }
 0x238   : > { %v2204_v31 = vpop.permute.xlu0 %2203  ;;  %v1066_v62 = vadd.f32 %v998_v23, %v12624_v59 }
 0x239   : > { %v2273_v8 = vadd.f32 %v2204_v31, %v2065_v63  ;;  %3184 = vrot.lane.b32.xlu1 %v9581_v13, %s7949_s14 }
 0x23a   : > { %3188 = vrot.lane.b32.xlu0 %v12623_v39, %s7949_s14  ;;  %v12636_v39 = vld [vmem:[#allocation89_spill] sm:$0xff] }
 0x23b   : > { %v9983_v24 = vadd.f32 %v9572_v36, %v2273_v8  ;;  %v1207_v2 = vpop.permute.xlu1 %1206  ;;  %v12629_v36 = vld [vmem:[#allocation19_spill] sm:$0xff]  ;;  %v12635_v8 = vld [vmem:[#allocation85_spill] sm:$0xff] }
 0x23c   : > { %v2206_v1 = vpop.permute.xlu0 %2205  ;;  %v1275_v18 = vadd.f32 %v1207_v2, %v1066_v62 }
 0x23d   : > { %3186 = vrot.lane.b32.xlu1 %v12625_v43, %s7949_s14  ;;  %v12639_v43 = vld [vmem:[#allocation92_spill] sm:$0xff] }
 0x23e   : > { %2982 = vrot.lane.b32.xlu0 %v12626_v19, %s7948_s13  ;;  %v1810_v55 = vadd.f32 %v12627_v29, %v1275_v18  ;;  %v12638_v18 = vld [vmem:[#allocation18_spill] sm:$0xff] }
 0x23f   : > { %v1998_v13 = vpop.permute.xlu1 %1997 }
 0x240   : > { %v1000_v25 = vpop.permute.xlu0 %999  ;;  %v2066_v51 = vadd.f32 %v1998_v13, %v1810_v55  ;;  %v12641_v13 = vld [vmem:[#allocation76_spill] sm:$0xff] }
 0x241   : > { %3190 = vrot.lane.b32.xlu1 %v12628_v6, %s7949_s14  ;;  %v1067_v28 = vadd.f32 %v1000_v25, %v12630_v56  ;;  %v12642_v56 = vld [vmem:[#allocation88_spill] sm:$0xff] }
 0x242   : > { %2986 = vrot.lane.b32.xlu0 %v12629_v36, %s7948_s13  ;;  %v2274_v61 = vadd.f32 %v2206_v1, %v2066_v51  ;;  %v12637_v1 = vld [vmem:[#allocation71_spill] sm:$0xff] }
 0x243   : > { %v2208_v7 = vpop.permute.xlu1 %2207 }
 0x244   : > { %v1209_v20 = vpop.permute.xlu0 %1208  ;;  %v9996_v26 = vadd.f32 %v9634_v14, %v2274_v61  ;;  %v12634_v14 = vld [vmem:[#allocation80_spill] sm:$0xff] }
 0x245   : > { %v1276_v22 = vadd.f32 %v1209_v20, %v1067_v28  ;;  %2984 = vrot.lane.b32.xlu1 %v12631_v46, %s7948_s13 }
 0x246   : > { %2988 = vrot.lane.b32.xlu0 %v12632_v47, %s7948_s13 }
 0x247   : > { %v1811_v0 = vadd.f32 %v12633_v52, %v1276_v22  ;;  %v1002_v10 = vpop.permute.xlu1 %1001  ;;  %v12644_v52 = vld [vmem:[#allocation81_spill] sm:$0xff] }
 0x248   : > { %v2000_v54 = vpop.permute.xlu0 %1999  ;;  %v1068_v60 = vadd.f32 %v12634_v14, %v1002_v10  ;;  %v12646_v10 = vld [vmem:[#allocation22_spill] sm:$0xff] }
 0x249   : > { %v2067_v21 = vadd.f32 %v2000_v54, %v1811_v0  ;;  %3192 = vrot.lane.b32.xlu1 %v9649_v57, %s7949_s14 }
 0x24a   : > { %3196 = vrot.lane.b32.xlu0 %v9652_v40, %s7949_s14 }
 0x24b   : > { %v2275_v35 = vadd.f32 %v2208_v7, %v2067_v21  ;;  %v1211_v11 = vpop.permute.xlu1 %1210 }
 0x24c   : > { %v1004_v63 = vpop.permute.xlu0 %1003  ;;  %v1277_v23 = vadd.f32 %v1211_v11, %v1068_v60 }
 0x24d   : > { %v10009_v31 = vadd.f32 %v9659_v5, %v2275_v35  ;;  %3194 = vrot.lane.b32.xlu1 %v9662_v41, %s7949_s14  ;;  %v1069_v57 = vadd.f32 %v12635_v8, %v1004_v63  ;;  %v4219_v35 = vrot.slane %v12644_v52, 2  ;;  %v12647_v63 = vld [vmem:[#allocation77_spill] sm:$0xff] }
 0x24e   : > { %2990 = vrot.lane.b32.xlu0 %v9671_v3, %s7948_s13  ;;  %v1812_v59 = vadd.f32 %v12636_v39, %v1277_v23  ;;  %v12640_v3 = vld [vmem:[#allocation75_spill] sm:$0xff]  ;;  %v12648_v23 = vld [vmem:[#allocation109_spill] sm:$0xff] }
 0x24f   : > { %v2002_v40 = vpop.permute.xlu1 %2001 }
 0x250   : > { %v1213_v62 = vpop.permute.xlu0 %1212  ;;  %v2068_v5 = vadd.f32 %v2002_v40, %v1812_v59  ;;  %v12650_v59 = vld [vmem:[#allocation82_spill] sm:$0xff] }
 0x251   : > { %v1278_v2 = vadd.f32 %v1213_v62, %v1069_v57  ;;  %3198 = vrot.lane.b32.xlu1 %v12637_v1, %s7949_s14  ;;  %v12649_v57 = vld [vmem:[#allocation6_spill] sm:$0xff] }
 0x252   : > { %2994 = vrot.lane.b32.xlu0 %v12638_v18, %s7948_s13 }
 0x253   : > { %v1813_v19 = vadd.f32 %v12639_v43, %v1278_v2  ;;  %v2210_v41 = vpop.permute.xlu1 %2209  ;;  %v10067_v2 = vld [vmem:[%s12226_s3] ss:$0 sm:$0xff] }
 0x254   : > { %v2004_v29 = vpop.permute.xlu0 %2003  ;;  %v2276_v55 = vadd.f32 %v2210_v41, %v2068_v5  ;;  %v7103_v41 = vld [vmem:[%s12225_s2 + $0x8] sm:$0xf] }
 0x255   : > { %2992 = vrot.lane.b32.xlu1 %v12640_v3, %s7948_s13  ;;  %v2069_v25 = vadd.f32 %v2004_v29, %v1813_v19  ;;  %v10072_v19 = vld [vmem:[%s12227_s4] ss:$0 sm:$0xff]  ;;  %7854 = vmatprep.subr.msk.mxu1 %vm473_vm0, %v7103_v41 }
 0x256   : > { %2996 = vrot.lane.b32.xlu0 %v12641_v13, %s7948_s13  ;;  %v10027_v51 = vadd.f32 %v9655_v45, %v2276_v55  ;;  %v12643_v45 = vld [vmem:[#allocation101_spill] sm:$0xff]  ;;  %7855 = vmatpush3.msk.msra.mxu1 %vm473_vm0, %v7103_v41 }
 0x257   : > { %v1006_v6 = vpop.permute.xlu1 %1005  ;;  %v12651_v29 = vld [vmem:[#allocation5_spill] sm:$0xff] }
 0x258   : > { %v2212_v36 = vpop.permute.xlu0 %2211  ;;  %v1070_v28 = vadd.f32 %v1006_v6, %v12642_v56 }
 0x259   : > { %v2277_v61 = vadd.f32 %v2212_v36, %v2069_v25  ;;  %3200 = vrot.lane.b32.xlu1 %v9715_v27, %s7949_s14  ;;  %v4012_v27 = vrot.slane %v9752_v53, 1 }
 0x25a   : > { %3204 = vrot.lane.b32.xlu0 %v9718_v17, %s7949_s14  ;;  %v4011_v17 = vrot.slane %v12644_v52, 1 }
 0x25b   : > { %v10035_v7 = vadd.f32 %v9721_v48, %v2277_v61  ;;  %v1215_v20 = vpop.permute.xlu1 %1214  ;;  %v12645_v48 = vld [vmem:[#allocation23_spill] sm:$0xff] }
 0x25c   : > { %v2943_v22 = vpop.permute.xlu0 %2942  ;;  %v1279_v46 = vadd.f32 %v1215_v20, %v1070_v28 }
 0x25d   : > { %3202 = vrot.lane.b32.xlu1 %v9726_v30, %s7949_s14  ;;  %v4220_v30 = vrot.slane %v9752_v53, 2  ;;  %v3038_v8 = vadd.f32 %v2943_v22, %v12648_v23  ;;  %v12655_v23 = vld [vmem:[#allocation48_spill] sm:$0xff] }
 0x25e   : > { %2998 = vrot.lane.b32.xlu0 %v9733_v37, %s7948_s13  ;;  %v1814_v47 = vadd.f32 %v12643_v45, %v1279_v46  ;;  %v4013_v37 = vsel %vm862_vm2, %v4011_v17, %v4012_v27  ;;  %v12652_v46 = vld [vmem:[#allocation46_spill] sm:$0xff] }
 0x25f   : > { %v2006_v0 = vpop.permute.xlu1 %2005  ;;  %v4221_v62 = vsel %vm1071_vm3, %v4219_v35, %v4220_v30 }
 0x260   : > { %v2945_v54 = vpop.permute.xlu0 %2944  ;;  %v2070_v21 = vadd.f32 %v2006_v0, %v1814_v47  ;;  %v12653_v0 = vld [vmem:[#allocation11_spill] sm:$0xff] }
 0x261   : > { %3206 = vrot.lane.b32.xlu1 %v12645_v48, %s7949_s14  ;;  %v3039_v55 = vadd.f32 %v2945_v54, %v12651_v29 }
 0x262   : > { %3000 = vrot.lane.b32.xlu0 %v12646_v10, %s7948_s13  ;;  %v12654_v10 = vld [vmem:[#allocation12_spill] sm:$0xff] }
 0x263   : > { %v2214_v14 = vpop.permute.xlu1 %2213 }
 0x264   : > { %v2947_v60 = vpop.permute.xlu0 %2946  ;;  %v2278_v11 = vadd.f32 %v2214_v14, %v2070_v21 }
 0x265   : > { %3208 = vrot.lane.b32.xlu1 %v12647_v63, %s7949_s14  ;;  %v3040_v39 = vadd.f32 %v2947_v60, %v12649_v57 }
 0x266   : > { %4091 = vrot.lane.b32.xlu0 %v4013_v37, %s7948_s13  ;;  %v10059_v40 = vadd.f32 %v12650_v59, %v2278_v11 }
 0x267   : > { %v3151_v1 = vpop.permute.xlu1 %3150 }
 0x268   : > { %v3155_v18 = vpop.permute.xlu0 %3154  ;;  %v3246_v5 = vadd.f32 %v3151_v1, %v3038_v8 }
 0x269   : > { %v3248_v43 = vadd.f32 %v3155_v18, %v3040_v39  ;;  %3004 = vrot.lane.b32.xlu1 %v9775_v44, %s7948_s13 }
 0x26a   : > { %4299 = vrot.lane.b32.xlu0 %v4221_v62, %s7949_s14  ;;  %v3285_v3 = vmul.f32 %v10067_v2, %v3246_v5 }
 0x26b   : > { %v3287_v13 = vmul.f32 %v10067_v2, %v3248_v43  ;;  %v3153_v25 = vpop.permute.xlu1 %3152 }
 0x26c   : > { %v2951_v6 = vpop.permute.xlu0 %2950  ;;  %v3324_v44 = vadd.f32 %v10072_v19, %v3285_v3  ;;  %v3247_v61 = vadd.f32 %v3153_v25, %v3039_v55 }
 0x26d   : > { %v3326_v36 = vadd.f32 %v10072_v19, %v3287_v13  ;;  %3212 = vrot.lane.b32.xlu1 %v9786_v4, %s7949_s14  ;;  %v3042_v54 = vadd.f32 %v2951_v6, %v12653_v0  ;;  %v12656_v6 = vld [vmem:[#allocation54_spill] sm:$0xff] }
 0x26e   : > { %3002 = vrot.lane.b32.xlu0 %v9789_v16, %s7948_s13  ;;  %3398 = vst.msk [vmem:[#allocation2 + $0x19] sm:$0xff] %vm328_vm1, %v3324_v44  ;;  %v3286_v56 = vmul.f32 %v10067_v2, %v3247_v61 }
 0x26f   : > { %3400 = vst.msk [vmem:[#allocation2 + $0x31] sm:$0xff] %vm328_vm1, %v3326_v36  ;;  %v2949_v28 = vpop.permute.xlu1 %2948 }
 0x270   : > { %v2953_v20 = vpop.permute.xlu0 %2952  ;;  %v3325_v22 = vadd.f32 %v10072_v19, %v3286_v56  ;;  %v3041_v4 = vadd.f32 %v2949_v28, %v12652_v46 }
 0x271   : > { %v3043_v8 = vadd.f32 %v2953_v20, %v12655_v23  ;;  %v12657_v20 = vld [vmem:[#allocation15_spill] sm:$0xff] }
 0x272   : > { %3210 = vrot.lane.b32.xlu0 %v9830_v49, %s7949_s14  ;;  %3399 = vst.msk [vmem:[#allocation2 + $0x21] sm:$0xff] %vm328_vm1, %v3325_v22 }
 0x273   : > { %v3157_v45 = vpop.permute.xlu1 %3156 }
 0x274   : > { %v2955_v47 = vpop.permute.xlu0 %2954  ;;  %v3249_v16 = vadd.f32 %v3157_v45, %v3041_v4  ;;  %v12658_v4 = vld [vmem:[#allocation60_spill] sm:$0xff] }
 0x275   : > { %v3433_v17 = vld [vmem:[#allocation2 + $0x18] sm:$0xff]  ;;  %v3044_v21 = vadd.f32 %v2955_v47, %v12654_v10 }
 0x276   : > { %v3288_v48 = vmul.f32 %v10067_v2, %v3249_v16  ;;  %7712 = vmatmul.mubr.msk.f32.gmra.mrb[50].mxu1 %vm328_vm1, %v3433_v17  ;;  %7782 = vmatprep.mubr.msk.f32.mxu0 %vm328_vm1, %v3433_v17  ;;  %v10113_v1 = vld [vmem:[#allocation2 + $0x30] sm:$0xff] }
 0x277   : > { %v3159_v35 = vpop.permute.xlu1 %3158 }
 0x278   : > { %v3163_v49 = vpop.permute.xlu0 %3162  ;;  %v3327_v37 = vadd.f32 %v10072_v19, %v3288_v48  ;;  %v3250_v14 = vadd.f32 %v3159_v35, %v3042_v54 }
 0x279   : > { %v3252_v60 = vadd.f32 %v3163_v49, %v3044_v21  ;;  %v3434_v11 = vld [vmem:[#allocation2 + $0x20] sm:$0xff]  ;;  %v3435_v63 = vld [vmem:[#allocation2 + $0x28] sm:$0xff] }
 0x27a   : > { %3401 = vst.msk [vmem:[#allocation2 + $0x39] sm:$0xff] %vm328_vm1, %v3327_v37  ;;  %v3289_v57 = vmul.f32 %v10067_v2, %v3250_v14  ;;  %7714 = vmatprep.mubr.msk.f32.mxu1 %vm328_vm1, %v3434_v11  ;;  %7783 = vmatmul.mubr.msk.f32.vlgmr.msra.gmra.mrb[96].mxu0 %vm328_vm1, %v3434_v11  ;;  %v12659_v21 = vld [vmem:[#allocation14_spill] sm:$0xff] }
 0x27b   : > { %v3291_v39 = vmul.f32 %v10067_v2, %v3252_v60  ;;  %v3161_v59 = vpop.permute.xlu1 %3160  ;;  %7715 = vmatmul.mubr.msk.f32.gmra.mrb[52].mxu1 %vm328_vm1, %v3435_v63  ;;  %7785 = vmatprep.mubr.msk.f32.mxu0 %vm328_vm1, %v3435_v63 }
 0x27c   : > { %v2959_v62 = vpop.permute.xlu0 %2958  ;;  %v3328_v18 = vadd.f32 %v10072_v19, %v3289_v57  ;;  %v3251_v43 = vadd.f32 %v3161_v59, %v3043_v8  ;;  %7717 = vmatprep.mubr.msk.f32.mxu1 %vm328_vm1, %v10113_v1 }
 0x27d   : > { %v3330_v5 = vadd.f32 %v10072_v19, %v3291_v39  ;;  %v3046_v22 = vadd.f32 %v2959_v62, %v12657_v20 }
 0x27e   : > { %3402 = vst.msk [vmem:[#allocation2 + $0x49] sm:$0xff] %vm328_vm1, %v3328_v18  ;;  %v3290_v41 = vmul.f32 %v10067_v2, %v3251_v43  ;;  %7786 = vmatmul.mubr.msk.f32.gmra.mrb[98].mxu0 %vm328_vm1, %v10113_v1  ;;  %v12660_v43 = vld [vmem:[#allocation66_spill] sm:$0xff] }
 0x27f   : > { %3404 = vst.msk [vmem:[#allocation2 + $0x61] sm:$0xff] %vm328_vm1, %v3330_v5  ;;  %v2957_v29 = vpop.permute.xlu1 %2956 }
 0x280   : > { %v2961_v55 = vpop.permute.xlu0 %2960  ;;  %v3329_v3 = vadd.f32 %v10072_v19, %v3290_v41  ;;  %v3045_v44 = vadd.f32 %v2957_v29, %v12656_v6 }
 0x281   : > { %v10125_v13 = vld [vmem:[#allocation2 + $0x38] sm:$0xff]  ;;  %v10127_v25 = vld [vmem:[#allocation2 + $0x40] sm:$0xff]  ;;  %v3047_v35 = vadd.f32 %v2961_v55, %v12659_v21 }
 0x282   : > { %3403 = vst.msk [vmem:[#allocation2 + $0x51] sm:$0xff] %vm328_vm1, %v3329_v3  ;;  %7718 = vmatmul.mubr.msk.f32.gmra.mrb[54].mxu1 %vm328_vm1, %v10125_v13  ;;  %7788 = vmatprep.mubr.msk.f32.mxu0 %vm328_vm1, %v10125_v13 }
 0x283   : > { %v3165_v36 = vpop.permute.xlu1 %3164  ;;  %7720 = vmatprep.mubr.msk.f32.mxu1 %vm328_vm1, %v10127_v25  ;;  %7789 = vmatmul.mubr.msk.f32.gmra.mrb[100].mxu0 %vm328_vm1, %v10127_v25 }
 0x284   : > { %v2963_v61 = vpop.permute.xlu0 %2962  ;;  %v3253_v56 = vadd.f32 %v3165_v36, %v3045_v44  ;;  %v12661_v44 = vld [vmem:[#allocation20_spill] sm:$0xff] }
 0x285   : > { %v10139_v28 = vld [vmem:[#allocation2 + $0x48] sm:$0xff]  ;;  %v3048_v45 = vadd.f32 %v2963_v61, %v12658_v4 }
 0x286   : > { %v3292_v46 = vmul.f32 %v10067_v2, %v3253_v56  ;;  %7721 = vmatmul.mubr.msk.f32.gmra.mrb[56].mxu1 %vm328_vm1, %v10139_v28  ;;  %7791 = vmatprep.mubr.msk.f32.mxu0 %vm328_vm1, %v10139_v28  ;;  %v10165_v11 = vld [vmem:[#allocation2 + $0x60] sm:$0xff] }
 0x287   : > { %v3167_v47 = vpop.permute.xlu1 %3166 }
 0x288   : > { %v3171_v16 = vpop.permute.xlu0 %3170  ;;  %v3331_v17 = vadd.f32 %v10072_v19, %v3292_v46  ;;  %v3254_v0 = vadd.f32 %v3167_v47, %v3046_v22  ;;  %v12662_v47 = vld [vmem:[#allocation72_spill] sm:$0xff] }
 0x289   : > { %v3256_v54 = vadd.f32 %v3171_v16, %v3048_v45  ;;  %v10149_v48 = vld [vmem:[#allocation2 + $0x50] sm:$0xff]  ;;  %v10151_v10 = vld [vmem:[#allocation2 + $0x58] sm:$0xff] }
 0x28a   : > { %3405 = vst.msk [vmem:[#allocation2 + $0x69] sm:$0xff] %vm328_vm1, %v3331_v17  ;;  %v3293_v49 = vmul.f32 %v10067_v2, %v3254_v0  ;;  %7723 = vmatprep.mubr.msk.f32.mxu1 %vm328_vm1, %v10149_v48  ;;  %7792 = vmatmul.mubr.msk.f32.gmra.mrb[102].mxu0 %vm328_vm1, %v10149_v48  ;;  %v12663_v0 = vld [vmem:[#allocation24_spill] sm:$0xff] }
 0x28b   : > { %v3295_v37 = vmul.f32 %v10067_v2, %v3256_v54  ;;  %v3169_v14 = vpop.permute.xlu1 %3168  ;;  %7724 = vmatmul.mubr.msk.f32.gmra.mrb[58].mxu1 %vm328_vm1, %v10151_v10  ;;  %7794 = vmatprep.mubr.msk.f32.mxu0 %vm328_vm1, %v10151_v10 }
 0x28c   : > { %v2967_v60 = vpop.permute.xlu0 %2966  ;;  %v3332_v63 = vadd.f32 %v10072_v19, %v3293_v49  ;;  %v3255_v8 = vadd.f32 %v3169_v14, %v3047_v35  ;;  %7726 = vmatprep.mubr.msk.f32.mxu1 %vm328_vm1, %v10165_v11 }
 0x28d   : > { %v3334_v23 = vadd.f32 %v10072_v19, %v3295_v37  ;;  %v3050_v36 = vadd.f32 %v2967_v60, %v12661_v44 }
 0x28e   : > { %3406 = vst.msk [vmem:[#allocation2 + $0x79] sm:$0xff] %vm328_vm1, %v3332_v63  ;;  %v3294_v57 = vmul.f32 %v10067_v2, %v3255_v8  ;;  %7795 = vmatmul.mubr.msk.f32.gmra.mrb[104].mxu0 %vm328_vm1, %v10165_v11  ;;  %v12664_v63 = vld [vmem:[#allocation21_spill] sm:$0xff] }
 0x28f   : > { %3408 = vst.msk [vmem:[#allocation2 + $0x91] sm:$0xff] %vm328_vm1, %v3334_v23  ;;  %v2965_v39 = vpop.permute.xlu1 %2964 }
 0x290   : > { %v2969_v59 = vpop.permute.xlu0 %2968  ;;  %v3333_v62 = vadd.f32 %v10072_v19, %v3294_v57  ;;  %v3049_v41 = vadd.f32 %v2965_v39, %v12660_v43 }
 0x291   : > { %v10177_v18 = vld [vmem:[#allocation2 + $0x68] sm:$0xff]  ;;  %v10179_v5 = vld [vmem:[#allocation2 + $0x70] sm:$0xff]  ;;  %v3051_v16 = vadd.f32 %v2969_v59, %v12662_v47 }
 0x292   : > { %3407 = vst.msk [vmem:[#allocation2 + $0x81] sm:$0xff] %vm328_vm1, %v3333_v62  ;;  %7727 = vmatmul.mubr.msk.f32.gmra.mrb[60].mxu1 %vm328_vm1, %v10177_v18  ;;  %7797 = vmatprep.mubr.msk.f32.mxu0 %vm328_vm1, %v10177_v18 }
 0x293   : > { %v3173_v29 = vpop.permute.xlu1 %3172  ;;  %7729 = vmatprep.mubr.msk.f32.mxu1 %vm328_vm1, %v10179_v5  ;;  %7798 = vmatmul.mubr.msk.f32.gmra.mrb[106].mxu0 %vm328_vm1, %v10179_v5 }
 0x294   : > { %v2971_v55 = vpop.permute.xlu0 %2970  ;;  %v3257_v3 = vadd.f32 %v3173_v29, %v3049_v41 }
 0x295   : > { %v10191_v6 = vld [vmem:[#allocation2 + $0x78] sm:$0xff]  ;;  %v3052_v23 = vadd.f32 %v2971_v55, %v12664_v63 }
 0x296   : > { %v3296_v61 = vmul.f32 %v10067_v2, %v3257_v3  ;;  %7730 = vmatmul.mubr.msk.f32.gmra.mrb[62].mxu1 %vm328_vm1, %v10191_v6  ;;  %7800 = vmatprep.mubr.msk.f32.mxu0 %vm328_vm1, %v10191_v6  ;;  %v10216_v49 = vld [vmem:[#allocation2 + $0x90] sm:$0xff] }
 0x297   : > { %v3175_v56 = vpop.permute.xlu1 %3174 }
 0x298   : > { %v2973_v20 = vpop.permute.xlu0 %2972  ;;  %v3335_v22 = vadd.f32 %v10072_v19, %v3296_v61  ;;  %v3258_v46 = vadd.f32 %v3175_v56, %v3050_v36 }
 0x299   : > { %v10200_v4 = vld [vmem:[#allocation2 + $0x80] sm:$0xff]  ;;  %v10202_v45 = vld [vmem:[#allocation2 + $0x88] sm:$0xff]  ;;  %v3053_v54 = vadd.f32 %v2973_v20, %v12663_v0 }
 0x29a   : > { %3409 = vst.msk [vmem:[#allocation2 + $0x99] sm:$0xff] %vm328_vm1, %v3335_v22  ;;  %v3297_v17 = vmul.f32 %v10067_v2, %v3258_v46  ;;  %7732 = vmatprep.mubr.msk.f32.mxu1 %vm328_vm1, %v10200_v4  ;;  %7801 = vmatmul.mubr.msk.f32.gmra.mrb[108].mxu0 %vm328_vm1, %v10200_v4 }
 0x29b   : > { %v3177_v21 = vpop.permute.xlu1 %3176  ;;  %7733 = vmatmul.mubr.msk.f32.gmra.mrb[64].mxu1 %vm328_vm1, %v10202_v45  ;;  %7803 = vmatprep.mubr.msk.f32.mxu0 %vm328_vm1, %v10202_v45 }
 0x29c   : > { %v3181_v35 = vpop.permute.xlu0 %3180  ;;  %v3336_v37 = vadd.f32 %v10072_v19, %v3297_v17  ;;  %v3259_v14 = vadd.f32 %v3177_v21, %v3051_v16  ;;  %7735 = vmatprep.mubr.msk.f32.mxu1 %vm328_vm1, %v10216_v49 }
 0x29d   : > { %v3261_v60 = vadd.f32 %v3181_v35, %v3053_v54 }
 0x29e   : > { %3410 = vst.msk [vmem:[#allocation2 + $0xa9] sm:$0xff] %vm328_vm1, %v3336_v37  ;;  %v3298_v8 = vmul.f32 %v10067_v2, %v3259_v14  ;;  %7804 = vmatmul.mubr.msk.f32.gmra.mrb[110].mxu0 %vm328_vm1, %v10216_v49 }
 0x29f   : > { %v3300_v57 = vmul.f32 %v10067_v2, %v3261_v60  ;;  %v3179_v39 = vpop.permute.xlu1 %3178 }
 0x2a0   : > { %v2975_v59 = vpop.permute.xlu0 %2974  ;;  %v3337_v62 = vadd.f32 %v10072_v19, %v3298_v8  ;;  %v3260_v41 = vadd.f32 %v3179_v39, %v3052_v23 }
 0x2a1   : > { %v3339_v43 = vadd.f32 %v10072_v19, %v3300_v57  ;;  %v10229_v29 = vld [vmem:[#allocation2 + $0x98] sm:$0xff]  ;;  %v10231_v3 = vld [vmem:[#allocation2 + $0xa0] sm:$0xff]  ;;  %v3054_v44 = vadd.f32 %v2975_v59, %v9778_v15 }
 0x2a2   : > { %3411 = vst.msk [vmem:[#allocation2 + $0xb1] sm:$0xff] %vm328_vm1, %v3337_v62  ;;  %v3299_v55 = vmul.f32 %v10067_v2, %v3260_v41  ;;  %7736 = vmatmul.mubr.msk.f32.gmra.mrb[66].mxu1 %vm328_vm1, %v10229_v29  ;;  %7806 = vmatprep.mubr.msk.f32.mxu0 %vm328_vm1, %v10229_v29 }
 0x2a3   : > { %3413 = vst.msk [vmem:[#allocation2 + $0xc9] sm:$0xff] %vm328_vm1, %v3339_v43  ;;  %v3183_v36 = vpop.permute.xlu1 %3182  ;;  %7738 = vmatprep.mubr.msk.f32.mxu1 %vm328_vm1, %v10231_v3  ;;  %7807 = vmatmul.mubr.msk.f32.gmra.mrb[112].mxu0 %vm328_vm1, %v10231_v3 }
 0x2a4   : > { %v2979_v61 = vpop.permute.xlu0 %2978  ;;  %v3338_v56 = vadd.f32 %v10072_v19, %v3299_v55  ;;  %v3262_v20 = vadd.f32 %v3183_v36, %v3054_v44 }
 0x2a5   : > { %v10246_v22 = vld [vmem:[#allocation2 + $0xa8] sm:$0xff] }
 0x2a6   : > { %3412 = vst.msk [vmem:[#allocation2 + $0xc1] sm:$0xff] %vm328_vm1, %v3338_v56  ;;  %v3301_v15 = vmul.f32 %v10067_v2, %v3262_v20  ;;  %7739 = vmatmul.mubr.msk.f32.gmra.mrb[68].mxu1 %vm328_vm1, %v10246_v22  ;;  %7809 = vmatprep.mubr.msk.f32.mxu0 %vm328_vm1, %v10246_v22 }
 0x2a7   : > { %v2977_v46 = vpop.permute.xlu1 %2976 }
 0x2a8   : > { %v2981_v47 = vpop.permute.xlu0 %2980  ;;  %v3340_v16 = vadd.f32 %v10072_v19, %v3301_v15  ;;  %v3055_v54 = vadd.f32 %v2977_v46, %v9871_v9 }
 0x2a9   : > { %v10255_v17 = vld [vmem:[#allocation2 + $0xb0] sm:$0xff]  ;;  %v10257_v0 = vld [vmem:[#allocation2 + $0xb8] sm:$0xff]  ;;  %v3057_v21 = vadd.f32 %v2981_v47, %v9892_v42  ;;  %v3056_v42 = vadd.f32 %v2979_v61, %v9879_v38 }
 0x2aa   : > { %3414 = vst.msk [vmem:[#allocation2 + $0xd9] sm:$0xff] %vm328_vm1, %v3340_v16  ;;  %7741 = vmatprep.mubr.msk.f32.mxu1 %vm328_vm1, %v10255_v17  ;;  %7810 = vmatmul.mubr.msk.f32.gmra.mrb[114].mxu0 %vm328_vm1, %v10255_v17  ;;  %v10285_v59 = vld [vmem:[#allocation2 + $0xd0] sm:$0xff] }
 0x2ab   : > { %v3185_v35 = vpop.permute.xlu1 %3184  ;;  %7742 = vmatmul.mubr.msk.f32.gmra.mrb[70].mxu1 %vm328_vm1, %v10257_v0  ;;  %7812 = vmatprep.mubr.msk.f32.mxu0 %vm328_vm1, %v10257_v0 }
 0x2ac   : > { %v3189_v37 = vpop.permute.xlu0 %3188  ;;  %v3263_v14 = vadd.f32 %v3185_v35, %v3055_v54 }
 0x2ad   : > { %v3265_v60 = vadd.f32 %v3189_v37, %v3057_v21  ;;  %v10270_v63 = vld [vmem:[#allocation2 + $0xc0] sm:$0xff]  ;;  %v10272_v9 = vld [vmem:[#allocation2 + $0xc8] sm:$0xff] }
 0x2ae   : > { %v3302_v23 = vmul.f32 %v10067_v2, %v3263_v14  ;;  %7744 = vmatprep.mubr.msk.f32.mxu1 %vm328_vm1, %v10270_v63  ;;  %7813 = vmatmul.mubr.msk.f32.gmra.mrb[116].mxu0 %vm328_vm1, %v10270_v63 }
 0x2af   : > { %v3304_v8 = vmul.f32 %v10067_v2, %v3265_v60  ;;  %v3187_v57 = vpop.permute.xlu1 %3186  ;;  %7745 = vmatmul.mubr.msk.f32.gmra.mrb[72].mxu1 %vm328_vm1, %v10272_v9  ;;  %7815 = vmatprep.mubr.msk.f32.mxu0 %vm328_vm1, %v10272_v9 }
 0x2b0   : > { %v2983_v39 = vpop.permute.xlu0 %2982  ;;  %v3341_v38 = vadd.f32 %v10072_v19, %v3302_v23  ;;  %v3264_v43 = vadd.f32 %v3187_v57, %v3056_v42  ;;  %7747 = vmatprep.mubr.msk.f32.mxu1 %vm328_vm1, %v10285_v59 }
 0x2b1   : > { %v3343_v62 = vadd.f32 %v10072_v19, %v3304_v8  ;;  %v10291_v41 = vld [vmem:[#allocation2 + $0xd8] sm:$0xff]  ;;  %v3058_v44 = vadd.f32 %v2983_v39, %v9905_v12 }
 0x2b2   : > { %3415 = vst.msk [vmem:[#allocation2 + $0xe1] sm:$0xff] %vm328_vm1, %v3341_v38  ;;  %v3303_v55 = vmul.f32 %v10067_v2, %v3264_v43  ;;  %7816 = vmatmul.mubr.msk.f32.gmra.mrb[118].mxu0 %vm328_vm1, %v10285_v59 }
 0x2b3   : > { %3417 = vst.msk [vmem:[#allocation2 + $0xf9] sm:$0xff] %vm328_vm1, %v3343_v62  ;;  %v3191_v36 = vpop.permute.xlu1 %3190  ;;  %7748 = vmatmul.mubr.msk.f32.gmra.mrb[74].mxu1 %vm328_vm1, %v10291_v41  ;;  %7818 = vmatprep.mubr.msk.f32.mxu0 %vm328_vm1, %v10291_v41 }
 0x2b4   : > { %v2987_v61 = vpop.permute.xlu0 %2986  ;;  %v3342_v56 = vadd.f32 %v10072_v19, %v3303_v55  ;;  %v3266_v20 = vadd.f32 %v3191_v36, %v3058_v44 }
 0x2b6   : > { %3416 = vst.msk [vmem:[#allocation2 + $0xf1] sm:$0xff] %vm328_vm1, %v3342_v56  ;;  %v3305_v15 = vmul.f32 %v10067_v2, %v3266_v20 }
 0x2b7   : > { %v2985_v46 = vpop.permute.xlu1 %2984 }
 0x2b8   : > { %v2989_v12 = vpop.permute.xlu0 %2988  ;;  %v3344_v47 = vadd.f32 %v10072_v19, %v3305_v15  ;;  %v3059_v21 = vadd.f32 %v2985_v46, %v9923_v32 }
 0x2b9   : > { %v10307_v16 = vld [vmem:[#allocation2 + $0xe0] sm:$0xff]  ;;  %v10309_v54 = vld [vmem:[#allocation2 + $0xe8] sm:$0xff]  ;;  %v3061_v35 = vadd.f32 %v2989_v12, %v9944_v58  ;;  %v3060_v58 = vadd.f32 %v2987_v61, %v9931_v34 }
 0x2ba   : > { %3418 = vst.msk [vmem:[#allocation2 + $0x109] sm:$0xff] %vm328_vm1, %v3344_v47  ;;  %7750 = vmatprep.mubr.msk.f32.mxu1 %vm328_vm1, %v10307_v16  ;;  %7819 = vmatmul.mubr.msk.f32.gmra.mrb[120].mxu0 %vm328_vm1, %v10307_v16  ;;  %v10337_v62 = vld [vmem:[#allocation2 + $0x100] sm:$0xff] }
 0x2bb   : > { %v3193_v37 = vpop.permute.xlu1 %3192  ;;  %7751 = vmatmul.mubr.msk.f32.gmra.mrb[76].mxu1 %vm328_vm1, %v10309_v54  ;;  %7821 = vmatprep.mubr.msk.f32.mxu0 %vm328_vm1, %v10309_v54 }
 0x2bc   : > { %v3197_v14 = vpop.permute.xlu0 %3196  ;;  %v3267_v60 = vadd.f32 %v3193_v37, %v3059_v21 }
 0x2bd   : > { %v3269_v42 = vadd.f32 %v3197_v14, %v3061_v35  ;;  %v10322_v23 = vld [vmem:[#allocation2 + $0xf0] sm:$0xff]  ;;  %v10324_v32 = vld [vmem:[#allocation2 + $0xf8] sm:$0xff] }
 0x2be   : > { %v3306_v8 = vmul.f32 %v10067_v2, %v3267_v60  ;;  %7753 = vmatprep.mubr.msk.f32.mxu1 %vm328_vm1, %v10322_v23  ;;  %7822 = vmatmul.mubr.msk.f32.gmra.mrb[122].mxu0 %vm328_vm1, %v10322_v23 }
 0x2bf   : > { %v3308_v57 = vmul.f32 %v10067_v2, %v3269_v42  ;;  %v3195_v39 = vpop.permute.xlu1 %3194  ;;  %7754 = vmatmul.mubr.msk.f32.gmra.mrb[78].mxu1 %vm328_vm1, %v10324_v32  ;;  %7824 = vmatprep.mubr.msk.f32.mxu0 %vm328_vm1, %v10324_v32 }
 0x2c0   : > { %v2991_v38 = vpop.permute.xlu0 %2990  ;;  %v3345_v34 = vadd.f32 %v10072_v19, %v3306_v8  ;;  %v3268_v55 = vadd.f32 %v3195_v39, %v3060_v58  ;;  %7756 = vmatprep.mubr.msk.f32.mxu1 %vm328_vm1, %v10337_v62 }
 0x2c1   : > { %v3347_v43 = vadd.f32 %v10072_v19, %v3308_v57  ;;  %v10343_v44 = vld [vmem:[#allocation2 + $0x108] sm:$0xff]  ;;  %v3062_v61 = vadd.f32 %v2991_v38, %v9957_v50 }
 0x2c2   : > { %3419 = vst.msk [vmem:[#allocation2 + $0x111] sm:$0xff] %vm328_vm1, %v3345_v34  ;;  %v3307_v36 = vmul.f32 %v10067_v2, %v3268_v55  ;;  %7825 = vmatmul.mubr.msk.f32.gmra.mrb[124].mxu0 %vm328_vm1, %v10337_v62 }
 0x2c3   : > { %3421 = vst.msk [vmem:[#allocation2 + $0x129] sm:$0xff] %vm328_vm1, %v3347_v43  ;;  %v3199_v56 = vpop.permute.xlu1 %3198  ;;  %7757 = vmatmul.mubr.msk.f32.gmra.mrb[80].mxu1 %vm328_vm1, %v10343_v44  ;;  %7827 = vmatprep.mubr.msk.f32.mxu0 %vm328_vm1, %v10343_v44 }
 0x2c4   : > { %v2995_v20 = vpop.permute.xlu0 %2994  ;;  %v3346_v15 = vadd.f32 %v10072_v19, %v3307_v36  ;;  %v3270_v46 = vadd.f32 %v3199_v56, %v3062_v61 }
 0x2c6   : > { %3420 = vst.msk [vmem:[#allocation2 + $0x121] sm:$0xff] %vm328_vm1, %v3346_v15  ;;  %v3309_v12 = vmul.f32 %v10067_v2, %v3270_v46 }
 0x2c7   : > { %v2993_v47 = vpop.permute.xlu1 %2992 }
 0x2c8   : > { %v2997_v50 = vpop.permute.xlu0 %2996  ;;  %v3348_v21 = vadd.f32 %v10072_v19, %v3309_v12  ;;  %v3063_v14 = vadd.f32 %v2993_v47, %v9975_v33 }
 0x2c9   : > { %v10359_v35 = vld [vmem:[#allocation2 + $0x110] sm:$0xff]  ;;  %v10361_v37 = vld [vmem:[#allocation2 + $0x118] sm:$0xff]  ;;  %v3065_v60 = vadd.f32 %v2997_v50, %v9996_v26  ;;  %v3064_v26 = vadd.f32 %v2995_v20, %v9983_v24 }
 0x2ca   : > { %3422 = vst.msk [vmem:[#allocation2 + $0x139] sm:$0xff] %vm328_vm1, %v3348_v21  ;;  %7759 = vmatprep.mubr.msk.f32.mxu1 %vm328_vm1, %v10359_v35  ;;  %7828 = vmatmul.mubr.msk.f32.gmra.mrb[126].mxu0 %vm328_vm1, %v10359_v35  ;;  %v10389_v36 = vld [vmem:[#allocation2 + $0x130] sm:$0xff] }
 0x2cb   : > { %v3201_v42 = vpop.permute.xlu1 %3200  ;;  %7760 = vmatmul.mubr.msk.f32.gmra.mrb[82].mxu1 %vm328_vm1, %v10361_v37  ;;  %7830 = vmatprep.mubr.msk.f32.mxu0 %vm328_vm1, %v10361_v37 }
 0x2cc   : > { %v3205_v58 = vpop.permute.xlu0 %3204  ;;  %v3271_v8 = vadd.f32 %v3201_v42, %v3063_v14 }
 0x2cd   : > { %v3273_v57 = vadd.f32 %v3205_v58, %v3065_v60  ;;  %v10374_v39 = vld [vmem:[#allocation2 + $0x120] sm:$0xff]  ;;  %v10376_v33 = vld [vmem:[#allocation2 + $0x128] sm:$0xff] }
 0x2ce   : > { %v3310_v38 = vmul.f32 %v10067_v2, %v3271_v8  ;;  %7762 = vmatprep.mubr.msk.f32.mxu1 %vm328_vm1, %v10374_v39  ;;  %7831 = vmatmul.mubr.msk.f32.gmra.mrb[128].mxu0 %vm328_vm1, %v10374_v39 }
 0x2cf   : > { %v3312_v34 = vmul.f32 %v10067_v2, %v3273_v57  ;;  %v3203_v43 = vpop.permute.xlu1 %3202  ;;  %7763 = vmatmul.mubr.msk.f32.gmra.mrb[84].mxu1 %vm328_vm1, %v10376_v33  ;;  %7833 = vmatprep.mubr.msk.f32.mxu0 %vm328_vm1, %v10376_v33 }
 0x2d0   : > { %v2999_v55 = vpop.permute.xlu0 %2998  ;;  %v3349_v24 = vadd.f32 %v10072_v19, %v3310_v38  ;;  %v3272_v56 = vadd.f32 %v3203_v43, %v3064_v26  ;;  %7765 = vmatprep.mubr.msk.f32.mxu1 %vm328_vm1, %v10389_v36 }
 0x2d1   : > { %v3351_v61 = vadd.f32 %v10072_v19, %v3312_v34  ;;  %v10395_v20 = vld [vmem:[#allocation2 + $0x138] sm:$0xff]  ;;  %v3066_v46 = vadd.f32 %v2999_v55, %v10009_v31 }
 0x2d2   : > { %3423 = vst.msk [vmem:[#allocation2 + $0x141] sm:$0xff] %vm328_vm1, %v3349_v24  ;;  %v3311_v15 = vmul.f32 %v10067_v2, %v3272_v56  ;;  %7834 = vmatmul.mubr.msk.f32.gmra.mrb[130].mxu0 %vm328_vm1, %v10389_v36 }
 0x2d3   : > { %3425 = vst.msk [vmem:[#allocation2 + $0x159] sm:$0xff] %vm328_vm1, %v3351_v61  ;;  %v3207_v12 = vpop.permute.xlu1 %3206  ;;  %7766 = vmatmul.mubr.msk.f32.gmra.mrb[86].mxu1 %vm328_vm1, %v10395_v20  ;;  %7836 = vmatprep.mubr.msk.f32.mxu0 %vm328_vm1, %v10395_v20 }
 0x2d4   : > { %v3001_v47 = vpop.permute.xlu0 %3000  ;;  %v3350_v50 = vadd.f32 %v10072_v19, %v3311_v15  ;;  %v3274_v21 = vadd.f32 %v3207_v12, %v3066_v46 }
 0x2d5   : > { %v3067_v31 = vadd.f32 %v3001_v47, %v10027_v51 }
 0x2d6   : > { %3424 = vst.msk [vmem:[#allocation2 + $0x151] sm:$0xff] %vm328_vm1, %v3350_v50  ;;  %v3313_v14 = vmul.f32 %v10067_v2, %v3274_v21 }
 0x2d7   : > { %v3209_v60 = vpop.permute.xlu1 %3208 }
 0x2d8   : > { %v10411_v42 = vpop.permute.xlu0 %4091  ;;  %v3352_v58 = vadd.f32 %v10072_v19, %v3313_v14  ;;  %v3275_v8 = vadd.f32 %v3209_v60, %v3067_v31 }
 0x2d9   : > { %v10414_v57 = vld [vmem:[#allocation2 + $0x140] sm:$0xff]  ;;  %v10416_v26 = vld [vmem:[#allocation2 + $0x148] sm:$0xff] }
 0x2da   : > { %3426 = vst.msk [vmem:[#allocation2 + $0x169] sm:$0xff] %vm328_vm1, %v3352_v58  ;;  %v3314_v38 = vmul.f32 %v10067_v2, %v3275_v8  ;;  %7768 = vmatprep.mubr.msk.f32.mxu1 %vm328_vm1, %v10414_v57  ;;  %7837 = vmatmul.mubr.msk.f32.gmra.mrb[132].mxu0 %vm328_vm1, %v10414_v57  ;;  %v10445_v46 = vld [vmem:[#allocation2 + $0x160] sm:$0xff] }
 0x2db   : > { %v3005_v51 = vpop.permute.xlu1 %3004  ;;  %7769 = vmatmul.mubr.msk.f32.gmra.mrb[88].mxu1 %vm328_vm1, %v10416_v26  ;;  %7839 = vmatprep.mubr.msk.f32.mxu0 %vm328_vm1, %v10416_v26 }
 0x2dc   : > { %v10428_v34 = vpop.permute.xlu0 %4299  ;;  %v3353_v43 = vadd.f32 %v10072_v19, %v3314_v38  ;;  %v3069_v61 = vadd.f32 %v3005_v51, %v10059_v40 }
 0x2dd   : > { %v10431_v55 = vld [vmem:[#allocation2 + $0x150] sm:$0xff]  ;;  %v10433_v24 = vld [vmem:[#allocation2 + $0x158] sm:$0xff] }
 0x2de   : > { %3427 = vst.msk [vmem:[#allocation2 + $0x171] sm:$0xff] %vm328_vm1, %v3353_v43  ;;  %7771 = vmatprep.mubr.msk.f32.mxu1 %vm328_vm1, %v10431_v55  ;;  %7840 = vmatmul.mubr.msk.f32.gmra.mrb[134].mxu0 %vm328_vm1, %v10431_v55 }
 0x2df   : > { %v3213_v56 = vpop.permute.xlu1 %3212  ;;  %7772 = vmatmul.mubr.msk.f32.gmra.mrb[90].mxu1 %vm328_vm1, %v10433_v24  ;;  %7842 = vmatprep.mubr.msk.f32.mxu0 %vm328_vm1, %v10433_v24 }
 0x2e0   : > { %v3003_v15 = vpop.permute.xlu0 %3002  ;;  %v3277_v12 = vadd.f32 %v3213_v56, %v3069_v61  ;;  %7774 = vmatprep.mubr.msk.f32.mxu1 %vm328_vm1, %v10445_v46 }
 0x2e1   : > { %v10449_v40 = vld [vmem:[#allocation2 + $0x168] sm:$0xff]  ;;  %v3068_v50 = vadd.f32 %v3003_v15, %v10035_v7 }
 0x2e2   : > { %v3316_v47 = vmul.f32 %v10067_v2, %v3277_v12  ;;  %7843 = vmatmul.mubr.msk.f32.gmra.mrb[136].mxu0 %vm328_vm1, %v10445_v46 }
 0x2e3   : > { %7775 = vmatmul.mubr.msk.f32.gmra.mrb[92].mxu1 %vm328_vm1, %v10449_v40  ;;  %7845 = vmatprep.mubr.msk.f32.mxu0 %vm328_vm1, %v10449_v40 }
 0x2e4   : > { %v3211_v21 = vpop.permute.xlu0 %3210  ;;  %v3355_v14 = vadd.f32 %v10072_v19, %v3316_v47 }
 0x2e5   : > { %v3276_v31 = vadd.f32 %v3211_v21, %v3068_v50  ;;  %v3476_v60 = vld [vmem:[#allocation2 + $0x170] sm:$0xff]  ;;  %v3477_v58 = vld [vmem:[#allocation2 + $0x178] sm:$0xff] }
 0x2e6   : > { %3429 = vst.msk [vmem:[#allocation2 + $0x189] sm:$0xff] %vm328_vm1, %v3355_v14  ;;  %7777 = vmatprep.mubr.msk.f32.mxu1 %vm328_vm1, %v3476_v60  ;;  %7846 = vmatmul.mubr.msk.f32.gmra.mrb[138].mxu0 %vm328_vm1, %v3476_v60 }
 0x2e7   : > { %v3315_v8 = vmul.f32 %v10067_v2, %v3276_v31  ;;  %7778 = vmatmul.mubr.msk.f32.gmra.mrb[94].mxu1 %vm328_vm1, %v3477_v58  ;;  %7848 = vmatprep.mubr.msk.f32.mxu0 %vm328_vm1, %v3477_v58 }
 0x2e8   : > { %7856 = vmatprep.mubr.msk.f32.mxu1 %vm328_vm1, %v10113_v1  ;;  %v5471_v1 = vld [vmem:[#allocation2 + $0x198] sm:$0xff] }
 0x2e9   : > { %v3354_v7 = vadd.f32 %v10072_v19, %v3315_v8 }
 0x2eb   : > { %3428 = vst.msk [vmem:[#allocation2 + $0x181] sm:$0xff] %vm328_vm1, %v3354_v7  ;;  %7857 = vmatmul.mubr.msk.f32.vlgmr.msra.gmra.mrb[96].mxu1 %vm328_vm1, %v10125_v13 }
 0x2ec   : > { %7859 = vmatprep.mubr.msk.f32.mxu1 %vm328_vm1, %v10127_v25 }
 0x2ed   : > { %v4474_v19 = vld [vmem:[#allocation2 + $0x190] sm:$0xff] }
 0x2ef   : > { %7860 = vmatmul.mubr.msk.f32.gmra.mrb[98].mxu1 %vm328_vm1, %v10139_v28  ;;  %v4187_v28 = vadd.f32 %v10411_v42, %v12644_v52 }
 0x2f0   : > { %7862 = vmatprep.mubr.msk.f32.mxu1 %vm328_vm1, %v10149_v48 }
 0x2f2   : > { %v4472_v2 = vld [vmem:[#allocation2 + $0x180] sm:$0xff]  ;;  %v4473_v38 = vld [vmem:[#allocation2 + $0x188] sm:$0xff] }
 0x2f3   : > { %7849 = vmatmul.mubr.msk.f32.gmra.mrb[140].mxu0 %vm328_vm1, %v4472_v2  ;;  %7863 = vmatmul.mubr.msk.f32.gmra.mrb[100].mxu1 %vm328_vm1, %v10151_v10  ;;  %v4395_v10 = vadd.f32 %v10428_v34, %v4187_v28 }
 0x2f4   : > { %7851 = vmatprep.mubr.msk.f32.mxu0 %vm328_vm1, %v4473_v38  ;;  %7865 = vmatprep.mubr.msk.f32.mxu1 %vm328_vm1, %v10165_v11 }
 0x2f7   : > { %7852 = vmatmul.mubr.msk.f32.gmra.mrb[142].mxu0 %vm328_vm1, %v4474_v19  ;;  %7866 = vmatmul.mubr.msk.f32.gmra.mrb[102].mxu1 %vm328_vm1, %v10177_v18 }
 0x2f8   : > { %7868 = vmatprep.mubr.msk.f32.mxu1 %vm328_vm1, %v10179_v5 }
 0x2fb   : > { %7869 = vmatmul.mubr.msk.f32.gmra.mrb[104].mxu1 %vm328_vm1, %v10191_v6 }
 0x2fc   : > { %7871 = vmatprep.mubr.msk.f32.mxu1 %vm328_vm1, %v10200_v4 }
 0x2ff   : > { %7872 = vmatmul.mubr.msk.f32.gmra.mrb[106].mxu1 %vm328_vm1, %v10202_v45 }
 0x300   : > { %7874 = vmatprep.mubr.msk.f32.mxu1 %vm328_vm1, %v10216_v49 }
 0x303   : > { %7875 = vmatmul.mubr.msk.f32.gmra.mrb[108].mxu1 %vm328_vm1, %v10229_v29 }
 0x304   : > { %7877 = vmatprep.mubr.msk.f32.mxu1 %vm328_vm1, %v10231_v3 }
 0x307   : > { %7878 = vmatmul.mubr.msk.f32.gmra.mrb[110].mxu1 %vm328_vm1, %v10246_v22 }
 0x308   : > { %7880 = vmatprep.mubr.msk.f32.mxu1 %vm328_vm1, %v10255_v17 }
 0x30b   : > { %7881 = vmatmul.mubr.msk.f32.gmra.mrb[112].mxu1 %vm328_vm1, %v10257_v0 }
 0x30c   : > { %7883 = vmatprep.mubr.msk.f32.mxu1 %vm328_vm1, %v10270_v63 }
 0x30f   : > { %7884 = vmatmul.mubr.msk.f32.gmra.mrb[114].mxu1 %vm328_vm1, %v10272_v9 }
 0x310   : > { %7886 = vmatprep.mubr.msk.f32.mxu1 %vm328_vm1, %v10285_v59 }
 0x313   : > { %7887 = vmatmul.mubr.msk.f32.gmra.mrb[116].mxu1 %vm328_vm1, %v10291_v41 }
 0x314   : > { %7889 = vmatprep.mubr.msk.f32.mxu1 %vm328_vm1, %v10307_v16 }
 0x317   : > { %7890 = vmatmul.mubr.msk.f32.gmra.mrb[118].mxu1 %vm328_vm1, %v10309_v54 }
 0x318   : > { %7892 = vmatprep.mubr.msk.f32.mxu1 %vm328_vm1, %v10322_v23 }
 0x31b   : > { %7893 = vmatmul.mubr.msk.f32.gmra.mrb[120].mxu1 %vm328_vm1, %v10324_v32 }
 0x31c   : > { %7895 = vmatprep.mubr.msk.f32.mxu1 %vm328_vm1, %v10337_v62 }
 0x31f   : > { %7896 = vmatmul.mubr.msk.f32.gmra.mrb[122].mxu1 %vm328_vm1, %v10343_v44 }
 0x320   : > { %7898 = vmatprep.mubr.msk.f32.mxu1 %vm328_vm1, %v10359_v35 }
 0x323   : > { %7899 = vmatmul.mubr.msk.f32.gmra.mrb[124].mxu1 %vm328_vm1, %v10361_v37 }
 0x324   : > { %7901 = vmatprep.mubr.msk.f32.mxu1 %vm328_vm1, %v10374_v39 }
 0x327   : > { %7902 = vmatmul.mubr.msk.f32.gmra.mrb[126].mxu1 %vm328_vm1, %v10376_v33 }
 0x328   : > { %7904 = vmatprep.mubr.msk.f32.mxu1 %vm328_vm1, %v10389_v36 }
 0x32b   : > { %7905 = vmatmul.mubr.msk.f32.gmra.mrb[128].mxu1 %vm328_vm1, %v10395_v20 }
 0x32c   : > { %7907 = vmatprep.mubr.msk.f32.mxu1 %vm328_vm1, %v10414_v57 }
 0x32f   : > { %7908 = vmatmul.mubr.msk.f32.gmra.mrb[130].mxu1 %vm328_vm1, %v10416_v26 }
 0x330   : > { %7910 = vmatprep.mubr.msk.f32.mxu1 %vm328_vm1, %v10431_v55 }
 0x333   : > { %7911 = vmatmul.mubr.msk.f32.gmra.mrb[132].mxu1 %vm328_vm1, %v10433_v24 }
 0x334   : > { %7913 = vmatprep.mubr.msk.f32.mxu1 %vm328_vm1, %v10445_v46 }
 0x337   : > { %7914 = vmatmul.mubr.msk.f32.gmra.mrb[134].mxu1 %vm328_vm1, %v10449_v40 }
 0x338   : > { %7916 = vmatprep.mubr.msk.f32.mxu1 %vm328_vm1, %v3476_v60 }
 0x33b   : > { %7917 = vmatmul.mubr.msk.f32.gmra.mrb[136].mxu1 %vm328_vm1, %v3477_v58 }
 0x33c   : > { %7919 = vmatprep.mubr.msk.f32.mxu1 %vm328_vm1, %v4472_v2 }
 0x33f   : > { %7920 = vmatmul.mubr.msk.f32.gmra.mrb[138].mxu1 %vm328_vm1, %v4473_v38 }
 0x340   : > { %7922 = vmatprep.mubr.msk.f32.mxu1 %vm328_vm1, %v4474_v19 }
 0x343   : > { %7923 = vmatmul.mubr.msk.f32.gmra.mrb[140].mxu1 %vm328_vm1, %v5471_v1 }
 0x349   : > { %v10557_v13 = vpop.f32.mrb[50].mxu1 }
 0x34a   : > { %v3702_v25 = vpop.f32.mrb[51].mxu1  ;;  %v4016_v9 = vrot.slane %v10557_v13, 1  ;;  %v4224_v54 = vrot.slane %v10557_v13, 2 }
 0x34b   : > { %v4014_v48 = vrot.slane %v3702_v25, 1  ;;  %v4222_v11 = vrot.slane %v3702_v25, 2 }
 0x34d   : > { %v10562_v18 = vpop.f32.mrb[96].mxu0  ;;  %v4015_v5 = vsel %vm862_vm2, %v4012_v27, %v4014_v48  ;;  %v4223_v41 = vsel %vm1071_vm3, %v4220_v30, %v4222_v11 }
 0x34e   : > { %v5010_v6 = vrot.slane %v10562_v18, 1  ;;  %v5218_v4 = vrot.slane %v10562_v18, 2  ;;  %4093 = vrot.lane.b32.xlu1 %v4015_v5, %s7948_s13  ;;  %v7716_v45 = vpop.f32.mrb[52].mxu1  ;;  %v4690_v49 = vpop.f32.mrb[97].mxu0 }
 0x34f   : > { %v4019_v29 = vrot.slane %v7716_v45, 1  ;;  %v4227_v52 = vrot.slane %v7716_v45, 2  ;;  %v10570_v3 = vadd.f32 %v4690_v49, %v4395_v10  ;;  %v5009_v22 = vrot.slane %v4690_v49, 1  ;;  %v10572_v17 = vpop.f32.mrb[53].mxu1 }
 0x350   : > { %v5217_v0 = vrot.slane %v4690_v49, 2  ;;  %v4017_v63 = vrot.slane %v10572_v17, 1  ;;  %v4225_v27 = vrot.slane %v10572_v17, 2 }
 0x351   : > { %v10577_v59 = vpop.f32.mrb[98].mxu0  ;;  %v5011_v16 = vsel %vm862_vm2, %v5009_v22, %v5010_v6 }
 0x352   : > { %4301 = vrot.lane.b32.xlu1 %v4223_v41, %s7949_s14  ;;  %5089 = vrot.lane.b32.xlu0 %v5011_v16, %s7948_s13  ;;  %v4700_v23 = vpop.f32.mrb[99].mxu0  ;;  %v5219_v32 = vsel %vm1071_vm3, %v5217_v0, %v5218_v4  ;;  %v4020_v62 = vsel %vm862_vm2, %v4017_v63, %v4019_v29  ;;  %v4228_v37 = vsel %vm1071_vm3, %v4225_v27, %v4227_v52  ;;  %v5014_v46 = vrot.slane %v10577_v59, 1 }
 0x353   : > { %v5012_v44 = vrot.slane %v4700_v23, 1  ;;  %v5220_v35 = vrot.slane %v4700_v23, 2  ;;  %v4018_v39 = vsel %vm862_vm2, %v4016_v9, %v4017_v63  ;;  %v4226_v30 = vsel %vm1071_vm3, %v4224_v54, %v4225_v27 }
 0x354   : > { %v5222_v12 = vrot.slane %v10577_v59, 2 }
 0x355   : > { %v10591_v33 = vpop.f32.mrb[54].mxu1  ;;  %v5013_v36 = vsel %vm862_vm2, %v5010_v6, %v5012_v44  ;;  %v5221_v20 = vsel %vm1071_vm3, %v5218_v4, %v5220_v35 }
 0x356   : > { %12665 = vst [vmem:[#allocation27_spill] sm:$0xff] %v10591_v33  ;;  %v4022_v42 = vrot.slane %v10591_v33, 1  ;;  %v4230_v57 = vrot.slane %v10591_v33, 2  ;;  %5297 = vrot.lane.b32.xlu0 %v5219_v32, %s7949_s14  ;;  %4097 = vrot.lane.b32.xlu1 %v4020_v62, %s7948_s13  ;;  %v10599_v26 = vpop.f32.mrb[55].mxu1  ;;  %v7790_v51 = vpop.f32.mrb[100].mxu0 }
 0x357   : > { %v4021_v34 = vrot.slane %v10599_v26, 1  ;;  %v4229_v43 = vrot.slane %v10599_v26, 2  ;;  %v5017_v55 = vrot.slane %v7790_v51, 1  ;;  %v5225_v24 = vrot.slane %v7790_v51, 2  ;;  %v10603_v61 = vpop.f32.mrb[101].mxu0 }
 0x358   : > { %v5015_v56 = vrot.slane %v10603_v61, 1  ;;  %v5223_v15 = vrot.slane %v10603_v61, 2 }
 0x359   : > { %v10609_v40 = vpop.f32.mrb[56].mxu1  ;;  %v4023_v47 = vsel %vm862_vm2, %v4021_v34, %v4022_v42  ;;  %v4231_v50 = vsel %vm1071_vm3, %v4229_v43, %v4230_v57 }
 0x35a   : > { %12666 = vst [vmem:[#allocation86_spill] sm:$0xff] %v10609_v40  ;;  %4305 = vrot.lane.b32.xlu1 %v4228_v37, %s7949_s14  ;;  %4095 = vrot.lane.b32.xlu0 %v4018_v39, %s7948_s13  ;;  %v3732_v21 = vpop.f32.mrb[57].mxu1  ;;  %v5018_v14 = vsel %vm862_vm2, %v5015_v56, %v5017_v55  ;;  %v5226_v31 = vsel %vm1071_vm3, %v5223_v15, %v5225_v24  ;;  %v4026_v29 = vrot.slane %v10609_v40, 1  ;;  %v4234_v52 = vrot.slane %v10609_v40, 2  ;;  %v5472_v37 = vld [vmem:[#allocation2 + $0x1a0] sm:$0xff]  ;;  %v5473_v39 = vld [vmem:[#allocation2 + $0x1a8] sm:$0xff] }
 0x35b   : > { %v4024_v60 = vrot.slane %v3732_v21, 1  ;;  %v4232_v58 = vrot.slane %v3732_v21, 2  ;;  %v5016_v8 = vsel %vm862_vm2, %v5014_v46, %v5015_v56  ;;  %v10619_v7 = vsel %vm1071_vm3, %v5222_v12, %v5223_v15  ;;  %7925 = vmatprep.mubr.msk.f32.mxu1 %vm328_vm1, %v5472_v37 }
 0x35c   : > { %7926 = vmatmul.mubr.msk.f32.gmra.mrb[142].mxu1 %vm328_vm1, %v5473_v39 }
 0x35d   : > { %v10621_v2 = vpop.f32.mrb[102].mxu0  ;;  %v10624_v38 = vsel %vm862_vm2, %v4022_v42, %v4024_v60  ;;  %v10627_v19 = vsel %vm1071_vm3, %v4230_v57, %v4232_v58 }
 0x35e   : > { %12667 = vst [vmem:[#allocation83_spill] sm:$0xff] %v10621_v2  ;;  %v5020_v1 = vrot.slane %v10621_v2, 1  ;;  %v5228_v25 = vrot.slane %v10621_v2, 2  ;;  %4303 = vrot.lane.b32.xlu0 %v4226_v30, %s7949_s14  ;;  %5091 = vrot.lane.b32.xlu1 %v5013_v36, %s7948_s13  ;;  %v7725_v28 = vpop.f32.mrb[58].mxu1  ;;  %v10633_v48 = vpop.f32.mrb[103].mxu0 }
 0x35f   : > { %12668 = vst [vmem:[#allocation25_spill] sm:$0xff] %v10633_v48  ;;  %v4029_v10 = vrot.slane %v7725_v28, 1  ;;  %v4237_v11 = vrot.slane %v7725_v28, 2  ;;  %v5019_v5 = vrot.slane %v10633_v48, 1  ;;  %v5227_v6 = vrot.slane %v10633_v48, 2  ;;  %v10637_v4 = vpop.f32.mrb[59].mxu1 }
 0x360   : > { %12669 = vst [vmem:[#allocation28_spill] sm:$0xff] %v10637_v4  ;;  %v4027_v45 = vrot.slane %v10637_v4, 1  ;;  %v4235_v49 = vrot.slane %v10637_v4, 2 }
 0x361   : > { %v10643_v22 = vpop.f32.mrb[104].mxu0  ;;  %v10646_v0 = vsel %vm862_vm2, %v5019_v5, %v5020_v1  ;;  %v10649_v63 = vsel %vm1071_vm3, %v5227_v6, %v5228_v25 }
 0x362   : > { %12670 = vst [vmem:[#allocation87_spill] sm:$0xff] %v10643_v22  ;;  %5299 = vrot.lane.b32.xlu1 %v5221_v20, %s7949_s14  ;;  %4099 = vrot.lane.b32.xlu0 %v4023_v47, %s7948_s13  ;;  %v4730_v27 = vpop.f32.mrb[105].mxu0  ;;  %v10654_v9 = vsel %vm862_vm2, %v4027_v45, %v4029_v10  ;;  %v10657_v41 = vsel %vm1071_vm3, %v4235_v49, %v4237_v11  ;;  %v5024_v15 = vrot.slane %v10643_v22, 1  ;;  %v5232_v46 = vrot.slane %v10643_v22, 2 }
 0x363   : > { %v5022_v16 = vrot.slane %v4730_v27, 1  ;;  %v5230_v54 = vrot.slane %v4730_v27, 2  ;;  %v10660_v23 = vsel %vm862_vm2, %v4026_v29, %v4027_v45  ;;  %v10663_v32 = vsel %vm1071_vm3, %v4234_v52, %v4235_v49 }
 0x365   : > { %v10665_v62 = vpop.f32.mrb[60].mxu1  ;;  %v10668_v44 = vsel %vm862_vm2, %v5020_v1, %v5022_v16  ;;  %v10671_v35 = vsel %vm1071_vm3, %v5228_v25, %v5230_v54 }
 0x366   : > { %12671 = vst [vmem:[#allocation91_spill] sm:$0xff] %v10665_v62  ;;  %v4032_v30 = vrot.slane %v10665_v62, 1  ;;  %v4240_v36 = vrot.slane %v10665_v62, 2  ;;  %5095 = vrot.lane.b32.xlu1 %v5018_v14, %s7948_s13  ;;  %4307 = vrot.lane.b32.xlu0 %v4231_v50, %s7949_s14  ;;  %v10677_v20 = vpop.f32.mrb[61].mxu1  ;;  %v7799_v42 = vpop.f32.mrb[106].mxu0 }
 0x367   : > { %12672 = vst [vmem:[#allocation26_spill] sm:$0xff] %v10677_v20  ;;  %v4031_v57 = vrot.slane %v10677_v20, 1  ;;  %v4239_v51 = vrot.slane %v10677_v20, 2  ;;  %v5027_v34 = vrot.slane %v7799_v42, 1  ;;  %v5235_v43 = vrot.slane %v7799_v42, 2  ;;  %v10681_v55 = vpop.f32.mrb[107].mxu0 }
 0x368   : > { %12673 = vst [vmem:[#allocation93_spill] sm:$0xff] %v10681_v55  ;;  %v5025_v24 = vrot.slane %v10681_v55, 1  ;;  %v5233_v56 = vrot.slane %v10681_v55, 2 }
 0x369   : > { %v10689_v12 = vpop.f32.mrb[62].mxu1  ;;  %v10692_v47 = vsel %vm862_vm2, %v4031_v57, %v4032_v30  ;;  %v10695_v50 = vsel %vm1071_vm3, %v4239_v51, %v4240_v36 }
 0x36a   : > { %12674 = vst [vmem:[#allocation29_spill] sm:$0xff] %v10689_v12  ;;  %5303 = vrot.lane.b32.xlu1 %v5226_v31, %s7949_s14  ;;  %5093 = vrot.lane.b32.xlu0 %v5016_v8, %s7948_s13  ;;  %v3762_v21 = vpop.f32.mrb[63].mxu1  ;;  %v10700_v14 = vsel %vm862_vm2, %v5025_v24, %v5027_v34  ;;  %v10703_v60 = vsel %vm1071_vm3, %v5233_v56, %v5235_v43  ;;  %v4244_v39 = vrot.slane %v10689_v12, 2 }
 0x36b   : > { %v4034_v58 = vrot.slane %v3762_v21, 1  ;;  %v4242_v1 = vrot.slane %v3762_v21, 2  ;;  %v10706_v25 = vsel %vm862_vm2, %v5024_v15, %v5025_v24  ;;  %v10709_v28 = vsel %vm1071_vm3, %v5232_v46, %v5233_v56 }
 0x36d   : > { %v10711_v10 = vpop.f32.mrb[108].mxu0  ;;  %v10714_v31 = vsel %vm862_vm2, %v4032_v30, %v4034_v58  ;;  %v10717_v8 = vsel %vm1071_vm3, %v4240_v36, %v4242_v1 }
 0x36e   : > { %12675 = vst [vmem:[#allocation94_spill] sm:$0xff] %v10711_v10  ;;  %v5030_v11 = vrot.slane %v10711_v10, 1  ;;  %v5238_v5 = vrot.slane %v10711_v10, 2  ;;  %5301 = vrot.lane.b32.xlu0 %v10619_v7, %s7949_s14  ;;  %4101 = vrot.lane.b32.xlu1 %v10624_v38, %s7948_s13  ;;  %v7734_v6 = vpop.f32.mrb[64].mxu1  ;;  %v10725_v45 = vpop.f32.mrb[109].mxu0  ;;  %v4036_v7 = vrot.slane %v10689_v12, 1 }
 0x36f   : > { %12676 = vst [vmem:[#allocation95_spill] sm:$0xff] %v10725_v45  ;;  %v4039_v49 = vrot.slane %v7734_v6, 1  ;;  %v4247_v29 = vrot.slane %v7734_v6, 2  ;;  %v5029_v52 = vrot.slane %v10725_v45, 1  ;;  %v5237_v27 = vrot.slane %v10725_v45, 2  ;;  %v10729_v16 = vpop.f32.mrb[65].mxu1 }
 0x370   : > { %12677 = vst [vmem:[#allocation31_spill] sm:$0xff] %v10729_v16  ;;  %v4037_v54 = vrot.slane %v10729_v16, 1  ;;  %v4245_v37 = vrot.slane %v10729_v16, 2 }
 0x371   : > { %v10735_v38 = vpop.f32.mrb[110].mxu0  ;;  %v10738_v30 = vsel %vm862_vm2, %v5029_v52, %v5030_v11  ;;  %v10741_v36 = vsel %vm1071_vm3, %v5237_v27, %v5238_v5 }
 0x372   : > { %12678 = vst [vmem:[#allocation30_spill] sm:$0xff] %v10735_v38  ;;  %4309 = vrot.lane.b32.xlu1 %v10627_v19, %s7949_s14  ;;  %5097 = vrot.lane.b32.xlu0 %v10646_v0, %s7948_s13  ;;  %v4760_v42 = vpop.f32.mrb[111].mxu0  ;;  %v10748_v57 = vsel %vm862_vm2, %v4037_v54, %v4039_v49  ;;  %v10751_v51 = vsel %vm1071_vm3, %v4245_v37, %v4247_v29 }
 0x373   : > { %v5032_v34 = vrot.slane %v4760_v42, 1  ;;  %v5240_v43 = vrot.slane %v4760_v42, 2  ;;  %v10754_v24 = vsel %vm862_vm2, %v4036_v7, %v4037_v54  ;;  %v10757_v56 = vsel %vm1071_vm3, %v4244_v39, %v4245_v37 }
 0x374   : > { %v5242_v54 = vrot.slane %v10735_v38, 2 }
 0x375   : > { %v10759_v15 = vpop.f32.mrb[66].mxu1  ;;  %v10762_v19 = vsel %vm862_vm2, %v5030_v11, %v5032_v34  ;;  %v10765_v0 = vsel %vm1071_vm3, %v5238_v5, %v5240_v43 }
 0x376   : > { %12679 = vst [vmem:[#allocation96_spill] sm:$0xff] %v10759_v15  ;;  %v4042_v46 = vrot.slane %v10759_v15, 1  ;;  %v4250_v21 = vrot.slane %v10759_v15, 2  ;;  %5305 = vrot.lane.b32.xlu0 %v10649_v63, %s7949_s14  ;;  %4105 = vrot.lane.b32.xlu1 %v10654_v9, %s7948_s13  ;;  %v10773_v58 = vpop.f32.mrb[67].mxu1  ;;  %v7808_v1 = vpop.f32.mrb[112].mxu0  ;;  %v5034_v63 = vrot.slane %v10735_v38, 1 }
 0x377   : > { %12680 = vst [vmem:[#allocation99_spill] sm:$0xff] %v10773_v58  ;;  %v4041_v6 = vrot.slane %v10773_v58, 1  ;;  %v4249_v11 = vrot.slane %v10773_v58, 2  ;;  %v5037_v49 = vrot.slane %v7808_v1, 1  ;;  %v5245_v5 = vrot.slane %v7808_v1, 2  ;;  %v10777_v29 = vpop.f32.mrb[113].mxu0 }
 0x378   : > { %12681 = vst [vmem:[#allocation32_spill] sm:$0xff] %v10777_v29  ;;  %v5035_v52 = vrot.slane %v10777_v29, 1  ;;  %v5243_v27 = vrot.slane %v10777_v29, 2 }
 0x379   : > { %v10783_v9 = vpop.f32.mrb[68].mxu1  ;;  %v10786_v37 = vsel %vm862_vm2, %v4041_v6, %v4042_v46  ;;  %v10789_v7 = vsel %vm1071_vm3, %v4249_v11, %v4250_v21 }
 0x37a   : > { %12682 = vst [vmem:[#allocation97_spill] sm:$0xff] %v10783_v9  ;;  %4313 = vrot.lane.b32.xlu1 %v10657_v41, %s7949_s14  ;;  %4103 = vrot.lane.b32.xlu0 %v10660_v23, %s7948_s13  ;;  %v3792_v39 = vpop.f32.mrb[69].mxu1  ;;  %v10796_v42 = vsel %vm862_vm2, %v5035_v52, %v5037_v49  ;;  %v10799_v34 = vsel %vm1071_vm3, %v5243_v27, %v5245_v5  ;;  %v4254_v58 = vrot.slane %v10783_v9, 2 }
 0x37b   : > { %v4044_v43 = vrot.slane %v3792_v39, 1  ;;  %v4252_v1 = vrot.slane %v3792_v39, 2  ;;  %v10802_v6 = vsel %vm862_vm2, %v5034_v63, %v5035_v52  ;;  %v10805_v11 = vsel %vm1071_vm3, %v5242_v54, %v5243_v27 }
 0x37d   : > { %v10807_v15 = vpop.f32.mrb[114].mxu0  ;;  %v10810_v41 = vsel %vm862_vm2, %v4042_v46, %v4044_v43  ;;  %v10813_v23 = vsel %vm1071_vm3, %v4250_v21, %v4252_v1 }
 0x37e   : > { %12683 = vst [vmem:[#allocation100_spill] sm:$0xff] %v10807_v15  ;;  %v5040_v49 = vrot.slane %v10807_v15, 1  ;;  %v5248_v5 = vrot.slane %v10807_v15, 2  ;;  %4311 = vrot.lane.b32.xlu0 %v10663_v32, %s7949_s14  ;;  %5099 = vrot.lane.b32.xlu1 %v10668_v44, %s7948_s13  ;;  %v7743_v52 = vpop.f32.mrb[70].mxu1  ;;  %v10821_v27 = vpop.f32.mrb[115].mxu0 }
 0x37f   : > { %12684 = vst [vmem:[#allocation98_spill] sm:$0xff] %v10821_v27  ;;  %v4049_v63 = vrot.slane %v7743_v52, 1  ;;  %v4257_v54 = vrot.slane %v7743_v52, 2  ;;  %v5039_v46 = vrot.slane %v10821_v27, 1  ;;  %v5247_v21 = vrot.slane %v10821_v27, 2  ;;  %v10825_v39 = vpop.f32.mrb[71].mxu1 }
 0x380   : > { %12685 = vst [vmem:[#allocation102_spill] sm:$0xff] %v10825_v39  ;;  %v4047_v43 = vrot.slane %v10825_v39, 1  ;;  %v4255_v1 = vrot.slane %v10825_v39, 2  ;;  %v4046_v52 = vrot.slane %v10783_v9, 1 }
 0x381   : > { %v10829_v15 = vpop.f32.mrb[116].mxu0  ;;  %v10832_v32 = vsel %vm862_vm2, %v5039_v46, %v5040_v49  ;;  %v10835_v44 = vsel %vm1071_vm3, %v5247_v21, %v5248_v5 }
 0x382   : > { %12686 = vst [vmem:[#allocation35_spill] sm:$0xff] %v10829_v15  ;;  %5307 = vrot.lane.b32.xlu1 %v10671_v35, %s7949_s14  ;;  %4107 = vrot.lane.b32.xlu0 %v10692_v47, %s7948_s13  ;;  %v10843_v27 = vpop.f32.mrb[72].mxu1  ;;  %v4790_v39 = vpop.f32.mrb[117].mxu0  ;;  %v10846_v38 = vsel %vm862_vm2, %v4047_v43, %v4049_v63  ;;  %v10849_v46 = vsel %vm1071_vm3, %v4255_v1, %v4257_v54 }
 0x383   : > { %12687 = vst [vmem:[#allocation104_spill] sm:$0xff] %v10843_v27  ;;  %v4052_v21 = vrot.slane %v10843_v27, 1  ;;  %v4260_v29 = vrot.slane %v10843_v27, 2  ;;  %v5042_v9 = vrot.slane %v4790_v39, 1  ;;  %v5250_v12 = vrot.slane %v4790_v39, 2  ;;  %v10853_v16 = vpop.f32.mrb[73].mxu1 }
 0x384   : > { %12688 = vst [vmem:[#allocation103_spill] sm:$0xff] %v10853_v16  ;;  %v4051_v35 = vrot.slane %v10853_v16, 1  ;;  %v4259_v47 = vrot.slane %v10853_v16, 2  ;;  %v10858_v10 = vsel %vm862_vm2, %v4046_v52, %v4047_v43  ;;  %v10861_v63 = vsel %vm1071_vm3, %v4254_v58, %v4255_v1 }
 0x385   : > { %v7817_v54 = vpop.f32.mrb[118].mxu0  ;;  %v10864_v62 = vsel %vm862_vm2, %v5040_v49, %v5042_v9  ;;  %v10867_v27 = vsel %vm1071_vm3, %v5248_v5, %v5250_v12  ;;  %v5044_v12 = vrot.slane %v10829_v15, 1  ;;  %v5252_v49 = vrot.slane %v10829_v15, 2 }
 0x386   : > { %v5047_v39 = vrot.slane %v7817_v54, 1  ;;  %v5255_v45 = vrot.slane %v7817_v54, 2  ;;  %5103 = vrot.lane.b32.xlu1 %v10700_v14, %s7948_s13  ;;  %4315 = vrot.lane.b32.xlu0 %v10695_v50, %s7949_s14  ;;  %v10873_v43 = vpop.f32.mrb[74].mxu1  ;;  %v10875_v52 = vpop.f32.mrb[119].mxu0  ;;  %v10878_v58 = vsel %vm862_vm2, %v4051_v35, %v4052_v21  ;;  %v10881_v9 = vsel %vm1071_vm3, %v4259_v47, %v4260_v29 }
 0x387   : > { %12689 = vst [vmem:[#allocation36_spill] sm:$0xff] %v10873_v43  ;;  %12690 = vst [vmem:[#allocation105_spill] sm:$0xff] %v10875_v52  ;;  %v5045_v5 = vrot.slane %v10875_v52, 1  ;;  %v5253_v14 = vrot.slane %v10875_v52, 2  ;;  %v3822_v1 = vpop.f32.mrb[75].mxu1  ;;  %v4264_v52 = vrot.slane %v10873_v43, 2 }
 0x388   : > { %v4054_v50 = vrot.slane %v3822_v1, 1  ;;  %v4262_v54 = vrot.slane %v3822_v1, 2 }
 0x389   : > { %v10888_v16 = vsel %vm862_vm2, %v5045_v5, %v5047_v39  ;;  %v10891_v35 = vsel %vm1071_vm3, %v5253_v14, %v5255_v45  ;;  %v10894_v47 = vsel %vm862_vm2, %v5044_v12, %v5045_v5  ;;  %v10897_v20 = vsel %vm1071_vm3, %v5252_v49, %v5253_v14 }
 0x38a   : > { %5311 = vrot.lane.b32.xlu1 %v10703_v60, %s7949_s14  ;;  %5101 = vrot.lane.b32.xlu0 %v10706_v25, %s7948_s13  ;;  %v10904_v1 = vsel %vm862_vm2, %v4052_v21, %v4054_v50  ;;  %v10907_v39 = vsel %vm1071_vm3, %v4260_v29, %v4262_v54 }
 0x38d   : > { %v10909_v45 = vpop.f32.mrb[120].mxu0 }
 0x38e   : > { %12691 = vst [vmem:[#allocation106_spill] sm:$0xff] %v10909_v45  ;;  %v5050_v12 = vrot.slane %v10909_v45, 1  ;;  %v5258_v5 = vrot.slane %v10909_v45, 2  ;;  %5309 = vrot.lane.b32.xlu0 %v10709_v28, %s7949_s14  ;;  %4109 = vrot.lane.b32.xlu1 %v10714_v31, %s7948_s13  ;;  %v7752_v60 = vpop.f32.mrb[76].mxu1  ;;  %v10917_v25 = vpop.f32.mrb[121].mxu0 }
 0x38f   : > { %12692 = vst [vmem:[#allocation33_spill] sm:$0xff] %v10917_v25  ;;  %v4059_v21 = vrot.slane %v7752_v60, 1  ;;  %v4267_v49 = vrot.slane %v7752_v60, 2  ;;  %v5049_v29 = vrot.slane %v10917_v25, 1  ;;  %v5257_v14 = vrot.slane %v10917_v25, 2  ;;  %v10921_v50 = vpop.f32.mrb[77].mxu1 }
 0x390   : > { %12693 = vst [vmem:[#allocation107_spill] sm:$0xff] %v10921_v50  ;;  %v4057_v54 = vrot.slane %v10921_v50, 1  ;;  %v4265_v45 = vrot.slane %v10921_v50, 2  ;;  %v4056_v60 = vrot.slane %v10873_v43, 1 }
 0x391   : > { %v10925_v15 = vpop.f32.mrb[122].mxu0  ;;  %v10928_v28 = vsel %vm862_vm2, %v5049_v29, %v5050_v12  ;;  %v10931_v31 = vsel %vm1071_vm3, %v5257_v14, %v5258_v5 }
 0x392   : > { %12694 = vst [vmem:[#allocation39_spill] sm:$0xff] %v10925_v15  ;;  %4317 = vrot.lane.b32.xlu1 %v10717_v8, %s7949_s14  ;;  %5105 = vrot.lane.b32.xlu0 %v10738_v30, %s7948_s13  ;;  %v10939_v25 = vpop.f32.mrb[78].mxu1  ;;  %v4820_v50 = vpop.f32.mrb[123].mxu0  ;;  %v10942_v22 = vsel %vm862_vm2, %v4057_v54, %v4059_v21  ;;  %v10945_v29 = vsel %vm1071_vm3, %v4265_v45, %v4267_v49 }
 0x393   : > { %12695 = vst [vmem:[#allocation37_spill] sm:$0xff] %v10939_v25  ;;  %v4062_v14 = vrot.slane %v10939_v25, 1  ;;  %v4270_v55 = vrot.slane %v10939_v25, 2  ;;  %v5052_v43 = vrot.slane %v4820_v50, 1  ;;  %v5260_v40 = vrot.slane %v4820_v50, 2  ;;  %v10949_v4 = vpop.f32.mrb[79].mxu1 }
 0x394   : > { %12696 = vst [vmem:[#allocation34_spill] sm:$0xff] %v10949_v4  ;;  %v4061_v8 = vrot.slane %v10949_v4, 1  ;;  %v4269_v30 = vrot.slane %v10949_v4, 2  ;;  %v10954_v2 = vsel %vm862_vm2, %v4056_v60, %v4057_v54  ;;  %v10957_v21 = vsel %vm1071_vm3, %v4264_v52, %v4265_v45 }
 0x395   : > { %v7826_v49 = vpop.f32.mrb[124].mxu0  ;;  %v10960_v33 = vsel %vm862_vm2, %v5050_v12, %v5052_v43  ;;  %v10963_v25 = vsel %vm1071_vm3, %v5258_v5, %v5260_v40  ;;  %v5054_v40 = vrot.slane %v10925_v15, 1  ;;  %v5262_v45 = vrot.slane %v10925_v15, 2 }
 0x396   : > { %v5057_v50 = vrot.slane %v7826_v49, 1  ;;  %v5265_v48 = vrot.slane %v7826_v49, 2  ;;  %5313 = vrot.lane.b32.xlu0 %v10741_v36, %s7949_s14  ;;  %4113 = vrot.lane.b32.xlu1 %v10748_v57, %s7948_s13  ;;  %v10969_v54 = vpop.f32.mrb[80].mxu1  ;;  %v10971_v60 = vpop.f32.mrb[125].mxu0  ;;  %v10974_v52 = vsel %vm862_vm2, %v4061_v8, %v4062_v14  ;;  %v10977_v43 = vsel %vm1071_vm3, %v4269_v30, %v4270_v55 }
 0x397   : > { %12697 = vst [vmem:[#allocation108_spill] sm:$0xff] %v10969_v54  ;;  %12698 = vst [vmem:[#allocation38_spill] sm:$0xff] %v10971_v60  ;;  %v5055_v12 = vrot.slane %v10971_v60, 1  ;;  %v5263_v36 = vrot.slane %v10971_v60, 2  ;;  %v3852_v5 = vpop.f32.mrb[81].mxu1  ;;  %v4274_v60 = vrot.slane %v10969_v54, 2 }
 0x398   : > { %12699 = vst [vmem:[#allocation40_spill] sm:$0xff] %v10977_v43  ;;  %v4064_v57 = vrot.slane %v3852_v5, 1  ;;  %v4272_v49 = vrot.slane %v3852_v5, 2 }
 0x399   : > { %v10984_v4 = vsel %vm862_vm2, %v5055_v12, %v5057_v50  ;;  %v10987_v8 = vsel %vm1071_vm3, %v5263_v36, %v5265_v48  ;;  %v10990_v30 = vsel %vm862_vm2, %v5054_v40, %v5055_v12  ;;  %v10993_v43 = vsel %vm1071_vm3, %v5262_v45, %v5263_v36 }
 0x39a   : > { %12700 = vst [vmem:[#allocation3_spill] sm:$0xff] %v10993_v43  ;;  %4321 = vrot.lane.b32.xlu1 %v10751_v51, %s7949_s14  ;;  %4111 = vrot.lane.b32.xlu0 %v10754_v24, %s7948_s13  ;;  %v11000_v5 = vsel %vm862_vm2, %v4062_v14, %v4064_v57  ;;  %v11003_v50 = vsel %vm1071_vm3, %v4270_v55, %v4272_v49 }
 0x39b   : > { %12701 = vst [vmem:[#allocation43_spill] sm:$0xff] %v11000_v5  ;;  %12702 = vst [vmem:[#allocation4_spill] sm:$0xff] %v11003_v50 }
 0x39d   : > { %v11005_v48 = vpop.f32.mrb[126].mxu0 }
 0x39e   : > { %12703 = vst [vmem:[#allocation8_spill] sm:$0xff] %v11005_v48  ;;  %v5060_v40 = vrot.slane %v11005_v48, 1  ;;  %v5268_v12 = vrot.slane %v11005_v48, 2  ;;  %4319 = vrot.lane.b32.xlu0 %v10757_v56, %s7949_s14  ;;  %5107 = vrot.lane.b32.xlu1 %v10762_v19, %s7948_s13  ;;  %v7761_v51 = vpop.f32.mrb[82].mxu1  ;;  %v11013_v24 = vpop.f32.mrb[127].mxu0 }
 0x39f   : > { %12704 = vst [vmem:[#allocation44_spill] sm:$0xff] %v11013_v24  ;;  %v4069_v14 = vrot.slane %v7761_v51, 1  ;;  %v4277_v45 = vrot.slane %v7761_v51, 2  ;;  %v5059_v55 = vrot.slane %v11013_v24, 1  ;;  %v5267_v36 = vrot.slane %v11013_v24, 2  ;;  %v11017_v57 = vpop.f32.mrb[83].mxu1 }
 0x3a0   : > { %12705 = vst [vmem:[#allocation7_spill] sm:$0xff] %v11017_v57  ;;  %v4067_v49 = vrot.slane %v11017_v57, 1  ;;  %v4275_v48 = vrot.slane %v11017_v57, 2  ;;  %v4066_v51 = vrot.slane %v10969_v54, 1 }
 0x3a1   : > { %v11021_v15 = vpop.f32.mrb[128].mxu0  ;;  %v11024_v56 = vsel %vm862_vm2, %v5059_v55, %v5060_v40  ;;  %v11027_v19 = vsel %vm1071_vm3, %v5267_v36, %v5268_v12 }
 0x3a2   : > { %12706 = vst [vmem:[#allocation41_spill] sm:$0xff] %v11021_v15  ;;  %12707 = vst [vmem:[#allocation50_spill] sm:$0xff] %v11024_v56  ;;  %5315 = vrot.lane.b32.xlu1 %v10765_v0, %s7949_s14  ;;  %4115 = vrot.lane.b32.xlu0 %v10786_v37, %s7948_s13  ;;  %v11035_v24 = vpop.f32.mrb[84].mxu1  ;;  %v4850_v57 = vpop.f32.mrb[129].mxu0  ;;  %v11038_v50 = vsel %vm862_vm2, %v4067_v49, %v4069_v14  ;;  %v11041_v55 = vsel %vm1071_vm3, %v4275_v48, %v4277_v45 }
 0x3a3   : > { %12708 = vst [vmem:[#allocation42_spill] sm:$0xff] %v11027_v19  ;;  %12709 = vst [vmem:[#allocation47_spill] sm:$0xff] %v11035_v24  ;;  %v4072_v36 = vrot.slane %v11035_v24, 1  ;;  %v4280_v19 = vrot.slane %v11035_v24, 2  ;;  %v5062_v54 = vrot.slane %v4850_v57, 1  ;;  %v5270_v56 = vrot.slane %v4850_v57, 2 }
 0x3a4   : > { %12710 = vst [vmem:[#allocation52_spill] sm:$0xff] %v11038_v50  ;;  %12711 = vst [vmem:[#allocation45_spill] sm:$0xff] %v11041_v55  ;;  %v11045_v43 = vpop.f32.mrb[85].mxu1  ;;  %v11050_v5 = vsel %vm862_vm2, %v4066_v51, %v4067_v49  ;;  %v11053_v14 = vsel %vm1071_vm3, %v4274_v60, %v4275_v48  ;;  %v5064_v48 = vrot.slane %v11021_v15, 1 }
 0x3a5   : > { %12712 = vst [vmem:[#allocation55_spill] sm:$0xff] %v11045_v43  ;;  %v4071_v0 = vrot.slane %v11045_v43, 1  ;;  %v4279_v37 = vrot.slane %v11045_v43, 2  ;;  %v7835_v45 = vpop.f32.mrb[130].mxu0  ;;  %v11056_v55 = vsel %vm862_vm2, %v5060_v40, %v5062_v54  ;;  %v11059_v24 = vsel %vm1071_vm3, %v5268_v12, %v5270_v56 }
 0x3a6   : > { %v5067_v57 = vrot.slane %v7835_v45, 1  ;;  %v5275_v50 = vrot.slane %v7835_v45, 2  ;;  %5111 = vrot.lane.b32.xlu1 %v10796_v42, %s7948_s13  ;;  %4323 = vrot.lane.b32.xlu0 %v10789_v7, %s7949_s14  ;;  %v11065_v49 = vpop.f32.mrb[86].mxu1  ;;  %v11067_v51 = vpop.f32.mrb[131].mxu0  ;;  %v5272_v40 = vrot.slane %v11021_v15, 2 }
 0x3a7   : > { %12713 = vst [vmem:[#allocation49_spill] sm:$0xff] %v11065_v49  ;;  %12714 = vst [vmem:[#allocation56_spill] sm:$0xff] %v11067_v51  ;;  %v11070_v60 = vsel %vm862_vm2, %v4071_v0, %v4072_v36  ;;  %v11073_v54 = vsel %vm1071_vm3, %v4279_v37, %v4280_v19  ;;  %v5065_v12 = vrot.slane %v11067_v51, 1  ;;  %v5273_v42 = vrot.slane %v11067_v51, 2  ;;  %v3882_v56 = vpop.f32.mrb[87].mxu1 }
 0x3a8   : > { %12715 = vst [vmem:[#allocation51_spill] sm:$0xff] %v11073_v54  ;;  %v4074_v7 = vrot.slane %v3882_v56, 1  ;;  %v4282_v45 = vrot.slane %v3882_v56, 2  ;;  %v4284_v51 = vrot.slane %v11065_v49, 2 }
 0x3a9   : > { %v11080_v43 = vsel %vm862_vm2, %v5065_v12, %v5067_v57  ;;  %v11083_v0 = vsel %vm1071_vm3, %v5273_v42, %v5275_v50  ;;  %v11086_v37 = vsel %vm862_vm2, %v5064_v48, %v5065_v12  ;;  %v11089_v54 = vsel %vm1071_vm3, %v5272_v40, %v5273_v42 }
 0x3aa   : > { %12716 = vst [vmem:[#allocation61_spill] sm:$0xff] %v11089_v54  ;;  %5319 = vrot.lane.b32.xlu1 %v10799_v34, %s7949_s14  ;;  %5109 = vrot.lane.b32.xlu0 %v10802_v6, %s7948_s13  ;;  %v11096_v56 = vsel %vm862_vm2, %v4072_v36, %v4074_v7  ;;  %v11099_v57 = vsel %vm1071_vm3, %v4280_v19, %v4282_v45 }
 0x3ab   : > { %12717 = vst [vmem:[#allocation9_spill] sm:$0xff] %v11096_v56  ;;  %12718 = vst [vmem:[#allocation62_spill] sm:$0xff] %v11099_v57 }
 0x3ad   : > { %v11101_v50 = vpop.f32.mrb[132].mxu0 }
 0x3ae   : > { %12719 = vst [vmem:[#allocation53_spill] sm:$0xff] %v11101_v50  ;;  %v5070_v48 = vrot.slane %v11101_v50, 1  ;;  %v5278_v12 = vrot.slane %v11101_v50, 2  ;;  %5317 = vrot.lane.b32.xlu0 %v10805_v11, %s7949_s14  ;;  %4117 = vrot.lane.b32.xlu1 %v10810_v41, %s7948_s13  ;;  %v7770_v34 = vpop.f32.mrb[88].mxu1  ;;  %v11109_v6 = vpop.f32.mrb[133].mxu0 }
 0x3af   : > { %12720 = vst [vmem:[#allocation10_spill] sm:$0xff] %v11109_v6  ;;  %v4079_v36 = vrot.slane %v7770_v34, 1  ;;  %v4287_v40 = vrot.slane %v7770_v34, 2  ;;  %v5069_v19 = vrot.slane %v11109_v6, 1  ;;  %v5277_v42 = vrot.slane %v11109_v6, 2  ;;  %v11113_v7 = vpop.f32.mrb[89].mxu1 }
 0x3b0   : > { %12721 = vst [vmem:[#allocation68_spill] sm:$0xff] %v11113_v7  ;;  %v4077_v45 = vrot.slane %v11113_v7, 1  ;;  %v4285_v50 = vrot.slane %v11113_v7, 2  ;;  %v4076_v34 = vrot.slane %v11065_v49, 1 }
 0x3b1   : > { %v11117_v15 = vpop.f32.mrb[134].mxu0  ;;  %v11120_v11 = vsel %vm862_vm2, %v5069_v19, %v5070_v48  ;;  %v11123_v41 = vsel %vm1071_vm3, %v5277_v42, %v5278_v12 }
 0x3b2   : > { %12722 = vst [vmem:[#allocation57_spill] sm:$0xff] %v11117_v15  ;;  %12723 = vst [vmem:[#allocation58_spill] sm:$0xff] %v11120_v11  ;;  %4325 = vrot.lane.b32.xlu1 %v10813_v23, %s7949_s14  ;;  %5113 = vrot.lane.b32.xlu0 %v10832_v32, %s7948_s13  ;;  %v11131_v6 = vpop.f32.mrb[90].mxu1  ;;  %v4880_v7 = vpop.f32.mrb[135].mxu0  ;;  %v11134_v57 = vsel %vm862_vm2, %v4077_v45, %v4079_v36  ;;  %v11137_v19 = vsel %vm1071_vm3, %v4285_v50, %v4287_v40 }
 0x3b3   : > { %12724 = vst [vmem:[#allocation70_spill] sm:$0xff] %v11123_v41  ;;  %12725 = vst [vmem:[#allocation63_spill] sm:$0xff] %v11131_v6  ;;  %v4082_v42 = vrot.slane %v11131_v6, 1  ;;  %v4290_v41 = vrot.slane %v11131_v6, 2  ;;  %v5072_v49 = vrot.slane %v4880_v7, 1  ;;  %v5280_v11 = vrot.slane %v4880_v7, 2 }
 0x3b4   : > { %12726 = vst [vmem:[#allocation13_spill] sm:$0xff] %v11134_v57  ;;  %12727 = vst [vmem:[#allocation73_spill] sm:$0xff] %v11137_v19  ;;  %v11141_v54 = vpop.f32.mrb[91].mxu1  ;;  %v11146_v56 = vsel %vm862_vm2, %v4076_v34, %v4077_v45  ;;  %v11149_v36 = vsel %vm1071_vm3, %v4284_v51, %v4285_v50  ;;  %v5074_v50 = vrot.slane %v11117_v15, 1 }
 0x3b5   : > { %12728 = vst [vmem:[#allocation67_spill] sm:$0xff] %v11141_v54  ;;  %v4081_v23 = vrot.slane %v11141_v54, 1  ;;  %v4289_v32 = vrot.slane %v11141_v54, 2  ;;  %v7844_v40 = vpop.f32.mrb[136].mxu0  ;;  %v11152_v19 = vsel %vm862_vm2, %v5070_v48, %v5072_v49  ;;  %v11155_v6 = vsel %vm1071_vm3, %v5278_v12, %v5280_v11 }
 0x3b6   : > { %12729 = vst [vmem:[#allocation74_spill] sm:$0xff] %v11155_v6  ;;  %v5077_v7 = vrot.slane %v7844_v40, 1  ;;  %v5285_v57 = vrot.slane %v7844_v40, 2  ;;  %5321 = vrot.lane.b32.xlu0 %v10835_v44, %s7949_s14  ;;  %4121 = vrot.lane.b32.xlu1 %v10846_v38, %s7948_s13  ;;  %v11161_v45 = vpop.f32.mrb[92].mxu1  ;;  %v11163_v34 = vpop.f32.mrb[137].mxu0  ;;  %v5282_v48 = vrot.slane %v11117_v15, 2 }
 0x3b7   : > { %12730 = vst [vmem:[#allocation16_spill] sm:$0xff] %v11161_v45  ;;  %12731 = vst [vmem:[#allocation78_spill] sm:$0xff] %v11163_v34  ;;  %v11166_v51 = vsel %vm862_vm2, %v4081_v23, %v4082_v42  ;;  %v11169_v49 = vsel %vm1071_vm3, %v4289_v32, %v4290_v41  ;;  %v5075_v12 = vrot.slane %v11163_v34, 1  ;;  %v5283_v44 = vrot.slane %v11163_v34, 2  ;;  %v3912_v11 = vpop.f32.mrb[93].mxu1 }
 0x3b8   : > { %12732 = vst [vmem:[#allocation59_spill] sm:$0xff] %v11169_v49  ;;  %v4084_v38 = vrot.slane %v3912_v11, 1  ;;  %v4292_v40 = vrot.slane %v3912_v11, 2 }
 0x3b9   : > { %v11175_v54 = vpop.f32.mrb[138].mxu0  ;;  %v11178_v6 = vsel %vm862_vm2, %v5075_v12, %v5077_v7  ;;  %v11181_v23 = vsel %vm1071_vm3, %v5283_v44, %v5285_v57  ;;  %v11184_v32 = vsel %vm862_vm2, %v5074_v50, %v5075_v12  ;;  %v11187_v15 = vsel %vm1071_vm3, %v5282_v48, %v5283_v44 }
 0x3ba   : > { %12733 = vst [vmem:[#allocation64_spill] sm:$0xff] %v11175_v54  ;;  %12734 = vst [vmem:[#allocation79_spill] sm:$0xff] %v11178_v6  ;;  %4329 = vrot.lane.b32.xlu1 %v10849_v46, %s7949_s14  ;;  %4119 = vrot.lane.b32.xlu0 %v10858_v10, %s7948_s13  ;;  %v7779_v7 = vpop.f32.mrb[94].mxu1  ;;  %v11195_v11 = vpop.f32.mrb[139].mxu0  ;;  %v11198_v57 = vsel %vm862_vm2, %v4082_v42, %v4084_v38  ;;  %v11201_v50 = vsel %vm1071_vm3, %v4290_v41, %v4292_v40  ;;  %v4086_v46 = vrot.slane %v11161_v45, 1 }
 0x3bb   : > { %12735 = vst [vmem:[#allocation65_spill] sm:$0xff] %v11181_v23  ;;  %12736 = vst [vmem:[#allocation19_spill] sm:$0xff] %v11184_v32  ;;  %v4089_v48 = vrot.slane %v7779_v7, 1  ;;  %v4297_v12 = vrot.slane %v7779_v7, 2  ;;  %v5079_v44 = vrot.slane %v11195_v11, 1  ;;  %v5287_v34 = vrot.slane %v11195_v11, 2 }
 0x3bc   : > { %12737 = vst [vmem:[#allocation84_spill] sm:$0xff] %v11187_v15  ;;  %12738 = vst [vmem:[#allocation69_spill] sm:$0xff] %v11195_v11  ;;  %v11205_v49 = vpop.f32.mrb[95].mxu1  ;;  %v4294_v42 = vrot.slane %v11161_v45, 2  ;;  %v12742_v38 = vrot.slane %v11175_v54, 1  ;;  %v12744_v40 = vrot.slane %v11175_v54, 2 }
 0x3bd   : > { %12739 = vst [vmem:[#allocation17_spill] sm:$0xff] %v11198_v57  ;;  %12740 = vst [vmem:[#allocation90_spill] sm:$0xff] %v11201_v50  ;;  %v4087_v10 = vrot.slane %v11205_v49, 1  ;;  %v4295_v15 = vrot.slane %v11205_v49, 2 }
 0x3be   : > { %12741 = vst [vmem:[#allocation80_spill] sm:$0xff] %v11205_v49  ;;  %v11214_v41 = vsel %vm862_vm2, %v5079_v44, %v12742_v38  ;;  %v11219_v7 = vsel %vm1071_vm3, %v5287_v34, %v12744_v40  ;;  %4327 = vrot.lane.b32.xlu0 %v10861_v63, %s7949_s14  ;;  %5115 = vrot.lane.b32.xlu1 %v10864_v62, %s7948_s13  ;;  %v11225_v11 = vpop.f32.mrb[96].mxu1 }
 0x3bf   : > { %12743 = vst [vmem:[#allocation85_spill] sm:$0xff] %v11214_v41  ;;  %12745 = vst [vmem:[#allocation89_spill] sm:$0xff] %v11219_v7  ;;  %v11228_v45 = vsel %vm862_vm2, %v4087_v10, %v4089_v48  ;;  %v11231_v49 = vsel %vm1071_vm3, %v4295_v15, %v4297_v12  ;;  %v11234_v44 = vsel %vm862_vm2, %v4086_v46, %v4087_v10  ;;  %v6009_v34 = vrot.slane %v11225_v11, 1  ;;  %v11238_v40 = vpop.f32.mrb[97].mxu1 }
 0x3c0   : > { %12746 = vst [vmem:[#allocation71_spill] sm:$0xff] %v11228_v45  ;;  %12747 = vst [vmem:[#allocation18_spill] sm:$0xff] %v11231_v49  ;;  %v6217_v38 = vrot.slane %v11225_v11, 2  ;;  %v11241_v63 = vsel %vm1071_vm3, %v4294_v42, %v4295_v15  ;;  %v6008_v62 = vrot.slane %v11238_v40, 1  ;;  %v6216_v48 = vrot.slane %v11238_v40, 2  ;;  %v4094_v7 = vpop.permute.xlu1 %4093 }
 0x3c1   : > { %12748 = vst [vmem:[#allocation92_spill] sm:$0xff] %v11234_v44  ;;  %12749 = vst [vmem:[#allocation75_spill] sm:$0xff] %v11241_v63  ;;  %v4188_v15 = vadd.f32 %v9752_v53, %v4094_v7 }
 0x3c2   : > { %5323 = vrot.lane.b32.xlu1 %v10867_v27, %s7949_s14  ;;  %4123 = vrot.lane.b32.xlu0 %v10878_v58, %s7948_s13  ;;  %v11249_v12 = vpop.f32.mrb[98].mxu1  ;;  %v11252_v46 = vsel %vm862_vm2, %v6008_v62, %v6009_v34  ;;  %v11255_v10 = vsel %vm1071_vm3, %v6216_v48, %v6217_v38 }
 0x3c3   : > { %12750 = vst [vmem:[#allocation76_spill] sm:$0xff] %v11252_v46  ;;  %12751 = vst [vmem:[#allocation88_spill] sm:$0xff] %v11255_v10  ;;  %v5699_v42 = vpop.f32.mrb[99].mxu1  ;;  %v6013_v27 = vrot.slane %v11249_v12, 1  ;;  %v6221_v41 = vrot.slane %v11249_v12, 2 }
 0x3c4   : > { %v6011_v63 = vrot.slane %v5699_v42, 1  ;;  %v6219_v44 = vrot.slane %v5699_v42, 2  ;;  %v4302_v49 = vpop.permute.xlu1 %4301  ;;  %v5090_v45 = vpop.permute.xlu0 %5089 }
 0x3c5   : > { %v4396_v58 = vadd.f32 %v4302_v49, %v4188_v15  ;;  %v5185_v62 = vadd.f32 %v5090_v45, %v10570_v3 }
 0x3c6   : > { %v11260_v50 = vpop.f32.mrb[140].mxu0  ;;  %5119 = vrot.lane.b32.xlu1 %v10888_v16, %s7948_s13  ;;  %4331 = vrot.lane.b32.xlu0 %v10881_v9, %s7949_s14  ;;  %v7864_v7 = vpop.f32.mrb[100].mxu1  ;;  %v11269_v48 = vsel %vm862_vm2, %v6009_v34, %v6011_v63  ;;  %v11272_v42 = vsel %vm1071_vm3, %v6217_v38, %v6219_v44 }
 0x3c7   : > { %12752 = vst [vmem:[#allocation101_spill] sm:$0xff] %v11260_v50  ;;  %v5084_v46 = vrot.slane %v11260_v50, 1  ;;  %v4910_v53 = vpop.f32.mrb[141].mxu0  ;;  %12753 = vst [vmem:[#allocation81_spill] sm:$0xff] %v11269_v48  ;;  %v5292_v49 = vrot.slane %v11260_v50, 2  ;;  %v6016_v45 = vrot.slane %v7864_v7, 1  ;;  %v4930_v34 = vadd.f32 %v10562_v18, %v4396_v58 }
 0x3c8   : > { %12754 = vst [vmem:[#allocation23_spill] sm:$0xff] %v11272_v42  ;;  %v5082_v15 = vrot.slane %v4910_v53, 1  ;;  %v5290_v3 = vrot.slane %v4910_v53, 2  ;;  %v11275_v10 = vpop.f32.mrb[101].mxu1  ;;  %v6224_v57 = vrot.slane %v7864_v7, 2  ;;  %v4098_v32 = vpop.permute.xlu1 %4097  ;;  %v12755_v50 = vrot.slane %v11175_v54, 1 }
 0x3c9   : > { %v6014_v16 = vrot.slane %v11275_v10, 1  ;;  %v6222_v9 = vrot.slane %v11275_v10, 2  ;;  %v5298_v23 = vpop.permute.xlu0 %5297  ;;  %v4190_v63 = vadd.f32 %v4098_v32, %v10572_v17  ;;  %v12756_v42 = vrot.slane %v11175_v54, 2 }
 0x3ca   : > { %v5393_v44 = vadd.f32 %v5298_v23, %v5185_v62  ;;  %v7853_v38 = vpop.f32.mrb[142].mxu0  ;;  %v11284_v53 = vsel %vm862_vm2, %v12755_v50, %v5082_v15  ;;  %5327 = vrot.lane.b32.xlu1 %v10891_v35, %s7949_s14  ;;  %5117 = vrot.lane.b32.xlu0 %v10894_v47, %s7948_s13  ;;  %v11297_v17 = vpop.f32.mrb[102].mxu1 }
 0x3cb   : > { %v11289_v7 = vsel %vm1071_vm3, %v12756_v42, %v5290_v3  ;;  %v5087_v48 = vrot.slane %v7853_v38, 1  ;;  %v5295_v6 = vrot.slane %v7853_v38, 2  ;;  %v11295_v18 = vpop.f32.mrb[143].mxu0  ;;  %v11300_v23 = vsel %vm862_vm2, %v6013_v27, %v6014_v16  ;;  %v11309_v42 = vpop.f32.mrb[103].mxu1 }
 0x3cc   : > { %12757 = vst [vmem:[#allocation22_spill] sm:$0xff] %v11295_v18  ;;  %v11303_v32 = vsel %vm862_vm2, %v6014_v16, %v6016_v45  ;;  %v5085_v50 = vrot.slane %v11295_v18, 1  ;;  %v5293_v58 = vrot.slane %v11295_v18, 2  ;;  %v6019_v62 = vrot.slane %v11297_v17, 1  ;;  %v4306_v3 = vpop.permute.xlu1 %4305 }
 0x3cd   : > { %12758 = vst [vmem:[#allocation77_spill] sm:$0xff] %v11303_v32  ;;  %v6227_v35 = vrot.slane %v11297_v17, 2  ;;  %v6018_v47 = vrot.slane %v11309_v42, 1  ;;  %v6226_v15 = vrot.slane %v11309_v42, 2  ;;  %v4096_v27 = vpop.permute.xlu0 %4095  ;;  %v11314_v38 = vsel %vm1071_vm3, %v6221_v41, %v6222_v9 }
 0x3ce   : > { %12759 = vst [vmem:[#allocation109_spill] sm:$0xff] %v11314_v38  ;;  %v11317_v45 = vsel %vm1071_vm3, %v6222_v9, %v6224_v57  ;;  %v4398_v16 = vadd.f32 %v4306_v3, %v4190_v63  ;;  %v11320_v18 = vsel %vm862_vm2, %v5085_v50, %v5087_v48  ;;  %v11323_v54 = vsel %vm1071_vm3, %v5293_v58, %v5295_v6  ;;  %v11329_v32 = vpop.f32.mrb[104].mxu1 }
 0x3cf   : > { %12760 = vst [vmem:[#allocation6_spill] sm:$0xff] %v11317_v45  ;;  %4125 = vrot.lane.b32.xlu1 %v10904_v1, %s7948_s13  ;;  %5325 = vrot.lane.b32.xlu0 %v10897_v20, %s7949_s14  ;;  %v11332_v41 = vsel %vm862_vm2, %v5084_v46, %v5085_v50  ;;  %v11335_v57 = vsel %vm1071_vm3, %v5292_v49, %v5293_v58  ;;  %v5729_v9 = vpop.f32.mrb[105].mxu1 }
 0x3d0   : > { %v11338_v48 = vsel %vm862_vm2, %v6018_v47, %v6019_v62  ;;  %v4189_v6 = vadd.f32 %v10557_v13, %v4096_v27  ;;  %v4932_v63 = vadd.f32 %v10603_v61, %v4398_v16  ;;  %v11343_v1 = vsel %vm1071_vm3, %v6226_v15, %v6227_v35  ;;  %v5092_v45 = vpop.permute.xlu1 %5091 }
 0x3d1   : > { %v6021_v20 = vrot.slane %v5729_v9, 1  ;;  %v6229_v3 = vrot.slane %v5729_v9, 2  ;;  %v4304_v38 = vpop.permute.xlu0 %4303  ;;  %v11346_v46 = vadd.f32 %v11238_v40, %v5393_v44  ;;  %v5186_v58 = vadd.f32 %v5092_v45, %v4930_v34 }
 0x3d2   : > { %v4397_v49 = vadd.f32 %v4304_v38, %v4189_v6  ;;  %v7873_v13 = vpop.f32.mrb[106].mxu1  ;;  %v6023_v44 = vrot.slane %v11329_v32, 1 }
 0x3d3   : > { %12761 = vst [vmem:[#allocation82_spill] sm:$0xff] %v11346_v46  ;;  %4333 = vrot.lane.b32.xlu1 %v10907_v39, %s7949_s14  ;;  %5121 = vrot.lane.b32.xlu0 %v10928_v28, %s7948_s13  ;;  %v11353_v61 = vsel %vm862_vm2, %v6019_v62, %v6021_v20  ;;  %v11356_v50 = vsel %vm1071_vm3, %v6227_v35, %v6229_v3  ;;  %v6026_v47 = vrot.slane %v7873_v13, 1  ;;  %v6234_v15 = vrot.slane %v7873_v13, 2  ;;  %v11358_v27 = vpop.f32.mrb[107].mxu1 }
 0x3d4   : > { %v4931_v40 = vadd.f32 %v10577_v59, %v4397_v49  ;;  %v6231_v39 = vrot.slane %v11329_v32, 2  ;;  %v6024_v28 = vrot.slane %v11358_v27, 1  ;;  %v6232_v38 = vrot.slane %v11358_v27, 2  ;;  %v5300_v62 = vpop.permute.xlu1 %5299 }
 0x3d5   : > { %v4100_v16 = vpop.permute.xlu0 %4099  ;;  %v5394_v6 = vadd.f32 %v5300_v62, %v5186_v58  ;;  %v12764_v62 = vld [vmem:[#allocation25_spill] sm:$0xff] }
 0x3d6   : > { %v4191_v35 = vadd.f32 %v4100_v16, %v10599_v26  ;;  %v11370_v59 = vpop.f32.mrb[108].mxu1  ;;  %v11373_v34 = vsel %vm862_vm2, %v6023_v44, %v6024_v28  ;;  %v11376_v45 = vsel %vm862_vm2, %v6024_v28, %v6026_v47  ;;  %v11379_v9 = vsel %vm1071_vm3, %v6231_v39, %v6232_v38 }
 0x3d7   : > { %4129 = vrot.lane.b32.xlu1 %v10942_v22, %s7948_s13  ;;  %5329 = vrot.lane.b32.xlu0 %v10931_v31, %s7949_s14  ;;  %v6029_v20 = vrot.slane %v11370_v59, 1  ;;  %v6237_v26 = vrot.slane %v11370_v59, 2  ;;  %v11383_v3 = vpop.f32.mrb[109].mxu1  ;;  %v11386_v22 = vsel %vm1071_vm3, %v6232_v38, %v6234_v15  ;;  %v11389_v31 = vadd.f32 %v11225_v11, %v5394_v6 }
 0x3d8   : > { %v6028_v49 = vrot.slane %v11383_v3, 1  ;;  %v6236_v13 = vrot.slane %v11383_v3, 2  ;;  %v5096_v58 = vpop.permute.xlu1 %5095 }
 0x3d9   : > { %12762 = vst [vmem:[#allocation5_spill] sm:$0xff] %v11389_v31  ;;  %v4308_v47 = vpop.permute.xlu0 %4307  ;;  %v5188_v28 = vadd.f32 %v5096_v58, %v4932_v63 }
 0x3da   : > { %v4399_v44 = vadd.f32 %v4308_v47, %v4191_v35  ;;  %v11397_v39 = vpop.f32.mrb[110].mxu1  ;;  %v11400_v15 = vsel %vm862_vm2, %v6028_v49, %v6029_v20  ;;  %v11403_v11 = vsel %vm1071_vm3, %v6236_v13, %v6237_v26 }
 0x3db   : > { %4337 = vrot.lane.b32.xlu1 %v10945_v29, %s7949_s14  ;;  %4127 = vrot.lane.b32.xlu0 %v10954_v2, %s7948_s13  ;;  %12763 = vst [vmem:[#allocation46_spill] sm:$0xff] %v11403_v11  ;;  %v5759_v38 = vpop.f32.mrb[111].mxu1  ;;  %v12793_v11 = vld [vmem:[#allocation52_spill] sm:$0xff] }
 0x3dc   : > { %v4933_v16 = vadd.f32 %v12764_v62, %v4399_v44  ;;  %v6031_v6 = vrot.slane %v5759_v38, 1  ;;  %v6239_v35 = vrot.slane %v5759_v38, 2  ;;  %v5304_v47 = vpop.permute.xlu1 %5303  ;;  %v6241_v62 = vrot.slane %v11397_v39, 2 }
 0x3dd   : > { %v5094_v31 = vpop.permute.xlu0 %5093  ;;  %v5396_v29 = vadd.f32 %v5304_v47, %v5188_v28 }
 0x3de   : > { %v7882_v2 = vpop.f32.mrb[112].mxu1  ;;  %v11411_v49 = vsel %vm862_vm2, %v6029_v20, %v6031_v6  ;;  %v11414_v63 = vsel %vm1071_vm3, %v6237_v26, %v6239_v35  ;;  %v5187_v13 = vadd.f32 %v5094_v31, %v4931_v40  ;;  %v12767_v26 = vld [vmem:[#allocation27_spill] sm:$0xff] }
 0x3df   : > { %5123 = vrot.lane.b32.xlu1 %v10960_v33, %s7948_s13  ;;  %4335 = vrot.lane.b32.xlu0 %v10957_v21, %s7949_s14  ;;  %12765 = vst [vmem:[#allocation11_spill] sm:$0xff] %v11414_v63  ;;  %v6036_v58 = vrot.slane %v7882_v2, 1  ;;  %v6244_v44 = vrot.slane %v7882_v2, 2  ;;  %v11416_v38 = vpop.f32.mrb[113].mxu1  ;;  %v11419_v28 = vadd.f32 %v11275_v10, %v5396_v29  ;;  %v6033_v33 = vrot.slane %v11397_v39, 1 }
 0x3e0   : > { %v6034_v21 = vrot.slane %v11416_v38, 1  ;;  %v6242_v20 = vrot.slane %v11416_v38, 2  ;;  %v4102_v6 = vpop.permute.xlu1 %4101 }
 0x3e1   : > { %12766 = vst [vmem:[#allocation12_spill] sm:$0xff] %v11419_v28  ;;  %v5302_v47 = vpop.permute.xlu0 %5301  ;;  %v4192_v35 = vadd.f32 %v12767_v26, %v4102_v6  ;;  %v12773_v28 = vld [vmem:[#allocation40_spill] sm:$0xff] }
 0x3e2   : > { %v5395_v40 = vadd.f32 %v5302_v47, %v5187_v13  ;;  %v11430_v10 = vpop.f32.mrb[114].mxu1  ;;  %v11433_v31 = vsel %vm862_vm2, %v6033_v33, %v6034_v21  ;;  %v11436_v29 = vsel %vm862_vm2, %v6034_v21, %v6036_v58  ;;  %v11439_v2 = vsel %vm1071_vm3, %v6241_v62, %v6242_v20 }
 0x3e3   : > { %5331 = vrot.lane.b32.xlu1 %v10963_v25, %s7949_s14  ;;  %4131 = vrot.lane.b32.xlu0 %v10974_v52, %s7948_s13  ;;  %12768 = vst [vmem:[#allocation48_spill] sm:$0xff] %v11433_v31  ;;  %12769 = vst [vmem:[#allocation54_spill] sm:$0xff] %v11436_v29  ;;  %v6039_v6 = vrot.slane %v11430_v10, 1  ;;  %v6247_v13 = vrot.slane %v11430_v10, 2  ;;  %v11443_v47 = vpop.f32.mrb[115].mxu1  ;;  %v11446_v25 = vsel %vm1071_vm3, %v6242_v20, %v6244_v44 }
 0x3e4   : > { %12770 = vst [vmem:[#allocation15_spill] sm:$0xff] %v11439_v2  ;;  %12771 = vst [vmem:[#allocation60_spill] sm:$0xff] %v11446_v25  ;;  %v11449_v52 = vadd.f32 %v11249_v12, %v5395_v40  ;;  %v6038_v33 = vrot.slane %v11443_v47, 1  ;;  %v6246_v58 = vrot.slane %v11443_v47, 2  ;;  %v4310_v21 = vpop.permute.xlu1 %4309 }
 0x3e5   : > { %v5098_v26 = vpop.permute.xlu0 %5097  ;;  %v4400_v62 = vadd.f32 %v4310_v21, %v4192_v35 }
 0x3e6   : > { %12772 = vst [vmem:[#allocation14_spill] sm:$0xff] %v11449_v52  ;;  %v11457_v46 = vpop.f32.mrb[116].mxu1  ;;  %v11460_v44 = vsel %vm862_vm2, %v6038_v33, %v6039_v6  ;;  %v11463_v12 = vsel %vm1071_vm3, %v6246_v58, %v6247_v13  ;;  %v5189_v20 = vadd.f32 %v5098_v26, %v4933_v16  ;;  %v12776_v52 = vld [vmem:[#allocation83_spill] sm:$0xff]  ;;  %v12779_v58 = vld [vmem:[#allocation28_spill] sm:$0xff] }
 0x3e7   : > { %5127 = vrot.lane.b32.xlu1 %v10984_v4, %s7948_s13  ;;  %4339 = vrot.lane.b32.xlu0 %v12773_v28, %s7949_s14  ;;  %12774 = vst [vmem:[#allocation66_spill] sm:$0xff] %v11460_v44  ;;  %12775 = vst [vmem:[#allocation20_spill] sm:$0xff] %v11463_v12  ;;  %v5789_v40 = vpop.f32.mrb[117].mxu1  ;;  %v4934_v25 = vadd.f32 %v12776_v52, %v4400_v62 }
 0x3e8   : > { %v6041_v2 = vrot.slane %v5789_v40, 1  ;;  %v6249_v35 = vrot.slane %v5789_v40, 2  ;;  %v4106_v21 = vpop.permute.xlu1 %4105 }
 0x3e9   : > { %v5306_v29 = vpop.permute.xlu0 %5305  ;;  %v4194_v52 = vadd.f32 %v4106_v21, %v12779_v58  ;;  %v12783_v58 = vld [vmem:[#allocation3_spill] sm:$0xff] }
 0x3ea   : > { %v5397_v4 = vadd.f32 %v5306_v29, %v5189_v20  ;;  %v7891_v28 = vpop.f32.mrb[118].mxu1  ;;  %v11471_v33 = vsel %vm862_vm2, %v6039_v6, %v6041_v2  ;;  %v11474_v16 = vsel %vm1071_vm3, %v6247_v13, %v6249_v35 }
 0x3eb   : > { %5335 = vrot.lane.b32.xlu1 %v10987_v8, %s7949_s14  ;;  %5125 = vrot.lane.b32.xlu0 %v10990_v30, %s7948_s13  ;;  %12777 = vst [vmem:[#allocation72_spill] sm:$0xff] %v11471_v33  ;;  %12778 = vst [vmem:[#allocation24_spill] sm:$0xff] %v11474_v16  ;;  %v6046_v26 = vrot.slane %v7891_v28, 1  ;;  %v6254_v62 = vrot.slane %v7891_v28, 2  ;;  %v11477_v40 = vpop.f32.mrb[119].mxu1  ;;  %v6043_v8 = vrot.slane %v11457_v46, 1 }
 0x3ec   : > { %v11480_v29 = vadd.f32 %v11309_v42, %v5397_v4  ;;  %v6251_v30 = vrot.slane %v11457_v46, 2  ;;  %v6044_v20 = vrot.slane %v11477_v40, 1  ;;  %v6252_v2 = vrot.slane %v11477_v40, 2  ;;  %v4314_v6 = vpop.permute.xlu1 %4313  ;;  %v12781_v16 = vld [vmem:[#allocation86_spill] sm:$0xff]  ;;  %v12782_v28 = vld [vmem:[#allocation43_spill] sm:$0xff] }
 0x3ed   : > { %v4104_v13 = vpop.permute.xlu0 %4103  ;;  %v4402_v35 = vadd.f32 %v4314_v6, %v4194_v52 }
 0x3ee   : > { %12780 = vst [vmem:[#allocation21_spill] sm:$0xff] %v11480_v29  ;;  %v4193_v21 = vadd.f32 %v12781_v16, %v4104_v13  ;;  %v11491_v42 = vpop.f32.mrb[120].mxu1  ;;  %v11494_v4 = vsel %vm862_vm2, %v6043_v8, %v6044_v20  ;;  %v11497_v29 = vsel %vm862_vm2, %v6044_v20, %v6046_v26  ;;  %v11500_v12 = vsel %vm1071_vm3, %v6251_v30, %v6252_v2  ;;  %v12787_v13 = vld [vmem:[#allocation93_spill] sm:$0xff]  ;;  %v12789_v30 = vld [vmem:[#allocation4_spill] sm:$0xff] }
 0x3ef   : > { %4133 = vrot.lane.b32.xlu1 %v12782_v28, %s7948_s13  ;;  %5333 = vrot.lane.b32.xlu0 %v12783_v58, %s7949_s14  ;;  %12784 = vst [vmem:[#allocation25_spill] sm:$0xff] %v11494_v4  ;;  %12785 = vst [vmem:[#allocation27_spill] sm:$0xff] %v11497_v29  ;;  %v6049_v52 = vrot.slane %v11491_v42, 1  ;;  %v6257_v16 = vrot.slane %v11491_v42, 2  ;;  %v11504_v6 = vpop.f32.mrb[121].mxu1  ;;  %v4936_v28 = vadd.f32 %v12787_v13, %v4402_v35 }
 0x3f0   : > { %12786 = vst [vmem:[#allocation40_spill] sm:$0xff] %v11500_v12  ;;  %v11508_v58 = vsel %vm1071_vm3, %v6252_v2, %v6254_v62  ;;  %v6048_v8 = vrot.slane %v11504_v6, 1  ;;  %v6256_v4 = vrot.slane %v11504_v6, 2  ;;  %v5100_v26 = vpop.permute.xlu1 %5099  ;;  %v12790_v12 = vld [vmem:[#allocation50_spill] sm:$0xff] }
 0x3f1   : > { %12788 = vst [vmem:[#allocation83_spill] sm:$0xff] %v11508_v58  ;;  %v4312_v20 = vpop.permute.xlu0 %4311  ;;  %v5190_v2 = vadd.f32 %v5100_v26, %v4934_v25  ;;  %v12792_v58 = vld [vmem:[#allocation87_spill] sm:$0xff] }
 0x3f2   : > { %v4401_v29 = vadd.f32 %v4312_v20, %v4193_v21  ;;  %v11516_v33 = vpop.f32.mrb[122].mxu1  ;;  %v11519_v35 = vsel %vm862_vm2, %v6048_v8, %v6049_v52  ;;  %v11522_v62 = vsel %vm1071_vm3, %v6256_v4, %v6257_v16  ;;  %v12796_v4 = vld [vmem:[#allocation26_spill] sm:$0xff] }
 0x3f3   : > { %4341 = vrot.lane.b32.xlu1 %v12789_v30, %s7949_s14  ;;  %5129 = vrot.lane.b32.xlu0 %v12790_v12, %s7948_s13  ;;  %12791 = vst [vmem:[#allocation28_spill] sm:$0xff] %v11519_v35  ;;  %v5819_v13 = vpop.f32.mrb[123].mxu1  ;;  %v12794_v12 = vld [vmem:[#allocation42_spill] sm:$0xff] }
 0x3f4   : > { %v4935_v44 = vadd.f32 %v12792_v58, %v4401_v29  ;;  %v6051_v31 = vrot.slane %v5819_v13, 1  ;;  %v6259_v21 = vrot.slane %v5819_v13, 2  ;;  %v5308_v20 = vpop.permute.xlu1 %5307 }
 0x3f5   : > { %v4108_v63 = vpop.permute.xlu0 %4107  ;;  %v5398_v30 = vadd.f32 %v5308_v20, %v5190_v2  ;;  %v6261_v20 = vrot.slane %v11516_v33, 2 }
 0x3f6   : > { %v7900_v8 = vpop.f32.mrb[124].mxu1  ;;  %v11530_v35 = vsel %vm862_vm2, %v6049_v52, %v6051_v31  ;;  %v11533_v25 = vsel %vm1071_vm3, %v6257_v16, %v6259_v21  ;;  %v4195_v29 = vadd.f32 %v4108_v63, %v12796_v4  ;;  %v12798_v63 = vld [vmem:[#allocation45_spill] sm:$0xff] }
 0x3f7   : > { %4137 = vrot.lane.b32.xlu1 %v12793_v11, %s7948_s13  ;;  %5337 = vrot.lane.b32.xlu0 %v12794_v12, %s7949_s14  ;;  %12795 = vst [vmem:[#allocation86_spill] sm:$0xff] %v11533_v25  ;;  %v6056_v58 = vrot.slane %v7900_v8, 1  ;;  %v6264_v26 = vrot.slane %v7900_v8, 2  ;;  %v11536_v13 = vpop.f32.mrb[125].mxu1  ;;  %v11539_v2 = vadd.f32 %v11297_v17, %v5398_v30  ;;  %v6053_v11 = vrot.slane %v11516_v33, 1 }
 0x3f8   : > { %v6054_v12 = vrot.slane %v11536_v13, 1  ;;  %v6262_v31 = vrot.slane %v11536_v13, 2  ;;  %v5104_v52 = vpop.permute.xlu1 %5103 }
 0x3f9   : > { %12797 = vst [vmem:[#allocation43_spill] sm:$0xff] %v11539_v2  ;;  %v4316_v16 = vpop.permute.xlu0 %4315  ;;  %v5192_v21 = vadd.f32 %v5104_v52, %v4936_v28 }
 0x3fa   : > { %v4403_v25 = vadd.f32 %v4316_v16, %v4195_v29  ;;  %v11549_v17 = vpop.f32.mrb[126].mxu1  ;;  %v11552_v30 = vsel %vm862_vm2, %v6053_v11, %v6054_v12  ;;  %v11555_v8 = vsel %vm862_vm2, %v6054_v12, %v6056_v58  ;;  %v11558_v4 = vsel %vm1071_vm3, %v6261_v20, %v6262_v31  ;;  %v12802_v16 = vld [vmem:[#allocation95_spill] sm:$0xff] }
 0x3fb   : > { %4345 = vrot.lane.b32.xlu1 %v12798_v63, %s7949_s14  ;;  %4135 = vrot.lane.b32.xlu0 %v11050_v5, %s7948_s13  ;;  %12799 = vst [vmem:[#allocation3_spill] sm:$0xff] %v11552_v30  ;;  %12800 = vst [vmem:[#allocation93_spill] sm:$0xff] %v11555_v8  ;;  %v6059_v28 = vrot.slane %v11549_v17, 1  ;;  %v6267_v29 = vrot.slane %v11549_v17, 2  ;;  %v11562_v52 = vpop.f32.mrb[127].mxu1  ;;  %v11566_v5 = vsel %vm1071_vm3, %v6262_v31, %v6264_v26 }
 0x3fc   : > { %12801 = vst [vmem:[#allocation4_spill] sm:$0xff] %v11558_v4  ;;  %v4937_v63 = vadd.f32 %v12802_v16, %v4403_v25  ;;  %12803 = vst [vmem:[#allocation50_spill] sm:$0xff] %v11566_v5  ;;  %v6058_v11 = vrot.slane %v11562_v52, 1  ;;  %v6266_v2 = vrot.slane %v11562_v52, 2  ;;  %v5312_v58 = vpop.permute.xlu1 %5311 }
 0x3fd   : > { %v5102_v12 = vpop.permute.xlu0 %5101  ;;  %v5400_v8 = vadd.f32 %v5312_v58, %v5192_v21 }
 0x3fe   : > { %v11574_v20 = vpop.f32.mrb[128].mxu1  ;;  %v11577_v25 = vsel %vm862_vm2, %v6058_v11, %v6059_v28  ;;  %v11580_v26 = vsel %vm1071_vm3, %v6266_v2, %v6267_v29  ;;  %v5191_v31 = vadd.f32 %v5102_v12, %v4935_v44 }
 0x3ff   : > { %5131 = vrot.lane.b32.xlu1 %v11056_v55, %s7948_s13  ;;  %4343 = vrot.lane.b32.xlu0 %v11053_v14, %s7949_s14  ;;  %12804 = vst [vmem:[#allocation87_spill] sm:$0xff] %v11580_v26  ;;  %v5849_v16 = vpop.f32.mrb[129].mxu1  ;;  %v11583_v5 = vadd.f32 %v11358_v27, %v5400_v8  ;;  %v12807_v27 = vld [vmem:[#allocation91_spill] sm:$0xff]  ;;  %v12820_v26 = vld [vmem:[#allocation9_spill] sm:$0xff] }
 0x400   : > { %v6061_v21 = vrot.slane %v5849_v16, 1  ;;  %v6269_v58 = vrot.slane %v5849_v16, 2  ;;  %v4110_v4 = vpop.permute.xlu1 %4109 }
 0x401   : > { %12805 = vst [vmem:[#allocation52_spill] sm:$0xff] %v11583_v5  ;;  %v5310_v55 = vpop.permute.xlu0 %5309  ;;  %v4196_v8 = vadd.f32 %v12807_v27, %v4110_v4 }
 0x402   : > { %v5399_v30 = vadd.f32 %v5310_v55, %v5191_v31  ;;  %v7909_v14 = vpop.f32.mrb[130].mxu1  ;;  %v11590_v2 = vsel %vm862_vm2, %v6059_v28, %v6061_v21  ;;  %v11593_v44 = vsel %vm1071_vm3, %v6267_v29, %v6269_v58  ;;  %v6271_v55 = vrot.slane %v11574_v20, 2 }
 0x403   : > { %5339 = vrot.lane.b32.xlu1 %v11059_v24, %s7949_s14  ;;  %4139 = vrot.lane.b32.xlu0 %v11070_v60, %s7948_s13  ;;  %12806 = vst [vmem:[#allocation42_spill] sm:$0xff] %v11593_v44  ;;  %v6066_v11 = vrot.slane %v7909_v14, 1  ;;  %v6274_v12 = vrot.slane %v7909_v14, 2  ;;  %v11596_v16 = vpop.f32.mrb[131].mxu1  ;;  %v6063_v24 = vrot.slane %v11574_v20, 1 }
 0x404   : > { %v11599_v31 = vadd.f32 %v11329_v32, %v5399_v30  ;;  %v6064_v60 = vrot.slane %v11596_v16, 1  ;;  %v6272_v28 = vrot.slane %v11596_v16, 2  ;;  %v4318_v21 = vpop.permute.xlu1 %4317  ;;  %v12809_v32 = vld [vmem:[#allocation51_spill] sm:$0xff] }
 0x405   : > { %v5106_v29 = vpop.permute.xlu0 %5105  ;;  %v4404_v58 = vadd.f32 %v4318_v21, %v4196_v8 }
 0x406   : > { %12808 = vst [vmem:[#allocation26_spill] sm:$0xff] %v11599_v31  ;;  %v5193_v5 = vadd.f32 %v5106_v29, %v4937_v63  ;;  %v11607_v4 = vpop.f32.mrb[132].mxu1  ;;  %v11612_v30 = vsel %vm862_vm2, %v6063_v24, %v6064_v60  ;;  %v11615_v14 = vsel %vm862_vm2, %v6064_v60, %v6066_v11  ;;  %v11618_v27 = vsel %vm1071_vm3, %v6271_v55, %v6272_v28 }
 0x407   : > { %5135 = vrot.lane.b32.xlu1 %v11080_v43, %s7948_s13  ;;  %4347 = vrot.lane.b32.xlu0 %v12809_v32, %s7949_s14  ;;  %12810 = vst [vmem:[#allocation45_spill] sm:$0xff] %v11612_v30  ;;  %12811 = vst [vmem:[#allocation95_spill] sm:$0xff] %v11615_v14  ;;  %v6069_v8 = vrot.slane %v11607_v4, 1  ;;  %v6277_v63 = vrot.slane %v11607_v4, 2  ;;  %v11622_v21 = vpop.f32.mrb[133].mxu1  ;;  %v12813_v43 = vld [vmem:[#allocation94_spill] sm:$0xff]  ;;  %v11626_v31 = vsel %vm1071_vm3, %v6272_v28, %v6274_v12 }
 0x408   : > { %12812 = vst [vmem:[#allocation91_spill] sm:$0xff] %v11618_v27  ;;  %v4938_v29 = vadd.f32 %v12813_v43, %v4404_v58  ;;  %12814 = vst [vmem:[#allocation51_spill] sm:$0xff] %v11626_v31  ;;  %v6068_v24 = vrot.slane %v11622_v21, 1  ;;  %v6276_v32 = vrot.slane %v11622_v21, 2  ;;  %v4114_v11 = vpop.permute.xlu1 %4113  ;;  %v12818_v28 = vld [vmem:[#allocation31_spill] sm:$0xff] }
 0x409   : > { %v5314_v60 = vpop.permute.xlu0 %5313  ;;  %v4198_v43 = vadd.f32 %v4114_v11, %v12818_v28 }
 0x40a   : > { %v5401_v14 = vadd.f32 %v5314_v60, %v5193_v5  ;;  %v11632_v55 = vpop.f32.mrb[134].mxu1  ;;  %v11637_v58 = vsel %vm862_vm2, %v6068_v24, %v6069_v8  ;;  %v11640_v12 = vsel %vm1071_vm3, %v6276_v32, %v6277_v63  ;;  %v12821_v24 = vld [vmem:[#allocation61_spill] sm:$0xff] }
 0x40b   : > { %5343 = vrot.lane.b32.xlu1 %v11083_v0, %s7949_s14  ;;  %12815 = vst [vmem:[#allocation94_spill] sm:$0xff] %v11632_v55  ;;  %5133 = vrot.lane.b32.xlu0 %v11086_v37, %s7948_s13  ;;  %12816 = vst [vmem:[#allocation110_spill] sm:$0xff] %v11637_v58  ;;  %v5879_v31 = vpop.f32.mrb[135].mxu1 }
 0x40c   : > { %12817 = vst [vmem:[#allocation111_spill] sm:$0xff] %v11640_v12  ;;  %v11644_v27 = vadd.f32 %v11383_v3, %v5401_v14  ;;  %v6071_v5 = vrot.slane %v5879_v31, 1  ;;  %v6279_v60 = vrot.slane %v5879_v31, 2  ;;  %v4322_v0 = vpop.permute.xlu1 %4321  ;;  %v12824_v3 = vld [vmem:[#allocation29_spill] sm:$0xff]  ;;  %v6281_v12 = vrot.slane %v11632_v55, 2 }
 0x40d   : > { %v4112_v30 = vpop.permute.xlu0 %4111  ;;  %v4406_v44 = vadd.f32 %v4322_v0, %v4198_v43  ;;  %v12826_v43 = vld [vmem:[#allocation32_spill] sm:$0xff] }
 0x40e   : > { %12819 = vst [vmem:[#allocation31_spill] sm:$0xff] %v11644_v27  ;;  %v7918_v37 = vpop.f32.mrb[136].mxu1  ;;  %v11651_v32 = vsel %vm862_vm2, %v6069_v8, %v6071_v5  ;;  %v11654_v11 = vsel %vm1071_vm3, %v6277_v63, %v6279_v60  ;;  %v4197_v14 = vadd.f32 %v12824_v3, %v4112_v30  ;;  %v12827_v30 = vld [vmem:[#allocation62_spill] sm:$0xff] }
 0x40f   : > { %4141 = vrot.lane.b32.xlu1 %v12820_v26, %s7948_s13  ;;  %5341 = vrot.lane.b32.xlu0 %v12821_v24, %s7949_s14  ;;  %12822 = vst [vmem:[#allocation9_spill] sm:$0xff] %v11651_v32  ;;  %12823 = vst [vmem:[#allocation61_spill] sm:$0xff] %v11654_v11  ;;  %v6076_v28 = vrot.slane %v7918_v37, 1  ;;  %v6284_v31 = vrot.slane %v7918_v37, 2  ;;  %v11657_v27 = vpop.f32.mrb[137].mxu1  ;;  %v4940_v0 = vadd.f32 %v12826_v43, %v4406_v44  ;;  %v6073_v26 = vrot.slane %v11632_v55, 1 }
 0x410   : > { %12825 = vst [vmem:[#allocation29_spill] sm:$0xff] %v11657_v27  ;;  %v6074_v24 = vrot.slane %v11657_v27, 1  ;;  %v6282_v8 = vrot.slane %v11657_v27, 2  ;;  %v5108_v5 = vpop.permute.xlu1 %5107  ;;  %v12829_v3 = vld [vmem:[#allocation58_spill] sm:$0xff]  ;;  %v12839_v27 = vld [vmem:[#allocation73_spill] sm:$0xff] }
 0x411   : > { %v4320_v32 = vpop.permute.xlu0 %4319  ;;  %v5194_v63 = vadd.f32 %v5108_v5, %v4938_v29  ;;  %v12834_v5 = vld [vmem:[#allocation30_spill] sm:$0xff] }
 0x412   : > { %v4405_v60 = vadd.f32 %v4320_v32, %v4197_v14  ;;  %v11666_v37 = vpop.f32.mrb[138].mxu1  ;;  %v11671_v44 = vsel %vm862_vm2, %v6073_v26, %v6074_v24  ;;  %v11674_v43 = vsel %vm862_vm2, %v6074_v24, %v6076_v28  ;;  %v11677_v11 = vsel %vm1071_vm3, %v6281_v12, %v6282_v8  ;;  %v12836_v12 = vld [vmem:[#allocation13_spill] sm:$0xff] }
 0x413   : > { %4349 = vrot.lane.b32.xlu1 %v12827_v30, %s7949_s14  ;;  %12828 = vst [vmem:[#allocation32_spill] sm:$0xff] %v11666_v37  ;;  %5137 = vrot.lane.b32.xlu0 %v12829_v3, %s7948_s13  ;;  %12830 = vst [vmem:[#allocation62_spill] sm:$0xff] %v11671_v44  ;;  %v6079_v29 = vrot.slane %v11666_v37, 1  ;;  %v6287_v32 = vrot.slane %v11666_v37, 2  ;;  %v11681_v14 = vpop.f32.mrb[139].mxu1  ;;  %v11685_v58 = vsel %vm1071_vm3, %v6282_v8, %v6284_v31  ;;  %v12837_v37 = vld [vmem:[#allocation70_spill] sm:$0xff] }
 0x414   : > { %12831 = vst [vmem:[#allocation58_spill] sm:$0xff] %v11674_v43  ;;  %12832 = vst [vmem:[#allocation112_spill] sm:$0xff] %v11677_v11  ;;  %v4939_v30 = vadd.f32 %v12834_v5, %v4405_v60  ;;  %v6078_v26 = vrot.slane %v11681_v14, 1  ;;  %v6286_v3 = vrot.slane %v11681_v14, 2  ;;  %v5316_v28 = vpop.permute.xlu1 %5315  ;;  %v12838_v8 = vld [vmem:[#allocation99_spill] sm:$0xff] }
 0x415   : > { %12833 = vst [vmem:[#allocation113_spill] sm:$0xff] %v11681_v14  ;;  %12835 = vst [vmem:[#allocation30_spill] sm:$0xff] %v11685_v58  ;;  %v4116_v24 = vpop.permute.xlu0 %4115  ;;  %v5402_v43 = vadd.f32 %v5316_v28, %v5194_v63 }
 0x416   : > { %v11691_v11 = vpop.f32.mrb[140].mxu1  ;;  %v11696_v60 = vsel %vm862_vm2, %v6078_v26, %v6079_v29  ;;  %v11699_v31 = vsel %vm1071_vm3, %v6286_v3, %v6287_v32  ;;  %v4199_v5 = vadd.f32 %v4116_v24, %v12838_v8 }
 0x417   : > { %4145 = vrot.lane.b32.xlu1 %v12836_v12, %s7948_s13  ;;  %5345 = vrot.lane.b32.xlu0 %v12837_v37, %s7949_s14  ;;  %v5909_v58 = vpop.f32.mrb[141].mxu1  ;;  %v11703_v44 = vadd.f32 %v11370_v59, %v5402_v43  ;;  %v12840_v59 = vld [vmem:[#allocation98_spill] sm:$0xff] }
 0x418   : > { %v6081_v63 = vrot.slane %v5909_v58, 1  ;;  %v6289_v28 = vrot.slane %v5909_v58, 2  ;;  %v5112_v12 = vpop.permute.xlu1 %5111 }
 0x419   : > { %v4324_v14 = vpop.permute.xlu0 %4323  ;;  %v5196_v3 = vadd.f32 %v5112_v12, %v4940_v0  ;;  %v12841_v0 = vld [vmem:[#allocation74_spill] sm:$0xff] }
 0x41a   : > { %v4407_v55 = vadd.f32 %v4324_v14, %v4199_v5  ;;  %v11710_v37 = vsel %vm862_vm2, %v6079_v29, %v6081_v63  ;;  %v11713_v26 = vsel %vm1071_vm3, %v6287_v32, %v6289_v28  ;;  %v12844_v28 = vld [vmem:[#allocation59_spill] sm:$0xff] }
 0x41b   : > { %4353 = vrot.lane.b32.xlu1 %v12839_v27, %s7949_s14  ;;  %4143 = vrot.lane.b32.xlu0 %v11146_v56, %s7948_s13 }
 0x41c   : > { %v4941_v43 = vadd.f32 %v12840_v59, %v4407_v55  ;;  %v5320_v24 = vpop.permute.xlu1 %5319  ;;  %v12842_v55 = vld [vmem:[#allocation96_spill] sm:$0xff] }
 0x41d   : > { %v5110_v58 = vpop.permute.xlu0 %5109  ;;  %v5404_v8 = vadd.f32 %v5320_v24, %v5196_v3  ;;  %v12845_v3 = vld [vmem:[#allocation100_spill] sm:$0xff] }
 0x41e   : > { %v5195_v27 = vadd.f32 %v5110_v58, %v4939_v30 }
 0x41f   : > { %5139 = vrot.lane.b32.xlu1 %v11152_v19, %s7948_s13  ;;  %4351 = vrot.lane.b32.xlu0 %v11149_v36, %s7949_s14  ;;  %v11721_v56 = vadd.f32 %v11416_v38, %v5404_v8  ;;  %v12843_v38 = vld [vmem:[#allocation79_spill] sm:$0xff]  ;;  %v12846_v8 = vld [vmem:[#allocation65_spill] sm:$0xff] }
 0x420   : > { %v4118_v29 = vpop.permute.xlu1 %4117 }
 0x421   : > { %v5318_v14 = vpop.permute.xlu0 %5317  ;;  %v4200_v5 = vadd.f32 %v12842_v55, %v4118_v29 }
 0x422   : > { %v5403_v32 = vadd.f32 %v5318_v14, %v5195_v27  ;;  %v12848_v27 = vld [vmem:[#allocation102_spill] sm:$0xff] }
 0x423   : > { %5347 = vrot.lane.b32.xlu1 %v12841_v0, %s7949_s14  ;;  %4147 = vrot.lane.b32.xlu0 %v11166_v51, %s7948_s13 }
 0x424   : > { %v11729_v19 = vadd.f32 %v11397_v39, %v5403_v32  ;;  %v4326_v63 = vpop.permute.xlu1 %4325  ;;  %v12847_v39 = vld [vmem:[#allocation19_spill] sm:$0xff] }
 0x425   : > { %v5114_v36 = vpop.permute.xlu0 %5113  ;;  %v4408_v30 = vadd.f32 %v4326_v63, %v4200_v5  ;;  %v12850_v5 = vld [vmem:[#allocation84_spill] sm:$0xff]  ;;  %v12851_v63 = vld [vmem:[#allocation97_spill] sm:$0xff] }
 0x426   : > { %v5197_v12 = vadd.f32 %v5114_v36, %v4941_v43  ;;  %v12849_v43 = vld [vmem:[#allocation17_spill] sm:$0xff] }
 0x427   : > { %5143 = vrot.lane.b32.xlu1 %v12843_v38, %s7948_s13  ;;  %4355 = vrot.lane.b32.xlu0 %v12844_v28, %s7949_s14  ;;  %v4942_v59 = vadd.f32 %v12845_v3, %v4408_v30  ;;  %v12852_v30 = vld [vmem:[#allocation105_spill] sm:$0xff] }
 0x428   : > { %v4122_v24 = vpop.permute.xlu1 %4121 }
 0x429   : > { %v5322_v58 = vpop.permute.xlu0 %5321  ;;  %v4202_v29 = vadd.f32 %v4122_v24, %v12848_v27  ;;  %v12853_v24 = vld [vmem:[#allocation90_spill] sm:$0xff] }
 0x42a   : > { %v5405_v51 = vadd.f32 %v5322_v58, %v5197_v12 }
 0x42b   : > { %5351 = vrot.lane.b32.xlu1 %v12846_v8, %s7949_s14  ;;  %5141 = vrot.lane.b32.xlu0 %v12847_v39, %s7948_s13 }
 0x42c   : > { %v11742_v14 = vadd.f32 %v11443_v47, %v5405_v51  ;;  %v4330_v32 = vpop.permute.xlu1 %4329  ;;  %v12854_v47 = vld [vmem:[#allocation85_spill] sm:$0xff]  ;;  %v12855_v51 = vld [vmem:[#allocation35_spill] sm:$0xff] }
 0x42d   : > { %v4120_v0 = vpop.permute.xlu0 %4119  ;;  %v4410_v55 = vadd.f32 %v4330_v32, %v4202_v29  ;;  %v12856_v32 = vld [vmem:[#allocation71_spill] sm:$0xff] }
 0x42e   : > { %v4201_v36 = vadd.f32 %v12851_v63, %v4120_v0  ;;  %v12857_v0 = vld [vmem:[#allocation89_spill] sm:$0xff] }
 0x42f   : > { %4149 = vrot.lane.b32.xlu1 %v12849_v43, %s7948_s13  ;;  %5349 = vrot.lane.b32.xlu0 %v12850_v5, %s7949_s14  ;;  %v4944_v38 = vadd.f32 %v12852_v30, %v4410_v55  ;;  %v12858_v55 = vld [vmem:[#allocation103_spill] sm:$0xff] }
 0x430   : > { %v5116_v28 = vpop.permute.xlu1 %5115 }
 0x431   : > { %v4328_v12 = vpop.permute.xlu0 %4327  ;;  %v5198_v58 = vadd.f32 %v5116_v28, %v4942_v59  ;;  %v12859_v59 = vld [vmem:[#allocation18_spill] sm:$0xff]  ;;  %v12860_v28 = vld [vmem:[#allocation92_spill] sm:$0xff] }
 0x432   : > { %v4409_v3 = vadd.f32 %v4328_v12, %v4201_v36 }
 0x433   : > { %4357 = vrot.lane.b32.xlu1 %v12853_v24, %s7949_s14  ;;  %5145 = vrot.lane.b32.xlu0 %v12854_v47, %s7948_s13  ;;  %v7927_v47 = vpop.f32.mrb[142].mxu1 }
 0x434   : > { %v4943_v8 = vadd.f32 %v12855_v51, %v4409_v3  ;;  %v5324_v39 = vpop.permute.xlu1 %5323  ;;  %v12861_v3 = vld [vmem:[#allocation33_spill] sm:$0xff] }
 0x435   : > { %v4124_v27 = vpop.permute.xlu0 %4123  ;;  %v5406_v29 = vadd.f32 %v5324_v39, %v5198_v58  ;;  %v6083_v39 = vrot.slane %v11691_v11, 1 }
 0x436   : > { %v4203_v43 = vadd.f32 %v4124_v27, %v12858_v55 }
 0x437   : > { %4153 = vrot.lane.b32.xlu1 %v12856_v32, %s7948_s13  ;;  %5353 = vrot.lane.b32.xlu0 %v12857_v0, %s7949_s14  ;;  %v11761_v5 = vadd.f32 %v11430_v10, %v5406_v29  ;;  %v6291_v10 = vrot.slane %v11691_v11, 2  ;;  %v12862_v29 = vld [vmem:[#allocation75_spill] sm:$0xff]  ;;  %v11774_v32 = vpop.f32.mrb[143].mxu1 }
 0x438   : > { %v5120_v63 = vpop.permute.xlu1 %5119  ;;  %v6292_v55 = vrot.slane %v11774_v32, 2 }
 0x439   : > { %v4332_v36 = vpop.permute.xlu0 %4331  ;;  %v5200_v12 = vadd.f32 %v5120_v63, %v4944_v38  ;;  %v6084_v38 = vrot.slane %v11774_v32, 1 }
 0x43a   : > { %v4411_v30 = vadd.f32 %v4332_v36, %v4203_v43 }
 0x43b   : > { %4361 = vrot.lane.b32.xlu1 %v12859_v59, %s7949_s14  ;;  %4151 = vrot.lane.b32.xlu0 %v12860_v28, %s7948_s13  ;;  %v11782_v59 = vsel %vm862_vm2, %v6083_v39, %v6084_v38  ;;  %v12864_v28 = vld [vmem:[#allocation104_spill] sm:$0xff]  ;;  %v6294_v39 = vrot.slane %v7927_v47, 2 }
 0x43c   : > { %v4945_v24 = vadd.f32 %v12861_v3, %v4411_v30  ;;  %v5328_v58 = vpop.permute.xlu1 %5327 }
 0x43d   : > { %v5118_v51 = vpop.permute.xlu0 %5117  ;;  %v5408_v27 = vadd.f32 %v5328_v58, %v5200_v12 }
 0x43e   : > { %v5199_v0 = vadd.f32 %v5118_v51, %v4943_v8  ;;  %v12863_v8 = vld [vmem:[#allocation76_spill] sm:$0xff] }
 0x43f   : > { %5147 = vrot.lane.b32.xlu1 %v11284_v53, %s7948_s13  ;;  %4359 = vrot.lane.b32.xlu0 %v12862_v29, %s7949_s14  ;;  %v11779_v43 = vadd.f32 %v11477_v40, %v5408_v27  ;;  %v11785_v53 = vsel %vm1071_vm3, %v6291_v10, %v6292_v55  ;;  %v6086_v27 = vrot.slane %v7927_v47, 1  ;;  %v12865_v10 = vld [vmem:[#allocation88_spill] sm:$0xff]  ;;  %v12866_v29 = vld [vmem:[#allocation106_spill] sm:$0xff] }
 0x441   : > { %v4126_v63 = vpop.permute.xlu1 %4125  ;;  %v5326_v36 = vpop.permute.xlu0 %5325 }
 0x442   : > { %v5407_v30 = vadd.f32 %v5326_v36, %v5199_v0  ;;  %v4204_v12 = vadd.f32 %v12864_v28, %v4126_v63 }
 0x443   : > { %5355 = vrot.lane.b32.xlu1 %v11289_v7, %s7949_s14  ;;  %6088 = vrot.lane.b32.xlu0 %v12863_v8, %s7948_s13 }
 0x444   : > { %v11793_v40 = vadd.f32 %v11457_v46, %v5407_v30  ;;  %v11801_v46 = vsel %vm862_vm2, %v6084_v38, %v6086_v27  ;;  %v11804_v30 = vsel %vm1071_vm3, %v6292_v55, %v6294_v39  ;;  %v12868_v38 = vld [vmem:[#allocation81_spill] sm:$0xff]  ;;  %v12869_v55 = vld [vmem:[#allocation36_spill] sm:$0xff] }
 0x445   : > { %v4334_v3 = vpop.permute.xlu1 %4333  ;;  %v5122_v58 = vpop.permute.xlu0 %5121 }
 0x446   : > { %v4412_v51 = vadd.f32 %v4334_v3, %v4204_v12  ;;  %v5201_v7 = vadd.f32 %v5122_v58, %v4945_v24 }
 0x447   : > { %5151 = vrot.lane.b32.xlu1 %v11320_v18, %s7948_s13  ;;  %6296 = vrot.lane.b32.xlu0 %v12865_v10, %s7949_s14  ;;  %v12867_v18 = vld [vmem:[#allocation107_spill] sm:$0xff] }
 0x448   : > { %v4946_v0 = vadd.f32 %v12866_v29, %v4412_v51  ;;  %v12871_v10 = vld [vmem:[#allocation23_spill] sm:$0xff] }
 0x449   : > { %v4130_v36 = vpop.permute.xlu1 %4129  ;;  %v5330_v8 = vpop.permute.xlu0 %5329 }
 0x44a   : > { %v5409_v63 = vadd.f32 %v5330_v8, %v5201_v7  ;;  %v4206_v47 = vadd.f32 %v4130_v36, %v12867_v18  ;;  %v12872_v7 = vld [vmem:[#allocation39_spill] sm:$0xff]  ;;  %v12874_v18 = vld [vmem:[#allocation109_spill] sm:$0xff] }
 0x44b   : > { %5359 = vrot.lane.b32.xlu1 %v11323_v54, %s7949_s14  ;;  %5149 = vrot.lane.b32.xlu0 %v11332_v41, %s7948_s13  ;;  %v12870_v54 = vld [vmem:[#allocation38_spill] sm:$0xff] }
 0x44c   : > { %v11812_v24 = vadd.f32 %v11504_v6, %v5409_v63 }
 0x44d   : > { %v4338_v28 = vpop.permute.xlu1 %4337  ;;  %v4128_v12 = vpop.permute.xlu0 %4127 }
 0x44e   : > { %v4414_v3 = vadd.f32 %v4338_v28, %v4206_v47  ;;  %v4205_v58 = vadd.f32 %v12869_v55, %v4128_v12  ;;  %v12875_v47 = vld [vmem:[#allocation34_spill] sm:$0xff] }
 0x44f   : > { %6090 = vrot.lane.b32.xlu1 %v12868_v38, %s7948_s13  ;;  %5357 = vrot.lane.b32.xlu0 %v11335_v57, %s7949_s14  ;;  %v12873_v57 = vld [vmem:[#allocation77_spill] sm:$0xff] }
 0x450   : > { %v4948_v51 = vadd.f32 %v12870_v54, %v4414_v3 }
 0x451   : > { %v5124_v27 = vpop.permute.xlu1 %5123  ;;  %v4336_v41 = vpop.permute.xlu0 %4335 }
 0x452   : > { %v4413_v39 = vadd.f32 %v4336_v41, %v4205_v58  ;;  %v5202_v6 = vadd.f32 %v5124_v27, %v4946_v0  ;;  %v12876_v0 = vld [vmem:[#allocation6_spill] sm:$0xff]  ;;  %v12877_v58 = vld [vmem:[#allocation44_spill] sm:$0xff] }
 0x453   : > { %6298 = vrot.lane.b32.xlu1 %v12871_v10, %s7949_s14  ;;  %6092 = vrot.lane.b32.xlu0 %v11300_v23, %s7948_s13 }
 0x454   : > { %v4947_v29 = vadd.f32 %v12872_v7, %v4413_v39 }
 0x455   : > { %v5332_v36 = vpop.permute.xlu1 %5331  ;;  %v4132_v8 = vpop.permute.xlu0 %4131 }
 0x456   : > { %v5410_v63 = vadd.f32 %v5332_v36, %v5202_v6  ;;  %v4207_v28 = vadd.f32 %v4132_v8, %v12875_v47 }
 0x457   : > { %6094 = vrot.lane.b32.xlu1 %v12873_v57, %s7948_s13  ;;  %6300 = vrot.lane.b32.xlu0 %v12874_v18, %s7949_s14 }
 0x458   : > { %v11831_v12 = vadd.f32 %v11491_v42, %v5410_v63  ;;  %v12879_v63 = vld [vmem:[#allocation8_spill] sm:$0xff] }
 0x459   : > { %v5128_v3 = vpop.permute.xlu1 %5127  ;;  %v4340_v38 = vpop.permute.xlu0 %4339 }
 0x45a   : > { %v4415_v23 = vadd.f32 %v4340_v38, %v4207_v28  ;;  %v5204_v55 = vadd.f32 %v5128_v3, %v4948_v51  ;;  %v12881_v38 = vld [vmem:[#allocation46_spill] sm:$0xff] }
 0x45b   : > { %6302 = vrot.lane.b32.xlu1 %v12876_v0, %s7949_s14  ;;  %6096 = vrot.lane.b32.xlu0 %v11338_v48, %s7948_s13  ;;  %v12878_v48 = vld [vmem:[#allocation37_spill] sm:$0xff] }
 0x45c   : > { %v4949_v54 = vadd.f32 %v12877_v58, %v4415_v23  ;;  %v12882_v23 = vld [vmem:[#allocation108_spill] sm:$0xff] }
 0x45d   : > { %v5336_v27 = vpop.permute.xlu1 %5335  ;;  %v5126_v41 = vpop.permute.xlu0 %5125 }
 0x45e   : > { %v5412_v39 = vadd.f32 %v5336_v27, %v5204_v55  ;;  %v5203_v42 = vadd.f32 %v5126_v41, %v4947_v29  ;;  %v12884_v27 = vld [vmem:[#allocation11_spill] sm:$0xff] }
 0x45f   : > { %6098 = vrot.lane.b32.xlu1 %v11353_v61, %s7948_s13  ;;  %6304 = vrot.lane.b32.xlu0 %v11343_v1, %s7949_s14 }
 0x460   : > { %v11843_v10 = vadd.f32 %v11536_v13, %v5412_v39  ;;  %v12886_v39 = vld [vmem:[#allocation41_spill] sm:$0xff] }
 0x461   : > { %v4134_v6 = vpop.permute.xlu1 %4133  ;;  %v5334_v7 = vpop.permute.xlu0 %5333 }
 0x462   : > { %v5411_v36 = vadd.f32 %v5334_v7, %v5203_v42  ;;  %v4208_v51 = vadd.f32 %v12878_v48, %v4134_v6  ;;  %v12888_v48 = vld [vmem:[#allocation15_spill] sm:$0xff] }
 0x463   : > { %6306 = vrot.lane.b32.xlu1 %v11356_v50, %s7949_s14  ;;  %6100 = vrot.lane.b32.xlu0 %v11373_v34, %s7948_s13 }
 0x464   : > { %v11851_v61 = vadd.f32 %v11516_v33, %v5411_v36  ;;  %v12880_v33 = vld [vmem:[#allocation7_spill] sm:$0xff]  ;;  %v12887_v36 = vld [vmem:[#allocation54_spill] sm:$0xff] }
 0x465   : > { %v4342_v8 = vpop.permute.xlu1 %4341  ;;  %v5130_v1 = vpop.permute.xlu0 %5129 }
 0x466   : > { %v4416_v29 = vadd.f32 %v4342_v8, %v4208_v51  ;;  %v5205_v13 = vadd.f32 %v5130_v1, %v4949_v54  ;;  %v12889_v51 = vld [vmem:[#allocation55_spill] sm:$0xff] }
 0x467   : > { %6102 = vrot.lane.b32.xlu1 %v11376_v45, %s7948_s13  ;;  %6308 = vrot.lane.b32.xlu0 %v11379_v9, %s7949_s14 }
 0x468   : > { %v4950_v50 = vadd.f32 %v12879_v63, %v4416_v29 }
 0x469   : > { %v4138_v57 = vpop.permute.xlu1 %4137  ;;  %v5338_v18 = vpop.permute.xlu0 %5337 }
 0x46a   : > { %v5413_v34 = vadd.f32 %v5338_v18, %v5205_v13  ;;  %v4210_v47 = vadd.f32 %v4138_v57, %v12880_v33  ;;  %v12891_v57 = vld [vmem:[#allocation66_spill] sm:$0xff] }
 0x46b   : > { %6310 = vrot.lane.b32.xlu1 %v11386_v22, %s7949_s14  ;;  %6104 = vrot.lane.b32.xlu0 %v11400_v15, %s7948_s13  ;;  %v12883_v22 = vld [vmem:[#allocation56_spill] sm:$0xff] }
 0x46c   : > { %v11864_v28 = vadd.f32 %v11562_v52, %v5413_v34  ;;  %v12885_v52 = vld [vmem:[#allocation48_spill] sm:$0xff]  ;;  %v12892_v34 = vld [vmem:[#allocation10_spill] sm:$0xff] }
 0x46d   : > { %v4346_v45 = vpop.permute.xlu1 %4345  ;;  %v4136_v3 = vpop.permute.xlu0 %4135 }
 0x46e   : > { %v4418_v9 = vadd.f32 %v4346_v45, %v4210_v47  ;;  %v4209_v0 = vadd.f32 %v12882_v23, %v4136_v3 }
 0x46f   : > { %6106 = vrot.lane.b32.xlu1 %v11411_v49, %s7948_s13  ;;  %6312 = vrot.lane.b32.xlu0 %v12881_v38, %s7949_s14  ;;  %v12893_v38 = vld [vmem:[#allocation72_spill] sm:$0xff] }
 0x470   : > { %v4952_v55 = vadd.f32 %v12883_v22, %v4418_v9 }
 0x471   : > { %v5132_v58 = vpop.permute.xlu1 %5131  ;;  %v4344_v15 = vpop.permute.xlu0 %4343 }
 0x472   : > { %v4417_v54 = vadd.f32 %v4344_v15, %v4209_v0  ;;  %v5206_v41 = vadd.f32 %v5132_v58, %v4950_v50  ;;  %v12890_v50 = vld [vmem:[#allocation60_spill] sm:$0xff]  ;;  %v12895_v58 = vld [vmem:[#allocation47_spill] sm:$0xff] }
 0x473   : > { %6314 = vrot.lane.b32.xlu1 %v12884_v27, %s7949_s14  ;;  %6108 = vrot.lane.b32.xlu0 %v12885_v52, %s7948_s13  ;;  %v12897_v27 = vld [vmem:[#allocation25_spill] sm:$0xff] }
 0x474   : > { %v4951_v42 = vadd.f32 %v12886_v39, %v4417_v54  ;;  %v12896_v54 = vld [vmem:[#allocation24_spill] sm:$0xff] }
 0x475   : > { %v5340_v49 = vpop.permute.xlu1 %5339  ;;  %v4140_v6 = vpop.permute.xlu0 %4139 }
 0x476   : > { %v5414_v7 = vadd.f32 %v5340_v49, %v5206_v41  ;;  %v4211_v8 = vadd.f32 %v4140_v6, %v12889_v51  ;;  %v12899_v6 = vld [vmem:[#allocation40_spill] sm:$0xff] }
 0x477   : > { %6110 = vrot.lane.b32.xlu1 %v12887_v36, %s7948_s13  ;;  %6316 = vrot.lane.b32.xlu0 %v12888_v48, %s7949_s14 }
 0x478   : > { %v11883_v1 = vadd.f32 %v11549_v17, %v5414_v7  ;;  %v12894_v17 = vld [vmem:[#allocation20_spill] sm:$0xff]  ;;  %v12900_v7 = vld [vmem:[#allocation53_spill] sm:$0xff] }
 0x479   : > { %v5136_v29 = vpop.permute.xlu1 %5135  ;;  %v4348_v13 = vpop.permute.xlu0 %4347 }
 0x47a   : > { %v4419_v63 = vadd.f32 %v4348_v13, %v4211_v8  ;;  %v5208_v18 = vadd.f32 %v5136_v29, %v4952_v55  ;;  %v12901_v8 = vld [vmem:[#allocation68_spill] sm:$0xff] }
 0x47b   : > { %6318 = vrot.lane.b32.xlu1 %v12890_v50, %s7949_s14  ;;  %6112 = vrot.lane.b32.xlu0 %v12891_v57, %s7948_s13 }
 0x47c   : > { %v4953_v33 = vadd.f32 %v12892_v34, %v4419_v63  ;;  %v12903_v63 = vld [vmem:[#allocation28_spill] sm:$0xff] }
 0x47d   : > { %v5344_v47 = vpop.permute.xlu1 %5343  ;;  %v5134_v45 = vpop.permute.xlu0 %5133 }
 0x47e   : > { %v5416_v3 = vadd.f32 %v5344_v47, %v5208_v18  ;;  %v5207_v9 = vadd.f32 %v5134_v45, %v4951_v42  ;;  %v12905_v45 = vld [vmem:[#allocation78_spill] sm:$0xff] }
 0x47f   : > { %6114 = vrot.lane.b32.xlu1 %v12893_v38, %s7948_s13  ;;  %6320 = vrot.lane.b32.xlu0 %v12894_v17, %s7949_s14 }
 0x480   : > { %v11895_v23 = vadd.f32 %v11596_v16, %v5416_v3  ;;  %v12898_v16 = vld [vmem:[#allocation27_spill] sm:$0xff] }
 0x481   : > { %v4142_v0 = vpop.permute.xlu1 %4141  ;;  %v5342_v22 = vpop.permute.xlu0 %5341 }
 0x482   : > { %v4212_v15 = vadd.f32 %v12895_v58, %v4142_v0  ;;  %v5415_v55 = vadd.f32 %v5342_v22, %v5207_v9  ;;  %v12907_v22 = vld [vmem:[#allocation3_spill] sm:$0xff]  ;;  %v12908_v58 = vld [vmem:[#allocation57_spill] sm:$0xff] }
 0x483   : > { %6322 = vrot.lane.b32.xlu1 %v12896_v54, %s7949_s14  ;;  %6116 = vrot.lane.b32.xlu0 %v12897_v27, %s7948_s13  ;;  %v12909_v27 = vld [vmem:[#allocation67_spill] sm:$0xff] }
 0x484   : > { %v11903_v52 = vadd.f32 %v11574_v20, %v5415_v55  ;;  %v12902_v20 = vld [vmem:[#allocation83_spill] sm:$0xff] }
 0x485   : > { %v4350_v41 = vpop.permute.xlu1 %4349  ;;  %v5138_v39 = vpop.permute.xlu0 %5137 }
 0x486   : > { %v4420_v42 = vadd.f32 %v4350_v41, %v4212_v15  ;;  %v5209_v49 = vadd.f32 %v5138_v39, %v4953_v33  ;;  %v12904_v33 = vld [vmem:[#allocation49_spill] sm:$0xff]  ;;  %v12911_v39 = vld [vmem:[#allocation4_spill] sm:$0xff] }
 0x487   : > { %6118 = vrot.lane.b32.xlu1 %v12898_v16, %s7948_s13  ;;  %6324 = vrot.lane.b32.xlu0 %v12899_v6, %s7949_s14 }
 0x488   : > { %v4954_v36 = vadd.f32 %v12900_v7, %v4420_v42 }
 0x489   : > { %v4146_v48 = vpop.permute.xlu1 %4145  ;;  %v5346_v51 = vpop.permute.xlu0 %5345 }
 0x48a   : > { %v4214_v29 = vadd.f32 %v4146_v48, %v12901_v8  ;;  %v5417_v13 = vadd.f32 %v5346_v51, %v5209_v49  ;;  %v12913_v48 = vld [vmem:[#allocation69_spill] sm:$0xff] }
 0x48b   : > { %6326 = vrot.lane.b32.xlu1 %v12902_v20, %s7949_s14  ;;  %6120 = vrot.lane.b32.xlu0 %v12903_v63, %s7948_s13  ;;  %v12915_v63 = vld [vmem:[#allocation29_spill] sm:$0xff] }
 0x48c   : > { %v11916_v50 = vadd.f32 %v11622_v21, %v5417_v13  ;;  %v12906_v21 = vld [vmem:[#allocation86_spill] sm:$0xff] }
 0x48d   : > { %v4354_v57 = vpop.permute.xlu1 %4353  ;;  %v4144_v18 = vpop.permute.xlu0 %4143 }
 0x48e   : > { %v4422_v34 = vadd.f32 %v4354_v57, %v4214_v29  ;;  %v4213_v47 = vadd.f32 %v12904_v33, %v4144_v18  ;;  %v12916_v33 = vld [vmem:[#allocation63_spill] sm:$0xff] }
 0x48f   : > { %6122 = vrot.lane.b32.xlu1 %v11530_v35, %s7948_s13  ;;  %6328 = vrot.lane.b32.xlu0 %v11522_v62, %s7949_s14  ;;  %v12910_v62 = vld [vmem:[#allocation93_spill] sm:$0xff] }
 0x490   : > { %v4956_v3 = vadd.f32 %v12905_v45, %v4422_v34  ;;  %v12917_v45 = vld [vmem:[#allocation42_spill] sm:$0xff] }
 0x491   : > { %v5140_v9 = vpop.permute.xlu1 %5139  ;;  %v4352_v38 = vpop.permute.xlu0 %4351 }
 0x492   : > { %v5210_v17 = vadd.f32 %v5140_v9, %v4954_v36  ;;  %v4421_v0 = vadd.f32 %v4352_v38, %v4213_v47  ;;  %v12912_v36 = vld [vmem:[#allocation50_spill] sm:$0xff] }
 0x493   : > { %6330 = vrot.lane.b32.xlu1 %v12906_v21, %s7949_s14  ;;  %6124 = vrot.lane.b32.xlu0 %v12907_v22, %s7948_s13  ;;  %v12919_v9 = vld [vmem:[#allocation94_spill] sm:$0xff]  ;;  %v12920_v22 = vld [vmem:[#allocation95_spill] sm:$0xff] }
 0x494   : > { %v4955_v15 = vadd.f32 %v12908_v58, %v4421_v0  ;;  %v12921_v58 = vld [vmem:[#allocation91_spill] sm:$0xff] }
 0x495   : > { %v5348_v55 = vpop.permute.xlu1 %5347  ;;  %v4148_v54 = vpop.permute.xlu0 %4147 }
 0x496   : > { %v5418_v35 = vadd.f32 %v5348_v55, %v5210_v17  ;;  %v4215_v41 = vadd.f32 %v4148_v54, %v12909_v27  ;;  %v12923_v27 = vld [vmem:[#allocation80_spill] sm:$0xff] }
 0x497   : > { %6126 = vrot.lane.b32.xlu1 %v12910_v62, %s7948_s13  ;;  %6332 = vrot.lane.b32.xlu0 %v12911_v39, %s7949_s14  ;;  %v12924_v39 = vld [vmem:[#allocation51_spill] sm:$0xff] }
 0x498   : > { %v11935_v42 = vadd.f32 %v11607_v4, %v5418_v35  ;;  %v12914_v4 = vld [vmem:[#allocation87_spill] sm:$0xff] }
 0x499   : > { %v5144_v49 = vpop.permute.xlu1 %5143  ;;  %v4356_v16 = vpop.permute.xlu0 %4355 }
 0x49a   : > { %v5212_v6 = vadd.f32 %v5144_v49, %v4956_v3  ;;  %v4423_v7 = vadd.f32 %v4356_v16, %v4215_v41  ;;  %v12918_v3 = vld [vmem:[#allocation45_spill] sm:$0xff]  ;;  %v12925_v49 = vld [vmem:[#allocation110_spill] sm:$0xff] }
 0x49b   : > { %6334 = vrot.lane.b32.xlu1 %v12912_v36, %s7949_s14  ;;  %6128 = vrot.lane.b32.xlu0 %v11577_v25, %s7948_s13  ;;  %v12926_v16 = vld [vmem:[#allocation113_spill] sm:$0xff] }
 0x49c   : > { %v4957_v51 = vadd.f32 %v12913_v48, %v4423_v7 }
 0x49d   : > { %v5352_v8 = vpop.permute.xlu1 %5351  ;;  %v5142_v29 = vpop.permute.xlu0 %5141 }
 0x49e   : > { %v5420_v13 = vadd.f32 %v5352_v8, %v5212_v6  ;;  %v5211_v20 = vadd.f32 %v5142_v29, %v4955_v15  ;;  %v12922_v15 = vld [vmem:[#allocation64_spill] sm:$0xff]  ;;  %v12928_v29 = vld [vmem:[#allocation9_spill] sm:$0xff] }
 0x49f   : > { %6130 = vrot.lane.b32.xlu1 %v11590_v2, %s7948_s13  ;;  %6336 = vrot.lane.b32.xlu0 %v12914_v4, %s7949_s14 }
 0x4a0   : > { %v11947_v57 = vadd.f32 %v12915_v63, %v5420_v13  ;;  %v12929_v13 = vld [vmem:[#allocation111_spill] sm:$0xff] }
 0x4a1   : > { %v4150_v18 = vpop.permute.xlu1 %4149  ;;  %v5350_v34 = vpop.permute.xlu0 %5349 }
 0x4a2   : > { %v4216_v47 = vadd.f32 %v12916_v33, %v4150_v18  ;;  %v5419_v25 = vadd.f32 %v5350_v34, %v5211_v20  ;;  %v12930_v20 = vld [vmem:[#allocation22_spill] sm:$0xff] }
 0x4a3   : > { %6338 = vrot.lane.b32.xlu1 %v12917_v45, %s7949_s14  ;;  %6132 = vrot.lane.b32.xlu0 %v12918_v3, %s7948_s13  ;;  %v12933_v45 = vld [vmem:[#allocation101_spill] sm:$0xff] }
 0x4a4   : > { %v11955_v38 = vadd.f32 %v12919_v9, %v5419_v25  ;;  %v12932_v25 = vld [vmem:[#allocation62_spill] sm:$0xff] }
 0x4a5   : > { %v4358_v2 = vpop.permute.xlu1 %4357  ;;  %v5146_v17 = vpop.permute.xlu0 %5145 }
 0x4a6   : > { %v4424_v0 = vadd.f32 %v4358_v2, %v4216_v47  ;;  %v5213_v21 = vadd.f32 %v5146_v17, %v4957_v51  ;;  %v12927_v51 = vld [vmem:[#allocation16_spill] sm:$0xff]  ;;  %v12931_v47 = vld [vmem:[#allocation61_spill] sm:$0xff] }
 0x4a7   : > { %6134 = vrot.lane.b32.xlu1 %v12920_v22, %s7948_s13  ;;  %6340 = vrot.lane.b32.xlu0 %v12921_v58, %s7949_s14  ;;  %v12936_v22 = vld [vmem:[#allocation82_spill] sm:$0xff] }
 0x4a8   : > { %v4958_v55 = vadd.f32 %v12922_v15, %v4424_v0  ;;  %v12934_v0 = vld [vmem:[#allocation58_spill] sm:$0xff]  ;;  %v12937_v15 = vld [vmem:[#allocation32_spill] sm:$0xff] }
 0x4a9   : > { %v4154_v54 = vpop.permute.xlu1 %4153  ;;  %v5354_v35 = vpop.permute.xlu0 %5353 }
 0x4aa   : > { %v4218_v41 = vadd.f32 %v4154_v54, %v12923_v27  ;;  %v5421_v62 = vadd.f32 %v5354_v35, %v5213_v21  ;;  %v12935_v21 = vld [vmem:[#allocation112_spill] sm:$0xff]  ;;  %v11992_v35 = vld [vmem:[%s12228_s5] ss:$0 sm:$0xff] }
 0x4ab   : > { %6342 = vrot.lane.b32.xlu1 %v12924_v39, %s7949_s14  ;;  %6136 = vrot.lane.b32.xlu0 %v12925_v49, %s7948_s13  ;;  %v11997_v39 = vld [vmem:[%s12229_s6] ss:$0 sm:$0xff]  ;;  %v12938_v49 = vld [vmem:[#allocation30_spill] sm:$0xff] }
 0x4ac   : > { %v11968_v6 = vadd.f32 %v12926_v16, %v5421_v62 }
 0x4ad   : > { %v4362_v7 = vpop.permute.xlu1 %4361  ;;  %v4152_v36 = vpop.permute.xlu0 %4151 }
 0x4ae   : > { %v4426_v48 = vadd.f32 %v4362_v7, %v4218_v41  ;;  %v4217_v8 = vadd.f32 %v12927_v51, %v4152_v36  ;;  %v7155_v7 = vld [vmem:[%s8019_s12 + $0x19] sm:$0xff] }
 0x4af   : > { %6138 = vrot.lane.b32.xlu1 %v12928_v29, %s7948_s13  ;;  %6344 = vrot.lane.b32.xlu0 %v12929_v13, %s7949_s14 }
 0x4b0   : > { %v4960_v4 = vadd.f32 %v12930_v20, %v4426_v48 }
 0x4b1   : > { %v5148_v63 = vpop.permute.xlu1 %5147  ;;  %v4360_v18 = vpop.permute.xlu0 %4359 }
 0x4b2   : > { %v5214_v34 = vadd.f32 %v5148_v63, %v4958_v55  ;;  %v4425_v33 = vadd.f32 %v4360_v18, %v4217_v8 }
 0x4b3   : > { %6346 = vrot.lane.b32.xlu1 %v12931_v47, %s7949_s14  ;;  %6140 = vrot.lane.b32.xlu0 %v12932_v25, %s7948_s13 }
 0x4b4   : > { %v4959_v3 = vadd.f32 %v12933_v45, %v4425_v33 }
 0x4b5   : > { %v5356_v9 = vpop.permute.xlu1 %5355  ;;  %v6089_v2 = vpop.permute.xlu0 %6088 }
 0x4b6   : > { %v5422_v17 = vadd.f32 %v5356_v9, %v5214_v34  ;;  %v6184_v58 = vadd.f32 %v6089_v2, %v12936_v22  ;;  %v7157_v22 = vld [vmem:[%s8019_s12 + $0x31] sm:$0xff] }
 0x4b7   : > { %6142 = vrot.lane.b32.xlu1 %v12934_v0, %s7948_s13  ;;  %6348 = vrot.lane.b32.xlu0 %v12935_v21, %s7949_s14 }
 0x4b8   : > { %v11987_v55 = vadd.f32 %v12937_v15, %v5422_v17 }
 0x4b9   : > { %v5152_v54 = vpop.permute.xlu1 %5151  ;;  %v6297_v27 = vpop.permute.xlu0 %6296 }
 0x4ba   : > { %v5216_v41 = vadd.f32 %v5152_v54, %v4960_v4  ;;  %v6392_v62 = vadd.f32 %v6297_v27, %v6184_v58 }
 0x4bb   : > { %6350 = vrot.lane.b32.xlu1 %v12938_v49, %s7949_s14  ;;  %6144 = vrot.lane.b32.xlu0 %v11696_v60, %s7948_s13 }
 0x4bc   : > { %v6431_v16 = vmul.f32 %v11992_v35, %v6392_v62 }
 0x4bd   : > { %v5360_v36 = vpop.permute.xlu1 %5359  ;;  %v5150_v48 = vpop.permute.xlu0 %5149 }
 0x4be   : > { %v6470_v51 = vadd.f32 %v11997_v39, %v6431_v16  ;;  %v5424_v8 = vadd.f32 %v5360_v36, %v5216_v41  ;;  %v5215_v29 = vadd.f32 %v5150_v48, %v4959_v3  ;;  %v7156_v3 = vld [vmem:[%s8019_s12 + $0x21] sm:$0xff] }
 0x4bf   : > { %6146 = vrot.lane.b32.xlu1 %v11710_v37, %s7948_s13  ;;  %6352 = vrot.lane.b32.xlu0 %v11699_v31, %s7949_s14  ;;  %v12939_v37 = vld [vmem:[#allocation5_spill] sm:$0xff] }
 0x4c0   : > { %v6534_v13 = vadd.f32 %v7155_v7, %v6470_v51  ;;  %v12012_v20 = vadd.f32 %v11774_v32, %v5424_v8  ;;  %v12942_v7 = vld [vmem:[#allocation21_spill] sm:$0xff] }
 0x4c1   : > { %v6091_v60 = vpop.permute.xlu1 %6090  ;;  %v5358_v4 = vpop.permute.xlu0 %5357 }
 0x4c2   : > { %vm6566_vm6 = vcmp.ge.f32.partialorder %v6534_v13, 0.0  ;;  %v6598_v63 = vmul.f32 0.2, %v6534_v13  ;;  %v5423_v18 = vadd.f32 %v5358_v4, %v5215_v29  ;;  %v6185_v32 = vadd.f32 %v6091_v60, %v12939_v37 }
 0x4c3   : > { %6354 = vrot.lane.b32.xlu1 %v11713_v26, %s7949_s14  ;;  %6148 = vrot.lane.b32.xlu0 %v11782_v59, %s7948_s13  ;;  %v12940_v59 = vld [vmem:[#allocation14_spill] sm:$0xff] }
 0x4c4   : > { %v6630_v31 = vsel %vm6566_vm6, %v6534_v13, %v6598_v63  ;;  %v12025_v34 = vadd.f32 %v11691_v11, %v5423_v18  ;;  %v12943_v63 = vld [vmem:[#allocation43_spill] sm:$0xff] }
 0x4c5   : > { %6662 = vst.msk [vmem:[%s12017_s11] sm:$0xff] %vm328_vm1, %v6630_v31  ;;  %v6299_v33 = vpop.permute.xlu1 %6298  ;;  %v6093_v47 = vpop.permute.xlu0 %6092 }
 0x4c6   : > { %v6393_v25 = vadd.f32 %v6299_v33, %v6185_v32  ;;  %v6186_v45 = vadd.f32 %v6093_v47, %v12940_v59  ;;  %v7159_v47 = vld [vmem:[%s8019_s12 + $0x49] sm:$0xff] }
 0x4c7   : > { %6150 = vrot.lane.b32.xlu1 %v11801_v46, %s7948_s13  ;;  %6356 = vrot.lane.b32.xlu0 %v11785_v53, %s7949_s14  ;;  %v12941_v46 = vld [vmem:[#allocation12_spill] sm:$0xff] }
 0x4c8   : > { %v6432_v26 = vmul.f32 %v11992_v35, %v6393_v25 }
 0x4c9   : > { %v6095_v9 = vpop.permute.xlu1 %6094  ;;  %v6301_v11 = vpop.permute.xlu0 %6300 }
 0x4ca   : > { %v6471_v2 = vadd.f32 %v11997_v39, %v6432_v26  ;;  %v6394_v17 = vadd.f32 %v6301_v11, %v6186_v45  ;;  %v6187_v21 = vadd.f32 %v6095_v9, %v12941_v46 }
 0x4cb   : > { %6358 = vrot.lane.b32.xlu1 %v11804_v30, %s7949_s14  ;;  %v7158_v30 = vld [vmem:[%s8019_s12 + $0x39] sm:$0xff] }
 0x4cc   : > { %v6535_v0 = vadd.f32 %v7156_v3, %v6471_v2  ;;  %v6433_v53 = vmul.f32 %v11992_v35, %v6394_v17  ;;  %v12944_v3 = vld [vmem:[#allocation26_spill] sm:$0xff]  ;;  %v7160_v2 = vld [vmem:[%s8019_s12 + $0x51] sm:$0xff] }
 0x4cd   : > { %v6303_v58 = vpop.permute.xlu1 %6302  ;;  %v6097_v15 = vpop.permute.xlu0 %6096 }
 0x4ce   : > { %vm6567_vm7 = vcmp.ge.f32.partialorder %v6535_v0, 0.0  ;;  %v6599_v54 = vmul.f32 0.2, %v6535_v0  ;;  %v6472_v27 = vadd.f32 %v11997_v39, %v6433_v53  ;;  %v6395_v41 = vadd.f32 %v6303_v58, %v6187_v21  ;;  %v12945_v58 = vld [vmem:[#allocation52_spill] sm:$0xff] }
 0x4cf   : > { %v6188_v36 = vadd.f32 %v6097_v15, %v12942_v7 }
 0x4d0   : > { %v6631_v62 = vsel %vm6567_vm7, %v6535_v0, %v6599_v54  ;;  %v6536_v49 = vadd.f32 %v7157_v22, %v6472_v27  ;;  %v6434_v16 = vmul.f32 %v11992_v35, %v6395_v41  ;;  %v7161_v41 = vld [vmem:[%s8019_s12 + $0x61] sm:$0xff] }
 0x4d1   : > { %6663 = vst.msk [vmem:[%s12017_s11 + $0x8] sm:$0xff] %vm328_vm1, %v6631_v62  ;;  %v6099_v48 = vpop.permute.xlu1 %6098  ;;  %v6305_v51 = vpop.permute.xlu0 %6304 }
 0x4d2   : > { %vm6568_vm8 = vcmp.ge.f32.partialorder %v6536_v49, 0.0  ;;  %v6600_v8 = vmul.f32 0.2, %v6536_v49  ;;  %v6473_v29 = vadd.f32 %v11997_v39, %v6434_v16  ;;  %v6396_v13 = vadd.f32 %v6305_v51, %v6188_v36 }
 0x4d3   : > { %v6189_v18 = vadd.f32 %v6099_v48, %v12943_v63 }
 0x4d4   : > { %v6632_v60 = vsel %vm6568_vm8, %v6536_v49, %v6600_v8  ;;  %v6537_v4 = vadd.f32 %v7158_v30, %v6473_v29  ;;  %v6435_v31 = vmul.f32 %v11992_v35, %v6396_v13  ;;  %v7162_v8 = vld [vmem:[%s8019_s12 + $0x69] sm:$0xff] }
 0x4d5   : > { %6664 = vst.msk [vmem:[%s12017_s11 + $0x10] sm:$0xff] %vm328_vm1, %v6632_v60  ;;  %v6307_v37 = vpop.permute.xlu1 %6306  ;;  %v6101_v32 = vpop.permute.xlu0 %6100  ;;  %v12946_v29 = vld [vmem:[#allocation31_spill] sm:$0xff] }
 0x4d6   : > { %vm6569_vm9 = vcmp.ge.f32.partialorder %v6537_v4, 0.0  ;;  %v6601_v33 = vmul.f32 0.2, %v6537_v4  ;;  %v6397_v25 = vadd.f32 %v6307_v37, %v6189_v18  ;;  %v6474_v26 = vadd.f32 %v11997_v39, %v6435_v31 }
 0x4d7   : > { %v6190_v9 = vadd.f32 %v6101_v32, %v12944_v3 }
 0x4d8   : > { %v6633_v59 = vsel %vm6569_vm9, %v6537_v4, %v6601_v33  ;;  %v6436_v45 = vmul.f32 %v11992_v35, %v6397_v25  ;;  %v6538_v11 = vadd.f32 %v7159_v47, %v6474_v26 }
 0x4d9   : > { %6665 = vst.msk [vmem:[%s12017_s11 + $0x18] sm:$0xff] %vm328_vm1, %v6633_v59  ;;  %v6103_v17 = vpop.permute.xlu1 %6102  ;;  %v6309_v0 = vpop.permute.xlu0 %6308 }
 0x4da   : > { %v6475_v46 = vadd.f32 %v11997_v39, %v6436_v45  ;;  %v6398_v21 = vadd.f32 %v6309_v0, %v6190_v9  ;;  %vm6570_vm10 = vcmp.ge.f32.partialorder %v6538_v11, 0.0  ;;  %v6602_v53 = vmul.f32 0.2, %v6538_v11  ;;  %v7163_v45 = vld [vmem:[%s8019_s12 + $0x79] sm:$0xff]  ;;  %v7164_v0 = vld [vmem:[%s8019_s12 + $0x81] sm:$0xff] }
 0x4db   : > { %v6191_v15 = vadd.f32 %v6103_v17, %v12945_v58 }
 0x4dc   : > { %v6539_v22 = vadd.f32 %v7160_v2, %v6475_v46  ;;  %v6437_v54 = vmul.f32 %v11992_v35, %v6398_v21  ;;  %v6634_v27 = vsel %vm6570_vm10, %v6538_v11, %v6602_v53 }
 0x4dd   : > { %v6311_v62 = vpop.permute.xlu1 %6310  ;;  %v6105_v49 = vpop.permute.xlu0 %6104  ;;  %6666 = vst.msk [vmem:[%s12017_s11 + $0x20] sm:$0xff] %vm328_vm1, %v6634_v27 }
 0x4de   : > { %vm6571_vm11 = vcmp.ge.f32.partialorder %v6539_v22, 0.0  ;;  %v6603_v16 = vmul.f32 0.2, %v6539_v22  ;;  %v6476_v30 = vadd.f32 %v11997_v39, %v6437_v54  ;;  %v6399_v7 = vadd.f32 %v6311_v62, %v6191_v15 }
 0x4df   : > { %v6192_v13 = vadd.f32 %v6105_v49, %v12946_v29 }
 0x4e0   : > { %v6635_v36 = vsel %vm6571_vm11, %v6539_v22, %v6603_v16  ;;  %v6540_v48 = vadd.f32 %v7161_v41, %v6476_v30  ;;  %v6438_v51 = vmul.f32 %v11992_v35, %v6399_v7  ;;  %v7165_v41 = vld [vmem:[%s8019_s12 + $0x91] sm:$0xff] }
 0x4e1   : > { %6667 = vst.msk [vmem:[%s12017_s11 + $0x28] sm:$0xff] %vm328_vm1, %v6635_v36  ;;  %v6107_v60 = vpop.permute.xlu1 %6106  ;;  %v6313_v4 = vpop.permute.xlu0 %6312 }
 0x4e2   : > { %vm6572_vm12 = vcmp.ge.f32.partialorder %v6540_v48, 0.0  ;;  %v6604_v63 = vmul.f32 0.2, %v6540_v48  ;;  %v6477_v18 = vadd.f32 %v11997_v39, %v6438_v51  ;;  %v6400_v31 = vadd.f32 %v6313_v4, %v6192_v13 }
 0x4e3   : > { %v6193_v33 = vadd.f32 %v6107_v60, %v11703_v44 }
 0x4e4   : > { %v6636_v37 = vsel %vm6572_vm12, %v6540_v48, %v6604_v63  ;;  %v6541_v32 = vadd.f32 %v7162_v8, %v6477_v18  ;;  %v6439_v47 = vmul.f32 %v11992_v35, %v6400_v31 }
 0x4e5   : > { %6668 = vst.msk [vmem:[%s12017_s11 + $0x30] sm:$0xff] %vm328_vm1, %v6636_v37  ;;  %v6315_v25 = vpop.permute.xlu1 %6314  ;;  %v6109_v26 = vpop.permute.xlu0 %6108 }
 0x4e6   : > { %vm6573_vm13 = vcmp.ge.f32.partialorder %v6541_v32, 0.0  ;;  %v6605_v59 = vmul.f32 0.2, %v6541_v32  ;;  %v6401_v3 = vadd.f32 %v6315_v25, %v6193_v33  ;;  %v6478_v9 = vadd.f32 %v11997_v39, %v6439_v47  ;;  %v7167_v25 = vld [vmem:[%s8019_s12 + $0xa9] sm:$0xff] }
 0x4e7   : > { %v6194_v17 = vadd.f32 %v6109_v26, %v11729_v19 }
 0x4e8   : > { %v6637_v11 = vsel %vm6573_vm13, %v6541_v32, %v6605_v59  ;;  %v6440_v2 = vmul.f32 %v11992_v35, %v6401_v3  ;;  %v6542_v44 = vadd.f32 %v7163_v45, %v6478_v9 }
 0x4e9   : > { %6669 = vst.msk [vmem:[%s12017_s11 + $0x38] sm:$0xff] %vm328_vm1, %v6637_v11  ;;  %v6111_v46 = vpop.permute.xlu1 %6110  ;;  %v6317_v21 = vpop.permute.xlu0 %6316  ;;  %v7168_v11 = vld [vmem:[%s8019_s12 + $0xb1] sm:$0xff] }
 0x4ea   : > { %v6479_v53 = vadd.f32 %v11997_v39, %v6440_v2  ;;  %v6402_v22 = vadd.f32 %v6317_v21, %v6194_v17  ;;  %vm6574_vm14 = vcmp.ge.f32.partialorder %v6542_v44, 0.0  ;;  %v6606_v58 = vmul.f32 0.2, %v6542_v44 }
 0x4eb   : > { %v6195_v54 = vadd.f32 %v6111_v46, %v11721_v56  ;;  %v7166_v56 = vld [vmem:[%s8019_s12 + $0x99] sm:$0xff] }
 0x4ec   : > { %v6543_v15 = vadd.f32 %v7164_v0, %v6479_v53  ;;  %v6441_v27 = vmul.f32 %v11992_v35, %v6402_v22  ;;  %v6638_v19 = vsel %vm6574_vm14, %v6542_v44, %v6606_v58  ;;  %v7169_v58 = vld [vmem:[%s8019_s12 + $0xc1] sm:$0xff] }
 0x4ed   : > { %v6319_v62 = vpop.permute.xlu1 %6318  ;;  %v6113_v49 = vpop.permute.xlu0 %6112  ;;  %6670 = vst.msk [vmem:[%s12017_s11 + $0x40] sm:$0xff] %vm328_vm1, %v6638_v19 }
 0x4ee   : > { %vm6575_vm15 = vcmp.ge.f32.partialorder %v6543_v15, 0.0  ;;  %v6607_v16 = vmul.f32 0.2, %v6543_v15  ;;  %v6480_v30 = vadd.f32 %v11997_v39, %v6441_v27  ;;  %v6403_v7 = vadd.f32 %v6319_v62, %v6195_v54 }
 0x4ef   : > { %v6196_v8 = vadd.f32 %v6113_v49, %v11742_v14 }
 0x4f0   : > { %v6639_v36 = vsel %vm6575_vm15, %v6543_v15, %v6607_v16  ;;  %v6544_v48 = vadd.f32 %v7165_v41, %v6480_v30  ;;  %v6442_v51 = vmul.f32 %v11992_v35, %v6403_v7 }
 0x4f1   : > { %6671 = vst.msk [vmem:[%s12017_s11 + $0x48] sm:$0xff] %vm328_vm1, %v6639_v36  ;;  %v6115_v29 = vpop.permute.xlu1 %6114  ;;  %v6321_v13 = vpop.permute.xlu0 %6320 }
 0x4f2   : > { %vm6576_vm0 = vcmp.ge.f32.partialorder %v6544_v48, 0.0  ;;  %v6608_v60 = vmul.f32 0.2, %v6544_v48  ;;  %v6481_v4 = vadd.f32 %v11997_v39, %v6442_v51  ;;  %v6404_v63 = vadd.f32 %v6321_v13, %v6196_v8 }
 0x4f3   : > { %v6197_v37 = vadd.f32 %v6115_v29, %v11761_v5 }
 0x4f4   : > { %v6640_v18 = vsel %vm6576_vm0, %v6544_v48, %v6608_v60  ;;  %v6545_v31 = vadd.f32 %v7166_v56, %v6481_v4  ;;  %v6443_v32 = vmul.f32 %v11992_v35, %v6404_v63 }
 0x4f5   : > { %6672 = vst.msk [vmem:[%s12017_s11 + $0x50] sm:$0xff] %vm328_vm1, %v6640_v18  ;;  %v6323_v33 = vpop.permute.xlu1 %6322  ;;  %v6117_v14 = vpop.permute.xlu0 %6116  ;;  %v7171_v18 = vld [vmem:[%s8019_s12 + $0xd9] sm:$0xff] }
 0x4f6   : > { %vm6577_vm2 = vcmp.ge.f32.partialorder %v6545_v31, 0.0  ;;  %v6609_v47 = vmul.f32 0.2, %v6545_v31  ;;  %v6405_v26 = vadd.f32 %v6323_v33, %v6197_v37  ;;  %v6482_v59 = vadd.f32 %v11997_v39, %v6443_v32 }
 0x4f7   : > { %v6198_v9 = vadd.f32 %v6117_v14, %v11793_v40 }
 0x4f8   : > { %v6641_v45 = vsel %vm6577_vm2, %v6545_v31, %v6609_v47  ;;  %v6444_v3 = vmul.f32 %v11992_v35, %v6405_v26  ;;  %v6546_v5 = vadd.f32 %v7167_v25, %v6482_v59  ;;  %v7172_v47 = vld [vmem:[%s8019_s12 + $0xe1] sm:$0xff] }
 0x4f9   : > { %6673 = vst.msk [vmem:[%s12017_s11 + $0x58] sm:$0xff] %vm328_vm1, %v6641_v45  ;;  %v6119_v2 = vpop.permute.xlu1 %6118  ;;  %v6325_v17 = vpop.permute.xlu0 %6324 }
 0x4fa   : > { %v6483_v44 = vadd.f32 %v11997_v39, %v6444_v3  ;;  %v6406_v0 = vadd.f32 %v6325_v17, %v6198_v9  ;;  %vm6578_vm3 = vcmp.ge.f32.partialorder %v6546_v5, 0.0  ;;  %v6610_v46 = vmul.f32 0.2, %v6546_v5 }
 0x4fb   : > { %v6199_v53 = vadd.f32 %v6119_v2, %v11779_v43  ;;  %v7170_v43 = vld [vmem:[%s8019_s12 + $0xc9] sm:$0xff]  ;;  %v7173_v2 = vld [vmem:[%s8019_s12 + $0xf1] sm:$0xff] }
 0x4fc   : > { %v6547_v21 = vadd.f32 %v7168_v11, %v6483_v44  ;;  %v6445_v22 = vmul.f32 %v11992_v35, %v6406_v0  ;;  %v6642_v40 = vsel %vm6578_vm3, %v6546_v5, %v6610_v46 }
 0x4fd   : > { %v6327_v15 = vpop.permute.xlu1 %6326  ;;  %v6121_v54 = vpop.permute.xlu0 %6120  ;;  %6674 = vst.msk [vmem:[%s12017_s11 + $0x60] sm:$0xff] %vm328_vm1, %v6642_v40 }
 0x4fe   : > { %vm6579_vm4 = vcmp.ge.f32.partialorder %v6547_v21, 0.0  ;;  %v6611_v27 = vmul.f32 0.2, %v6547_v21  ;;  %v6484_v19 = vadd.f32 %v11997_v39, %v6445_v22  ;;  %v6407_v41 = vadd.f32 %v6327_v15, %v6199_v53 }
 0x4ff   : > { %v6200_v30 = vadd.f32 %v6121_v54, %v11812_v24 }
 0x500   : > { %v6643_v62 = vsel %vm6579_vm4, %v6547_v21, %v6611_v27  ;;  %v6548_v49 = vadd.f32 %v7169_v58, %v6484_v19  ;;  %v6446_v16 = vmul.f32 %v11992_v35, %v6407_v41 }
 0x501   : > { %6675 = vst.msk [vmem:[%s12017_s11 + $0x68] sm:$0xff] %vm328_vm1, %v6643_v62  ;;  %v6123_v7 = vpop.permute.xlu1 %6122  ;;  %v6329_v36 = vpop.permute.xlu0 %6328 }
 0x502   : > { %vm6580_vm5 = vcmp.ge.f32.partialorder %v6548_v49, 0.0  ;;  %v6612_v48 = vmul.f32 0.2, %v6548_v49  ;;  %v6485_v51 = vadd.f32 %v11997_v39, %v6446_v16  ;;  %v6408_v56 = vadd.f32 %v6329_v36, %v6200_v30  ;;  %v7175_v36 = vld [vmem:[%s8019_s12 + $0x109] sm:$0xff] }
 0x503   : > { %v6201_v13 = vadd.f32 %v6123_v7, %v11831_v12 }
 0x504   : > { %v6644_v8 = vsel %vm6580_vm5, %v6548_v49, %v6612_v48  ;;  %v6549_v29 = vadd.f32 %v7170_v43, %v6485_v51  ;;  %v6447_v60 = vmul.f32 %v11992_v35, %v6408_v56 }
 0x505   : > { %6676 = vst.msk [vmem:[%s12017_s11 + $0x70] sm:$0xff] %vm328_vm1, %v6644_v8  ;;  %v6331_v4 = vpop.permute.xlu1 %6330  ;;  %v6125_v24 = vpop.permute.xlu0 %6124 }
 0x506   : > { %vm6581_vm6 = vcmp.ge.f32.partialorder %v6549_v29, 0.0  ;;  %v6613_v63 = vmul.f32 0.2, %v6549_v29  ;;  %v6409_v31 = vadd.f32 %v6331_v4, %v6201_v13  ;;  %v6486_v37 = vadd.f32 %v11997_v39, %v6447_v60  ;;  %v7176_v13 = vld [vmem:[%s8019_s12 + $0x111] sm:$0xff] }
 0x507   : > { %v6202_v14 = vadd.f32 %v6125_v24, %v11851_v61 }
 0x508   : > { %v6645_v32 = vsel %vm6581_vm6, %v6549_v29, %v6613_v63  ;;  %v6448_v33 = vmul.f32 %v11992_v35, %v6409_v31  ;;  %v6550_v12 = vadd.f32 %v7171_v18, %v6486_v37 }
 0x509   : > { %6677 = vst.msk [vmem:[%s12017_s11 + $0x78] sm:$0xff] %vm328_vm1, %v6645_v32  ;;  %v6127_v25 = vpop.permute.xlu1 %6126  ;;  %v6333_v26 = vpop.permute.xlu0 %6332 }
 0x50a   : > { %v6487_v59 = vadd.f32 %v11997_v39, %v6448_v33  ;;  %v6410_v45 = vadd.f32 %v6333_v26, %v6202_v14  ;;  %vm6582_vm7 = vcmp.ge.f32.partialorder %v6550_v12, 0.0  ;;  %v6614_v3 = vmul.f32 0.2, %v6550_v12  ;;  %v7177_v33 = vld [vmem:[%s8019_s12 + $0x121] sm:$0xff] }
 0x50b   : > { %v6203_v5 = vadd.f32 %v6127_v25, %v11843_v10  ;;  %v7174_v10 = vld [vmem:[%s8019_s12 + $0xf9] sm:$0xff] }
 0x50c   : > { %v6551_v9 = vadd.f32 %v7172_v47, %v6487_v59  ;;  %v6449_v11 = vmul.f32 %v11992_v35, %v6410_v45  ;;  %v6646_v61 = vsel %vm6582_vm7, %v6550_v12, %v6614_v3 }
 0x50d   : > { %v6335_v17 = vpop.permute.xlu1 %6334  ;;  %v6129_v44 = vpop.permute.xlu0 %6128  ;;  %6678 = vst.msk [vmem:[%s12017_s11 + $0x80] sm:$0xff] %vm328_vm1, %v6646_v61 }
 0x50e   : > { %vm6583_vm8 = vcmp.ge.f32.partialorder %v6551_v9, 0.0  ;;  %v6615_v0 = vmul.f32 0.2, %v6551_v9  ;;  %v6488_v46 = vadd.f32 %v11997_v39, %v6449_v11  ;;  %v6411_v21 = vadd.f32 %v6335_v17, %v6203_v5 }
 0x50f   : > { %v6204_v58 = vadd.f32 %v6129_v44, %v11864_v28 }
 0x510   : > { %v6647_v53 = vsel %vm6583_vm8, %v6551_v9, %v6615_v0  ;;  %v6552_v22 = vadd.f32 %v7173_v2, %v6488_v46  ;;  %v6450_v40 = vmul.f32 %v11992_v35, %v6411_v21 }
 0x511   : > { %6679 = vst.msk [vmem:[%s12017_s11 + $0x88] sm:$0xff] %vm328_vm1, %v6647_v53  ;;  %v6131_v15 = vpop.permute.xlu1 %6130  ;;  %v6337_v54 = vpop.permute.xlu0 %6336 }
 0x512   : > { %vm6584_vm9 = vcmp.ge.f32.partialorder %v6552_v22, 0.0  ;;  %v6616_v27 = vmul.f32 0.2, %v6552_v22  ;;  %v6489_v19 = vadd.f32 %v11997_v39, %v6450_v40  ;;  %v6412_v41 = vadd.f32 %v6337_v54, %v6204_v58  ;;  %v7179_v40 = vld [vmem:[%s8019_s12 + $0x139] sm:$0xff] }
 0x513   : > { %v6205_v16 = vadd.f32 %v6131_v15, %v11883_v1 }
 0x514   : > { %v6648_v62 = vsel %vm6584_vm9, %v6552_v22, %v6616_v27  ;;  %v6553_v49 = vadd.f32 %v7174_v10, %v6489_v19  ;;  %v6451_v43 = vmul.f32 %v11992_v35, %v6412_v41  ;;  %v7180_v19 = vld [vmem:[%s8019_s12 + $0x141] sm:$0xff] }
 0x515   : > { %6680 = vst.msk [vmem:[%s12017_s11 + $0x90] sm:$0xff] %vm328_vm1, %v6648_v62  ;;  %v6339_v30 = vpop.permute.xlu1 %6338  ;;  %v6133_v28 = vpop.permute.xlu0 %6132 }
 0x516   : > { %vm6585_vm10 = vcmp.ge.f32.partialorder %v6553_v49, 0.0  ;;  %v6617_v7 = vmul.f32 0.2, %v6553_v49  ;;  %v6413_v48 = vadd.f32 %v6339_v30, %v6205_v16  ;;  %v6490_v51 = vadd.f32 %v11997_v39, %v6451_v43 }
 0x517   : > { %v6206_v29 = vadd.f32 %v6133_v28, %v11903_v52 }
 0x518   : > { %v6649_v56 = vsel %vm6585_vm10, %v6553_v49, %v6617_v7  ;;  %v6452_v8 = vmul.f32 %v11992_v35, %v6413_v48  ;;  %v6554_v1 = vadd.f32 %v7175_v36, %v6490_v51  ;;  %v7181_v36 = vld [vmem:[%s8019_s12 + $0x151] sm:$0xff] }
 0x519   : > { %6681 = vst.msk [vmem:[%s12017_s11 + $0x98] sm:$0xff] %vm328_vm1, %v6649_v56  ;;  %v6135_v60 = vpop.permute.xlu1 %6134  ;;  %v6341_v4 = vpop.permute.xlu0 %6340 }
 0x51a   : > { %v6491_v24 = vadd.f32 %v11997_v39, %v6452_v8  ;;  %v6414_v63 = vadd.f32 %v6341_v4, %v6206_v29  ;;  %vm6586_vm11 = vcmp.ge.f32.partialorder %v6554_v1, 0.0  ;;  %v6618_v18 = vmul.f32 0.2, %v6554_v1 }
 0x51b   : > { %v6207_v37 = vadd.f32 %v6135_v60, %v11895_v23  ;;  %v7178_v23 = vld [vmem:[%s8019_s12 + $0x129] sm:$0xff] }
 0x51c   : > { %v6555_v31 = vadd.f32 %v7176_v13, %v6491_v24  ;;  %v6453_v32 = vmul.f32 %v11992_v35, %v6414_v63  ;;  %v6650_v52 = vsel %vm6586_vm11, %v6554_v1, %v6618_v18 }
 0x51d   : > { %v6343_v14 = vpop.permute.xlu1 %6342  ;;  %v6137_v12 = vpop.permute.xlu0 %6136  ;;  %6682 = vst.msk [vmem:[%s12017_s11 + $0xa0] sm:$0xff] %vm328_vm1, %v6650_v52 }
 0x51e   : > { %vm6587_vm12 = vcmp.ge.f32.partialorder %v6555_v31, 0.0  ;;  %v6619_v47 = vmul.f32 0.2, %v6555_v31  ;;  %v6492_v25 = vadd.f32 %v11997_v39, %v6453_v32  ;;  %v6415_v26 = vadd.f32 %v6343_v14, %v6207_v37 }
 0x51f   : > { %v6208_v9 = vadd.f32 %v6137_v12, %v11916_v50 }
 0x520   : > { %v6651_v59 = vsel %vm6587_vm12, %v6555_v31, %v6619_v47  ;;  %v6556_v45 = vadd.f32 %v7177_v33, %v6492_v25  ;;  %v6454_v3 = vmul.f32 %v11992_v35, %v6415_v26  ;;  %v7183_v25 = vld [vmem:[%s8019_s12 + $0x169] sm:$0xff] }
 0x521   : > { %6683 = vst.msk [vmem:[%s12017_s11 + $0xa8] sm:$0xff] %vm328_vm1, %v6651_v59  ;;  %v6139_v5 = vpop.permute.xlu1 %6138  ;;  %v6345_v11 = vpop.permute.xlu0 %6344 }
 0x522   : > { %vm6588_vm13 = vcmp.ge.f32.partialorder %v6556_v45, 0.0  ;;  %v6620_v61 = vmul.f32 0.2, %v6556_v45  ;;  %v6493_v2 = vadd.f32 %v11997_v39, %v6454_v3  ;;  %v6416_v17 = vadd.f32 %v6345_v11, %v6208_v9  ;;  %v7184_v9 = vld [vmem:[%s8019_s12 + $0x171] sm:$0xff] }
 0x523   : > { %v6209_v46 = vadd.f32 %v6139_v5, %v11935_v42 }
 0x524   : > { %v6652_v44 = vsel %vm6588_vm13, %v6556_v45, %v6620_v61  ;;  %v6557_v0 = vadd.f32 %v7178_v23, %v6493_v2  ;;  %v6455_v21 = vmul.f32 %v11992_v35, %v6416_v17 }
 0x525   : > { %6684 = vst.msk [vmem:[%s12017_s11 + $0xb0] sm:$0xff] %vm328_vm1, %v6652_v44  ;;  %v6347_v53 = vpop.permute.xlu1 %6346  ;;  %v6141_v50 = vpop.permute.xlu0 %6140 }
 0x526   : > { %vm6589_vm14 = vcmp.ge.f32.partialorder %v6557_v0, 0.0  ;;  %v6621_v22 = vmul.f32 0.2, %v6557_v0  ;;  %v6417_v10 = vadd.f32 %v6347_v53, %v6209_v46  ;;  %v6494_v58 = vadd.f32 %v11997_v39, %v6455_v21  ;;  %v7185_v21 = vld [vmem:[%s8019_s12 + $0x181] sm:$0xff] }
 0x527   : > { %v6210_v27 = vadd.f32 %v6141_v50, %v11955_v38 }
 0x528   : > { %v6653_v15 = vsel %vm6589_vm14, %v6557_v0, %v6621_v22  ;;  %v6456_v54 = vmul.f32 %v11992_v35, %v6417_v10  ;;  %v6558_v42 = vadd.f32 %v7179_v40, %v6494_v58 }
 0x529   : > { %6685 = vst.msk [vmem:[%s12017_s11 + $0xb8] sm:$0xff] %vm328_vm1, %v6653_v15  ;;  %v6143_v41 = vpop.permute.xlu1 %6142  ;;  %v6349_v62 = vpop.permute.xlu0 %6348 }
 0x52a   : > { %v6495_v49 = vadd.f32 %v11997_v39, %v6456_v54  ;;  %v6418_v16 = vadd.f32 %v6349_v62, %v6210_v27  ;;  %vm6590_vm15 = vcmp.ge.f32.partialorder %v6558_v42, 0.0  ;;  %v6622_v43 = vmul.f32 0.2, %v6558_v42 }
 0x52b   : > { %v6211_v28 = vadd.f32 %v6143_v41, %v11947_v57  ;;  %v7182_v57 = vld [vmem:[%s8019_s12 + $0x159] sm:$0xff] }
 0x52c   : > { %v6559_v30 = vadd.f32 %v7180_v19, %v6495_v49  ;;  %v6457_v7 = vmul.f32 %v11992_v35, %v6418_v16  ;;  %v6654_v38 = vsel %vm6590_vm15, %v6558_v42, %v6622_v43 }
 0x52d   : > { %v6351_v48 = vpop.permute.xlu1 %6350  ;;  %v6145_v51 = vpop.permute.xlu0 %6144  ;;  %6686 = vst.msk [vmem:[%s12017_s11 + $0xc0] sm:$0xff] %vm328_vm1, %v6654_v38 }
 0x52e   : > { %vm6591_vm0 = vcmp.ge.f32.partialorder %v6559_v30, 0.0  ;;  %v6623_v56 = vmul.f32 0.2, %v6559_v30  ;;  %v6496_v8 = vadd.f32 %v11997_v39, %v6457_v7  ;;  %v6419_v29 = vadd.f32 %v6351_v48, %v6211_v28 }
 0x52f   : > { %v6212_v4 = vadd.f32 %v6145_v51, %v11968_v6 }
 0x530   : > { %v6655_v1 = vsel %vm6591_vm0, %v6559_v30, %v6623_v56  ;;  %v6560_v13 = vadd.f32 %v7181_v36, %v6496_v8  ;;  %v6458_v60 = vmul.f32 %v11992_v35, %v6419_v29 }
 0x531   : > { %6687 = vst.msk [vmem:[%s12017_s11 + $0xc8] sm:$0xff] %vm328_vm1, %v6655_v1  ;;  %v6147_v24 = vpop.permute.xlu1 %6146  ;;  %v6353_v63 = vpop.permute.xlu0 %6352 }
 0x532   : > { %vm6592_vm2 = vcmp.ge.f32.partialorder %v6560_v13, 0.0  ;;  %v6624_v18 = vmul.f32 0.2, %v6560_v13  ;;  %v6497_v31 = vadd.f32 %v11997_v39, %v6458_v60  ;;  %v6420_v37 = vadd.f32 %v6353_v63, %v6212_v4 }
 0x533   : > { %v6213_v33 = vadd.f32 %v6147_v24, %v11987_v55 }
 0x534   : > { %v6656_v32 = vsel %vm6592_vm2, %v6560_v13, %v6624_v18  ;;  %v6561_v52 = vadd.f32 %v7182_v57, %v6497_v31  ;;  %v6459_v14 = vmul.f32 %v11992_v35, %v6420_v37 }
 0x535   : > { %6688 = vst.msk [vmem:[%s12017_s11 + $0xd0] sm:$0xff] %vm328_vm1, %v6656_v32  ;;  %v6355_v12 = vpop.permute.xlu1 %6354  ;;  %v6149_v6 = vpop.permute.xlu0 %6148 }
 0x536   : > { %vm6593_vm3 = vcmp.ge.f32.partialorder %v6561_v52, 0.0  ;;  %v6625_v47 = vmul.f32 0.2, %v6561_v52  ;;  %v6421_v26 = vadd.f32 %v6355_v12, %v6213_v33  ;;  %v6498_v59 = vadd.f32 %v11997_v39, %v6459_v14 }
 0x537   : > { %v6214_v23 = vadd.f32 %v6149_v6, %v12025_v34 }
 0x538   : > { %v6657_v45 = vsel %vm6593_vm3, %v6561_v52, %v6625_v47  ;;  %v6460_v3 = vmul.f32 %v11992_v35, %v6421_v26  ;;  %v6562_v55 = vadd.f32 %v7183_v25, %v6498_v59 }
 0x539   : > { %6689 = vst.msk [vmem:[%s12017_s11 + $0xd8] sm:$0xff] %vm328_vm1, %v6657_v45  ;;  %v6151_v5 = vpop.permute.xlu1 %6150  ;;  %v6357_v11 = vpop.permute.xlu0 %6356 }
 0x53a   : > { %v6499_v61 = vadd.f32 %v11997_v39, %v6460_v3  ;;  %v6422_v2 = vadd.f32 %v6357_v11, %v6214_v23  ;;  %vm6594_vm4 = vcmp.ge.f32.partialorder %v6562_v55, 0.0  ;;  %v6626_v17 = vmul.f32 0.2, %v6562_v55 }
 0x53b   : > { %v6215_v0 = vadd.f32 %v6151_v5, %v12012_v20  ;;  %v7186_v20 = vld [vmem:[%s8019_s12 + $0x189] sm:$0xff] }
 0x53c   : > { %v6563_v44 = vadd.f32 %v7184_v9, %v6499_v61  ;;  %v6461_v46 = vmul.f32 %v11992_v35, %v6422_v2  ;;  %v6658_v34 = vsel %vm6594_vm4, %v6562_v55, %v6626_v17 }
 0x53d   : > { %v6359_v53 = vpop.permute.xlu1 %6358  ;;  %6690 = vst.msk [vmem:[%s12017_s11 + $0xe0] sm:$0xff] %vm328_vm1, %v6658_v34 }
 0x53e   : > { %vm6595_vm5 = vcmp.ge.f32.partialorder %v6563_v44, 0.0  ;;  %v6627_v50 = vmul.f32 0.2, %v6563_v44  ;;  %v6500_v22 = vadd.f32 %v11997_v39, %v6461_v46  ;;  %v6423_v40 = vadd.f32 %v6359_v53, %v6215_v0 }
 0x540   : > { %v6659_v10 = vsel %vm6595_vm5, %v6563_v44, %v6627_v50  ;;  %v6564_v58 = vadd.f32 %v7185_v21, %v6500_v22  ;;  %v6462_v15 = vmul.f32 %v11992_v35, %v6423_v40 }
 0x541   : > { %6691 = vst.msk [vmem:[%s12017_s11 + $0xe8] sm:$0xff] %vm328_vm1, %v6659_v10 }
 0x542   : > { %vm6596_vm6 = vcmp.ge.f32.partialorder %v6564_v58, 0.0  ;;  %v6628_v54 = vmul.f32 0.2, %v6564_v58  ;;  %v6501_v27 = vadd.f32 %v11997_v39, %v6462_v15 }
 0x544   : > { %v6660_v42 = vsel %vm6596_vm6, %v6564_v58, %v6628_v54  ;;  %v6565_v19 = vadd.f32 %v7186_v20, %v6501_v27 }
 0x545   : > { %6692 = vst.msk [vmem:[%s12017_s11 + $0xf0] sm:$0xff] %vm328_vm1, %v6660_v42 }
 0x546   : > { %vm6597_vm7 = vcmp.ge.f32.partialorder %v6565_v19, 0.0  ;;  %v6629_v41 = vmul.f32 0.2, %v6565_v19 }
 0x548   : > { %v6661_v62 = vsel %vm6597_vm7, %v6565_v19, %v6629_v41 }
 0x549   : > { %6693 = vst.msk [vmem:[%s12017_s11 + $0xf8] sm:$0xff] %vm328_vm1, %v6661_v62 }
 0x54a PF: > { %s17_s24 = sadd.s32 1, %s7946_s24  }
 0x54b   : > { %p14_p4 = scmp.ge.s32.totalorder %s17_s24, 4  }
 0x54d   :  { %16 = sbr.rel (!%p14_p4) target bundleno = 1 (0x1), region = 87 }

</bundles_post_ra>
